<compile_context>
chip_gen: v7x
topology: tpu7x:2x2x1
jax: 0.10.0
libtpu: 0.0.40
codegen_flags: <defaults>
</compile_context>

<pallas_src>
import math

import jax
import jax.numpy as jnp
from jax.experimental import pallas as pl
from jax.experimental.pallas import tpu as pltpu


# -----------------------------------------------------------------------------
# Fused Pallas kernel (transposed layout: features on sublanes, T on lanes)
# -----------------------------------------------------------------------------
def _mbnet_kernel(
    # inputs ------------------------------------------------------------------
    scal_ref,   # (5,) SMEM  [mu_x, mu_small, lb_alpha, sb_alpha, en_bias]
    x_ref,      # (F, Tb)          |x|
    sm_ref,     # (F, K, Tb)       small-band input (torch raw-reshape order)
    wl0_ref,    # (4H, F+1)  bf16  large LSTM l0   [W_ih | b]
    wl1_ref,    # (4H, H+1)  bf16  large LSTM l1   [W_ih | b]
    wlb_ref,    # (F, H+1)   bf16  large_band Linear [W | b]
    ws0_ref,    # (4H, H+K+1) bf16 small LSTM l0   [W_hh | W_ih | b]
    ws1_ref,    # (4H, 2H+1) bf16  small LSTM l1   [W_hh | W_ih | b]
    wsb_ref,    # (K, H+1)   bf16  small_band Linear [W | b]
    enw_ref,    # (K, 1)     f32   enhance Linear weight
    # output ------------------------------------------------------------------
    out_ref,    # (F, Tb)          sigmoid(mask logit) * |x|
    # scratch -----------------------------------------------------------------
    sdot_scr,   # (F, Tb)          per-band enhance dot-products
):
    F, Tb = x_ref.shape
    K = sm_ref.shape[1]
    H = ws0_ref.shape[0] // 4

    mu_x = scal_ref[0]
    mu_s = scal_ref[1]
    lb_a = scal_ref[2]
    sb_a = scal_ref[3]
    en_b = scal_ref[4]

    ones_t = jnp.ones((1, Tb), jnp.float32)   # hoisted (broadcasts aren't CSE'd)

    def mxu(w_bf16, a_f32):
        # bf16 MXU operands, f32 accumulation.
        return jnp.dot(w_bf16, a_f32.astype(jnp.bfloat16),
                       preferred_element_type=jnp.float32)

    def lstm_act(g, c_prev):
        # gate rows are [i|f|g|o]; each H-row slice is vreg-row aligned.
        i = jax.nn.sigmoid(g[0 * H:1 * H, :])
        f = jax.nn.sigmoid(g[1 * H:2 * H, :])
        gg = jnp.tanh(g[2 * H:3 * H, :])
        o = jax.nn.sigmoid(g[3 * H:4 * H, :])
        c = f * c_prev + i * gg
        return o * jnp.tanh(c), c

    def lstm_act_zero(g):
        # zero initial (h, c): forget-gate term vanishes (valid only because
        # no state is carried across calls -- seq_len == 1 on the large path).
        i = jax.nn.sigmoid(g[0 * H:1 * H, :])
        gg = jnp.tanh(g[2 * H:3 * H, :])
        o = jax.nn.sigmoid(g[3 * H:4 * H, :])
        return o * jnp.tanh(i * gg)

    # ---- large path: seq_len == 1 -> pure feed-forward stack, already (F, T)
    x_ft = x_ref[...]
    a_l = x_ft / (mu_x + 1e-6)
    h = lstm_act_zero(mxu(wl0_ref[...], jnp.concatenate([a_l, ones_t], 0)))
    h = lstm_act_zero(mxu(wl1_ref[...], jnp.concatenate([h, ones_t], 0)))
    lo = mxu(wlb_ref[...], jnp.concatenate([h, ones_t], 0))      # (F, Tb)
    lo = jnp.where(lo >= 0.0, lo, lb_a * lo)                     # PReLU

    # ---- small path: 2-layer LSTM over seq = F --------------------------------
    inv_mu_s = 1.0 / (mu_s + 1e-6)
    w_s0 = ws0_ref[...]
    w_s1 = ws1_ref[...]
    w_sb = wsb_ref[...]
    en_w = enw_ref[...]                                          # (K, 1)

    def step(f, carry):
        h0, c0, h1, c1 = carry
        x_f = sm_ref[f] * inv_mu_s                               # (K, Tb)
        # one fused MXU push per layer: [W_hh | W_ih | b] @ [h ; x ; 1]
        g0 = mxu(w_s0, jnp.concatenate([h0, x_f, ones_t], 0))
        h0, c0 = lstm_act(g0, c0)
        g1 = mxu(w_s1, jnp.concatenate([h1, h0, ones_t], 0))
        h1, c1 = lstm_act(g1, c1)
        # small_band Linear + PReLU + enhance dot (off the serial chain)
        so = mxu(w_sb, jnp.concatenate([h1, ones_t], 0))         # (K, Tb)
        so = jnp.where(so >= 0.0, so, sb_a * so)
        sdot_scr[pl.ds(f, 1), :] = jnp.sum(so * en_w, axis=0, keepdims=True)
        return h0, c0, h1, c1

    zero = jnp.zeros((H, Tb), jnp.float32)
    jax.lax.fori_loop(0, F, step, (zero, zero, zero, zero),
                      unroll=True if F <= 32 else 8)

    # ---- enhance + mask: full-block, lane-dense elementwise stage -------------
    logit = lo * sdot_scr[...] + en_b
    out_ref[...] = jax.nn.sigmoid(logit) * x_ft


# -----------------------------------------------------------------------------
# Wrapper: layout prep (pad / gather / torch raw reshape / weight stacking and
# bf16 cast / global means) in JAX; everything else in one pallas_call.
# -----------------------------------------------------------------------------
def mbnet_forward(x, y, params, neighbor_num):
    """Eval-mode forward of MBNET_withlargeband.  x, y: (1, 1, F, T)."""
    del y  # only used by the training-mode MSE loss
    x = jnp.abs(x).astype(jnp.float32)
    B, C, F, T = x.shape
    assert B == 1 and C == 1, 'channel and batch must == 1'
    N = neighbor_num
    K = 2 * N + 1
    p = params
    H = p['sl0_whh'].shape[1]

    x_ft = x.reshape(F, T)

    # small-band input: reflect pad on F, gather K neighbour bands, then the
    # same (intentionally reproduced) raw reshape as the PyTorch code.
    spec_padded = jnp.pad(x, ((0, 0), (0, 0), (N, N), (0, 0)), mode='reflect')
    small = jnp.concatenate(
        [spec_padded[:, :, i - N:i + N + 1, :] for i in range(N, N + F)],
        axis=1)                                      # (1, F, K, T)
    small = small.reshape(T, F, K)                   # raw reshape (as in torch)
    small = jnp.transpose(small, (1, 0, 2))          # (F, T, K)
    small_fkt = jnp.transpose(small, (0, 2, 1))      # (F, K, T): T on lanes

    # global normalization statistics (shared by every T tile)
    mu_x = jnp.mean(x_ft)
    mu_s = jnp.mean(small_fkt)

    bf = jnp.bfloat16
    wl0 = jnp.concatenate([p['ll0_wih'], p['ll0_b'][:, None]], 1).astype(bf)
    wl1 = jnp.concatenate([p['ll1_wih'], p['ll1_b'][:, None]], 1).astype(bf)
    wlb = jnp.concatenate([p['lb_w'], p['lb_b'][:, None]], 1).astype(bf)
    ws0 = jnp.concatenate([p['sl0_whh'], p['sl0_wih'],
                           p['sl0_b'][:, None]], 1).astype(bf)
    ws1 = jnp.concatenate([p['sl1_whh'], p['sl1_wih'],
                           p['sl1_b'][:, None]], 1).astype(bf)
    wsb = jnp.concatenate([p['sb_w'], p['sb_b'][:, None]], 1).astype(bf)
    enw = p['en_w'].reshape(K, 1).astype(jnp.float32)
    scalars = jnp.stack([mu_x, mu_s,
                         p['lb_a'].reshape(()),
                         p['sb_a'].reshape(()),
                         p['en_b'].reshape(())]).astype(jnp.float32)   # (5,)

    Tb = T if T <= 128 else 128
    assert T % Tb == 0, 'toy wrapper assumes T multiple of the T-block'
    H4 = 4 * H

    out_ft = pl.pallas_call(
        _mbnet_kernel,
        out_shape=jax.ShapeDtypeStruct((F, T), jnp.float32),
        grid=(T // Tb,),
        in_specs=[
            pl.BlockSpec(memory_space=pltpu.MemorySpace.SMEM),     # scalars
            pl.BlockSpec((F, Tb), lambda t: (0, t)),               # x_ft
            pl.BlockSpec((F, K, Tb), lambda t: (0, 0, t)),         # small
            pl.BlockSpec((H4, F + 1), lambda t: (0, 0)),           # wl0
            pl.BlockSpec((H4, H + 1), lambda t: (0, 0)),           # wl1
            pl.BlockSpec((F, H + 1), lambda t: (0, 0)),            # wlb
            pl.BlockSpec((H4, H + K + 1), lambda t: (0, 0)),       # ws0
            pl.BlockSpec((H4, 2 * H + 1), lambda t: (0, 0)),       # ws1
            pl.BlockSpec((K, H + 1), lambda t: (0, 0)),            # wsb
            pl.BlockSpec((K, 1), lambda t: (0, 0)),                # en_w
        ],
        out_specs=pl.BlockSpec((F, Tb), lambda t: (0, t)),
        scratch_shapes=[pltpu.VMEM((F, Tb), jnp.float32)],
        compiler_params=pltpu.CompilerParams(
            dimension_semantics=("parallel",),
            vmem_limit_bytes=32 * 1024 * 1024),
    )(scalars, x_ft, small_fkt, wl0, wl1, wlb, ws0, ws1, wsb, enw)

    return out_ft.reshape(B, C, F, T)


# -----------------------------------------------------------------------------
# Parameters (torch orientation: rows = outputs; LSTM gate rows [i|f|g|o])
# -----------------------------------------------------------------------------
def init_params(key, fft_num, neighbor_num, hidden_size):
    K = 2 * neighbor_num + 1
    H = hidden_size
    ks = iter(jax.random.split(key, 32))

    def uni(shape, fan):
        bound = 1.0 / math.sqrt(fan)
        return jax.random.uniform(next(ks), shape, jnp.float32, -bound, bound)

    p = {}
    # large_lstm (2 layers); biases pre-summed (b_ih + b_hh)
    p['ll0_wih'] = uni((4 * H, fft_num), H)
    p['ll0_whh'] = uni((4 * H, H), H)   # unused: seq_len == 1, zero init state
    p['ll0_b'] = uni((4 * H,), H)
    p['ll1_wih'] = uni((4 * H, H), H)
    p['ll1_whh'] = uni((4 * H, H), H)   # unused: seq_len == 1
    p['ll1_b'] = uni((4 * H,), H)
    # large_band: Linear(H -> fft_num) + PReLU
    p['lb_w'] = uni((fft_num, H), H)
    p['lb_b'] = uni((fft_num,), H)
    p['lb_a'] = jnp.full((1,), 0.25, jnp.float32)
    # small_lstm (2 layers)
    p['sl0_wih'] = uni((4 * H, K), H)
    p['sl0_whh'] = uni((4 * H, H), H)
    p['sl0_b'] = uni((4 * H,), H)
    p['sl1_wih'] = uni((4 * H, H), H)
    p['sl1_whh'] = uni((4 * H, H), H)
    p['sl1_b'] = uni((4 * H,), H)
    # small_band: Linear(H -> K) + PReLU
    p['sb_w'] = uni((K, H), H)
    p['sb_b'] = uni((K,), H)
    p['sb_a'] = jnp.full((1,), 0.25, jnp.float32)
    # enhance: Linear(K -> 1) + Sigmoid
    p['en_w'] = uni((1, K), K)
    p['en_b'] = uni((1,), K)
    return p


# -----------------------------------------------------------------------------
# Pure-JAX reference (mirrors the PyTorch module, f32 HIGHEST precision)
# -----------------------------------------------------------------------------
def _lstm_ref(x, w_ih, w_hh, b):
    S, Bb, _ = x.shape
    H = w_hh.shape[1]
    hp = jax.lax.Precision.HIGHEST
    h = jnp.zeros((Bb, H), jnp.float32)
    c = jnp.zeros((Bb, H), jnp.float32)
    outs = []
    for s in range(S):
        g = (jnp.dot(x[s], w_ih.T, precision=hp)
             + jnp.dot(h, w_hh.T, precision=hp) + b)
        i = jax.nn.sigmoid(g[:, 0 * H:1 * H])
        f = jax.nn.sigmoid(g[:, 1 * H:2 * H])
        gg = jnp.tanh(g[:, 2 * H:3 * H])
        o = jax.nn.sigmoid(g[:, 3 * H:4 * H])
        c = f * c + i * gg
        h = o * jnp.tanh(c)
        outs.append(h)
    return jnp.stack(outs, axis=0)


def mbnet_forward_ref(x, y, params, neighbor_num):
    del y
    x = jnp.abs(x).astype(jnp.float32)
    B, C, F, T = x.shape
    N = neighbor_num
    K = 2 * N + 1
    p = params
    hp = jax.lax.Precision.HIGHEST

    # large path
    large_in = jnp.transpose(x.reshape(B, F, T), (0, 2, 1))       # (1, T, F)
    large_in = large_in / (jnp.mean(large_in) + 1e-6)
    h = _lstm_ref(large_in, p['ll0_wih'], p['ll0_whh'], p['ll0_b'])
    h = _lstm_ref(h, p['ll1_wih'], p['ll1_whh'], p['ll1_b'])
    lo = jnp.dot(h, p['lb_w'].T, precision=hp) + p['lb_b']        # (1, T, F)
    lo = jnp.where(lo >= 0.0, lo, p['lb_a'] * lo)
    large_out = jnp.transpose(lo, (1, 2, 0))                      # (T, F, 1)

    # small path
    spec_padded = jnp.pad(x, ((0, 0), (0, 0), (N, N), (0, 0)), mode='reflect')
    small = jnp.concatenate(
        [spec_padded[:, :, i - N:i + N + 1, :] for i in range(N, N + F)],
        axis=1)
    small = small.reshape(T, F, K)
    small = jnp.transpose(small, (1, 0, 2))                       # (F, T, K)
    small = small / (jnp.mean(small) + 1e-6)
    hs = _lstm_ref(small, p['sl0_wih'], p['sl0_whh'], p['sl0_b'])
    hs = _lstm_ref(hs, p['sl1_wih'], p['sl1_whh'], p['sl1_b'])
    so = jnp.dot(hs, p['sb_w'].T, precision=hp) + p['sb_b']       # (F, T, K)
    so = jnp.where(so >= 0.0, so, p['sb_a'] * so)
    so = jnp.transpose(so, (1, 0, 2))                             # (T, F, K)
    enh = so * large_out
    enh = jnp.transpose(enh, (1, 0, 2))                           # (F, T, K)
    z = jnp.dot(enh, p['en_w'].T, precision=hp) + p['en_b']       # (F, T, 1)
    mask = jax.nn.sigmoid(z).reshape(B, C, F, T)
    return mask * x


# -----------------------------------------------------------------------------
# main
# -----------------------------------------------------------------------------
if __name__ == "__main__":
    FFT_NUM = 16     # F
    NEIGHBOR = 3     # K = 7 ; reflect pad requires NEIGHBOR < FFT_NUM
    HIDDEN = 32      # 4*H = 128 -> one full sublane block of gates
    T = 8            # frames (= LSTM "batch", lives on lanes)

    key = jax.random.PRNGKey(0)
    kx, ky, kp = jax.random.split(key, 3)
    x = jax.random.normal(kx, (1, 1, FFT_NUM, T), jnp.float32)
    y = jax.random.normal(ky, (1, 1, FFT_NUM, T), jnp.float32)
    params = init_params(kp, FFT_NUM, NEIGHBOR, HIDDEN)

    fwd = jax.jit(lambda xx, yy, pp: mbnet_forward(xx, yy, pp, NEIGHBOR))
    out = jax.block_until_ready(fwd(x, y, params))

    ref = jax.block_until_ready(mbnet_forward_ref(x, y, params, NEIGHBOR))

    assert out.shape == (1, 1, FFT_NUM, T)
    assert bool(jnp.all(jnp.isfinite(out)))
    err = float(jnp.max(jnp.abs(out - ref)))
    # bf16 MXU operands in the kernel vs f32 HIGHEST-precision reference.
    assert jnp.allclose(out, ref, atol=2e-2, rtol=2e-2), f"max abs err={err}"

    print("KERNEL_OK")
</pallas_src>

<mosaic_0001>
module attributes {stable_mosaic.version = 11 : i64} {
  func.func @_mbnet_kernel(%arg0: i32, %arg1: memref<5xf32, #tpu.memory_space<smem>>, %arg2: memref<16x8xf32, #tpu.memory_space<vmem>>, %arg3: memref<16x7x8xf32, #tpu.memory_space<vmem>>, %arg4: memref<128x17xbf16, #tpu.memory_space<vmem>>, %arg5: memref<128x33xbf16, #tpu.memory_space<vmem>>, %arg6: memref<16x33xbf16, #tpu.memory_space<vmem>>, %arg7: memref<128x40xbf16, #tpu.memory_space<vmem>>, %arg8: memref<128x65xbf16, #tpu.memory_space<vmem>>, %arg9: memref<7x33xbf16, #tpu.memory_space<vmem>>, %arg10: memref<7x1xf32, #tpu.memory_space<vmem>>, %arg11: memref<16x8xf32, #tpu.memory_space<vmem>>, %arg12: memref<16x8xf32, #tpu.memory_space<vmem>>) attributes {dimension_semantics = [#tpu.dimension_semantics<parallel>], iteration_bounds = array<i64: 1>, scalar_prefetch = 0 : i64, scratch_operands = 1 : i64, tpu.core_type = #tpu.core_type<tc>, window_params = [{transform_indices = @transform_0, window_bounds = array<i64: 5>}, {transform_indices = @transform_1, window_bounds = array<i64: 16, 8>}, {transform_indices = @transform_2, window_bounds = array<i64: 16, 7, 8>}, {pipeline_mode = #tpu.pipeline_mode<synchronous>, transform_indices = @transform_3, window_bounds = array<i64: 128, 17>}, {pipeline_mode = #tpu.pipeline_mode<synchronous>, transform_indices = @transform_4, window_bounds = array<i64: 128, 33>}, {pipeline_mode = #tpu.pipeline_mode<synchronous>, transform_indices = @transform_5, window_bounds = array<i64: 16, 33>}, {pipeline_mode = #tpu.pipeline_mode<synchronous>, transform_indices = @transform_6, window_bounds = array<i64: 128, 40>}, {pipeline_mode = #tpu.pipeline_mode<synchronous>, transform_indices = @transform_7, window_bounds = array<i64: 128, 65>}, {pipeline_mode = #tpu.pipeline_mode<synchronous>, transform_indices = @transform_8, window_bounds = array<i64: 7, 33>}, {pipeline_mode = #tpu.pipeline_mode<synchronous>, transform_indices = @transform_9, window_bounds = array<i64: 7, 1>}, {transform_indices = @transform_10, window_bounds = array<i64: 16, 8>}]} {
    %c0 = arith.constant 0 : index
    %0 = memref.load %arg1[%c0] : memref<5xf32, #tpu.memory_space<smem>>
    %c1 = arith.constant 1 : index
    %1 = memref.load %arg1[%c1] : memref<5xf32, #tpu.memory_space<smem>>
    %c2 = arith.constant 2 : index
    %2 = memref.load %arg1[%c2] : memref<5xf32, #tpu.memory_space<smem>>
    %c3 = arith.constant 3 : index
    %3 = memref.load %arg1[%c3] : memref<5xf32, #tpu.memory_space<smem>>
    %c4 = arith.constant 4 : index
    %4 = memref.load %arg1[%c4] : memref<5xf32, #tpu.memory_space<smem>>
    %cst = arith.constant 1.000000e+00 : f32
    %5 = vector.broadcast %cst : f32 to vector<1x8xf32>
    %c0_0 = arith.constant 0 : index
    %c0_1 = arith.constant 0 : index
    %6 = vector.load %arg2[%c0_0, %c0_1] : memref<16x8xf32, #tpu.memory_space<vmem>>, vector<16x8xf32>
    %cst_2 = arith.constant 9.99999997E-7 : f32
    %7 = arith.addf %0, %cst_2 : f32
    %8 = vector.broadcast %7 : f32 to vector<16x8xf32>
    %9 = arith.divf %6, %8 : vector<16x8xf32>
    %c0_3 = arith.constant 0 : index
    %c0_4 = arith.constant 0 : index
    %10 = vector.load %arg4[%c0_3, %c0_4] : memref<128x17xbf16, #tpu.memory_space<vmem>>, vector<128x17xbf16>
    %11 = tpu.concatenate %9, %5 in 0 : vector<16x8xf32>, vector<1x8xf32> -> vector<17x8xf32>
    %12 = arith.truncf %11 : vector<17x8xf32> to vector<17x8xbf16>
    %cst_5 = arith.constant dense<0.000000e+00> : vector<128x8xf32>
    %13 = tpu.matmul %10, %12, %cst_5 {dimension_numbers = #tpu.dot_dimension_numbers<[1], [0], [0], [1], [0, 0, 1, 1], [], []>} : vector<128x17xbf16>, vector<17x8xbf16>, vector<128x8xf32> -> vector<128x8xf32>
    %14 = vector.extract_strided_slice %13 {offsets = [0, 0], sizes = [32, 8], strides = [1, 1]} : vector<128x8xf32> to vector<32x8xf32>
    %15 = arith.negf %14 : vector<32x8xf32>
    %16 = math.exp %15 : vector<32x8xf32>
    %cst_6 = arith.constant 1.000000e+00 : f32
    %17 = vector.broadcast %cst_6 : f32 to vector<32x8xf32>
    %18 = arith.addf %17, %16 : vector<32x8xf32>
    %19 = arith.divf %17, %18 : vector<32x8xf32>
    %20 = vector.extract_strided_slice %13 {offsets = [64, 0], sizes = [32, 8], strides = [1, 1]} : vector<128x8xf32> to vector<32x8xf32>
    %21 = math.tanh %20 : vector<32x8xf32>
    %22 = vector.extract_strided_slice %13 {offsets = [96, 0], sizes = [32, 8], strides = [1, 1]} : vector<128x8xf32> to vector<32x8xf32>
    %23 = arith.negf %22 : vector<32x8xf32>
    %24 = math.exp %23 : vector<32x8xf32>
    %cst_7 = arith.constant 1.000000e+00 : f32
    %25 = vector.broadcast %cst_7 : f32 to vector<32x8xf32>
    %26 = arith.addf %25, %24 : vector<32x8xf32>
    %27 = arith.divf %25, %26 : vector<32x8xf32>
    %28 = arith.mulf %19, %21 : vector<32x8xf32>
    %29 = math.tanh %28 : vector<32x8xf32>
    %30 = arith.mulf %27, %29 : vector<32x8xf32>
    %c0_8 = arith.constant 0 : index
    %c0_9 = arith.constant 0 : index
    %31 = vector.load %arg5[%c0_8, %c0_9] : memref<128x33xbf16, #tpu.memory_space<vmem>>, vector<128x33xbf16>
    %32 = tpu.concatenate %30, %5 in 0 : vector<32x8xf32>, vector<1x8xf32> -> vector<33x8xf32>
    %33 = arith.truncf %32 : vector<33x8xf32> to vector<33x8xbf16>
    %cst_10 = arith.constant dense<0.000000e+00> : vector<128x8xf32>
    %34 = tpu.matmul %31, %33, %cst_10 {dimension_numbers = #tpu.dot_dimension_numbers<[1], [0], [0], [1], [0, 0, 1, 1], [], []>} : vector<128x33xbf16>, vector<33x8xbf16>, vector<128x8xf32> -> vector<128x8xf32>
    %35 = vector.extract_strided_slice %34 {offsets = [0, 0], sizes = [32, 8], strides = [1, 1]} : vector<128x8xf32> to vector<32x8xf32>
    %36 = arith.negf %35 : vector<32x8xf32>
    %37 = math.exp %36 : vector<32x8xf32>
    %cst_11 = arith.constant 1.000000e+00 : f32
    %38 = vector.broadcast %cst_11 : f32 to vector<32x8xf32>
    %39 = arith.addf %38, %37 : vector<32x8xf32>
    %40 = arith.divf %38, %39 : vector<32x8xf32>
    %41 = vector.extract_strided_slice %34 {offsets = [64, 0], sizes = [32, 8], strides = [1, 1]} : vector<128x8xf32> to vector<32x8xf32>
    %42 = math.tanh %41 : vector<32x8xf32>
    %43 = vector.extract_strided_slice %34 {offsets = [96, 0], sizes = [32, 8], strides = [1, 1]} : vector<128x8xf32> to vector<32x8xf32>
    %44 = arith.negf %43 : vector<32x8xf32>
    %45 = math.exp %44 : vector<32x8xf32>
    %cst_12 = arith.constant 1.000000e+00 : f32
    %46 = vector.broadcast %cst_12 : f32 to vector<32x8xf32>
    %47 = arith.addf %46, %45 : vector<32x8xf32>
    %48 = arith.divf %46, %47 : vector<32x8xf32>
    %49 = arith.mulf %40, %42 : vector<32x8xf32>
    %50 = math.tanh %49 : vector<32x8xf32>
    %51 = arith.mulf %48, %50 : vector<32x8xf32>
    %c0_13 = arith.constant 0 : index
    %c0_14 = arith.constant 0 : index
    %52 = vector.load %arg6[%c0_13, %c0_14] : memref<16x33xbf16, #tpu.memory_space<vmem>>, vector<16x33xbf16>
    %53 = tpu.concatenate %51, %5 in 0 : vector<32x8xf32>, vector<1x8xf32> -> vector<33x8xf32>
    %54 = arith.truncf %53 : vector<33x8xf32> to vector<33x8xbf16>
    %cst_15 = arith.constant dense<0.000000e+00> : vector<16x8xf32>
    %55 = tpu.matmul %52, %54, %cst_15 {dimension_numbers = #tpu.dot_dimension_numbers<[1], [0], [0], [1], [0, 0, 1, 1], [], []>} : vector<16x33xbf16>, vector<33x8xbf16>, vector<16x8xf32> -> vector<16x8xf32>
    %cst_16 = arith.constant 0.000000e+00 : f32
    %56 = vector.broadcast %cst_16 : f32 to vector<16x8xf32>
    %57 = arith.cmpf oge, %55, %56 : vector<16x8xf32>
    %58 = vector.broadcast %2 : f32 to vector<16x8xf32>
    %59 = arith.mulf %58, %55 : vector<16x8xf32>
    %60 = arith.select %57, %55, %59 : vector<16x8xi1>, vector<16x8xf32>
    %cst_17 = arith.constant 9.99999997E-7 : f32
    %61 = arith.addf %1, %cst_17 : f32
    %cst_18 = arith.constant 1.000000e+00 : f32
    %62 = arith.divf %cst_18, %61 : f32
    %c0_19 = arith.constant 0 : index
    %c0_20 = arith.constant 0 : index
    %63 = vector.load %arg7[%c0_19, %c0_20] : memref<128x40xbf16, #tpu.memory_space<vmem>>, vector<128x40xbf16>
    %c0_21 = arith.constant 0 : index
    %c0_22 = arith.constant 0 : index
    %64 = vector.load %arg8[%c0_21, %c0_22] : memref<128x65xbf16, #tpu.memory_space<vmem>>, vector<128x65xbf16>
    %c0_23 = arith.constant 0 : index
    %c0_24 = arith.constant 0 : index
    %65 = vector.load %arg9[%c0_23, %c0_24] : memref<7x33xbf16, #tpu.memory_space<vmem>>, vector<7x33xbf16>
    %c0_25 = arith.constant 0 : index
    %c0_26 = arith.constant 0 : index
    %66 = vector.load %arg10[%c0_25, %c0_26] : memref<7x1xf32, #tpu.memory_space<vmem>>, vector<7x1xf32>
    %cst_27 = arith.constant 0.000000e+00 : f32
    %67 = vector.broadcast %cst_27 : f32 to vector<32x8xf32>
    %c0_i32 = arith.constant 0 : i32
    %68 = arith.index_cast %c0_i32 : i32 to index
    %c0_28 = arith.constant 0 : index
    %c0_29 = arith.constant 0 : index
    %69 = vector.load %arg3[%68, %c0_28, %c0_29] : memref<16x7x8xf32, #tpu.memory_space<vmem>>, vector<1x7x8xf32>
    %70 = vector.shape_cast %69 : vector<1x7x8xf32> to vector<7x8xf32>
    %71 = vector.broadcast %62 : f32 to vector<7x8xf32>
    %72 = arith.mulf %70, %71 : vector<7x8xf32>
    %73 = tpu.concatenate %67, %72, %5 in 0 : vector<32x8xf32>, vector<7x8xf32>, vector<1x8xf32> -> vector<40x8xf32>
    %74 = arith.truncf %73 : vector<40x8xf32> to vector<40x8xbf16>
    %cst_30 = arith.constant dense<0.000000e+00> : vector<128x8xf32>
    %75 = tpu.matmul %63, %74, %cst_30 {dimension_numbers = #tpu.dot_dimension_numbers<[1], [0], [0], [1], [0, 0, 1, 1], [], []>} : vector<128x40xbf16>, vector<40x8xbf16>, vector<128x8xf32> -> vector<128x8xf32>
    %76 = vector.extract_strided_slice %75 {offsets = [0, 0], sizes = [32, 8], strides = [1, 1]} : vector<128x8xf32> to vector<32x8xf32>
    %77 = arith.negf %76 : vector<32x8xf32>
    %78 = math.exp %77 : vector<32x8xf32>
    %cst_31 = arith.constant 1.000000e+00 : f32
    %79 = vector.broadcast %cst_31 : f32 to vector<32x8xf32>
    %80 = arith.addf %79, %78 : vector<32x8xf32>
    %81 = arith.divf %79, %80 : vector<32x8xf32>
    %82 = vector.extract_strided_slice %75 {offsets = [32, 0], sizes = [32, 8], strides = [1, 1]} : vector<128x8xf32> to vector<32x8xf32>
    %83 = arith.negf %82 : vector<32x8xf32>
    %84 = math.exp %83 : vector<32x8xf32>
    %cst_32 = arith.constant 1.000000e+00 : f32
    %85 = vector.broadcast %cst_32 : f32 to vector<32x8xf32>
    %86 = arith.addf %85, %84 : vector<32x8xf32>
    %87 = arith.divf %85, %86 : vector<32x8xf32>
    %88 = vector.extract_strided_slice %75 {offsets = [64, 0], sizes = [32, 8], strides = [1, 1]} : vector<128x8xf32> to vector<32x8xf32>
    %89 = math.tanh %88 : vector<32x8xf32>
    %90 = vector.extract_strided_slice %75 {offsets = [96, 0], sizes = [32, 8], strides = [1, 1]} : vector<128x8xf32> to vector<32x8xf32>
    %91 = arith.negf %90 : vector<32x8xf32>
    %92 = math.exp %91 : vector<32x8xf32>
    %cst_33 = arith.constant 1.000000e+00 : f32
    %93 = vector.broadcast %cst_33 : f32 to vector<32x8xf32>
    %94 = arith.addf %93, %92 : vector<32x8xf32>
    %95 = arith.divf %93, %94 : vector<32x8xf32>
    %96 = arith.mulf %87, %67 : vector<32x8xf32>
    %97 = arith.mulf %81, %89 : vector<32x8xf32>
    %98 = arith.addf %96, %97 : vector<32x8xf32>
    %99 = math.tanh %98 : vector<32x8xf32>
    %100 = arith.mulf %95, %99 : vector<32x8xf32>
    %101 = tpu.concatenate %67, %100, %5 in 0 : vector<32x8xf32>, vector<32x8xf32>, vector<1x8xf32> -> vector<65x8xf32>
    %102 = arith.truncf %101 : vector<65x8xf32> to vector<65x8xbf16>
    %cst_34 = arith.constant dense<0.000000e+00> : vector<128x8xf32>
    %103 = tpu.matmul %64, %102, %cst_34 {dimension_numbers = #tpu.dot_dimension_numbers<[1], [0], [0], [1], [0, 0, 1, 1], [], []>} : vector<128x65xbf16>, vector<65x8xbf16>, vector<128x8xf32> -> vector<128x8xf32>
    %104 = vector.extract_strided_slice %103 {offsets = [0, 0], sizes = [32, 8], strides = [1, 1]} : vector<128x8xf32> to vector<32x8xf32>
    %105 = arith.negf %104 : vector<32x8xf32>
    %106 = math.exp %105 : vector<32x8xf32>
    %cst_35 = arith.constant 1.000000e+00 : f32
    %107 = vector.broadcast %cst_35 : f32 to vector<32x8xf32>
    %108 = arith.addf %107, %106 : vector<32x8xf32>
    %109 = arith.divf %107, %108 : vector<32x8xf32>
    %110 = vector.extract_strided_slice %103 {offsets = [32, 0], sizes = [32, 8], strides = [1, 1]} : vector<128x8xf32> to vector<32x8xf32>
    %111 = arith.negf %110 : vector<32x8xf32>
    %112 = math.exp %111 : vector<32x8xf32>
    %cst_36 = arith.constant 1.000000e+00 : f32
    %113 = vector.broadcast %cst_36 : f32 to vector<32x8xf32>
    %114 = arith.addf %113, %112 : vector<32x8xf32>
    %115 = arith.divf %113, %114 : vector<32x8xf32>
    %116 = vector.extract_strided_slice %103 {offsets = [64, 0], sizes = [32, 8], strides = [1, 1]} : vector<128x8xf32> to vector<32x8xf32>
    %117 = math.tanh %116 : vector<32x8xf32>
    %118 = vector.extract_strided_slice %103 {offsets = [96, 0], sizes = [32, 8], strides = [1, 1]} : vector<128x8xf32> to vector<32x8xf32>
    %119 = arith.negf %118 : vector<32x8xf32>
    %120 = math.exp %119 : vector<32x8xf32>
    %cst_37 = arith.constant 1.000000e+00 : f32
    %121 = vector.broadcast %cst_37 : f32 to vector<32x8xf32>
    %122 = arith.addf %121, %120 : vector<32x8xf32>
    %123 = arith.divf %121, %122 : vector<32x8xf32>
    %124 = arith.mulf %115, %67 : vector<32x8xf32>
    %125 = arith.mulf %109, %117 : vector<32x8xf32>
    %126 = arith.addf %124, %125 : vector<32x8xf32>
    %127 = math.tanh %126 : vector<32x8xf32>
    %128 = arith.mulf %123, %127 : vector<32x8xf32>
    %129 = tpu.concatenate %128, %5 in 0 : vector<32x8xf32>, vector<1x8xf32> -> vector<33x8xf32>
    %130 = arith.truncf %129 : vector<33x8xf32> to vector<33x8xbf16>
    %cst_38 = arith.constant dense<0.000000e+00> : vector<7x8xf32>
    %131 = tpu.matmul %65, %130, %cst_38 {dimension_numbers = #tpu.dot_dimension_numbers<[1], [0], [0], [1], [0, 0, 1, 1], [], []>} : vector<7x33xbf16>, vector<33x8xbf16>, vector<7x8xf32> -> vector<7x8xf32>
    %cst_39 = arith.constant 0.000000e+00 : f32
    %132 = vector.broadcast %cst_39 : f32 to vector<7x8xf32>
    %133 = arith.cmpf oge, %131, %132 : vector<7x8xf32>
    %134 = vector.broadcast %3 : f32 to vector<7x8xf32>
    %135 = arith.mulf %134, %131 : vector<7x8xf32>
    %136 = arith.select %133, %131, %135 : vector<7x8xi1>, vector<7x8xf32>
    %137 = vector.broadcast %66 : vector<7x1xf32> to vector<7x8xf32>
    %138 = arith.mulf %136, %137 : vector<7x8xf32>
    %cst_40 = arith.constant dense<0.000000e+00> : vector<8xf32>
    %139 = vector.multi_reduction <add>, %138, %cst_40 [0] : vector<7x8xf32> to vector<8xf32>
    %140 = vector.shape_cast %139 : vector<8xf32> to vector<1x8xf32>
    %141 = arith.index_cast %c0_i32 : i32 to index
    %c0_41 = arith.constant 0 : index
    %142 = vector.load %arg12[%141, %c0_41] : memref<16x8xf32, #tpu.memory_space<vmem>>, vector<1x8xf32>
    tpu.vector_store %arg12[%141, %c0_41], %140 {strides = array<i32>} : memref<16x8xf32, #tpu.memory_space<vmem>>, vector<1x8xf32>,
    %c1_i32 = arith.constant 1 : i32
    %143 = arith.index_cast %c1_i32 : i32 to index
    %c0_42 = arith.constant 0 : index
    %c0_43 = arith.constant 0 : index
    %144 = vector.load %arg3[%143, %c0_42, %c0_43] : memref<16x7x8xf32, #tpu.memory_space<vmem>>, vector<1x7x8xf32>
    %145 = vector.shape_cast %144 : vector<1x7x8xf32> to vector<7x8xf32>
    %146 = vector.broadcast %62 : f32 to vector<7x8xf32>
    %147 = arith.mulf %145, %146 : vector<7x8xf32>
    %148 = tpu.concatenate %100, %147, %5 in 0 : vector<32x8xf32>, vector<7x8xf32>, vector<1x8xf32> -> vector<40x8xf32>
    %149 = arith.truncf %148 : vector<40x8xf32> to vector<40x8xbf16>
    %cst_44 = arith.constant dense<0.000000e+00> : vector<128x8xf32>
    %150 = tpu.matmul %63, %149, %cst_44 {dimension_numbers = #tpu.dot_dimension_numbers<[1], [0], [0], [1], [0, 0, 1, 1], [], []>} : vector<128x40xbf16>, vector<40x8xbf16>, vector<128x8xf32> -> vector<128x8xf32>
    %151 = vector.extract_strided_slice %150 {offsets = [0, 0], sizes = [32, 8], strides = [1, 1]} : vector<128x8xf32> to vector<32x8xf32>
    %152 = arith.negf %151 : vector<32x8xf32>
    %153 = math.exp %152 : vector<32x8xf32>
    %cst_45 = arith.constant 1.000000e+00 : f32
    %154 = vector.broadcast %cst_45 : f32 to vector<32x8xf32>
    %155 = arith.addf %154, %153 : vector<32x8xf32>
    %156 = arith.divf %154, %155 : vector<32x8xf32>
    %157 = vector.extract_strided_slice %150 {offsets = [32, 0], sizes = [32, 8], strides = [1, 1]} : vector<128x8xf32> to vector<32x8xf32>
    %158 = arith.negf %157 : vector<32x8xf32>
    %159 = math.exp %158 : vector<32x8xf32>
    %cst_46 = arith.constant 1.000000e+00 : f32
    %160 = vector.broadcast %cst_46 : f32 to vector<32x8xf32>
    %161 = arith.addf %160, %159 : vector<32x8xf32>
    %162 = arith.divf %160, %161 : vector<32x8xf32>
    %163 = vector.extract_strided_slice %150 {offsets = [64, 0], sizes = [32, 8], strides = [1, 1]} : vector<128x8xf32> to vector<32x8xf32>
    %164 = math.tanh %163 : vector<32x8xf32>
    %165 = vector.extract_strided_slice %150 {offsets = [96, 0], sizes = [32, 8], strides = [1, 1]} : vector<128x8xf32> to vector<32x8xf32>
    %166 = arith.negf %165 : vector<32x8xf32>
    %167 = math.exp %166 : vector<32x8xf32>
    %cst_47 = arith.constant 1.000000e+00 : f32
    %168 = vector.broadcast %cst_47 : f32 to vector<32x8xf32>
    %169 = arith.addf %168, %167 : vector<32x8xf32>
    %170 = arith.divf %168, %169 : vector<32x8xf32>
    %171 = arith.mulf %162, %98 : vector<32x8xf32>
    %172 = arith.mulf %156, %164 : vector<32x8xf32>
    %173 = arith.addf %171, %172 : vector<32x8xf32>
    %174 = math.tanh %173 : vector<32x8xf32>
    %175 = arith.mulf %170, %174 : vector<32x8xf32>
    %176 = tpu.concatenate %128, %175, %5 in 0 : vector<32x8xf32>, vector<32x8xf32>, vector<1x8xf32> -> vector<65x8xf32>
    %177 = arith.truncf %176 : vector<65x8xf32> to vector<65x8xbf16>
    %cst_48 = arith.constant dense<0.000000e+00> : vector<128x8xf32>
    %178 = tpu.matmul %64, %177, %cst_48 {dimension_numbers = #tpu.dot_dimension_numbers<[1], [0], [0], [1], [0, 0, 1, 1], [], []>} : vector<128x65xbf16>, vector<65x8xbf16>, vector<128x8xf32> -> vector<128x8xf32>
    %179 = vector.extract_strided_slice %178 {offsets = [0, 0], sizes = [32, 8], strides = [1, 1]} : vector<128x8xf32> to vector<32x8xf32>
    %180 = arith.negf %179 : vector<32x8xf32>
    %181 = math.exp %180 : vector<32x8xf32>
    %cst_49 = arith.constant 1.000000e+00 : f32
    %182 = vector.broadcast %cst_49 : f32 to vector<32x8xf32>
    %183 = arith.addf %182, %181 : vector<32x8xf32>
    %184 = arith.divf %182, %183 : vector<32x8xf32>
    %185 = vector.extract_strided_slice %178 {offsets = [32, 0], sizes = [32, 8], strides = [1, 1]} : vector<128x8xf32> to vector<32x8xf32>
    %186 = arith.negf %185 : vector<32x8xf32>
    %187 = math.exp %186 : vector<32x8xf32>
    %cst_50 = arith.constant 1.000000e+00 : f32
    %188 = vector.broadcast %cst_50 : f32 to vector<32x8xf32>
    %189 = arith.addf %188, %187 : vector<32x8xf32>
    %190 = arith.divf %188, %189 : vector<32x8xf32>
    %191 = vector.extract_strided_slice %178 {offsets = [64, 0], sizes = [32, 8], strides = [1, 1]} : vector<128x8xf32> to vector<32x8xf32>
    %192 = math.tanh %191 : vector<32x8xf32>
    %193 = vector.extract_strided_slice %178 {offsets = [96, 0], sizes = [32, 8], strides = [1, 1]} : vector<128x8xf32> to vector<32x8xf32>
    %194 = arith.negf %193 : vector<32x8xf32>
    %195 = math.exp %194 : vector<32x8xf32>
    %cst_51 = arith.constant 1.000000e+00 : f32
    %196 = vector.broadcast %cst_51 : f32 to vector<32x8xf32>
    %197 = arith.addf %196, %195 : vector<32x8xf32>
    %198 = arith.divf %196, %197 : vector<32x8xf32>
    %199 = arith.mulf %190, %126 : vector<32x8xf32>
    %200 = arith.mulf %184, %192 : vector<32x8xf32>
    %201 = arith.addf %199, %200 : vector<32x8xf32>
    %202 = math.tanh %201 : vector<32x8xf32>
    %203 = arith.mulf %198, %202 : vector<32x8xf32>
    %204 = tpu.concatenate %203, %5 in 0 : vector<32x8xf32>, vector<1x8xf32> -> vector<33x8xf32>
    %205 = arith.truncf %204 : vector<33x8xf32> to vector<33x8xbf16>
    %cst_52 = arith.constant dense<0.000000e+00> : vector<7x8xf32>
    %206 = tpu.matmul %65, %205, %cst_52 {dimension_numbers = #tpu.dot_dimension_numbers<[1], [0], [0], [1], [0, 0, 1, 1], [], []>} : vector<7x33xbf16>, vector<33x8xbf16>, vector<7x8xf32> -> vector<7x8xf32>
    %cst_53 = arith.constant 0.000000e+00 : f32
    %207 = vector.broadcast %cst_53 : f32 to vector<7x8xf32>
    %208 = arith.cmpf oge, %206, %207 : vector<7x8xf32>
    %209 = vector.broadcast %3 : f32 to vector<7x8xf32>
    %210 = arith.mulf %209, %206 : vector<7x8xf32>
    %211 = arith.select %208, %206, %210 : vector<7x8xi1>, vector<7x8xf32>
    %212 = vector.broadcast %66 : vector<7x1xf32> to vector<7x8xf32>
    %213 = arith.mulf %211, %212 : vector<7x8xf32>
    %cst_54 = arith.constant dense<0.000000e+00> : vector<8xf32>
    %214 = vector.multi_reduction <add>, %213, %cst_54 [0] : vector<7x8xf32> to vector<8xf32>
    %215 = vector.shape_cast %214 : vector<8xf32> to vector<1x8xf32>
    %216 = arith.index_cast %c1_i32 : i32 to index
    %c0_55 = arith.constant 0 : index
    %217 = vector.load %arg12[%216, %c0_55] : memref<16x8xf32, #tpu.memory_space<vmem>>, vector<1x8xf32>
    tpu.vector_store %arg12[%216, %c0_55], %215 {strides = array<i32>} : memref<16x8xf32, #tpu.memory_space<vmem>>, vector<1x8xf32>,
    %c2_i32 = arith.constant 2 : i32
    %218 = arith.index_cast %c2_i32 : i32 to index
    %c0_56 = arith.constant 0 : index
    %c0_57 = arith.constant 0 : index
    %219 = vector.load %arg3[%218, %c0_56, %c0_57] : memref<16x7x8xf32, #tpu.memory_space<vmem>>, vector<1x7x8xf32>
    %220 = vector.shape_cast %219 : vector<1x7x8xf32> to vector<7x8xf32>
    %221 = vector.broadcast %62 : f32 to vector<7x8xf32>
    %222 = arith.mulf %220, %221 : vector<7x8xf32>
    %223 = tpu.concatenate %175, %222, %5 in 0 : vector<32x8xf32>, vector<7x8xf32>, vector<1x8xf32> -> vector<40x8xf32>
    %224 = arith.truncf %223 : vector<40x8xf32> to vector<40x8xbf16>
    %cst_58 = arith.constant dense<0.000000e+00> : vector<128x8xf32>
    %225 = tpu.matmul %63, %224, %cst_58 {dimension_numbers = #tpu.dot_dimension_numbers<[1], [0], [0], [1], [0, 0, 1, 1], [], []>} : vector<128x40xbf16>, vector<40x8xbf16>, vector<128x8xf32> -> vector<128x8xf32>
    %226 = vector.extract_strided_slice %225 {offsets = [0, 0], sizes = [32, 8], strides = [1, 1]} : vector<128x8xf32> to vector<32x8xf32>
    %227 = arith.negf %226 : vector<32x8xf32>
    %228 = math.exp %227 : vector<32x8xf32>
    %cst_59 = arith.constant 1.000000e+00 : f32
    %229 = vector.broadcast %cst_59 : f32 to vector<32x8xf32>
    %230 = arith.addf %229, %228 : vector<32x8xf32>
    %231 = arith.divf %229, %230 : vector<32x8xf32>
    %232 = vector.extract_strided_slice %225 {offsets = [32, 0], sizes = [32, 8], strides = [1, 1]} : vector<128x8xf32> to vector<32x8xf32>
    %233 = arith.negf %232 : vector<32x8xf32>
    %234 = math.exp %233 : vector<32x8xf32>
    %cst_60 = arith.constant 1.000000e+00 : f32
    %235 = vector.broadcast %cst_60 : f32 to vector<32x8xf32>
    %236 = arith.addf %235, %234 : vector<32x8xf32>
    %237 = arith.divf %235, %236 : vector<32x8xf32>
    %238 = vector.extract_strided_slice %225 {offsets = [64, 0], sizes = [32, 8], strides = [1, 1]} : vector<128x8xf32> to vector<32x8xf32>
    %239 = math.tanh %238 : vector<32x8xf32>
    %240 = vector.extract_strided_slice %225 {offsets = [96, 0], sizes = [32, 8], strides = [1, 1]} : vector<128x8xf32> to vector<32x8xf32>
    %241 = arith.negf %240 : vector<32x8xf32>
    %242 = math.exp %241 : vector<32x8xf32>
    %cst_61 = arith.constant 1.000000e+00 : f32
    %243 = vector.broadcast %cst_61 : f32 to vector<32x8xf32>
    %244 = arith.addf %243, %242 : vector<32x8xf32>
    %245 = arith.divf %243, %244 : vector<32x8xf32>
    %246 = arith.mulf %237, %173 : vector<32x8xf32>
    %247 = arith.mulf %231, %239 : vector<32x8xf32>
    %248 = arith.addf %246, %247 : vector<32x8xf32>
    %249 = math.tanh %248 : vector<32x8xf32>
    %250 = arith.mulf %245, %249 : vector<32x8xf32>
    %251 = tpu.concatenate %203, %250, %5 in 0 : vector<32x8xf32>, vector<32x8xf32>, vector<1x8xf32> -> vector<65x8xf32>
    %252 = arith.truncf %251 : vector<65x8xf32> to vector<65x8xbf16>
    %cst_62 = arith.constant dense<0.000000e+00> : vector<128x8xf32>
    %253 = tpu.matmul %64, %252, %cst_62 {dimension_numbers = #tpu.dot_dimension_numbers<[1], [0], [0], [1], [0, 0, 1, 1], [], []>} : vector<128x65xbf16>, vector<65x8xbf16>, vector<128x8xf32> -> vector<128x8xf32>
    %254 = vector.extract_strided_slice %253 {offsets = [0, 0], sizes = [32, 8], strides = [1, 1]} : vector<128x8xf32> to vector<32x8xf32>
    %255 = arith.negf %254 : vector<32x8xf32>
    %256 = math.exp %255 : vector<32x8xf32>
    %cst_63 = arith.constant 1.000000e+00 : f32
    %257 = vector.broadcast %cst_63 : f32 to vector<32x8xf32>
    %258 = arith.addf %257, %256 : vector<32x8xf32>
    %259 = arith.divf %257, %258 : vector<32x8xf32>
    %260 = vector.extract_strided_slice %253 {offsets = [32, 0], sizes = [32, 8], strides = [1, 1]} : vector<128x8xf32> to vector<32x8xf32>
    %261 = arith.negf %260 : vector<32x8xf32>
    %262 = math.exp %261 : vector<32x8xf32>
    %cst_64 = arith.constant 1.000000e+00 : f32
    %263 = vector.broadcast %cst_64 : f32 to vector<32x8xf32>
    %264 = arith.addf %263, %262 : vector<32x8xf32>
    %265 = arith.divf %263, %264 : vector<32x8xf32>
    %266 = vector.extract_strided_slice %253 {offsets = [64, 0], sizes = [32, 8], strides = [1, 1]} : vector<128x8xf32> to vector<32x8xf32>
    %267 = math.tanh %266 : vector<32x8xf32>
    %268 = vector.extract_strided_slice %253 {offsets = [96, 0], sizes = [32, 8], strides = [1, 1]} : vector<128x8xf32> to vector<32x8xf32>
    %269 = arith.negf %268 : vector<32x8xf32>
    %270 = math.exp %269 : vector<32x8xf32>
    %cst_65 = arith.constant 1.000000e+00 : f32
    %271 = vector.broadcast %cst_65 : f32 to vector<32x8xf32>
    %272 = arith.addf %271, %270 : vector<32x8xf32>
    %273 = arith.divf %271, %272 : vector<32x8xf32>
    %274 = arith.mulf %265, %201 : vector<32x8xf32>
    %275 = arith.mulf %259, %267 : vector<32x8xf32>
    %276 = arith.addf %274, %275 : vector<32x8xf32>
    %277 = math.tanh %276 : vector<32x8xf32>
    %278 = arith.mulf %273, %277 : vector<32x8xf32>
    %279 = tpu.concatenate %278, %5 in 0 : vector<32x8xf32>, vector<1x8xf32> -> vector<33x8xf32>
    %280 = arith.truncf %279 : vector<33x8xf32> to vector<33x8xbf16>
    %cst_66 = arith.constant dense<0.000000e+00> : vector<7x8xf32>
    %281 = tpu.matmul %65, %280, %cst_66 {dimension_numbers = #tpu.dot_dimension_numbers<[1], [0], [0], [1], [0, 0, 1, 1], [], []>} : vector<7x33xbf16>, vector<33x8xbf16>, vector<7x8xf32> -> vector<7x8xf32>
    %cst_67 = arith.constant 0.000000e+00 : f32
    %282 = vector.broadcast %cst_67 : f32 to vector<7x8xf32>
    %283 = arith.cmpf oge, %281, %282 : vector<7x8xf32>
    %284 = vector.broadcast %3 : f32 to vector<7x8xf32>
    %285 = arith.mulf %284, %281 : vector<7x8xf32>
    %286 = arith.select %283, %281, %285 : vector<7x8xi1>, vector<7x8xf32>
    %287 = vector.broadcast %66 : vector<7x1xf32> to vector<7x8xf32>
    %288 = arith.mulf %286, %287 : vector<7x8xf32>
    %cst_68 = arith.constant dense<0.000000e+00> : vector<8xf32>
    %289 = vector.multi_reduction <add>, %288, %cst_68 [0] : vector<7x8xf32> to vector<8xf32>
    %290 = vector.shape_cast %289 : vector<8xf32> to vector<1x8xf32>
    %291 = arith.index_cast %c2_i32 : i32 to index
    %c0_69 = arith.constant 0 : index
    %292 = vector.load %arg12[%291, %c0_69] : memref<16x8xf32, #tpu.memory_space<vmem>>, vector<1x8xf32>
    tpu.vector_store %arg12[%291, %c0_69], %290 {strides = array<i32>} : memref<16x8xf32, #tpu.memory_space<vmem>>, vector<1x8xf32>,
    %c3_i32 = arith.constant 3 : i32
    %293 = arith.index_cast %c3_i32 : i32 to index
    %c0_70 = arith.constant 0 : index
    %c0_71 = arith.constant 0 : index
    %294 = vector.load %arg3[%293, %c0_70, %c0_71] : memref<16x7x8xf32, #tpu.memory_space<vmem>>, vector<1x7x8xf32>
    %295 = vector.shape_cast %294 : vector<1x7x8xf32> to vector<7x8xf32>
    %296 = vector.broadcast %62 : f32 to vector<7x8xf32>
    %297 = arith.mulf %295, %296 : vector<7x8xf32>
    %298 = tpu.concatenate %250, %297, %5 in 0 : vector<32x8xf32>, vector<7x8xf32>, vector<1x8xf32> -> vector<40x8xf32>
    %299 = arith.truncf %298 : vector<40x8xf32> to vector<40x8xbf16>
    %cst_72 = arith.constant dense<0.000000e+00> : vector<128x8xf32>
    %300 = tpu.matmul %63, %299, %cst_72 {dimension_numbers = #tpu.dot_dimension_numbers<[1], [0], [0], [1], [0, 0, 1, 1], [], []>} : vector<128x40xbf16>, vector<40x8xbf16>, vector<128x8xf32> -> vector<128x8xf32>
    %301 = vector.extract_strided_slice %300 {offsets = [0, 0], sizes = [32, 8], strides = [1, 1]} : vector<128x8xf32> to vector<32x8xf32>
    %302 = arith.negf %301 : vector<32x8xf32>
    %303 = math.exp %302 : vector<32x8xf32>
    %cst_73 = arith.constant 1.000000e+00 : f32
    %304 = vector.broadcast %cst_73 : f32 to vector<32x8xf32>
    %305 = arith.addf %304, %303 : vector<32x8xf32>
    %306 = arith.divf %304, %305 : vector<32x8xf32>
    %307 = vector.extract_strided_slice %300 {offsets = [32, 0], sizes = [32, 8], strides = [1, 1]} : vector<128x8xf32> to vector<32x8xf32>
    %308 = arith.negf %307 : vector<32x8xf32>
    %309 = math.exp %308 : vector<32x8xf32>
    %cst_74 = arith.constant 1.000000e+00 : f32
    %310 = vector.broadcast %cst_74 : f32 to vector<32x8xf32>
    %311 = arith.addf %310, %309 : vector<32x8xf32>
    %312 = arith.divf %310, %311 : vector<32x8xf32>
    %313 = vector.extract_strided_slice %300 {offsets = [64, 0], sizes = [32, 8], strides = [1, 1]} : vector<128x8xf32> to vector<32x8xf32>
    %314 = math.tanh %313 : vector<32x8xf32>
    %315 = vector.extract_strided_slice %300 {offsets = [96, 0], sizes = [32, 8], strides = [1, 1]} : vector<128x8xf32> to vector<32x8xf32>
    %316 = arith.negf %315 : vector<32x8xf32>
    %317 = math.exp %316 : vector<32x8xf32>
    %cst_75 = arith.constant 1.000000e+00 : f32
    %318 = vector.broadcast %cst_75 : f32 to vector<32x8xf32>
    %319 = arith.addf %318, %317 : vector<32x8xf32>
    %320 = arith.divf %318, %319 : vector<32x8xf32>
    %321 = arith.mulf %312, %248 : vector<32x8xf32>
    %322 = arith.mulf %306, %314 : vector<32x8xf32>
    %323 = arith.addf %321, %322 : vector<32x8xf32>
    %324 = math.tanh %323 : vector<32x8xf32>
    %325 = arith.mulf %320, %324 : vector<32x8xf32>
    %326 = tpu.concatenate %278, %325, %5 in 0 : vector<32x8xf32>, vector<32x8xf32>, vector<1x8xf32> -> vector<65x8xf32>
    %327 = arith.truncf %326 : vector<65x8xf32> to vector<65x8xbf16>
    %cst_76 = arith.constant dense<0.000000e+00> : vector<128x8xf32>
    %328 = tpu.matmul %64, %327, %cst_76 {dimension_numbers = #tpu.dot_dimension_numbers<[1], [0], [0], [1], [0, 0, 1, 1], [], []>} : vector<128x65xbf16>, vector<65x8xbf16>, vector<128x8xf32> -> vector<128x8xf32>
    %329 = vector.extract_strided_slice %328 {offsets = [0, 0], sizes = [32, 8], strides = [1, 1]} : vector<128x8xf32> to vector<32x8xf32>
    %330 = arith.negf %329 : vector<32x8xf32>
    %331 = math.exp %330 : vector<32x8xf32>
    %cst_77 = arith.constant 1.000000e+00 : f32
    %332 = vector.broadcast %cst_77 : f32 to vector<32x8xf32>
    %333 = arith.addf %332, %331 : vector<32x8xf32>
    %334 = arith.divf %332, %333 : vector<32x8xf32>
    %335 = vector.extract_strided_slice %328 {offsets = [32, 0], sizes = [32, 8], strides = [1, 1]} : vector<128x8xf32> to vector<32x8xf32>
    %336 = arith.negf %335 : vector<32x8xf32>
    %337 = math.exp %336 : vector<32x8xf32>
    %cst_78 = arith.constant 1.000000e+00 : f32
    %338 = vector.broadcast %cst_78 : f32 to vector<32x8xf32>
    %339 = arith.addf %338, %337 : vector<32x8xf32>
    %340 = arith.divf %338, %339 : vector<32x8xf32>
    %341 = vector.extract_strided_slice %328 {offsets = [64, 0], sizes = [32, 8], strides = [1, 1]} : vector<128x8xf32> to vector<32x8xf32>
    %342 = math.tanh %341 : vector<32x8xf32>
    %343 = vector.extract_strided_slice %328 {offsets = [96, 0], sizes = [32, 8], strides = [1, 1]} : vector<128x8xf32> to vector<32x8xf32>
    %344 = arith.negf %343 : vector<32x8xf32>
    %345 = math.exp %344 : vector<32x8xf32>
    %cst_79 = arith.constant 1.000000e+00 : f32
    %346 = vector.broadcast %cst_79 : f32 to vector<32x8xf32>
    %347 = arith.addf %346, %345 : vector<32x8xf32>
    %348 = arith.divf %346, %347 : vector<32x8xf32>
    %349 = arith.mulf %340, %276 : vector<32x8xf32>
    %350 = arith.mulf %334, %342 : vector<32x8xf32>
    %351 = arith.addf %349, %350 : vector<32x8xf32>
    %352 = math.tanh %351 : vector<32x8xf32>
    %353 = arith.mulf %348, %352 : vector<32x8xf32>
    %354 = tpu.concatenate %353, %5 in 0 : vector<32x8xf32>, vector<1x8xf32> -> vector<33x8xf32>
    %355 = arith.truncf %354 : vector<33x8xf32> to vector<33x8xbf16>
    %cst_80 = arith.constant dense<0.000000e+00> : vector<7x8xf32>
    %356 = tpu.matmul %65, %355, %cst_80 {dimension_numbers = #tpu.dot_dimension_numbers<[1], [0], [0], [1], [0, 0, 1, 1], [], []>} : vector<7x33xbf16>, vector<33x8xbf16>, vector<7x8xf32> -> vector<7x8xf32>
    %cst_81 = arith.constant 0.000000e+00 : f32
    %357 = vector.broadcast %cst_81 : f32 to vector<7x8xf32>
    %358 = arith.cmpf oge, %356, %357 : vector<7x8xf32>
    %359 = vector.broadcast %3 : f32 to vector<7x8xf32>
    %360 = arith.mulf %359, %356 : vector<7x8xf32>
    %361 = arith.select %358, %356, %360 : vector<7x8xi1>, vector<7x8xf32>
    %362 = vector.broadcast %66 : vector<7x1xf32> to vector<7x8xf32>
    %363 = arith.mulf %361, %362 : vector<7x8xf32>
    %cst_82 = arith.constant dense<0.000000e+00> : vector<8xf32>
    %364 = vector.multi_reduction <add>, %363, %cst_82 [0] : vector<7x8xf32> to vector<8xf32>
    %365 = vector.shape_cast %364 : vector<8xf32> to vector<1x8xf32>
    %366 = arith.index_cast %c3_i32 : i32 to index
    %c0_83 = arith.constant 0 : index
    %367 = vector.load %arg12[%366, %c0_83] : memref<16x8xf32, #tpu.memory_space<vmem>>, vector<1x8xf32>
    tpu.vector_store %arg12[%366, %c0_83], %365 {strides = array<i32>} : memref<16x8xf32, #tpu.memory_space<vmem>>, vector<1x8xf32>,
    %c4_i32 = arith.constant 4 : i32
    %368 = arith.index_cast %c4_i32 : i32 to index
    %c0_84 = arith.constant 0 : index
    %c0_85 = arith.constant 0 : index
    %369 = vector.load %arg3[%368, %c0_84, %c0_85] : memref<16x7x8xf32, #tpu.memory_space<vmem>>, vector<1x7x8xf32>
    %370 = vector.shape_cast %369 : vector<1x7x8xf32> to vector<7x8xf32>
    %371 = vector.broadcast %62 : f32 to vector<7x8xf32>
    %372 = arith.mulf %370, %371 : vector<7x8xf32>
    %373 = tpu.concatenate %325, %372, %5 in 0 : vector<32x8xf32>, vector<7x8xf32>, vector<1x8xf32> -> vector<40x8xf32>
    %374 = arith.truncf %373 : vector<40x8xf32> to vector<40x8xbf16>
    %cst_86 = arith.constant dense<0.000000e+00> : vector<128x8xf32>
    %375 = tpu.matmul %63, %374, %cst_86 {dimension_numbers = #tpu.dot_dimension_numbers<[1], [0], [0], [1], [0, 0, 1, 1], [], []>} : vector<128x40xbf16>, vector<40x8xbf16>, vector<128x8xf32> -> vector<128x8xf32>
    %376 = vector.extract_strided_slice %375 {offsets = [0, 0], sizes = [32, 8], strides = [1, 1]} : vector<128x8xf32> to vector<32x8xf32>
    %377 = arith.negf %376 : vector<32x8xf32>
    %378 = math.exp %377 : vector<32x8xf32>
    %cst_87 = arith.constant 1.000000e+00 : f32
    %379 = vector.broadcast %cst_87 : f32 to vector<32x8xf32>
    %380 = arith.addf %379, %378 : vector<32x8xf32>
    %381 = arith.divf %379, %380 : vector<32x8xf32>
    %382 = vector.extract_strided_slice %375 {offsets = [32, 0], sizes = [32, 8], strides = [1, 1]} : vector<128x8xf32> to vector<32x8xf32>
    %383 = arith.negf %382 : vector<32x8xf32>
    %384 = math.exp %383 : vector<32x8xf32>
    %cst_88 = arith.constant 1.000000e+00 : f32
    %385 = vector.broadcast %cst_88 : f32 to vector<32x8xf32>
    %386 = arith.addf %385, %384 : vector<32x8xf32>
    %387 = arith.divf %385, %386 : vector<32x8xf32>
    %388 = vector.extract_strided_slice %375 {offsets = [64, 0], sizes = [32, 8], strides = [1, 1]} : vector<128x8xf32> to vector<32x8xf32>
    %389 = math.tanh %388 : vector<32x8xf32>
    %390 = vector.extract_strided_slice %375 {offsets = [96, 0], sizes = [32, 8], strides = [1, 1]} : vector<128x8xf32> to vector<32x8xf32>
    %391 = arith.negf %390 : vector<32x8xf32>
    %392 = math.exp %391 : vector<32x8xf32>
    %cst_89 = arith.constant 1.000000e+00 : f32
    %393 = vector.broadcast %cst_89 : f32 to vector<32x8xf32>
    %394 = arith.addf %393, %392 : vector<32x8xf32>
    %395 = arith.divf %393, %394 : vector<32x8xf32>
    %396 = arith.mulf %387, %323 : vector<32x8xf32>
    %397 = arith.mulf %381, %389 : vector<32x8xf32>
    %398 = arith.addf %396, %397 : vector<32x8xf32>
    %399 = math.tanh %398 : vector<32x8xf32>
    %400 = arith.mulf %395, %399 : vector<32x8xf32>
    %401 = tpu.concatenate %353, %400, %5 in 0 : vector<32x8xf32>, vector<32x8xf32>, vector<1x8xf32> -> vector<65x8xf32>
    %402 = arith.truncf %401 : vector<65x8xf32> to vector<65x8xbf16>
    %cst_90 = arith.constant dense<0.000000e+00> : vector<128x8xf32>
    %403 = tpu.matmul %64, %402, %cst_90 {dimension_numbers = #tpu.dot_dimension_numbers<[1], [0], [0], [1], [0, 0, 1, 1], [], []>} : vector<128x65xbf16>, vector<65x8xbf16>, vector<128x8xf32> -> vector<128x8xf32>
    %404 = vector.extract_strided_slice %403 {offsets = [0, 0], sizes = [32, 8], strides = [1, 1]} : vector<128x8xf32> to vector<32x8xf32>
    %405 = arith.negf %404 : vector<32x8xf32>
    %406 = math.exp %405 : vector<32x8xf32>
    %cst_91 = arith.constant 1.000000e+00 : f32
    %407 = vector.broadcast %cst_91 : f32 to vector<32x8xf32>
    %408 = arith.addf %407, %406 : vector<32x8xf32>
    %409 = arith.divf %407, %408 : vector<32x8xf32>
    %410 = vector.extract_strided_slice %403 {offsets = [32, 0], sizes = [32, 8], strides = [1, 1]} : vector<128x8xf32> to vector<32x8xf32>
    %411 = arith.negf %410 : vector<32x8xf32>
    %412 = math.exp %411 : vector<32x8xf32>
    %cst_92 = arith.constant 1.000000e+00 : f32
    %413 = vector.broadcast %cst_92 : f32 to vector<32x8xf32>
    %414 = arith.addf %413, %412 : vector<32x8xf32>
    %415 = arith.divf %413, %414 : vector<32x8xf32>
    %416 = vector.extract_strided_slice %403 {offsets = [64, 0], sizes = [32, 8], strides = [1, 1]} : vector<128x8xf32> to vector<32x8xf32>
    %417 = math.tanh %416 : vector<32x8xf32>
    %418 = vector.extract_strided_slice %403 {offsets = [96, 0], sizes = [32, 8], strides = [1, 1]} : vector<128x8xf32> to vector<32x8xf32>
    %419 = arith.negf %418 : vector<32x8xf32>
    %420 = math.exp %419 : vector<32x8xf32>
    %cst_93 = arith.constant 1.000000e+00 : f32
    %421 = vector.broadcast %cst_93 : f32 to vector<32x8xf32>
    %422 = arith.addf %421, %420 : vector<32x8xf32>
    %423 = arith.divf %421, %422 : vector<32x8xf32>
    %424 = arith.mulf %415, %351 : vector<32x8xf32>
    %425 = arith.mulf %409, %417 : vector<32x8xf32>
    %426 = arith.addf %424, %425 : vector<32x8xf32>
    %427 = math.tanh %426 : vector<32x8xf32>
    %428 = arith.mulf %423, %427 : vector<32x8xf32>
    %429 = tpu.concatenate %428, %5 in 0 : vector<32x8xf32>, vector<1x8xf32> -> vector<33x8xf32>
    %430 = arith.truncf %429 : vector<33x8xf32> to vector<33x8xbf16>
    %cst_94 = arith.constant dense<0.000000e+00> : vector<7x8xf32>
    %431 = tpu.matmul %65, %430, %cst_94 {dimension_numbers = #tpu.dot_dimension_numbers<[1], [0], [0], [1], [0, 0, 1, 1], [], []>} : vector<7x33xbf16>, vector<33x8xbf16>, vector<7x8xf32> -> vector<7x8xf32>
    %cst_95 = arith.constant 0.000000e+00 : f32
    %432 = vector.broadcast %cst_95 : f32 to vector<7x8xf32>
    %433 = arith.cmpf oge, %431, %432 : vector<7x8xf32>
    %434 = vector.broadcast %3 : f32 to vector<7x8xf32>
    %435 = arith.mulf %434, %431 : vector<7x8xf32>
    %436 = arith.select %433, %431, %435 : vector<7x8xi1>, vector<7x8xf32>
    %437 = vector.broadcast %66 : vector<7x1xf32> to vector<7x8xf32>
    %438 = arith.mulf %436, %437 : vector<7x8xf32>
    %cst_96 = arith.constant dense<0.000000e+00> : vector<8xf32>
    %439 = vector.multi_reduction <add>, %438, %cst_96 [0] : vector<7x8xf32> to vector<8xf32>
    %440 = vector.shape_cast %439 : vector<8xf32> to vector<1x8xf32>
    %441 = arith.index_cast %c4_i32 : i32 to index
    %c0_97 = arith.constant 0 : index
    %442 = vector.load %arg12[%441, %c0_97] : memref<16x8xf32, #tpu.memory_space<vmem>>, vector<1x8xf32>
    tpu.vector_store %arg12[%441, %c0_97], %440 {strides = array<i32>} : memref<16x8xf32, #tpu.memory_space<vmem>>, vector<1x8xf32>,
    %c5_i32 = arith.constant 5 : i32
    %443 = arith.index_cast %c5_i32 : i32 to index
    %c0_98 = arith.constant 0 : index
    %c0_99 = arith.constant 0 : index
    %444 = vector.load %arg3[%443, %c0_98, %c0_99] : memref<16x7x8xf32, #tpu.memory_space<vmem>>, vector<1x7x8xf32>
    %445 = vector.shape_cast %444 : vector<1x7x8xf32> to vector<7x8xf32>
    %446 = vector.broadcast %62 : f32 to vector<7x8xf32>
    %447 = arith.mulf %445, %446 : vector<7x8xf32>
    %448 = tpu.concatenate %400, %447, %5 in 0 : vector<32x8xf32>, vector<7x8xf32>, vector<1x8xf32> -> vector<40x8xf32>
    %449 = arith.truncf %448 : vector<40x8xf32> to vector<40x8xbf16>
    %cst_100 = arith.constant dense<0.000000e+00> : vector<128x8xf32>
    %450 = tpu.matmul %63, %449, %cst_100 {dimension_numbers = #tpu.dot_dimension_numbers<[1], [0], [0], [1], [0, 0, 1, 1], [], []>} : vector<128x40xbf16>, vector<40x8xbf16>, vector<128x8xf32> -> vector<128x8xf32>
    %451 = vector.extract_strided_slice %450 {offsets = [0, 0], sizes = [32, 8], strides = [1, 1]} : vector<128x8xf32> to vector<32x8xf32>
    %452 = arith.negf %451 : vector<32x8xf32>
    %453 = math.exp %452 : vector<32x8xf32>
    %cst_101 = arith.constant 1.000000e+00 : f32
    %454 = vector.broadcast %cst_101 : f32 to vector<32x8xf32>
    %455 = arith.addf %454, %453 : vector<32x8xf32>
    %456 = arith.divf %454, %455 : vector<32x8xf32>
    %457 = vector.extract_strided_slice %450 {offsets = [32, 0], sizes = [32, 8], strides = [1, 1]} : vector<128x8xf32> to vector<32x8xf32>
    %458 = arith.negf %457 : vector<32x8xf32>
    %459 = math.exp %458 : vector<32x8xf32>
    %cst_102 = arith.constant 1.000000e+00 : f32
    %460 = vector.broadcast %cst_102 : f32 to vector<32x8xf32>
    %461 = arith.addf %460, %459 : vector<32x8xf32>
    %462 = arith.divf %460, %461 : vector<32x8xf32>
    %463 = vector.extract_strided_slice %450 {offsets = [64, 0], sizes = [32, 8], strides = [1, 1]} : vector<128x8xf32> to vector<32x8xf32>
    %464 = math.tanh %463 : vector<32x8xf32>
    %465 = vector.extract_strided_slice %450 {offsets = [96, 0], sizes = [32, 8], strides = [1, 1]} : vector<128x8xf32> to vector<32x8xf32>
    %466 = arith.negf %465 : vector<32x8xf32>
    %467 = math.exp %466 : vector<32x8xf32>
    %cst_103 = arith.constant 1.000000e+00 : f32
    %468 = vector.broadcast %cst_103 : f32 to vector<32x8xf32>
    %469 = arith.addf %468, %467 : vector<32x8xf32>
    %470 = arith.divf %468, %469 : vector<32x8xf32>
    %471 = arith.mulf %462, %398 : vector<32x8xf32>
    %472 = arith.mulf %456, %464 : vector<32x8xf32>
    %473 = arith.addf %471, %472 : vector<32x8xf32>
    %474 = math.tanh %473 : vector<32x8xf32>
    %475 = arith.mulf %470, %474 : vector<32x8xf32>
    %476 = tpu.concatenate %428, %475, %5 in 0 : vector<32x8xf32>, vector<32x8xf32>, vector<1x8xf32> -> vector<65x8xf32>
    %477 = arith.truncf %476 : vector<65x8xf32> to vector<65x8xbf16>
    %cst_104 = arith.constant dense<0.000000e+00> : vector<128x8xf32>
    %478 = tpu.matmul %64, %477, %cst_104 {dimension_numbers = #tpu.dot_dimension_numbers<[1], [0], [0], [1], [0, 0, 1, 1], [], []>} : vector<128x65xbf16>, vector<65x8xbf16>, vector<128x8xf32> -> vector<128x8xf32>
    %479 = vector.extract_strided_slice %478 {offsets = [0, 0], sizes = [32, 8], strides = [1, 1]} : vector<128x8xf32> to vector<32x8xf32>
    %480 = arith.negf %479 : vector<32x8xf32>
    %481 = math.exp %480 : vector<32x8xf32>
    %cst_105 = arith.constant 1.000000e+00 : f32
    %482 = vector.broadcast %cst_105 : f32 to vector<32x8xf32>
    %483 = arith.addf %482, %481 : vector<32x8xf32>
    %484 = arith.divf %482, %483 : vector<32x8xf32>
    %485 = vector.extract_strided_slice %478 {offsets = [32, 0], sizes = [32, 8], strides = [1, 1]} : vector<128x8xf32> to vector<32x8xf32>
    %486 = arith.negf %485 : vector<32x8xf32>
    %487 = math.exp %486 : vector<32x8xf32>
    %cst_106 = arith.constant 1.000000e+00 : f32
    %488 = vector.broadcast %cst_106 : f32 to vector<32x8xf32>
    %489 = arith.addf %488, %487 : vector<32x8xf32>
    %490 = arith.divf %488, %489 : vector<32x8xf32>
    %491 = vector.extract_strided_slice %478 {offsets = [64, 0], sizes = [32, 8], strides = [1, 1]} : vector<128x8xf32> to vector<32x8xf32>
    %492 = math.tanh %491 : vector<32x8xf32>
    %493 = vector.extract_strided_slice %478 {offsets = [96, 0], sizes = [32, 8], strides = [1, 1]} : vector<128x8xf32> to vector<32x8xf32>
    %494 = arith.negf %493 : vector<32x8xf32>
    %495 = math.exp %494 : vector<32x8xf32>
    %cst_107 = arith.constant 1.000000e+00 : f32
    %496 = vector.broadcast %cst_107 : f32 to vector<32x8xf32>
    %497 = arith.addf %496, %495 : vector<32x8xf32>
    %498 = arith.divf %496, %497 : vector<32x8xf32>
    %499 = arith.mulf %490, %426 : vector<32x8xf32>
    %500 = arith.mulf %484, %492 : vector<32x8xf32>
    %501 = arith.addf %499, %500 : vector<32x8xf32>
    %502 = math.tanh %501 : vector<32x8xf32>
    %503 = arith.mulf %498, %502 : vector<32x8xf32>
    %504 = tpu.concatenate %503, %5 in 0 : vector<32x8xf32>, vector<1x8xf32> -> vector<33x8xf32>
    %505 = arith.truncf %504 : vector<33x8xf32> to vector<33x8xbf16>
    %cst_108 = arith.constant dense<0.000000e+00> : vector<7x8xf32>
    %506 = tpu.matmul %65, %505, %cst_108 {dimension_numbers = #tpu.dot_dimension_numbers<[1], [0], [0], [1], [0, 0, 1, 1], [], []>} : vector<7x33xbf16>, vector<33x8xbf16>, vector<7x8xf32> -> vector<7x8xf32>
    %cst_109 = arith.constant 0.000000e+00 : f32
    %507 = vector.broadcast %cst_109 : f32 to vector<7x8xf32>
    %508 = arith.cmpf oge, %506, %507 : vector<7x8xf32>
    %509 = vector.broadcast %3 : f32 to vector<7x8xf32>
    %510 = arith.mulf %509, %506 : vector<7x8xf32>
    %511 = arith.select %508, %506, %510 : vector<7x8xi1>, vector<7x8xf32>
    %512 = vector.broadcast %66 : vector<7x1xf32> to vector<7x8xf32>
    %513 = arith.mulf %511, %512 : vector<7x8xf32>
    %cst_110 = arith.constant dense<0.000000e+00> : vector<8xf32>
    %514 = vector.multi_reduction <add>, %513, %cst_110 [0] : vector<7x8xf32> to vector<8xf32>
    %515 = vector.shape_cast %514 : vector<8xf32> to vector<1x8xf32>
    %516 = arith.index_cast %c5_i32 : i32 to index
    %c0_111 = arith.constant 0 : index
    %517 = vector.load %arg12[%516, %c0_111] : memref<16x8xf32, #tpu.memory_space<vmem>>, vector<1x8xf32>
    tpu.vector_store %arg12[%516, %c0_111], %515 {strides = array<i32>} : memref<16x8xf32, #tpu.memory_space<vmem>>, vector<1x8xf32>,
    %c6_i32 = arith.constant 6 : i32
    %518 = arith.index_cast %c6_i32 : i32 to index
    %c0_112 = arith.constant 0 : index
    %c0_113 = arith.constant 0 : index
    %519 = vector.load %arg3[%518, %c0_112, %c0_113] : memref<16x7x8xf32, #tpu.memory_space<vmem>>, vector<1x7x8xf32>
    %520 = vector.shape_cast %519 : vector<1x7x8xf32> to vector<7x8xf32>
    %521 = vector.broadcast %62 : f32 to vector<7x8xf32>
    %522 = arith.mulf %520, %521 : vector<7x8xf32>
    %523 = tpu.concatenate %475, %522, %5 in 0 : vector<32x8xf32>, vector<7x8xf32>, vector<1x8xf32> -> vector<40x8xf32>
    %524 = arith.truncf %523 : vector<40x8xf32> to vector<40x8xbf16>
    %cst_114 = arith.constant dense<0.000000e+00> : vector<128x8xf32>
    %525 = tpu.matmul %63, %524, %cst_114 {dimension_numbers = #tpu.dot_dimension_numbers<[1], [0], [0], [1], [0, 0, 1, 1], [], []>} : vector<128x40xbf16>, vector<40x8xbf16>, vector<128x8xf32> -> vector<128x8xf32>
    %526 = vector.extract_strided_slice %525 {offsets = [0, 0], sizes = [32, 8], strides = [1, 1]} : vector<128x8xf32> to vector<32x8xf32>
    %527 = arith.negf %526 : vector<32x8xf32>
    %528 = math.exp %527 : vector<32x8xf32>
    %cst_115 = arith.constant 1.000000e+00 : f32
    %529 = vector.broadcast %cst_115 : f32 to vector<32x8xf32>
    %530 = arith.addf %529, %528 : vector<32x8xf32>
    %531 = arith.divf %529, %530 : vector<32x8xf32>
    %532 = vector.extract_strided_slice %525 {offsets = [32, 0], sizes = [32, 8], strides = [1, 1]} : vector<128x8xf32> to vector<32x8xf32>
    %533 = arith.negf %532 : vector<32x8xf32>
    %534 = math.exp %533 : vector<32x8xf32>
    %cst_116 = arith.constant 1.000000e+00 : f32
    %535 = vector.broadcast %cst_116 : f32 to vector<32x8xf32>
    %536 = arith.addf %535, %534 : vector<32x8xf32>
    %537 = arith.divf %535, %536 : vector<32x8xf32>
    %538 = vector.extract_strided_slice %525 {offsets = [64, 0], sizes = [32, 8], strides = [1, 1]} : vector<128x8xf32> to vector<32x8xf32>
    %539 = math.tanh %538 : vector<32x8xf32>
    %540 = vector.extract_strided_slice %525 {offsets = [96, 0], sizes = [32, 8], strides = [1, 1]} : vector<128x8xf32> to vector<32x8xf32>
    %541 = arith.negf %540 : vector<32x8xf32>
    %542 = math.exp %541 : vector<32x8xf32>
    %cst_117 = arith.constant 1.000000e+00 : f32
    %543 = vector.broadcast %cst_117 : f32 to vector<32x8xf32>
    %544 = arith.addf %543, %542 : vector<32x8xf32>
    %545 = arith.divf %543, %544 : vector<32x8xf32>
    %546 = arith.mulf %537, %473 : vector<32x8xf32>
    %547 = arith.mulf %531, %539 : vector<32x8xf32>
    %548 = arith.addf %546, %547 : vector<32x8xf32>
    %549 = math.tanh %548 : vector<32x8xf32>
    %550 = arith.mulf %545, %549 : vector<32x8xf32>
    %551 = tpu.concatenate %503, %550, %5 in 0 : vector<32x8xf32>, vector<32x8xf32>, vector<1x8xf32> -> vector<65x8xf32>
    %552 = arith.truncf %551 : vector<65x8xf32> to vector<65x8xbf16>
    %cst_118 = arith.constant dense<0.000000e+00> : vector<128x8xf32>
    %553 = tpu.matmul %64, %552, %cst_118 {dimension_numbers = #tpu.dot_dimension_numbers<[1], [0], [0], [1], [0, 0, 1, 1], [], []>} : vector<128x65xbf16>, vector<65x8xbf16>, vector<128x8xf32> -> vector<128x8xf32>
    %554 = vector.extract_strided_slice %553 {offsets = [0, 0], sizes = [32, 8], strides = [1, 1]} : vector<128x8xf32> to vector<32x8xf32>
    %555 = arith.negf %554 : vector<32x8xf32>
    %556 = math.exp %555 : vector<32x8xf32>
    %cst_119 = arith.constant 1.000000e+00 : f32
    %557 = vector.broadcast %cst_119 : f32 to vector<32x8xf32>
    %558 = arith.addf %557, %556 : vector<32x8xf32>
    %559 = arith.divf %557, %558 : vector<32x8xf32>
    %560 = vector.extract_strided_slice %553 {offsets = [32, 0], sizes = [32, 8], strides = [1, 1]} : vector<128x8xf32> to vector<32x8xf32>
    %561 = arith.negf %560 : vector<32x8xf32>
    %562 = math.exp %561 : vector<32x8xf32>
    %cst_120 = arith.constant 1.000000e+00 : f32
    %563 = vector.broadcast %cst_120 : f32 to vector<32x8xf32>
    %564 = arith.addf %563, %562 : vector<32x8xf32>
    %565 = arith.divf %563, %564 : vector<32x8xf32>
    %566 = vector.extract_strided_slice %553 {offsets = [64, 0], sizes = [32, 8], strides = [1, 1]} : vector<128x8xf32> to vector<32x8xf32>
    %567 = math.tanh %566 : vector<32x8xf32>
    %568 = vector.extract_strided_slice %553 {offsets = [96, 0], sizes = [32, 8], strides = [1, 1]} : vector<128x8xf32> to vector<32x8xf32>
    %569 = arith.negf %568 : vector<32x8xf32>
    %570 = math.exp %569 : vector<32x8xf32>
    %cst_121 = arith.constant 1.000000e+00 : f32
    %571 = vector.broadcast %cst_121 : f32 to vector<32x8xf32>
    %572 = arith.addf %571, %570 : vector<32x8xf32>
    %573 = arith.divf %571, %572 : vector<32x8xf32>
    %574 = arith.mulf %565, %501 : vector<32x8xf32>
    %575 = arith.mulf %559, %567 : vector<32x8xf32>
    %576 = arith.addf %574, %575 : vector<32x8xf32>
    %577 = math.tanh %576 : vector<32x8xf32>
    %578 = arith.mulf %573, %577 : vector<32x8xf32>
    %579 = tpu.concatenate %578, %5 in 0 : vector<32x8xf32>, vector<1x8xf32> -> vector<33x8xf32>
    %580 = arith.truncf %579 : vector<33x8xf32> to vector<33x8xbf16>
    %cst_122 = arith.constant dense<0.000000e+00> : vector<7x8xf32>
    %581 = tpu.matmul %65, %580, %cst_122 {dimension_numbers = #tpu.dot_dimension_numbers<[1], [0], [0], [1], [0, 0, 1, 1], [], []>} : vector<7x33xbf16>, vector<33x8xbf16>, vector<7x8xf32> -> vector<7x8xf32>
    %cst_123 = arith.constant 0.000000e+00 : f32
    %582 = vector.broadcast %cst_123 : f32 to vector<7x8xf32>
    %583 = arith.cmpf oge, %581, %582 : vector<7x8xf32>
    %584 = vector.broadcast %3 : f32 to vector<7x8xf32>
    %585 = arith.mulf %584, %581 : vector<7x8xf32>
    %586 = arith.select %583, %581, %585 : vector<7x8xi1>, vector<7x8xf32>
    %587 = vector.broadcast %66 : vector<7x1xf32> to vector<7x8xf32>
    %588 = arith.mulf %586, %587 : vector<7x8xf32>
    %cst_124 = arith.constant dense<0.000000e+00> : vector<8xf32>
    %589 = vector.multi_reduction <add>, %588, %cst_124 [0] : vector<7x8xf32> to vector<8xf32>
    %590 = vector.shape_cast %589 : vector<8xf32> to vector<1x8xf32>
    %591 = arith.index_cast %c6_i32 : i32 to index
    %c0_125 = arith.constant 0 : index
    %592 = vector.load %arg12[%591, %c0_125] : memref<16x8xf32, #tpu.memory_space<vmem>>, vector<1x8xf32>
    tpu.vector_store %arg12[%591, %c0_125], %590 {strides = array<i32>} : memref<16x8xf32, #tpu.memory_space<vmem>>, vector<1x8xf32>,
    %c7_i32 = arith.constant 7 : i32
    %593 = arith.index_cast %c7_i32 : i32 to index
    %c0_126 = arith.constant 0 : index
    %c0_127 = arith.constant 0 : index
    %594 = vector.load %arg3[%593, %c0_126, %c0_127] : memref<16x7x8xf32, #tpu.memory_space<vmem>>, vector<1x7x8xf32>
    %595 = vector.shape_cast %594 : vector<1x7x8xf32> to vector<7x8xf32>
    %596 = vector.broadcast %62 : f32 to vector<7x8xf32>
    %597 = arith.mulf %595, %596 : vector<7x8xf32>
    %598 = tpu.concatenate %550, %597, %5 in 0 : vector<32x8xf32>, vector<7x8xf32>, vector<1x8xf32> -> vector<40x8xf32>
    %599 = arith.truncf %598 : vector<40x8xf32> to vector<40x8xbf16>
    %cst_128 = arith.constant dense<0.000000e+00> : vector<128x8xf32>
    %600 = tpu.matmul %63, %599, %cst_128 {dimension_numbers = #tpu.dot_dimension_numbers<[1], [0], [0], [1], [0, 0, 1, 1], [], []>} : vector<128x40xbf16>, vector<40x8xbf16>, vector<128x8xf32> -> vector<128x8xf32>
    %601 = vector.extract_strided_slice %600 {offsets = [0, 0], sizes = [32, 8], strides = [1, 1]} : vector<128x8xf32> to vector<32x8xf32>
    %602 = arith.negf %601 : vector<32x8xf32>
    %603 = math.exp %602 : vector<32x8xf32>
    %cst_129 = arith.constant 1.000000e+00 : f32
    %604 = vector.broadcast %cst_129 : f32 to vector<32x8xf32>
    %605 = arith.addf %604, %603 : vector<32x8xf32>
    %606 = arith.divf %604, %605 : vector<32x8xf32>
    %607 = vector.extract_strided_slice %600 {offsets = [32, 0], sizes = [32, 8], strides = [1, 1]} : vector<128x8xf32> to vector<32x8xf32>
    %608 = arith.negf %607 : vector<32x8xf32>
    %609 = math.exp %608 : vector<32x8xf32>
    %cst_130 = arith.constant 1.000000e+00 : f32
    %610 = vector.broadcast %cst_130 : f32 to vector<32x8xf32>
    %611 = arith.addf %610, %609 : vector<32x8xf32>
    %612 = arith.divf %610, %611 : vector<32x8xf32>
    %613 = vector.extract_strided_slice %600 {offsets = [64, 0], sizes = [32, 8], strides = [1, 1]} : vector<128x8xf32> to vector<32x8xf32>
    %614 = math.tanh %613 : vector<32x8xf32>
    %615 = vector.extract_strided_slice %600 {offsets = [96, 0], sizes = [32, 8], strides = [1, 1]} : vector<128x8xf32> to vector<32x8xf32>
    %616 = arith.negf %615 : vector<32x8xf32>
    %617 = math.exp %616 : vector<32x8xf32>
    %cst_131 = arith.constant 1.000000e+00 : f32
    %618 = vector.broadcast %cst_131 : f32 to vector<32x8xf32>
    %619 = arith.addf %618, %617 : vector<32x8xf32>
    %620 = arith.divf %618, %619 : vector<32x8xf32>
    %621 = arith.mulf %612, %548 : vector<32x8xf32>
    %622 = arith.mulf %606, %614 : vector<32x8xf32>
    %623 = arith.addf %621, %622 : vector<32x8xf32>
    %624 = math.tanh %623 : vector<32x8xf32>
    %625 = arith.mulf %620, %624 : vector<32x8xf32>
    %626 = tpu.concatenate %578, %625, %5 in 0 : vector<32x8xf32>, vector<32x8xf32>, vector<1x8xf32> -> vector<65x8xf32>
    %627 = arith.truncf %626 : vector<65x8xf32> to vector<65x8xbf16>
    %cst_132 = arith.constant dense<0.000000e+00> : vector<128x8xf32>
    %628 = tpu.matmul %64, %627, %cst_132 {dimension_numbers = #tpu.dot_dimension_numbers<[1], [0], [0], [1], [0, 0, 1, 1], [], []>} : vector<128x65xbf16>, vector<65x8xbf16>, vector<128x8xf32> -> vector<128x8xf32>
    %629 = vector.extract_strided_slice %628 {offsets = [0, 0], sizes = [32, 8], strides = [1, 1]} : vector<128x8xf32> to vector<32x8xf32>
    %630 = arith.negf %629 : vector<32x8xf32>
    %631 = math.exp %630 : vector<32x8xf32>
    %cst_133 = arith.constant 1.000000e+00 : f32
    %632 = vector.broadcast %cst_133 : f32 to vector<32x8xf32>
    %633 = arith.addf %632, %631 : vector<32x8xf32>
    %634 = arith.divf %632, %633 : vector<32x8xf32>
    %635 = vector.extract_strided_slice %628 {offsets = [32, 0], sizes = [32, 8], strides = [1, 1]} : vector<128x8xf32> to vector<32x8xf32>
    %636 = arith.negf %635 : vector<32x8xf32>
    %637 = math.exp %636 : vector<32x8xf32>
    %cst_134 = arith.constant 1.000000e+00 : f32
    %638 = vector.broadcast %cst_134 : f32 to vector<32x8xf32>
    %639 = arith.addf %638, %637 : vector<32x8xf32>
    %640 = arith.divf %638, %639 : vector<32x8xf32>
    %641 = vector.extract_strided_slice %628 {offsets = [64, 0], sizes = [32, 8], strides = [1, 1]} : vector<128x8xf32> to vector<32x8xf32>
    %642 = math.tanh %641 : vector<32x8xf32>
    %643 = vector.extract_strided_slice %628 {offsets = [96, 0], sizes = [32, 8], strides = [1, 1]} : vector<128x8xf32> to vector<32x8xf32>
    %644 = arith.negf %643 : vector<32x8xf32>
    %645 = math.exp %644 : vector<32x8xf32>
    %cst_135 = arith.constant 1.000000e+00 : f32
    %646 = vector.broadcast %cst_135 : f32 to vector<32x8xf32>
    %647 = arith.addf %646, %645 : vector<32x8xf32>
    %648 = arith.divf %646, %647 : vector<32x8xf32>
    %649 = arith.mulf %640, %576 : vector<32x8xf32>
    %650 = arith.mulf %634, %642 : vector<32x8xf32>
    %651 = arith.addf %649, %650 : vector<32x8xf32>
    %652 = math.tanh %651 : vector<32x8xf32>
    %653 = arith.mulf %648, %652 : vector<32x8xf32>
    %654 = tpu.concatenate %653, %5 in 0 : vector<32x8xf32>, vector<1x8xf32> -> vector<33x8xf32>
    %655 = arith.truncf %654 : vector<33x8xf32> to vector<33x8xbf16>
    %cst_136 = arith.constant dense<0.000000e+00> : vector<7x8xf32>
    %656 = tpu.matmul %65, %655, %cst_136 {dimension_numbers = #tpu.dot_dimension_numbers<[1], [0], [0], [1], [0, 0, 1, 1], [], []>} : vector<7x33xbf16>, vector<33x8xbf16>, vector<7x8xf32> -> vector<7x8xf32>
    %cst_137 = arith.constant 0.000000e+00 : f32
    %657 = vector.broadcast %cst_137 : f32 to vector<7x8xf32>
    %658 = arith.cmpf oge, %656, %657 : vector<7x8xf32>
    %659 = vector.broadcast %3 : f32 to vector<7x8xf32>
    %660 = arith.mulf %659, %656 : vector<7x8xf32>
    %661 = arith.select %658, %656, %660 : vector<7x8xi1>, vector<7x8xf32>
    %662 = vector.broadcast %66 : vector<7x1xf32> to vector<7x8xf32>
    %663 = arith.mulf %661, %662 : vector<7x8xf32>
    %cst_138 = arith.constant dense<0.000000e+00> : vector<8xf32>
    %664 = vector.multi_reduction <add>, %663, %cst_138 [0] : vector<7x8xf32> to vector<8xf32>
    %665 = vector.shape_cast %664 : vector<8xf32> to vector<1x8xf32>
    %666 = arith.index_cast %c7_i32 : i32 to index
    %c0_139 = arith.constant 0 : index
    %667 = vector.load %arg12[%666, %c0_139] : memref<16x8xf32, #tpu.memory_space<vmem>>, vector<1x8xf32>
    tpu.vector_store %arg12[%666, %c0_139], %665 {strides = array<i32>} : memref<16x8xf32, #tpu.memory_space<vmem>>, vector<1x8xf32>,
    %c8_i32 = arith.constant 8 : i32
    %668 = arith.index_cast %c8_i32 : i32 to index
    %c0_140 = arith.constant 0 : index
    %c0_141 = arith.constant 0 : index
    %669 = vector.load %arg3[%668, %c0_140, %c0_141] : memref<16x7x8xf32, #tpu.memory_space<vmem>>, vector<1x7x8xf32>
    %670 = vector.shape_cast %669 : vector<1x7x8xf32> to vector<7x8xf32>
    %671 = vector.broadcast %62 : f32 to vector<7x8xf32>
    %672 = arith.mulf %670, %671 : vector<7x8xf32>
    %673 = tpu.concatenate %625, %672, %5 in 0 : vector<32x8xf32>, vector<7x8xf32>, vector<1x8xf32> -> vector<40x8xf32>
    %674 = arith.truncf %673 : vector<40x8xf32> to vector<40x8xbf16>
    %cst_142 = arith.constant dense<0.000000e+00> : vector<128x8xf32>
    %675 = tpu.matmul %63, %674, %cst_142 {dimension_numbers = #tpu.dot_dimension_numbers<[1], [0], [0], [1], [0, 0, 1, 1], [], []>} : vector<128x40xbf16>, vector<40x8xbf16>, vector<128x8xf32> -> vector<128x8xf32>
    %676 = vector.extract_strided_slice %675 {offsets = [0, 0], sizes = [32, 8], strides = [1, 1]} : vector<128x8xf32> to vector<32x8xf32>
    %677 = arith.negf %676 : vector<32x8xf32>
    %678 = math.exp %677 : vector<32x8xf32>
    %cst_143 = arith.constant 1.000000e+00 : f32
    %679 = vector.broadcast %cst_143 : f32 to vector<32x8xf32>
    %680 = arith.addf %679, %678 : vector<32x8xf32>
    %681 = arith.divf %679, %680 : vector<32x8xf32>
    %682 = vector.extract_strided_slice %675 {offsets = [32, 0], sizes = [32, 8], strides = [1, 1]} : vector<128x8xf32> to vector<32x8xf32>
    %683 = arith.negf %682 : vector<32x8xf32>
    %684 = math.exp %683 : vector<32x8xf32>
    %cst_144 = arith.constant 1.000000e+00 : f32
    %685 = vector.broadcast %cst_144 : f32 to vector<32x8xf32>
    %686 = arith.addf %685, %684 : vector<32x8xf32>
    %687 = arith.divf %685, %686 : vector<32x8xf32>
    %688 = vector.extract_strided_slice %675 {offsets = [64, 0], sizes = [32, 8], strides = [1, 1]} : vector<128x8xf32> to vector<32x8xf32>
    %689 = math.tanh %688 : vector<32x8xf32>
    %690 = vector.extract_strided_slice %675 {offsets = [96, 0], sizes = [32, 8], strides = [1, 1]} : vector<128x8xf32> to vector<32x8xf32>
    %691 = arith.negf %690 : vector<32x8xf32>
    %692 = math.exp %691 : vector<32x8xf32>
    %cst_145 = arith.constant 1.000000e+00 : f32
    %693 = vector.broadcast %cst_145 : f32 to vector<32x8xf32>
    %694 = arith.addf %693, %692 : vector<32x8xf32>
    %695 = arith.divf %693, %694 : vector<32x8xf32>
    %696 = arith.mulf %687, %623 : vector<32x8xf32>
    %697 = arith.mulf %681, %689 : vector<32x8xf32>
    %698 = arith.addf %696, %697 : vector<32x8xf32>
    %699 = math.tanh %698 : vector<32x8xf32>
    %700 = arith.mulf %695, %699 : vector<32x8xf32>
    %701 = tpu.concatenate %653, %700, %5 in 0 : vector<32x8xf32>, vector<32x8xf32>, vector<1x8xf32> -> vector<65x8xf32>
    %702 = arith.truncf %701 : vector<65x8xf32> to vector<65x8xbf16>
    %cst_146 = arith.constant dense<0.000000e+00> : vector<128x8xf32>
    %703 = tpu.matmul %64, %702, %cst_146 {dimension_numbers = #tpu.dot_dimension_numbers<[1], [0], [0], [1], [0, 0, 1, 1], [], []>} : vector<128x65xbf16>, vector<65x8xbf16>, vector<128x8xf32> -> vector<128x8xf32>
    %704 = vector.extract_strided_slice %703 {offsets = [0, 0], sizes = [32, 8], strides = [1, 1]} : vector<128x8xf32> to vector<32x8xf32>
    %705 = arith.negf %704 : vector<32x8xf32>
    %706 = math.exp %705 : vector<32x8xf32>
    %cst_147 = arith.constant 1.000000e+00 : f32
    %707 = vector.broadcast %cst_147 : f32 to vector<32x8xf32>
    %708 = arith.addf %707, %706 : vector<32x8xf32>
    %709 = arith.divf %707, %708 : vector<32x8xf32>
    %710 = vector.extract_strided_slice %703 {offsets = [32, 0], sizes = [32, 8], strides = [1, 1]} : vector<128x8xf32> to vector<32x8xf32>
    %711 = arith.negf %710 : vector<32x8xf32>
    %712 = math.exp %711 : vector<32x8xf32>
    %cst_148 = arith.constant 1.000000e+00 : f32
    %713 = vector.broadcast %cst_148 : f32 to vector<32x8xf32>
    %714 = arith.addf %713, %712 : vector<32x8xf32>
    %715 = arith.divf %713, %714 : vector<32x8xf32>
    %716 = vector.extract_strided_slice %703 {offsets = [64, 0], sizes = [32, 8], strides = [1, 1]} : vector<128x8xf32> to vector<32x8xf32>
    %717 = math.tanh %716 : vector<32x8xf32>
    %718 = vector.extract_strided_slice %703 {offsets = [96, 0], sizes = [32, 8], strides = [1, 1]} : vector<128x8xf32> to vector<32x8xf32>
    %719 = arith.negf %718 : vector<32x8xf32>
    %720 = math.exp %719 : vector<32x8xf32>
    %cst_149 = arith.constant 1.000000e+00 : f32
    %721 = vector.broadcast %cst_149 : f32 to vector<32x8xf32>
    %722 = arith.addf %721, %720 : vector<32x8xf32>
    %723 = arith.divf %721, %722 : vector<32x8xf32>
    %724 = arith.mulf %715, %651 : vector<32x8xf32>
    %725 = arith.mulf %709, %717 : vector<32x8xf32>
    %726 = arith.addf %724, %725 : vector<32x8xf32>
    %727 = math.tanh %726 : vector<32x8xf32>
    %728 = arith.mulf %723, %727 : vector<32x8xf32>
    %729 = tpu.concatenate %728, %5 in 0 : vector<32x8xf32>, vector<1x8xf32> -> vector<33x8xf32>
    %730 = arith.truncf %729 : vector<33x8xf32> to vector<33x8xbf16>
    %cst_150 = arith.constant dense<0.000000e+00> : vector<7x8xf32>
    %731 = tpu.matmul %65, %730, %cst_150 {dimension_numbers = #tpu.dot_dimension_numbers<[1], [0], [0], [1], [0, 0, 1, 1], [], []>} : vector<7x33xbf16>, vector<33x8xbf16>, vector<7x8xf32> -> vector<7x8xf32>
    %cst_151 = arith.constant 0.000000e+00 : f32
    %732 = vector.broadcast %cst_151 : f32 to vector<7x8xf32>
    %733 = arith.cmpf oge, %731, %732 : vector<7x8xf32>
    %734 = vector.broadcast %3 : f32 to vector<7x8xf32>
    %735 = arith.mulf %734, %731 : vector<7x8xf32>
    %736 = arith.select %733, %731, %735 : vector<7x8xi1>, vector<7x8xf32>
    %737 = vector.broadcast %66 : vector<7x1xf32> to vector<7x8xf32>
    %738 = arith.mulf %736, %737 : vector<7x8xf32>
    %cst_152 = arith.constant dense<0.000000e+00> : vector<8xf32>
    %739 = vector.multi_reduction <add>, %738, %cst_152 [0] : vector<7x8xf32> to vector<8xf32>
    %740 = vector.shape_cast %739 : vector<8xf32> to vector<1x8xf32>
    %741 = arith.index_cast %c8_i32 : i32 to index
    %c0_153 = arith.constant 0 : index
    %742 = vector.load %arg12[%741, %c0_153] : memref<16x8xf32, #tpu.memory_space<vmem>>, vector<1x8xf32>
    tpu.vector_store %arg12[%741, %c0_153], %740 {strides = array<i32>} : memref<16x8xf32, #tpu.memory_space<vmem>>, vector<1x8xf32>,
    %c9_i32 = arith.constant 9 : i32
    %743 = arith.index_cast %c9_i32 : i32 to index
    %c0_154 = arith.constant 0 : index
    %c0_155 = arith.constant 0 : index
    %744 = vector.load %arg3[%743, %c0_154, %c0_155] : memref<16x7x8xf32, #tpu.memory_space<vmem>>, vector<1x7x8xf32>
    %745 = vector.shape_cast %744 : vector<1x7x8xf32> to vector<7x8xf32>
    %746 = vector.broadcast %62 : f32 to vector<7x8xf32>
    %747 = arith.mulf %745, %746 : vector<7x8xf32>
    %748 = tpu.concatenate %700, %747, %5 in 0 : vector<32x8xf32>, vector<7x8xf32>, vector<1x8xf32> -> vector<40x8xf32>
    %749 = arith.truncf %748 : vector<40x8xf32> to vector<40x8xbf16>
    %cst_156 = arith.constant dense<0.000000e+00> : vector<128x8xf32>
    %750 = tpu.matmul %63, %749, %cst_156 {dimension_numbers = #tpu.dot_dimension_numbers<[1], [0], [0], [1], [0, 0, 1, 1], [], []>} : vector<128x40xbf16>, vector<40x8xbf16>, vector<128x8xf32> -> vector<128x8xf32>
    %751 = vector.extract_strided_slice %750 {offsets = [0, 0], sizes = [32, 8], strides = [1, 1]} : vector<128x8xf32> to vector<32x8xf32>
    %752 = arith.negf %751 : vector<32x8xf32>
    %753 = math.exp %752 : vector<32x8xf32>
    %cst_157 = arith.constant 1.000000e+00 : f32
    %754 = vector.broadcast %cst_157 : f32 to vector<32x8xf32>
    %755 = arith.addf %754, %753 : vector<32x8xf32>
    %756 = arith.divf %754, %755 : vector<32x8xf32>
    %757 = vector.extract_strided_slice %750 {offsets = [32, 0], sizes = [32, 8], strides = [1, 1]} : vector<128x8xf32> to vector<32x8xf32>
    %758 = arith.negf %757 : vector<32x8xf32>
    %759 = math.exp %758 : vector<32x8xf32>
    %cst_158 = arith.constant 1.000000e+00 : f32
    %760 = vector.broadcast %cst_158 : f32 to vector<32x8xf32>
    %761 = arith.addf %760, %759 : vector<32x8xf32>
    %762 = arith.divf %760, %761 : vector<32x8xf32>
    %763 = vector.extract_strided_slice %750 {offsets = [64, 0], sizes = [32, 8], strides = [1, 1]} : vector<128x8xf32> to vector<32x8xf32>
    %764 = math.tanh %763 : vector<32x8xf32>
    %765 = vector.extract_strided_slice %750 {offsets = [96, 0], sizes = [32, 8], strides = [1, 1]} : vector<128x8xf32> to vector<32x8xf32>
    %766 = arith.negf %765 : vector<32x8xf32>
    %767 = math.exp %766 : vector<32x8xf32>
    %cst_159 = arith.constant 1.000000e+00 : f32
    %768 = vector.broadcast %cst_159 : f32 to vector<32x8xf32>
    %769 = arith.addf %768, %767 : vector<32x8xf32>
    %770 = arith.divf %768, %769 : vector<32x8xf32>
    %771 = arith.mulf %762, %698 : vector<32x8xf32>
    %772 = arith.mulf %756, %764 : vector<32x8xf32>
    %773 = arith.addf %771, %772 : vector<32x8xf32>
    %774 = math.tanh %773 : vector<32x8xf32>
    %775 = arith.mulf %770, %774 : vector<32x8xf32>
    %776 = tpu.concatenate %728, %775, %5 in 0 : vector<32x8xf32>, vector<32x8xf32>, vector<1x8xf32> -> vector<65x8xf32>
    %777 = arith.truncf %776 : vector<65x8xf32> to vector<65x8xbf16>
    %cst_160 = arith.constant dense<0.000000e+00> : vector<128x8xf32>
    %778 = tpu.matmul %64, %777, %cst_160 {dimension_numbers = #tpu.dot_dimension_numbers<[1], [0], [0], [1], [0, 0, 1, 1], [], []>} : vector<128x65xbf16>, vector<65x8xbf16>, vector<128x8xf32> -> vector<128x8xf32>
    %779 = vector.extract_strided_slice %778 {offsets = [0, 0], sizes = [32, 8], strides = [1, 1]} : vector<128x8xf32> to vector<32x8xf32>
    %780 = arith.negf %779 : vector<32x8xf32>
    %781 = math.exp %780 : vector<32x8xf32>
    %cst_161 = arith.constant 1.000000e+00 : f32
    %782 = vector.broadcast %cst_161 : f32 to vector<32x8xf32>
    %783 = arith.addf %782, %781 : vector<32x8xf32>
    %784 = arith.divf %782, %783 : vector<32x8xf32>
    %785 = vector.extract_strided_slice %778 {offsets = [32, 0], sizes = [32, 8], strides = [1, 1]} : vector<128x8xf32> to vector<32x8xf32>
    %786 = arith.negf %785 : vector<32x8xf32>
    %787 = math.exp %786 : vector<32x8xf32>
    %cst_162 = arith.constant 1.000000e+00 : f32
    %788 = vector.broadcast %cst_162 : f32 to vector<32x8xf32>
    %789 = arith.addf %788, %787 : vector<32x8xf32>
    %790 = arith.divf %788, %789 : vector<32x8xf32>
    %791 = vector.extract_strided_slice %778 {offsets = [64, 0], sizes = [32, 8], strides = [1, 1]} : vector<128x8xf32> to vector<32x8xf32>
    %792 = math.tanh %791 : vector<32x8xf32>
    %793 = vector.extract_strided_slice %778 {offsets = [96, 0], sizes = [32, 8], strides = [1, 1]} : vector<128x8xf32> to vector<32x8xf32>
    %794 = arith.negf %793 : vector<32x8xf32>
    %795 = math.exp %794 : vector<32x8xf32>
    %cst_163 = arith.constant 1.000000e+00 : f32
    %796 = vector.broadcast %cst_163 : f32 to vector<32x8xf32>
    %797 = arith.addf %796, %795 : vector<32x8xf32>
    %798 = arith.divf %796, %797 : vector<32x8xf32>
    %799 = arith.mulf %790, %726 : vector<32x8xf32>
    %800 = arith.mulf %784, %792 : vector<32x8xf32>
    %801 = arith.addf %799, %800 : vector<32x8xf32>
    %802 = math.tanh %801 : vector<32x8xf32>
    %803 = arith.mulf %798, %802 : vector<32x8xf32>
    %804 = tpu.concatenate %803, %5 in 0 : vector<32x8xf32>, vector<1x8xf32> -> vector<33x8xf32>
    %805 = arith.truncf %804 : vector<33x8xf32> to vector<33x8xbf16>
    %cst_164 = arith.constant dense<0.000000e+00> : vector<7x8xf32>
    %806 = tpu.matmul %65, %805, %cst_164 {dimension_numbers = #tpu.dot_dimension_numbers<[1], [0], [0], [1], [0, 0, 1, 1], [], []>} : vector<7x33xbf16>, vector<33x8xbf16>, vector<7x8xf32> -> vector<7x8xf32>
    %cst_165 = arith.constant 0.000000e+00 : f32
    %807 = vector.broadcast %cst_165 : f32 to vector<7x8xf32>
    %808 = arith.cmpf oge, %806, %807 : vector<7x8xf32>
    %809 = vector.broadcast %3 : f32 to vector<7x8xf32>
    %810 = arith.mulf %809, %806 : vector<7x8xf32>
    %811 = arith.select %808, %806, %810 : vector<7x8xi1>, vector<7x8xf32>
    %812 = vector.broadcast %66 : vector<7x1xf32> to vector<7x8xf32>
    %813 = arith.mulf %811, %812 : vector<7x8xf32>
    %cst_166 = arith.constant dense<0.000000e+00> : vector<8xf32>
    %814 = vector.multi_reduction <add>, %813, %cst_166 [0] : vector<7x8xf32> to vector<8xf32>
    %815 = vector.shape_cast %814 : vector<8xf32> to vector<1x8xf32>
    %816 = arith.index_cast %c9_i32 : i32 to index
    %c0_167 = arith.constant 0 : index
    %817 = vector.load %arg12[%816, %c0_167] : memref<16x8xf32, #tpu.memory_space<vmem>>, vector<1x8xf32>
    tpu.vector_store %arg12[%816, %c0_167], %815 {strides = array<i32>} : memref<16x8xf32, #tpu.memory_space<vmem>>, vector<1x8xf32>,
    %c10_i32 = arith.constant 10 : i32
    %818 = arith.index_cast %c10_i32 : i32 to index
    %c0_168 = arith.constant 0 : index
    %c0_169 = arith.constant 0 : index
    %819 = vector.load %arg3[%818, %c0_168, %c0_169] : memref<16x7x8xf32, #tpu.memory_space<vmem>>, vector<1x7x8xf32>
    %820 = vector.shape_cast %819 : vector<1x7x8xf32> to vector<7x8xf32>
    %821 = vector.broadcast %62 : f32 to vector<7x8xf32>
    %822 = arith.mulf %820, %821 : vector<7x8xf32>
    %823 = tpu.concatenate %775, %822, %5 in 0 : vector<32x8xf32>, vector<7x8xf32>, vector<1x8xf32> -> vector<40x8xf32>
    %824 = arith.truncf %823 : vector<40x8xf32> to vector<40x8xbf16>
    %cst_170 = arith.constant dense<0.000000e+00> : vector<128x8xf32>
    %825 = tpu.matmul %63, %824, %cst_170 {dimension_numbers = #tpu.dot_dimension_numbers<[1], [0], [0], [1], [0, 0, 1, 1], [], []>} : vector<128x40xbf16>, vector<40x8xbf16>, vector<128x8xf32> -> vector<128x8xf32>
    %826 = vector.extract_strided_slice %825 {offsets = [0, 0], sizes = [32, 8], strides = [1, 1]} : vector<128x8xf32> to vector<32x8xf32>
    %827 = arith.negf %826 : vector<32x8xf32>
    %828 = math.exp %827 : vector<32x8xf32>
    %cst_171 = arith.constant 1.000000e+00 : f32
    %829 = vector.broadcast %cst_171 : f32 to vector<32x8xf32>
    %830 = arith.addf %829, %828 : vector<32x8xf32>
    %831 = arith.divf %829, %830 : vector<32x8xf32>
    %832 = vector.extract_strided_slice %825 {offsets = [32, 0], sizes = [32, 8], strides = [1, 1]} : vector<128x8xf32> to vector<32x8xf32>
    %833 = arith.negf %832 : vector<32x8xf32>
    %834 = math.exp %833 : vector<32x8xf32>
    %cst_172 = arith.constant 1.000000e+00 : f32
    %835 = vector.broadcast %cst_172 : f32 to vector<32x8xf32>
    %836 = arith.addf %835, %834 : vector<32x8xf32>
    %837 = arith.divf %835, %836 : vector<32x8xf32>
    %838 = vector.extract_strided_slice %825 {offsets = [64, 0], sizes = [32, 8], strides = [1, 1]} : vector<128x8xf32> to vector<32x8xf32>
    %839 = math.tanh %838 : vector<32x8xf32>
    %840 = vector.extract_strided_slice %825 {offsets = [96, 0], sizes = [32, 8], strides = [1, 1]} : vector<128x8xf32> to vector<32x8xf32>
    %841 = arith.negf %840 : vector<32x8xf32>
    %842 = math.exp %841 : vector<32x8xf32>
    %cst_173 = arith.constant 1.000000e+00 : f32
    %843 = vector.broadcast %cst_173 : f32 to vector<32x8xf32>
    %844 = arith.addf %843, %842 : vector<32x8xf32>
    %845 = arith.divf %843, %844 : vector<32x8xf32>
    %846 = arith.mulf %837, %773 : vector<32x8xf32>
    %847 = arith.mulf %831, %839 : vector<32x8xf32>
    %848 = arith.addf %846, %847 : vector<32x8xf32>
    %849 = math.tanh %848 : vector<32x8xf32>
    %850 = arith.mulf %845, %849 : vector<32x8xf32>
    %851 = tpu.concatenate %803, %850, %5 in 0 : vector<32x8xf32>, vector<32x8xf32>, vector<1x8xf32> -> vector<65x8xf32>
    %852 = arith.truncf %851 : vector<65x8xf32> to vector<65x8xbf16>
    %cst_174 = arith.constant dense<0.000000e+00> : vector<128x8xf32>
    %853 = tpu.matmul %64, %852, %cst_174 {dimension_numbers = #tpu.dot_dimension_numbers<[1], [0], [0], [1], [0, 0, 1, 1], [], []>} : vector<128x65xbf16>, vector<65x8xbf16>, vector<128x8xf32> -> vector<128x8xf32>
    %854 = vector.extract_strided_slice %853 {offsets = [0, 0], sizes = [32, 8], strides = [1, 1]} : vector<128x8xf32> to vector<32x8xf32>
    %855 = arith.negf %854 : vector<32x8xf32>
    %856 = math.exp %855 : vector<32x8xf32>
    %cst_175 = arith.constant 1.000000e+00 : f32
    %857 = vector.broadcast %cst_175 : f32 to vector<32x8xf32>
    %858 = arith.addf %857, %856 : vector<32x8xf32>
    %859 = arith.divf %857, %858 : vector<32x8xf32>
    %860 = vector.extract_strided_slice %853 {offsets = [32, 0], sizes = [32, 8], strides = [1, 1]} : vector<128x8xf32> to vector<32x8xf32>
    %861 = arith.negf %860 : vector<32x8xf32>
    %862 = math.exp %861 : vector<32x8xf32>
    %cst_176 = arith.constant 1.000000e+00 : f32
    %863 = vector.broadcast %cst_176 : f32 to vector<32x8xf32>
    %864 = arith.addf %863, %862 : vector<32x8xf32>
    %865 = arith.divf %863, %864 : vector<32x8xf32>
    %866 = vector.extract_strided_slice %853 {offsets = [64, 0], sizes = [32, 8], strides = [1, 1]} : vector<128x8xf32> to vector<32x8xf32>
    %867 = math.tanh %866 : vector<32x8xf32>
    %868 = vector.extract_strided_slice %853 {offsets = [96, 0], sizes = [32, 8], strides = [1, 1]} : vector<128x8xf32> to vector<32x8xf32>
    %869 = arith.negf %868 : vector<32x8xf32>
    %870 = math.exp %869 : vector<32x8xf32>
    %cst_177 = arith.constant 1.000000e+00 : f32
    %871 = vector.broadcast %cst_177 : f32 to vector<32x8xf32>
    %872 = arith.addf %871, %870 : vector<32x8xf32>
    %873 = arith.divf %871, %872 : vector<32x8xf32>
    %874 = arith.mulf %865, %801 : vector<32x8xf32>
    %875 = arith.mulf %859, %867 : vector<32x8xf32>
    %876 = arith.addf %874, %875 : vector<32x8xf32>
    %877 = math.tanh %876 : vector<32x8xf32>
    %878 = arith.mulf %873, %877 : vector<32x8xf32>
    %879 = tpu.concatenate %878, %5 in 0 : vector<32x8xf32>, vector<1x8xf32> -> vector<33x8xf32>
    %880 = arith.truncf %879 : vector<33x8xf32> to vector<33x8xbf16>
    %cst_178 = arith.constant dense<0.000000e+00> : vector<7x8xf32>
    %881 = tpu.matmul %65, %880, %cst_178 {dimension_numbers = #tpu.dot_dimension_numbers<[1], [0], [0], [1], [0, 0, 1, 1], [], []>} : vector<7x33xbf16>, vector<33x8xbf16>, vector<7x8xf32> -> vector<7x8xf32>
    %cst_179 = arith.constant 0.000000e+00 : f32
    %882 = vector.broadcast %cst_179 : f32 to vector<7x8xf32>
    %883 = arith.cmpf oge, %881, %882 : vector<7x8xf32>
    %884 = vector.broadcast %3 : f32 to vector<7x8xf32>
    %885 = arith.mulf %884, %881 : vector<7x8xf32>
    %886 = arith.select %883, %881, %885 : vector<7x8xi1>, vector<7x8xf32>
    %887 = vector.broadcast %66 : vector<7x1xf32> to vector<7x8xf32>
    %888 = arith.mulf %886, %887 : vector<7x8xf32>
    %cst_180 = arith.constant dense<0.000000e+00> : vector<8xf32>
    %889 = vector.multi_reduction <add>, %888, %cst_180 [0] : vector<7x8xf32> to vector<8xf32>
    %890 = vector.shape_cast %889 : vector<8xf32> to vector<1x8xf32>
    %891 = arith.index_cast %c10_i32 : i32 to index
    %c0_181 = arith.constant 0 : index
    %892 = vector.load %arg12[%891, %c0_181] : memref<16x8xf32, #tpu.memory_space<vmem>>, vector<1x8xf32>
    tpu.vector_store %arg12[%891, %c0_181], %890 {strides = array<i32>} : memref<16x8xf32, #tpu.memory_space<vmem>>, vector<1x8xf32>,
    %c11_i32 = arith.constant 11 : i32
    %893 = arith.index_cast %c11_i32 : i32 to index
    %c0_182 = arith.constant 0 : index
    %c0_183 = arith.constant 0 : index
    %894 = vector.load %arg3[%893, %c0_182, %c0_183] : memref<16x7x8xf32, #tpu.memory_space<vmem>>, vector<1x7x8xf32>
    %895 = vector.shape_cast %894 : vector<1x7x8xf32> to vector<7x8xf32>
    %896 = vector.broadcast %62 : f32 to vector<7x8xf32>
    %897 = arith.mulf %895, %896 : vector<7x8xf32>
    %898 = tpu.concatenate %850, %897, %5 in 0 : vector<32x8xf32>, vector<7x8xf32>, vector<1x8xf32> -> vector<40x8xf32>
    %899 = arith.truncf %898 : vector<40x8xf32> to vector<40x8xbf16>
    %cst_184 = arith.constant dense<0.000000e+00> : vector<128x8xf32>
    %900 = tpu.matmul %63, %899, %cst_184 {dimension_numbers = #tpu.dot_dimension_numbers<[1], [0], [0], [1], [0, 0, 1, 1], [], []>} : vector<128x40xbf16>, vector<40x8xbf16>, vector<128x8xf32> -> vector<128x8xf32>
    %901 = vector.extract_strided_slice %900 {offsets = [0, 0], sizes = [32, 8], strides = [1, 1]} : vector<128x8xf32> to vector<32x8xf32>
    %902 = arith.negf %901 : vector<32x8xf32>
    %903 = math.exp %902 : vector<32x8xf32>
    %cst_185 = arith.constant 1.000000e+00 : f32
    %904 = vector.broadcast %cst_185 : f32 to vector<32x8xf32>
    %905 = arith.addf %904, %903 : vector<32x8xf32>
    %906 = arith.divf %904, %905 : vector<32x8xf32>
    %907 = vector.extract_strided_slice %900 {offsets = [32, 0], sizes = [32, 8], strides = [1, 1]} : vector<128x8xf32> to vector<32x8xf32>
    %908 = arith.negf %907 : vector<32x8xf32>
    %909 = math.exp %908 : vector<32x8xf32>
    %cst_186 = arith.constant 1.000000e+00 : f32
    %910 = vector.broadcast %cst_186 : f32 to vector<32x8xf32>
    %911 = arith.addf %910, %909 : vector<32x8xf32>
    %912 = arith.divf %910, %911 : vector<32x8xf32>
    %913 = vector.extract_strided_slice %900 {offsets = [64, 0], sizes = [32, 8], strides = [1, 1]} : vector<128x8xf32> to vector<32x8xf32>
    %914 = math.tanh %913 : vector<32x8xf32>
    %915 = vector.extract_strided_slice %900 {offsets = [96, 0], sizes = [32, 8], strides = [1, 1]} : vector<128x8xf32> to vector<32x8xf32>
    %916 = arith.negf %915 : vector<32x8xf32>
    %917 = math.exp %916 : vector<32x8xf32>
    %cst_187 = arith.constant 1.000000e+00 : f32
    %918 = vector.broadcast %cst_187 : f32 to vector<32x8xf32>
    %919 = arith.addf %918, %917 : vector<32x8xf32>
    %920 = arith.divf %918, %919 : vector<32x8xf32>
    %921 = arith.mulf %912, %848 : vector<32x8xf32>
    %922 = arith.mulf %906, %914 : vector<32x8xf32>
    %923 = arith.addf %921, %922 : vector<32x8xf32>
    %924 = math.tanh %923 : vector<32x8xf32>
    %925 = arith.mulf %920, %924 : vector<32x8xf32>
    %926 = tpu.concatenate %878, %925, %5 in 0 : vector<32x8xf32>, vector<32x8xf32>, vector<1x8xf32> -> vector<65x8xf32>
    %927 = arith.truncf %926 : vector<65x8xf32> to vector<65x8xbf16>
    %cst_188 = arith.constant dense<0.000000e+00> : vector<128x8xf32>
    %928 = tpu.matmul %64, %927, %cst_188 {dimension_numbers = #tpu.dot_dimension_numbers<[1], [0], [0], [1], [0, 0, 1, 1], [], []>} : vector<128x65xbf16>, vector<65x8xbf16>, vector<128x8xf32> -> vector<128x8xf32>
    %929 = vector.extract_strided_slice %928 {offsets = [0, 0], sizes = [32, 8], strides = [1, 1]} : vector<128x8xf32> to vector<32x8xf32>
    %930 = arith.negf %929 : vector<32x8xf32>
    %931 = math.exp %930 : vector<32x8xf32>
    %cst_189 = arith.constant 1.000000e+00 : f32
    %932 = vector.broadcast %cst_189 : f32 to vector<32x8xf32>
    %933 = arith.addf %932, %931 : vector<32x8xf32>
    %934 = arith.divf %932, %933 : vector<32x8xf32>
    %935 = vector.extract_strided_slice %928 {offsets = [32, 0], sizes = [32, 8], strides = [1, 1]} : vector<128x8xf32> to vector<32x8xf32>
    %936 = arith.negf %935 : vector<32x8xf32>
    %937 = math.exp %936 : vector<32x8xf32>
    %cst_190 = arith.constant 1.000000e+00 : f32
    %938 = vector.broadcast %cst_190 : f32 to vector<32x8xf32>
    %939 = arith.addf %938, %937 : vector<32x8xf32>
    %940 = arith.divf %938, %939 : vector<32x8xf32>
    %941 = vector.extract_strided_slice %928 {offsets = [64, 0], sizes = [32, 8], strides = [1, 1]} : vector<128x8xf32> to vector<32x8xf32>
    %942 = math.tanh %941 : vector<32x8xf32>
    %943 = vector.extract_strided_slice %928 {offsets = [96, 0], sizes = [32, 8], strides = [1, 1]} : vector<128x8xf32> to vector<32x8xf32>
    %944 = arith.negf %943 : vector<32x8xf32>
    %945 = math.exp %944 : vector<32x8xf32>
    %cst_191 = arith.constant 1.000000e+00 : f32
    %946 = vector.broadcast %cst_191 : f32 to vector<32x8xf32>
    %947 = arith.addf %946, %945 : vector<32x8xf32>
    %948 = arith.divf %946, %947 : vector<32x8xf32>
    %949 = arith.mulf %940, %876 : vector<32x8xf32>
    %950 = arith.mulf %934, %942 : vector<32x8xf32>
    %951 = arith.addf %949, %950 : vector<32x8xf32>
    %952 = math.tanh %951 : vector<32x8xf32>
    %953 = arith.mulf %948, %952 : vector<32x8xf32>
    %954 = tpu.concatenate %953, %5 in 0 : vector<32x8xf32>, vector<1x8xf32> -> vector<33x8xf32>
    %955 = arith.truncf %954 : vector<33x8xf32> to vector<33x8xbf16>
    %cst_192 = arith.constant dense<0.000000e+00> : vector<7x8xf32>
    %956 = tpu.matmul %65, %955, %cst_192 {dimension_numbers = #tpu.dot_dimension_numbers<[1], [0], [0], [1], [0, 0, 1, 1], [], []>} : vector<7x33xbf16>, vector<33x8xbf16>, vector<7x8xf32> -> vector<7x8xf32>
    %cst_193 = arith.constant 0.000000e+00 : f32
    %957 = vector.broadcast %cst_193 : f32 to vector<7x8xf32>
    %958 = arith.cmpf oge, %956, %957 : vector<7x8xf32>
    %959 = vector.broadcast %3 : f32 to vector<7x8xf32>
    %960 = arith.mulf %959, %956 : vector<7x8xf32>
    %961 = arith.select %958, %956, %960 : vector<7x8xi1>, vector<7x8xf32>
    %962 = vector.broadcast %66 : vector<7x1xf32> to vector<7x8xf32>
    %963 = arith.mulf %961, %962 : vector<7x8xf32>
    %cst_194 = arith.constant dense<0.000000e+00> : vector<8xf32>
    %964 = vector.multi_reduction <add>, %963, %cst_194 [0] : vector<7x8xf32> to vector<8xf32>
    %965 = vector.shape_cast %964 : vector<8xf32> to vector<1x8xf32>
    %966 = arith.index_cast %c11_i32 : i32 to index
    %c0_195 = arith.constant 0 : index
    %967 = vector.load %arg12[%966, %c0_195] : memref<16x8xf32, #tpu.memory_space<vmem>>, vector<1x8xf32>
    tpu.vector_store %arg12[%966, %c0_195], %965 {strides = array<i32>} : memref<16x8xf32, #tpu.memory_space<vmem>>, vector<1x8xf32>,
    %c12_i32 = arith.constant 12 : i32
    %968 = arith.index_cast %c12_i32 : i32 to index
    %c0_196 = arith.constant 0 : index
    %c0_197 = arith.constant 0 : index
    %969 = vector.load %arg3[%968, %c0_196, %c0_197] : memref<16x7x8xf32, #tpu.memory_space<vmem>>, vector<1x7x8xf32>
    %970 = vector.shape_cast %969 : vector<1x7x8xf32> to vector<7x8xf32>
    %971 = vector.broadcast %62 : f32 to vector<7x8xf32>
    %972 = arith.mulf %970, %971 : vector<7x8xf32>
    %973 = tpu.concatenate %925, %972, %5 in 0 : vector<32x8xf32>, vector<7x8xf32>, vector<1x8xf32> -> vector<40x8xf32>
    %974 = arith.truncf %973 : vector<40x8xf32> to vector<40x8xbf16>
    %cst_198 = arith.constant dense<0.000000e+00> : vector<128x8xf32>
    %975 = tpu.matmul %63, %974, %cst_198 {dimension_numbers = #tpu.dot_dimension_numbers<[1], [0], [0], [1], [0, 0, 1, 1], [], []>} : vector<128x40xbf16>, vector<40x8xbf16>, vector<128x8xf32> -> vector<128x8xf32>
    %976 = vector.extract_strided_slice %975 {offsets = [0, 0], sizes = [32, 8], strides = [1, 1]} : vector<128x8xf32> to vector<32x8xf32>
    %977 = arith.negf %976 : vector<32x8xf32>
    %978 = math.exp %977 : vector<32x8xf32>
    %cst_199 = arith.constant 1.000000e+00 : f32
    %979 = vector.broadcast %cst_199 : f32 to vector<32x8xf32>
    %980 = arith.addf %979, %978 : vector<32x8xf32>
    %981 = arith.divf %979, %980 : vector<32x8xf32>
    %982 = vector.extract_strided_slice %975 {offsets = [32, 0], sizes = [32, 8], strides = [1, 1]} : vector<128x8xf32> to vector<32x8xf32>
    %983 = arith.negf %982 : vector<32x8xf32>
    %984 = math.exp %983 : vector<32x8xf32>
    %cst_200 = arith.constant 1.000000e+00 : f32
    %985 = vector.broadcast %cst_200 : f32 to vector<32x8xf32>
    %986 = arith.addf %985, %984 : vector<32x8xf32>
    %987 = arith.divf %985, %986 : vector<32x8xf32>
    %988 = vector.extract_strided_slice %975 {offsets = [64, 0], sizes = [32, 8], strides = [1, 1]} : vector<128x8xf32> to vector<32x8xf32>
    %989 = math.tanh %988 : vector<32x8xf32>
    %990 = vector.extract_strided_slice %975 {offsets = [96, 0], sizes = [32, 8], strides = [1, 1]} : vector<128x8xf32> to vector<32x8xf32>
    %991 = arith.negf %990 : vector<32x8xf32>
    %992 = math.exp %991 : vector<32x8xf32>
    %cst_201 = arith.constant 1.000000e+00 : f32
    %993 = vector.broadcast %cst_201 : f32 to vector<32x8xf32>
    %994 = arith.addf %993, %992 : vector<32x8xf32>
    %995 = arith.divf %993, %994 : vector<32x8xf32>
    %996 = arith.mulf %987, %923 : vector<32x8xf32>
    %997 = arith.mulf %981, %989 : vector<32x8xf32>
    %998 = arith.addf %996, %997 : vector<32x8xf32>
    %999 = math.tanh %998 : vector<32x8xf32>
    %1000 = arith.mulf %995, %999 : vector<32x8xf32>
    %1001 = tpu.concatenate %953, %1000, %5 in 0 : vector<32x8xf32>, vector<32x8xf32>, vector<1x8xf32> -> vector<65x8xf32>
    %1002 = arith.truncf %1001 : vector<65x8xf32> to vector<65x8xbf16>
    %cst_202 = arith.constant dense<0.000000e+00> : vector<128x8xf32>
    %1003 = tpu.matmul %64, %1002, %cst_202 {dimension_numbers = #tpu.dot_dimension_numbers<[1], [0], [0], [1], [0, 0, 1, 1], [], []>} : vector<128x65xbf16>, vector<65x8xbf16>, vector<128x8xf32> -> vector<128x8xf32>
    %1004 = vector.extract_strided_slice %1003 {offsets = [0, 0], sizes = [32, 8], strides = [1, 1]} : vector<128x8xf32> to vector<32x8xf32>
    %1005 = arith.negf %1004 : vector<32x8xf32>
    %1006 = math.exp %1005 : vector<32x8xf32>
    %cst_203 = arith.constant 1.000000e+00 : f32
    %1007 = vector.broadcast %cst_203 : f32 to vector<32x8xf32>
    %1008 = arith.addf %1007, %1006 : vector<32x8xf32>
    %1009 = arith.divf %1007, %1008 : vector<32x8xf32>
    %1010 = vector.extract_strided_slice %1003 {offsets = [32, 0], sizes = [32, 8], strides = [1, 1]} : vector<128x8xf32> to vector<32x8xf32>
    %1011 = arith.negf %1010 : vector<32x8xf32>
    %1012 = math.exp %1011 : vector<32x8xf32>
    %cst_204 = arith.constant 1.000000e+00 : f32
    %1013 = vector.broadcast %cst_204 : f32 to vector<32x8xf32>
    %1014 = arith.addf %1013, %1012 : vector<32x8xf32>
    %1015 = arith.divf %1013, %1014 : vector<32x8xf32>
    %1016 = vector.extract_strided_slice %1003 {offsets = [64, 0], sizes = [32, 8], strides = [1, 1]} : vector<128x8xf32> to vector<32x8xf32>
    %1017 = math.tanh %1016 : vector<32x8xf32>
    %1018 = vector.extract_strided_slice %1003 {offsets = [96, 0], sizes = [32, 8], strides = [1, 1]} : vector<128x8xf32> to vector<32x8xf32>
    %1019 = arith.negf %1018 : vector<32x8xf32>
    %1020 = math.exp %1019 : vector<32x8xf32>
    %cst_205 = arith.constant 1.000000e+00 : f32
    %1021 = vector.broadcast %cst_205 : f32 to vector<32x8xf32>
    %1022 = arith.addf %1021, %1020 : vector<32x8xf32>
    %1023 = arith.divf %1021, %1022 : vector<32x8xf32>
    %1024 = arith.mulf %1015, %951 : vector<32x8xf32>
    %1025 = arith.mulf %1009, %1017 : vector<32x8xf32>
    %1026 = arith.addf %1024, %1025 : vector<32x8xf32>
    %1027 = math.tanh %1026 : vector<32x8xf32>
    %1028 = arith.mulf %1023, %1027 : vector<32x8xf32>
    %1029 = tpu.concatenate %1028, %5 in 0 : vector<32x8xf32>, vector<1x8xf32> -> vector<33x8xf32>
    %1030 = arith.truncf %1029 : vector<33x8xf32> to vector<33x8xbf16>
    %cst_206 = arith.constant dense<0.000000e+00> : vector<7x8xf32>
    %1031 = tpu.matmul %65, %1030, %cst_206 {dimension_numbers = #tpu.dot_dimension_numbers<[1], [0], [0], [1], [0, 0, 1, 1], [], []>} : vector<7x33xbf16>, vector<33x8xbf16>, vector<7x8xf32> -> vector<7x8xf32>
    %cst_207 = arith.constant 0.000000e+00 : f32
    %1032 = vector.broadcast %cst_207 : f32 to vector<7x8xf32>
    %1033 = arith.cmpf oge, %1031, %1032 : vector<7x8xf32>
    %1034 = vector.broadcast %3 : f32 to vector<7x8xf32>
    %1035 = arith.mulf %1034, %1031 : vector<7x8xf32>
    %1036 = arith.select %1033, %1031, %1035 : vector<7x8xi1>, vector<7x8xf32>
    %1037 = vector.broadcast %66 : vector<7x1xf32> to vector<7x8xf32>
    %1038 = arith.mulf %1036, %1037 : vector<7x8xf32>
    %cst_208 = arith.constant dense<0.000000e+00> : vector<8xf32>
    %1039 = vector.multi_reduction <add>, %1038, %cst_208 [0] : vector<7x8xf32> to vector<8xf32>
    %1040 = vector.shape_cast %1039 : vector<8xf32> to vector<1x8xf32>
    %1041 = arith.index_cast %c12_i32 : i32 to index
    %c0_209 = arith.constant 0 : index
    %1042 = vector.load %arg12[%1041, %c0_209] : memref<16x8xf32, #tpu.memory_space<vmem>>, vector<1x8xf32>
    tpu.vector_store %arg12[%1041, %c0_209], %1040 {strides = array<i32>} : memref<16x8xf32, #tpu.memory_space<vmem>>, vector<1x8xf32>,
    %c13_i32 = arith.constant 13 : i32
    %1043 = arith.index_cast %c13_i32 : i32 to index
    %c0_210 = arith.constant 0 : index
    %c0_211 = arith.constant 0 : index
    %1044 = vector.load %arg3[%1043, %c0_210, %c0_211] : memref<16x7x8xf32, #tpu.memory_space<vmem>>, vector<1x7x8xf32>
    %1045 = vector.shape_cast %1044 : vector<1x7x8xf32> to vector<7x8xf32>
    %1046 = vector.broadcast %62 : f32 to vector<7x8xf32>
    %1047 = arith.mulf %1045, %1046 : vector<7x8xf32>
    %1048 = tpu.concatenate %1000, %1047, %5 in 0 : vector<32x8xf32>, vector<7x8xf32>, vector<1x8xf32> -> vector<40x8xf32>
    %1049 = arith.truncf %1048 : vector<40x8xf32> to vector<40x8xbf16>
    %cst_212 = arith.constant dense<0.000000e+00> : vector<128x8xf32>
    %1050 = tpu.matmul %63, %1049, %cst_212 {dimension_numbers = #tpu.dot_dimension_numbers<[1], [0], [0], [1], [0, 0, 1, 1], [], []>} : vector<128x40xbf16>, vector<40x8xbf16>, vector<128x8xf32> -> vector<128x8xf32>
    %1051 = vector.extract_strided_slice %1050 {offsets = [0, 0], sizes = [32, 8], strides = [1, 1]} : vector<128x8xf32> to vector<32x8xf32>
    %1052 = arith.negf %1051 : vector<32x8xf32>
    %1053 = math.exp %1052 : vector<32x8xf32>
    %cst_213 = arith.constant 1.000000e+00 : f32
    %1054 = vector.broadcast %cst_213 : f32 to vector<32x8xf32>
    %1055 = arith.addf %1054, %1053 : vector<32x8xf32>
    %1056 = arith.divf %1054, %1055 : vector<32x8xf32>
    %1057 = vector.extract_strided_slice %1050 {offsets = [32, 0], sizes = [32, 8], strides = [1, 1]} : vector<128x8xf32> to vector<32x8xf32>
    %1058 = arith.negf %1057 : vector<32x8xf32>
    %1059 = math.exp %1058 : vector<32x8xf32>
    %cst_214 = arith.constant 1.000000e+00 : f32
    %1060 = vector.broadcast %cst_214 : f32 to vector<32x8xf32>
    %1061 = arith.addf %1060, %1059 : vector<32x8xf32>
    %1062 = arith.divf %1060, %1061 : vector<32x8xf32>
    %1063 = vector.extract_strided_slice %1050 {offsets = [64, 0], sizes = [32, 8], strides = [1, 1]} : vector<128x8xf32> to vector<32x8xf32>
    %1064 = math.tanh %1063 : vector<32x8xf32>
    %1065 = vector.extract_strided_slice %1050 {offsets = [96, 0], sizes = [32, 8], strides = [1, 1]} : vector<128x8xf32> to vector<32x8xf32>
    %1066 = arith.negf %1065 : vector<32x8xf32>
    %1067 = math.exp %1066 : vector<32x8xf32>
    %cst_215 = arith.constant 1.000000e+00 : f32
    %1068 = vector.broadcast %cst_215 : f32 to vector<32x8xf32>
    %1069 = arith.addf %1068, %1067 : vector<32x8xf32>
    %1070 = arith.divf %1068, %1069 : vector<32x8xf32>
    %1071 = arith.mulf %1062, %998 : vector<32x8xf32>
    %1072 = arith.mulf %1056, %1064 : vector<32x8xf32>
    %1073 = arith.addf %1071, %1072 : vector<32x8xf32>
    %1074 = math.tanh %1073 : vector<32x8xf32>
    %1075 = arith.mulf %1070, %1074 : vector<32x8xf32>
    %1076 = tpu.concatenate %1028, %1075, %5 in 0 : vector<32x8xf32>, vector<32x8xf32>, vector<1x8xf32> -> vector<65x8xf32>
    %1077 = arith.truncf %1076 : vector<65x8xf32> to vector<65x8xbf16>
    %cst_216 = arith.constant dense<0.000000e+00> : vector<128x8xf32>
    %1078 = tpu.matmul %64, %1077, %cst_216 {dimension_numbers = #tpu.dot_dimension_numbers<[1], [0], [0], [1], [0, 0, 1, 1], [], []>} : vector<128x65xbf16>, vector<65x8xbf16>, vector<128x8xf32> -> vector<128x8xf32>
    %1079 = vector.extract_strided_slice %1078 {offsets = [0, 0], sizes = [32, 8], strides = [1, 1]} : vector<128x8xf32> to vector<32x8xf32>
    %1080 = arith.negf %1079 : vector<32x8xf32>
    %1081 = math.exp %1080 : vector<32x8xf32>
    %cst_217 = arith.constant 1.000000e+00 : f32
    %1082 = vector.broadcast %cst_217 : f32 to vector<32x8xf32>
    %1083 = arith.addf %1082, %1081 : vector<32x8xf32>
    %1084 = arith.divf %1082, %1083 : vector<32x8xf32>
    %1085 = vector.extract_strided_slice %1078 {offsets = [32, 0], sizes = [32, 8], strides = [1, 1]} : vector<128x8xf32> to vector<32x8xf32>
    %1086 = arith.negf %1085 : vector<32x8xf32>
    %1087 = math.exp %1086 : vector<32x8xf32>
    %cst_218 = arith.constant 1.000000e+00 : f32
    %1088 = vector.broadcast %cst_218 : f32 to vector<32x8xf32>
    %1089 = arith.addf %1088, %1087 : vector<32x8xf32>
    %1090 = arith.divf %1088, %1089 : vector<32x8xf32>
    %1091 = vector.extract_strided_slice %1078 {offsets = [64, 0], sizes = [32, 8], strides = [1, 1]} : vector<128x8xf32> to vector<32x8xf32>
    %1092 = math.tanh %1091 : vector<32x8xf32>
    %1093 = vector.extract_strided_slice %1078 {offsets = [96, 0], sizes = [32, 8], strides = [1, 1]} : vector<128x8xf32> to vector<32x8xf32>
    %1094 = arith.negf %1093 : vector<32x8xf32>
    %1095 = math.exp %1094 : vector<32x8xf32>
    %cst_219 = arith.constant 1.000000e+00 : f32
    %1096 = vector.broadcast %cst_219 : f32 to vector<32x8xf32>
    %1097 = arith.addf %1096, %1095 : vector<32x8xf32>
    %1098 = arith.divf %1096, %1097 : vector<32x8xf32>
    %1099 = arith.mulf %1090, %1026 : vector<32x8xf32>
    %1100 = arith.mulf %1084, %1092 : vector<32x8xf32>
    %1101 = arith.addf %1099, %1100 : vector<32x8xf32>
    %1102 = math.tanh %1101 : vector<32x8xf32>
    %1103 = arith.mulf %1098, %1102 : vector<32x8xf32>
    %1104 = tpu.concatenate %1103, %5 in 0 : vector<32x8xf32>, vector<1x8xf32> -> vector<33x8xf32>
    %1105 = arith.truncf %1104 : vector<33x8xf32> to vector<33x8xbf16>
    %cst_220 = arith.constant dense<0.000000e+00> : vector<7x8xf32>
    %1106 = tpu.matmul %65, %1105, %cst_220 {dimension_numbers = #tpu.dot_dimension_numbers<[1], [0], [0], [1], [0, 0, 1, 1], [], []>} : vector<7x33xbf16>, vector<33x8xbf16>, vector<7x8xf32> -> vector<7x8xf32>
    %cst_221 = arith.constant 0.000000e+00 : f32
    %1107 = vector.broadcast %cst_221 : f32 to vector<7x8xf32>
    %1108 = arith.cmpf oge, %1106, %1107 : vector<7x8xf32>
    %1109 = vector.broadcast %3 : f32 to vector<7x8xf32>
    %1110 = arith.mulf %1109, %1106 : vector<7x8xf32>
    %1111 = arith.select %1108, %1106, %1110 : vector<7x8xi1>, vector<7x8xf32>
    %1112 = vector.broadcast %66 : vector<7x1xf32> to vector<7x8xf32>
    %1113 = arith.mulf %1111, %1112 : vector<7x8xf32>
    %cst_222 = arith.constant dense<0.000000e+00> : vector<8xf32>
    %1114 = vector.multi_reduction <add>, %1113, %cst_222 [0] : vector<7x8xf32> to vector<8xf32>
    %1115 = vector.shape_cast %1114 : vector<8xf32> to vector<1x8xf32>
    %1116 = arith.index_cast %c13_i32 : i32 to index
    %c0_223 = arith.constant 0 : index
    %1117 = vector.load %arg12[%1116, %c0_223] : memref<16x8xf32, #tpu.memory_space<vmem>>, vector<1x8xf32>
    tpu.vector_store %arg12[%1116, %c0_223], %1115 {strides = array<i32>} : memref<16x8xf32, #tpu.memory_space<vmem>>, vector<1x8xf32>,
    %c14_i32 = arith.constant 14 : i32
    %1118 = arith.index_cast %c14_i32 : i32 to index
    %c0_224 = arith.constant 0 : index
    %c0_225 = arith.constant 0 : index
    %1119 = vector.load %arg3[%1118, %c0_224, %c0_225] : memref<16x7x8xf32, #tpu.memory_space<vmem>>, vector<1x7x8xf32>
    %1120 = vector.shape_cast %1119 : vector<1x7x8xf32> to vector<7x8xf32>
    %1121 = vector.broadcast %62 : f32 to vector<7x8xf32>
    %1122 = arith.mulf %1120, %1121 : vector<7x8xf32>
    %1123 = tpu.concatenate %1075, %1122, %5 in 0 : vector<32x8xf32>, vector<7x8xf32>, vector<1x8xf32> -> vector<40x8xf32>
    %1124 = arith.truncf %1123 : vector<40x8xf32> to vector<40x8xbf16>
    %cst_226 = arith.constant dense<0.000000e+00> : vector<128x8xf32>
    %1125 = tpu.matmul %63, %1124, %cst_226 {dimension_numbers = #tpu.dot_dimension_numbers<[1], [0], [0], [1], [0, 0, 1, 1], [], []>} : vector<128x40xbf16>, vector<40x8xbf16>, vector<128x8xf32> -> vector<128x8xf32>
    %1126 = vector.extract_strided_slice %1125 {offsets = [0, 0], sizes = [32, 8], strides = [1, 1]} : vector<128x8xf32> to vector<32x8xf32>
    %1127 = arith.negf %1126 : vector<32x8xf32>
    %1128 = math.exp %1127 : vector<32x8xf32>
    %cst_227 = arith.constant 1.000000e+00 : f32
    %1129 = vector.broadcast %cst_227 : f32 to vector<32x8xf32>
    %1130 = arith.addf %1129, %1128 : vector<32x8xf32>
    %1131 = arith.divf %1129, %1130 : vector<32x8xf32>
    %1132 = vector.extract_strided_slice %1125 {offsets = [32, 0], sizes = [32, 8], strides = [1, 1]} : vector<128x8xf32> to vector<32x8xf32>
    %1133 = arith.negf %1132 : vector<32x8xf32>
    %1134 = math.exp %1133 : vector<32x8xf32>
    %cst_228 = arith.constant 1.000000e+00 : f32
    %1135 = vector.broadcast %cst_228 : f32 to vector<32x8xf32>
    %1136 = arith.addf %1135, %1134 : vector<32x8xf32>
    %1137 = arith.divf %1135, %1136 : vector<32x8xf32>
    %1138 = vector.extract_strided_slice %1125 {offsets = [64, 0], sizes = [32, 8], strides = [1, 1]} : vector<128x8xf32> to vector<32x8xf32>
    %1139 = math.tanh %1138 : vector<32x8xf32>
    %1140 = vector.extract_strided_slice %1125 {offsets = [96, 0], sizes = [32, 8], strides = [1, 1]} : vector<128x8xf32> to vector<32x8xf32>
    %1141 = arith.negf %1140 : vector<32x8xf32>
    %1142 = math.exp %1141 : vector<32x8xf32>
    %cst_229 = arith.constant 1.000000e+00 : f32
    %1143 = vector.broadcast %cst_229 : f32 to vector<32x8xf32>
    %1144 = arith.addf %1143, %1142 : vector<32x8xf32>
    %1145 = arith.divf %1143, %1144 : vector<32x8xf32>
    %1146 = arith.mulf %1137, %1073 : vector<32x8xf32>
    %1147 = arith.mulf %1131, %1139 : vector<32x8xf32>
    %1148 = arith.addf %1146, %1147 : vector<32x8xf32>
    %1149 = math.tanh %1148 : vector<32x8xf32>
    %1150 = arith.mulf %1145, %1149 : vector<32x8xf32>
    %1151 = tpu.concatenate %1103, %1150, %5 in 0 : vector<32x8xf32>, vector<32x8xf32>, vector<1x8xf32> -> vector<65x8xf32>
    %1152 = arith.truncf %1151 : vector<65x8xf32> to vector<65x8xbf16>
    %cst_230 = arith.constant dense<0.000000e+00> : vector<128x8xf32>
    %1153 = tpu.matmul %64, %1152, %cst_230 {dimension_numbers = #tpu.dot_dimension_numbers<[1], [0], [0], [1], [0, 0, 1, 1], [], []>} : vector<128x65xbf16>, vector<65x8xbf16>, vector<128x8xf32> -> vector<128x8xf32>
    %1154 = vector.extract_strided_slice %1153 {offsets = [0, 0], sizes = [32, 8], strides = [1, 1]} : vector<128x8xf32> to vector<32x8xf32>
    %1155 = arith.negf %1154 : vector<32x8xf32>
    %1156 = math.exp %1155 : vector<32x8xf32>
    %cst_231 = arith.constant 1.000000e+00 : f32
    %1157 = vector.broadcast %cst_231 : f32 to vector<32x8xf32>
    %1158 = arith.addf %1157, %1156 : vector<32x8xf32>
    %1159 = arith.divf %1157, %1158 : vector<32x8xf32>
    %1160 = vector.extract_strided_slice %1153 {offsets = [32, 0], sizes = [32, 8], strides = [1, 1]} : vector<128x8xf32> to vector<32x8xf32>
    %1161 = arith.negf %1160 : vector<32x8xf32>
    %1162 = math.exp %1161 : vector<32x8xf32>
    %cst_232 = arith.constant 1.000000e+00 : f32
    %1163 = vector.broadcast %cst_232 : f32 to vector<32x8xf32>
    %1164 = arith.addf %1163, %1162 : vector<32x8xf32>
    %1165 = arith.divf %1163, %1164 : vector<32x8xf32>
    %1166 = vector.extract_strided_slice %1153 {offsets = [64, 0], sizes = [32, 8], strides = [1, 1]} : vector<128x8xf32> to vector<32x8xf32>
    %1167 = math.tanh %1166 : vector<32x8xf32>
    %1168 = vector.extract_strided_slice %1153 {offsets = [96, 0], sizes = [32, 8], strides = [1, 1]} : vector<128x8xf32> to vector<32x8xf32>
    %1169 = arith.negf %1168 : vector<32x8xf32>
    %1170 = math.exp %1169 : vector<32x8xf32>
    %cst_233 = arith.constant 1.000000e+00 : f32
    %1171 = vector.broadcast %cst_233 : f32 to vector<32x8xf32>
    %1172 = arith.addf %1171, %1170 : vector<32x8xf32>
    %1173 = arith.divf %1171, %1172 : vector<32x8xf32>
    %1174 = arith.mulf %1165, %1101 : vector<32x8xf32>
    %1175 = arith.mulf %1159, %1167 : vector<32x8xf32>
    %1176 = arith.addf %1174, %1175 : vector<32x8xf32>
    %1177 = math.tanh %1176 : vector<32x8xf32>
    %1178 = arith.mulf %1173, %1177 : vector<32x8xf32>
    %1179 = tpu.concatenate %1178, %5 in 0 : vector<32x8xf32>, vector<1x8xf32> -> vector<33x8xf32>
    %1180 = arith.truncf %1179 : vector<33x8xf32> to vector<33x8xbf16>
    %cst_234 = arith.constant dense<0.000000e+00> : vector<7x8xf32>
    %1181 = tpu.matmul %65, %1180, %cst_234 {dimension_numbers = #tpu.dot_dimension_numbers<[1], [0], [0], [1], [0, 0, 1, 1], [], []>} : vector<7x33xbf16>, vector<33x8xbf16>, vector<7x8xf32> -> vector<7x8xf32>
    %cst_235 = arith.constant 0.000000e+00 : f32
    %1182 = vector.broadcast %cst_235 : f32 to vector<7x8xf32>
    %1183 = arith.cmpf oge, %1181, %1182 : vector<7x8xf32>
    %1184 = vector.broadcast %3 : f32 to vector<7x8xf32>
    %1185 = arith.mulf %1184, %1181 : vector<7x8xf32>
    %1186 = arith.select %1183, %1181, %1185 : vector<7x8xi1>, vector<7x8xf32>
    %1187 = vector.broadcast %66 : vector<7x1xf32> to vector<7x8xf32>
    %1188 = arith.mulf %1186, %1187 : vector<7x8xf32>
    %cst_236 = arith.constant dense<0.000000e+00> : vector<8xf32>
    %1189 = vector.multi_reduction <add>, %1188, %cst_236 [0] : vector<7x8xf32> to vector<8xf32>
    %1190 = vector.shape_cast %1189 : vector<8xf32> to vector<1x8xf32>
    %1191 = arith.index_cast %c14_i32 : i32 to index
    %c0_237 = arith.constant 0 : index
    %1192 = vector.load %arg12[%1191, %c0_237] : memref<16x8xf32, #tpu.memory_space<vmem>>, vector<1x8xf32>
    tpu.vector_store %arg12[%1191, %c0_237], %1190 {strides = array<i32>} : memref<16x8xf32, #tpu.memory_space<vmem>>, vector<1x8xf32>,
    %c15_i32 = arith.constant 15 : i32
    %1193 = arith.index_cast %c15_i32 : i32 to index
    %c0_238 = arith.constant 0 : index
    %c0_239 = arith.constant 0 : index
    %1194 = vector.load %arg3[%1193, %c0_238, %c0_239] : memref<16x7x8xf32, #tpu.memory_space<vmem>>, vector<1x7x8xf32>
    %1195 = vector.shape_cast %1194 : vector<1x7x8xf32> to vector<7x8xf32>
    %1196 = vector.broadcast %62 : f32 to vector<7x8xf32>
    %1197 = arith.mulf %1195, %1196 : vector<7x8xf32>
    %1198 = tpu.concatenate %1150, %1197, %5 in 0 : vector<32x8xf32>, vector<7x8xf32>, vector<1x8xf32> -> vector<40x8xf32>
    %1199 = arith.truncf %1198 : vector<40x8xf32> to vector<40x8xbf16>
    %cst_240 = arith.constant dense<0.000000e+00> : vector<128x8xf32>
    %1200 = tpu.matmul %63, %1199, %cst_240 {dimension_numbers = #tpu.dot_dimension_numbers<[1], [0], [0], [1], [0, 0, 1, 1], [], []>} : vector<128x40xbf16>, vector<40x8xbf16>, vector<128x8xf32> -> vector<128x8xf32>
    %1201 = vector.extract_strided_slice %1200 {offsets = [0, 0], sizes = [32, 8], strides = [1, 1]} : vector<128x8xf32> to vector<32x8xf32>
    %1202 = arith.negf %1201 : vector<32x8xf32>
    %1203 = math.exp %1202 : vector<32x8xf32>
    %cst_241 = arith.constant 1.000000e+00 : f32
    %1204 = vector.broadcast %cst_241 : f32 to vector<32x8xf32>
    %1205 = arith.addf %1204, %1203 : vector<32x8xf32>
    %1206 = arith.divf %1204, %1205 : vector<32x8xf32>
    %1207 = vector.extract_strided_slice %1200 {offsets = [32, 0], sizes = [32, 8], strides = [1, 1]} : vector<128x8xf32> to vector<32x8xf32>
    %1208 = arith.negf %1207 : vector<32x8xf32>
    %1209 = math.exp %1208 : vector<32x8xf32>
    %cst_242 = arith.constant 1.000000e+00 : f32
    %1210 = vector.broadcast %cst_242 : f32 to vector<32x8xf32>
    %1211 = arith.addf %1210, %1209 : vector<32x8xf32>
    %1212 = arith.divf %1210, %1211 : vector<32x8xf32>
    %1213 = vector.extract_strided_slice %1200 {offsets = [64, 0], sizes = [32, 8], strides = [1, 1]} : vector<128x8xf32> to vector<32x8xf32>
    %1214 = math.tanh %1213 : vector<32x8xf32>
    %1215 = vector.extract_strided_slice %1200 {offsets = [96, 0], sizes = [32, 8], strides = [1, 1]} : vector<128x8xf32> to vector<32x8xf32>
    %1216 = arith.negf %1215 : vector<32x8xf32>
    %1217 = math.exp %1216 : vector<32x8xf32>
    %cst_243 = arith.constant 1.000000e+00 : f32
    %1218 = vector.broadcast %cst_243 : f32 to vector<32x8xf32>
    %1219 = arith.addf %1218, %1217 : vector<32x8xf32>
    %1220 = arith.divf %1218, %1219 : vector<32x8xf32>
    %1221 = arith.mulf %1212, %1148 : vector<32x8xf32>
    %1222 = arith.mulf %1206, %1214 : vector<32x8xf32>
    %1223 = arith.addf %1221, %1222 : vector<32x8xf32>
    %1224 = math.tanh %1223 : vector<32x8xf32>
    %1225 = arith.mulf %1220, %1224 : vector<32x8xf32>
    %1226 = tpu.concatenate %1178, %1225, %5 in 0 : vector<32x8xf32>, vector<32x8xf32>, vector<1x8xf32> -> vector<65x8xf32>
    %1227 = arith.truncf %1226 : vector<65x8xf32> to vector<65x8xbf16>
    %cst_244 = arith.constant dense<0.000000e+00> : vector<128x8xf32>
    %1228 = tpu.matmul %64, %1227, %cst_244 {dimension_numbers = #tpu.dot_dimension_numbers<[1], [0], [0], [1], [0, 0, 1, 1], [], []>} : vector<128x65xbf16>, vector<65x8xbf16>, vector<128x8xf32> -> vector<128x8xf32>
    %1229 = vector.extract_strided_slice %1228 {offsets = [0, 0], sizes = [32, 8], strides = [1, 1]} : vector<128x8xf32> to vector<32x8xf32>
    %1230 = arith.negf %1229 : vector<32x8xf32>
    %1231 = math.exp %1230 : vector<32x8xf32>
    %cst_245 = arith.constant 1.000000e+00 : f32
    %1232 = vector.broadcast %cst_245 : f32 to vector<32x8xf32>
    %1233 = arith.addf %1232, %1231 : vector<32x8xf32>
    %1234 = arith.divf %1232, %1233 : vector<32x8xf32>
    %1235 = vector.extract_strided_slice %1228 {offsets = [32, 0], sizes = [32, 8], strides = [1, 1]} : vector<128x8xf32> to vector<32x8xf32>
    %1236 = arith.negf %1235 : vector<32x8xf32>
    %1237 = math.exp %1236 : vector<32x8xf32>
    %cst_246 = arith.constant 1.000000e+00 : f32
    %1238 = vector.broadcast %cst_246 : f32 to vector<32x8xf32>
    %1239 = arith.addf %1238, %1237 : vector<32x8xf32>
    %1240 = arith.divf %1238, %1239 : vector<32x8xf32>
    %1241 = vector.extract_strided_slice %1228 {offsets = [64, 0], sizes = [32, 8], strides = [1, 1]} : vector<128x8xf32> to vector<32x8xf32>
    %1242 = math.tanh %1241 : vector<32x8xf32>
    %1243 = vector.extract_strided_slice %1228 {offsets = [96, 0], sizes = [32, 8], strides = [1, 1]} : vector<128x8xf32> to vector<32x8xf32>
    %1244 = arith.negf %1243 : vector<32x8xf32>
    %1245 = math.exp %1244 : vector<32x8xf32>
    %cst_247 = arith.constant 1.000000e+00 : f32
    %1246 = vector.broadcast %cst_247 : f32 to vector<32x8xf32>
    %1247 = arith.addf %1246, %1245 : vector<32x8xf32>
    %1248 = arith.divf %1246, %1247 : vector<32x8xf32>
    %1249 = arith.mulf %1240, %1176 : vector<32x8xf32>
    %1250 = arith.mulf %1234, %1242 : vector<32x8xf32>
    %1251 = arith.addf %1249, %1250 : vector<32x8xf32>
    %1252 = math.tanh %1251 : vector<32x8xf32>
    %1253 = arith.mulf %1248, %1252 : vector<32x8xf32>
    %1254 = tpu.concatenate %1253, %5 in 0 : vector<32x8xf32>, vector<1x8xf32> -> vector<33x8xf32>
    %1255 = arith.truncf %1254 : vector<33x8xf32> to vector<33x8xbf16>
    %cst_248 = arith.constant dense<0.000000e+00> : vector<7x8xf32>
    %1256 = tpu.matmul %65, %1255, %cst_248 {dimension_numbers = #tpu.dot_dimension_numbers<[1], [0], [0], [1], [0, 0, 1, 1], [], []>} : vector<7x33xbf16>, vector<33x8xbf16>, vector<7x8xf32> -> vector<7x8xf32>
    %cst_249 = arith.constant 0.000000e+00 : f32
    %1257 = vector.broadcast %cst_249 : f32 to vector<7x8xf32>
    %1258 = arith.cmpf oge, %1256, %1257 : vector<7x8xf32>
    %1259 = vector.broadcast %3 : f32 to vector<7x8xf32>
    %1260 = arith.mulf %1259, %1256 : vector<7x8xf32>
    %1261 = arith.select %1258, %1256, %1260 : vector<7x8xi1>, vector<7x8xf32>
    %1262 = vector.broadcast %66 : vector<7x1xf32> to vector<7x8xf32>
    %1263 = arith.mulf %1261, %1262 : vector<7x8xf32>
    %cst_250 = arith.constant dense<0.000000e+00> : vector<8xf32>
    %1264 = vector.multi_reduction <add>, %1263, %cst_250 [0] : vector<7x8xf32> to vector<8xf32>
    %1265 = vector.shape_cast %1264 : vector<8xf32> to vector<1x8xf32>
    %1266 = arith.index_cast %c15_i32 : i32 to index
    %c0_251 = arith.constant 0 : index
    %1267 = vector.load %arg12[%1266, %c0_251] : memref<16x8xf32, #tpu.memory_space<vmem>>, vector<1x8xf32>
    tpu.vector_store %arg12[%1266, %c0_251], %1265 {strides = array<i32>} : memref<16x8xf32, #tpu.memory_space<vmem>>, vector<1x8xf32>,
    %c16_i32 = arith.constant 16 : i32
    %c0_252 = arith.constant 0 : index
    %c0_253 = arith.constant 0 : index
    %1268 = vector.load %arg12[%c0_252, %c0_253] : memref<16x8xf32, #tpu.memory_space<vmem>>, vector<16x8xf32>
    %1269 = arith.mulf %60, %1268 : vector<16x8xf32>
    %1270 = vector.broadcast %4 : f32 to vector<16x8xf32>
    %1271 = arith.addf %1269, %1270 : vector<16x8xf32>
    %1272 = arith.negf %1271 : vector<16x8xf32>
    %1273 = math.exp %1272 : vector<16x8xf32>
    %cst_254 = arith.constant 1.000000e+00 : f32
    %1274 = vector.broadcast %cst_254 : f32 to vector<16x8xf32>
    %1275 = arith.addf %1274, %1273 : vector<16x8xf32>
    %1276 = arith.divf %1274, %1275 : vector<16x8xf32>
    %1277 = arith.mulf %1276, %6 : vector<16x8xf32>
    %c0_255 = arith.constant 0 : index
    %c0_256 = arith.constant 0 : index
    %1278 = vector.load %arg11[%c0_255, %c0_256] : memref<16x8xf32, #tpu.memory_space<vmem>>, vector<16x8xf32>
    tpu.vector_store %arg11[%c0_255, %c0_256], %1277 {strides = array<i32>} : memref<16x8xf32, #tpu.memory_space<vmem>>, vector<16x8xf32>,
    return
  }
  func.func @transform_0(%arg0: i32) -> i32 {
    %c0_i32 = arith.constant 0 : i32
    %c0_i32_0 = arith.constant 0 : i32
    return %c0_i32 : i32
  }
  func.func @transform_1(%arg0: i32) -> (i32, i32) {
    %c0_i32 = arith.constant 0 : i32
    %c0_i32_0 = arith.constant 0 : i32
    return %c0_i32, %arg0 : i32, i32
  }
  func.func @transform_2(%arg0: i32) -> (i32, i32, i32) {
    %c0_i32 = arith.constant 0 : i32
    %c0_i32_0 = arith.constant 0 : i32
    %c0_i32_1 = arith.constant 0 : i32
    return %c0_i32, %c0_i32_0, %arg0 : i32, i32, i32
  }
  func.func @transform_3(%arg0: i32) -> (i32, i32) {
    %c0_i32 = arith.constant 0 : i32
    %c0_i32_0 = arith.constant 0 : i32
    %c0_i32_1 = arith.constant 0 : i32
    return %c0_i32, %c0_i32_0 : i32, i32
  }
  func.func @transform_4(%arg0: i32) -> (i32, i32) {
    %c0_i32 = arith.constant 0 : i32
    %c0_i32_0 = arith.constant 0 : i32
    %c0_i32_1 = arith.constant 0 : i32
    return %c0_i32, %c0_i32_0 : i32, i32
  }
  func.func @transform_5(%arg0: i32) -> (i32, i32) {
    %c0_i32 = arith.constant 0 : i32
    %c0_i32_0 = arith.constant 0 : i32
    %c0_i32_1 = arith.constant 0 : i32
    return %c0_i32, %c0_i32_0 : i32, i32
  }
  func.func @transform_6(%arg0: i32) -> (i32, i32) {
    %c0_i32 = arith.constant 0 : i32
    %c0_i32_0 = arith.constant 0 : i32
    %c0_i32_1 = arith.constant 0 : i32
    return %c0_i32, %c0_i32_0 : i32, i32
  }
  func.func @transform_7(%arg0: i32) -> (i32, i32) {
    %c0_i32 = arith.constant 0 : i32
    %c0_i32_0 = arith.constant 0 : i32
    %c0_i32_1 = arith.constant 0 : i32
    return %c0_i32, %c0_i32_0 : i32, i32
  }
  func.func @transform_8(%arg0: i32) -> (i32, i32) {
    %c0_i32 = arith.constant 0 : i32
    %c0_i32_0 = arith.constant 0 : i32
    %c0_i32_1 = arith.constant 0 : i32
    return %c0_i32, %c0_i32_0 : i32, i32
  }
  func.func @transform_9(%arg0: i32) -> (i32, i32) {
    %c0_i32 = arith.constant 0 : i32
    %c0_i32_0 = arith.constant 0 : i32
    %c0_i32_1 = arith.constant 0 : i32
    return %c0_i32, %c0_i32_0 : i32, i32
  }
  func.func @transform_10(%arg0: i32) -> (i32, i32) {
    %c0_i32 = arith.constant 0 : i32
    %c0_i32_0 = arith.constant 0 : i32
    return %c0_i32, %arg0 : i32, i32
  }
}

</mosaic_0001>

<bundles_post_ra>
// kernel: _lambda_.1
= control target key start
LH: loop header
LB: loop body
LE: loop exit
PB: predicated region body
PF: predicated region fallthrough
CT: control target
= control target key end

     0   :  { %15 = vsyncpa [#allocation4], 0  ;;  %s14840_s0 = inlined_call_operand.vmem [shape: f32[5], index: 0, kind: input, shape index: {}]   ;;  %s14841_s1 = inlined_call_operand.vmem [shape: f32[16,8], index: 1, kind: input, shape index: {}]   ;;  %s14842_s2 = inlined_call_operand.vmem [shape: f32[16,7,8], index: 2, kind: input, shape index: {}]   ;;  %s14843_s3 = inlined_call_operand.vmem [shape: bf16[128,17], index: 3, kind: input, shape index: {}]   ;;  %s14844_s4 = inlined_call_operand.vmem [shape: bf16[128,33], index: 4, kind: input, shape index: {}]   ;;  %s14845_s5 = inlined_call_operand.vmem [shape: bf16[16,33], index: 5, kind: input, shape index: {}]   ;;  %s14846_s6 = inlined_call_operand.vmem [shape: bf16[128,40], index: 6, kind: input, shape index: {}]   ;;  %s14847_s7 = inlined_call_operand.vmem [shape: bf16[128,65], index: 7, kind: input, shape index: {}]   ;;  %s14848_s8 = inlined_call_operand.vmem [shape: bf16[7,33], index: 8, kind: input, shape index: {}]   ;;  %s14849_s9 = inlined_call_operand.vmem [shape: f32[7,1], index: 9, kind: input, shape index: {}]   ;;  %s14850_s10 = inlined_call_operand.vmem [shape: f32[16,8], index: 10, kind: output, shape index: {}]  }
   0x1   :  { %s22_s15 = sshll.u32 %s14840_s0, 4  ;;  %s23_s15 = int_to_ptr.vmem [resolvable:$true] %s22_s15 }
   0x2   :  { %s12548_s16 = scalar_lea.vmem %s23_s15, 16  ;;  %p12553_p1 = scmp.lt.s32.totalorder %s23_s15, %s23_s15 }
   0x3   :  { %p12549_p0 = scmp.ne.s32.totalorder %s23_s15, %s12548_s16  ;;  %p12554_p2 = scmp.lt.s32.totalorder %s12548_s16, %s12548_s16 }
   0x5   :  { %p12555_p3 = por %p12554_p2, %p12553_p1 }
   0x7   :  { %p12556_p4 = pnand %p12555_p3, %p12549_p0 }
   0x9   :  { %12559 = shalt.err (!%p12556_p4)
}
   0xa   :  { %s12562_s17 = smov [#allocation3]  }
   0xb   :  { %25 = dma.vmem_to_smem %s23_s15, 16, %s12562_s17, [#allocation4]  }
   0xc   :  { %12560 = dma.done.wait [#allocation4], 16  }
   0xd   :  { %12561 = vsyncadd [#allocation4], 4294967280 }
   0xe   :  { %47 = sfence }
   0xf   :  { %s49_s18 = sld [smem:[#allocation3]]  ;;  %v10238_v0 = vld [vmem:[%s14843_s3] sm:$0xff]   ;;  %v12563_v1 = vmov 0   ;;  %vm144_vm0 = vcmask 1040384   ;;  %vm119_vm1 = vcmask 138240   ;;  %v55_v6 = vld [vmem:[%s14841_s1 + $0x8] sm:$0xff] }
  0x10   :  { %10237 = vset.pattern.permute.xlu0 %v12563_v1  ;;  %9238 = vmatprep.mubr.msk.bf16.mxu0 %vm119_vm1, %v10238_v0  ;;  %v146_v2 = vsel %vm144_vm0, 65535, %v12563_v1  ;;  %v54_v5 = vld [vmem:[%s14841_s1] sm:$0xff]  ;;  %v10239_v11 = vld [vmem:[%s14843_s3 + $0x8] sm:$0xff]   ;;  %v10240_v12 = vld [vmem:[%s14843_s3 + $0x10] sm:$0xff]   ;;  %s8018_s19 = sld [smem:[#allocation3 + $0x1]]  ;;  %vm365_vm2 = vcmask 269312  }
  0x11   :  { %v12629_v4 = vand.u32 1.0|1.0, %v146_v2  ;;  %v10241_v13 = vld [vmem:[%s14843_s3 + $0x18] sm:$0xff]   ;;  %v10242_v14 = vld [vmem:[%s14843_s3 + $0x20] sm:$0xff]   ;;  %v10243_v15 = vld [vmem:[%s14843_s3 + $0x28] sm:$0xff]   ;;  %vm648_vm3 = vcmask 1046528  }
  0x12   :  { %v10244_v16 = vld [vmem:[%s14843_s3 + $0x30] sm:$0xff]   ;;  %v10245_v17 = vld [vmem:[%s14843_s3 + $0x38] sm:$0xff]   ;;  %v10246_v20 = vld [vmem:[%s14844_s4] sm:$0xff]   ;;  %vm717_vm4 = vcmask 1043456   ;;  %vm692_vm5 = vcmask 326656   ;;  %vm12566_vm6 = vmmov 0  }
  0x13   :  { %9260 = vmatprep.mubr.msk.bf16.mxu1 %vm365_vm2, %v10246_v20  ;;  %vm956_vm7 = vcmask 531456   ;;  %s12867_s25 = sld [smem:[#allocation3 + $0x2]]  ;;  %s8020_s11 = sld [smem:[#allocation3 + $0x3]]  ;;  %vm1229_vm10 = vcmask 63488   ;;  %vm1237_vm11 = vcmask 57344  }
  0x14   :  { %s13930_s15 = sld [smem:[#allocation3 + $0x4]] }
  0x15   :  { %s56_s0 = sadd.f32 1e-06, %s49_s18 }
  0x16   :  { %s607_s20 = sadd.f32 1e-06, %s8018_s19 }
  0x17   :  { %v57_v3 = vstv %s56_s0 }
  0x18   :  { %10271 = vrcp.f32 %v57_v3  ;;  %v608_v18 = vstv %s607_s20 }
  0x19   :  { %10273 = vrcp.f32 %v608_v18 }
  0x22   :  { %v10272_v7 = vpop.eup %10271 }
  0x23   :  { %v59_v8 = vmul.f32 %v10272_v7, %v54_v5  ;;  %v60_v9 = vmul.f32 %v10272_v7, %v55_v6  ;;  %v10274_v19 = vpop.eup %10273 }
  0x24   :  { %10230 = vpush %v10274_v19 }
  0x25   :  { %v77_v10 = vpack.c.bf16 %v60_v9, %v59_v8 }
  0x27   :  { %9234 = vmatprep.subr.bf16.mxu0 %v77_v10 }
  0x28   :  { %9235 = vmatpush3.bf16.msra.mxu0 %v77_v10 }
  0x29   :  { %9236 = vmatprep.subr.bf16.mxu0 %v12629_v4 }
  0x2c   :  { %9237 = vmatpush3.bf16.msra.mxu0 %v12629_v4 }
  0x2f   :  { %9239 = vmatmul.mubr.msk.bf16.vlgmr.msra.gmra.mrb[0].mxu0 %vm119_vm1, %v10239_v11 }
  0x30   :  { %9242 = vmatprep.mubr.msk.bf16.mxu0 %vm119_vm1, %v10240_v12 }
  0x37   :  { %9243 = vmatmul.mubr.msk.bf16.gmra.mrb[4].mxu0 %vm119_vm1, %v10241_v13 }
  0x38   :  { %9246 = vmatprep.mubr.msk.bf16.mxu0 %vm119_vm1, %v10242_v14 }
  0x3f   :  { %9247 = vmatmul.mubr.msk.bf16.gmra.mrb[8].mxu0 %vm119_vm1, %v10243_v15 }
  0x40   :  { %9250 = vmatprep.mubr.msk.bf16.mxu0 %vm119_vm1, %v10244_v16 }
  0x47   :  { %9251 = vmatmul.mubr.msk.bf16.gmra.mrb[12].mxu0 %vm119_vm1, %v10245_v17 }
  0x55   :  { %s10231_s3 = spop %10230 }
 0x102   :  { %v9240_v21 = vpop.f32.mrb[0].mxu0 }
 0x103   :  { %v8040_v22 = vmul.f32 -1.442695, %v9240_v21  ;;  %v184_v23 = vpop.f32.mrb[1].mxu0 }
 0x104   :  { %v8038_v24 = vmul.f32 -1.442695, %v184_v23  ;;  %v9241_v25 = vpop.f32.mrb[2].mxu0 }
 0x105   :  { %10275 = vpow2.f32 %v8040_v22  ;;  %v8041_v26 = vmul.f32 -1.442695, %v9241_v25  ;;  %v187_v27 = vpop.f32.mrb[3].mxu0  ;;  %v645_v25 = vld [vmem:[%s14842_s2] sm:$0x7f] }
 0x106   :  { %10277 = vpow2.f32 %v8038_v24  ;;  %v8039_v28 = vmul.f32 -1.442695, %v187_v27  ;;  %v12671_v24 = vstv %s10231_s3  ;;  %v10247_v27 = vld [vmem:[%s14844_s4 + $0x8] sm:$0xff]  }
 0x107   :  { %10279 = vpow2.f32 %v8041_v26  ;;  %v647_v26 = vmul.f32 %v12671_v24, %v645_v25 }
 0x108   :  { %10281 = vpow2.f32 %v8039_v28  ;;  %v10248_v28 = vld [vmem:[%s14844_s4 + $0x10] sm:$0xff]  }
 0x10a   :  { %v9244_v29 = vpop.f32.mrb[4].mxu0 }
 0x10b   :  { %v200_v30 = vpop.f32.mrb[5].mxu0  ;;  %v12564_v29 = vmov 0.0|0.0  }
 0x10c   :  { %v9245_v31 = vpop.f32.mrb[6].mxu0  ;;  %v649_v30 = vsel %vm648_vm3, %v647_v26, 1.0 }
 0x10d   :  { %v202_v32 = vpop.f32.mrb[7].mxu0  ;;  %v651_v31 = vpack.c.bf16 %v649_v30, %v649_v30 }
 0x10e   :  { %v10249_v32 = vld [vmem:[%s14844_s4 + $0x18] sm:$0xff]  }
 0x10f   :  { %v10276_v33 = vpop.eup %10275 }
 0x110   :  { %v10278_v34 = vpop.eup %10277  ;;  %v257_v35 = vadd.f32 1.0, %v10276_v33  ;;  %v10250_v33 = vld [vmem:[%s14844_s4 + $0x20] sm:$0xff]  }
 0x111   :  { %v10280_v36 = vpop.eup %10279  ;;  %v255_v37 = vadd.f32 1.0, %v10278_v34  ;;  %v719_v34 = vsel %vm717_vm4, %v651_v31, 0 }
 0x112   :  { %v10282_v38 = vpop.eup %10281  ;;  %10283 = vrcp.f32 %v257_v35  ;;  %v258_v39 = vadd.f32 1.0, %v10280_v36  ;;  %v9248_v40 = vpop.f32.mrb[8].mxu0  ;;  %v10251_v35 = vld [vmem:[%s14844_s4 + $0x28] sm:$0xff]   ;;  %v10252_v36 = vld [vmem:[%s14844_s4 + $0x30] sm:$0xff]  }
 0x113   :  { %10285 = vrcp.f32 %v255_v37  ;;  %v256_v41 = vadd.f32 1.0, %v10282_v38  ;;  %v212_v42 = vpop.f32.mrb[9].mxu0  ;;  %v10253_v37 = vld [vmem:[%s14844_s4 + $0x38] sm:$0xff]   ;;  %v12716_v38 = vld [vmem:[%s14846_s6] sm:$0xff]  }
 0x114   :  { %10287 = vrcp.f32 %v258_v39  ;;  %v9249_v43 = vpop.f32.mrb[10].mxu0  ;;  %v12724_v39 = vld [vmem:[%s14846_s6 + $0x8] sm:$0xff]  }
 0x115   :  { %10289 = vrcp.f32 %v256_v41  ;;  %v215_v44 = vpop.f32.mrb[11].mxu0  ;;  %v12738_v41 = vld [vmem:[%s14846_s6 + $0x18] sm:$0xff]  }
 0x116   :  { %10291 = vtanh.f32 %v9248_v40  ;;  %v12729_v40 = vld [vmem:[%s14846_s6 + $0x10] sm:$0xff]  }
 0x117   :  { %10293 = vtanh.f32 %v212_v42  ;;  %v12743_v42 = vld [vmem:[%s14846_s6 + $0x20] sm:$0xff]  }
 0x118   :  { %10295 = vtanh.f32 %v9249_v43  ;;  %v12752_v43 = vld [vmem:[%s14846_s6 + $0x28] sm:$0xff]  }
 0x119   :  { %10297 = vtanh.f32 %v215_v44  ;;  %v12757_v44 = vld [vmem:[%s14846_s6 + $0x30] sm:$0xff]  }
 0x11a   :  { %v9252_v45 = vpop.f32.mrb[12].mxu0 }
 0x11b   :  { %v8044_v46 = vmul.f32 -1.442695, %v9252_v45  ;;  %v228_v47 = vpop.f32.mrb[13].mxu0  ;;  %v12766_v45 = vld [vmem:[%s14846_s6 + $0x38] sm:$0xff]  }
 0x11c   :  { %v10284_v48 = vpop.eup %10283  ;;  %v8042_v49 = vmul.f32 -1.442695, %v228_v47  ;;  %v9253_v50 = vpop.f32.mrb[14].mxu0 }
 0x11d   :  { %v10286_v51 = vpop.eup %10285  ;;  %10299 = vpow2.f32 %v8044_v46  ;;  %v8045_v52 = vmul.f32 -1.442695, %v9253_v50  ;;  %v231_v53 = vpop.f32.mrb[15].mxu0  ;;  %v12565_v46 = vmov 0.0  }
 0x11e   :  { %v10288_v54 = vpop.eup %10287  ;;  %10301 = vpow2.f32 %v8042_v49  ;;  %v8043_v55 = vmul.f32 -1.442695, %v231_v53  ;;  %9276 = vmatprep.subr.bf16.mxu0 %v12565_v46  ;;  %9282 = vmatprep.mubr.msk.bf16.mxu0 %vm12566_vm6, %v12565_v46 }
 0x11f   :  { %v10290_v56 = vpop.eup %10289  ;;  %10303 = vpow2.f32 %v8045_v52 }
 0x120   :  { %v10292_v57 = vpop.eup %10291  ;;  %10305 = vpow2.f32 %v8043_v55 }
 0x121   :  { %v10294_v58 = vpop.eup %10293  ;;  %v297_v59 = vmul.f32 %v10292_v57, %v10284_v48 }
 0x122   :  { %v10296_v60 = vpop.eup %10295  ;;  %v295_v61 = vmul.f32 %v10294_v58, %v10286_v51 }
 0x123   :  { %v10298_v62 = vpop.eup %10297  ;;  %v298_v63 = vmul.f32 %v10296_v60, %v10288_v54  ;;  %10307 = vtanh.f32 %v297_v59 }
 0x124   :  { %v296_v0 = vmul.f32 %v10298_v62, %v10290_v56  ;;  %10309 = vtanh.f32 %v295_v61 }
 0x125   :  { %10311 = vtanh.f32 %v298_v63 }
 0x126   :  { %10313 = vtanh.f32 %v296_v0 }
 0x127   :  { %v10300_v1 = vpop.eup %10299 }
 0x128   :  { %v10302_v2 = vpop.eup %10301  ;;  %v285_v3 = vadd.f32 1.0, %v10300_v1 }
 0x129   :  { %v10304_v5 = vpop.eup %10303  ;;  %v283_v6 = vadd.f32 1.0, %v10302_v2 }
 0x12a   :  { %v10306_v7 = vpop.eup %10305  ;;  %10315 = vrcp.f32 %v285_v3  ;;  %v286_v8 = vadd.f32 1.0, %v10304_v5 }
 0x12b   :  { %10317 = vrcp.f32 %v283_v6  ;;  %v284_v9 = vadd.f32 1.0, %v10306_v7 }
 0x12c   :  { %10319 = vrcp.f32 %v286_v8 }
 0x12d   :  { %10321 = vrcp.f32 %v284_v9  ;;  %v10308_v10 = vpop.eup %10307 }
 0x12e   :  { %v10310_v11 = vpop.eup %10309 }
 0x12f   :  { %v10312_v12 = vpop.eup %10311 }
 0x130   :  { %v10314_v13 = vpop.eup %10313 }
 0x134   :  { %v10316_v14 = vpop.eup %10315 }
 0x135   :  { %v10318_v15 = vpop.eup %10317  ;;  %v305_v16 = vmul.f32 %v10316_v14, %v10308_v10 }
 0x136   :  { %v10320_v17 = vpop.eup %10319  ;;  %v303_v18 = vmul.f32 %v10318_v15, %v10310_v11 }
 0x137   :  { %v10322_v19 = vpop.eup %10321  ;;  %v306_v20 = vmul.f32 %v10320_v17, %v10312_v12 }
 0x138   :  { %v304_v21 = vmul.f32 %v10322_v19, %v10314_v13 }
 0x139   :  { %v324_v22 = vpack.c.bf16 %v306_v20, %v305_v16 }
 0x13a   :  { %v323_v23 = vpack.c.bf16 %v304_v21, %v303_v18 }
 0x13c   :  { %9254 = vmatprep.subr.bf16.mxu1 %v323_v23 }
 0x13d   :  { %9255 = vmatpush3.bf16.msra.mxu1 %v323_v23 }
 0x13e   :  { %9256 = vmatprep.subr.bf16.mxu1 %v324_v22 }
 0x141   :  { %9257 = vmatpush3.bf16.msra.mxu1 %v324_v22 }
 0x142   :  { %9258 = vmatprep.subr.bf16.mxu1 %v12629_v4 }
 0x145   :  { %9259 = vmatpush3.bf16.msra.mxu1 %v12629_v4 }
 0x146   :  { %9286 = vmatprep.subr.bf16.mxu1 %v12564_v29 }
 0x148   :  { %9261 = vmatmul.mubr.msk.bf16.vlgmr.msra.gmra.mrb[0].mxu1 %vm365_vm2, %v10247_v27 }
 0x149   :  { %9264 = vmatprep.mubr.msk.bf16.mxu1 %vm365_vm2, %v10248_v28  ;;  %9287 = vmatpush3.bf16.msra.mxu1 %v12564_v29 }
 0x14a   :  { %9288 = vmatprep.subr.bf16.mxu1 %v12564_v29 }
 0x14d   :  { %9289 = vmatpush3.bf16.msra.mxu1 %v12564_v29 }
 0x14e   :  { %10214 = vmatprep.subr.msk.bf16.mxu1 %vm717_vm4, %v651_v31 }
 0x150   :  { %9265 = vmatmul.mubr.msk.bf16.gmra.mrb[4].mxu1 %vm365_vm2, %v10249_v32 }
 0x151   :  { %9268 = vmatprep.mubr.msk.bf16.mxu1 %vm365_vm2, %v10250_v33  ;;  %9291 = vmatpush3.bf16.msra.mxu1 %v719_v34 }
 0x152   :  { %9334 = vmatprep.subr.bf16.mxu1 %v12565_v46 }
 0x158   :  { %9269 = vmatmul.mubr.msk.bf16.gmra.mrb[8].mxu1 %vm365_vm2, %v10251_v35 }
 0x159   :  { %9272 = vmatprep.mubr.msk.bf16.mxu1 %vm365_vm2, %v10252_v36 }
 0x160   :  { %9273 = vmatmul.mubr.msk.bf16.gmra.mrb[12].mxu1 %vm365_vm2, %v10253_v37 }
 0x161   :  { %9292 = vmatprep.mubr.msk.bf16.mxu1 %vm692_vm5, %v12716_v38 }
 0x168   :  { %9293 = vmatmul.mubr.msk.bf16.vlgmr.msra.gmra.mrb[16].mxu1 %vm692_vm5, %v12724_v39 }
 0x169   :  { %9296 = vmatprep.mubr.msk.bf16.mxu1 %vm692_vm5, %v12729_v40 }
 0x170   :  { %9297 = vmatmul.mubr.msk.bf16.gmra.mrb[20].mxu1 %vm692_vm5, %v12738_v41 }
 0x171   :  { %9300 = vmatprep.mubr.msk.bf16.mxu1 %vm692_vm5, %v12743_v42 }
 0x178   :  { %9301 = vmatmul.mubr.msk.bf16.gmra.mrb[24].mxu1 %vm692_vm5, %v12752_v43 }
 0x179   :  { %9304 = vmatprep.mubr.msk.bf16.mxu1 %vm692_vm5, %v12757_v44 }
 0x180   :  { %9305 = vmatmul.mubr.msk.bf16.gmra.mrb[28].mxu1 %vm692_vm5, %v12766_v45 }
 0x181   :  { %9340 = vmatprep.mubr.msk.bf16.mxu1 %vm12566_vm6, %v12565_v46 }
 0x21b   :  { %v9262_v47 = vpop.f32.mrb[0].mxu1 }
 0x21c   :  { %v8064_v48 = vmul.f32 -1.442695, %v9262_v47  ;;  %v424_v49 = vpop.f32.mrb[1].mxu1 }
 0x21d   :  { %v8062_v50 = vmul.f32 -1.442695, %v424_v49  ;;  %v9263_v51 = vpop.f32.mrb[2].mxu1 }
 0x21e   :  { %10323 = vpow2.f32 %v8064_v48  ;;  %v8065_v52 = vmul.f32 -1.442695, %v9263_v51  ;;  %v427_v53 = vpop.f32.mrb[3].mxu1 }
 0x21f   :  { %10325 = vpow2.f32 %v8062_v50  ;;  %v8063_v54 = vmul.f32 -1.442695, %v427_v53 }
 0x220   :  { %10327 = vpow2.f32 %v8065_v52 }
 0x221   :  { %10329 = vpow2.f32 %v8063_v54 }
 0x223   :  { %v9266_v55 = vpop.f32.mrb[4].mxu1 }
 0x224   :  { %v440_v56 = vpop.f32.mrb[5].mxu1 }
 0x225   :  { %v9267_v57 = vpop.f32.mrb[6].mxu1 }
 0x226   :  { %v442_v58 = vpop.f32.mrb[7].mxu1 }
 0x228   :  { %v10324_v59 = vpop.eup %10323 }
 0x229   :  { %v10326_v60 = vpop.eup %10325  ;;  %v497_v61 = vadd.f32 1.0, %v10324_v59 }
 0x22a   :  { %v10328_v62 = vpop.eup %10327  ;;  %v495_v63 = vadd.f32 1.0, %v10326_v60 }
 0x22b   :  { %v10330_v0 = vpop.eup %10329  ;;  %10331 = vrcp.f32 %v497_v61  ;;  %v498_v1 = vadd.f32 1.0, %v10328_v62  ;;  %v9270_v2 = vpop.f32.mrb[8].mxu1 }
 0x22c   :  { %10333 = vrcp.f32 %v495_v63  ;;  %v496_v3 = vadd.f32 1.0, %v10330_v0  ;;  %v452_v5 = vpop.f32.mrb[9].mxu1 }
 0x22d   :  { %10335 = vrcp.f32 %v498_v1  ;;  %v9271_v6 = vpop.f32.mrb[10].mxu1 }
 0x22e   :  { %10337 = vrcp.f32 %v496_v3  ;;  %v455_v7 = vpop.f32.mrb[11].mxu1 }
 0x22f   :  { %10339 = vtanh.f32 %v9270_v2 }
 0x230   :  { %10341 = vtanh.f32 %v452_v5 }
 0x231   :  { %10343 = vtanh.f32 %v9271_v6 }
 0x232   :  { %10345 = vtanh.f32 %v455_v7 }
 0x233   :  { %v9274_v8 = vpop.f32.mrb[12].mxu1 }
 0x234   :  { %v8068_v9 = vmul.f32 -1.442695, %v9274_v8  ;;  %v468_v10 = vpop.f32.mrb[13].mxu1 }
 0x235   :  { %v10332_v11 = vpop.eup %10331  ;;  %v8066_v12 = vmul.f32 -1.442695, %v468_v10  ;;  %v9275_v13 = vpop.f32.mrb[14].mxu1 }
 0x236   :  { %v10334_v14 = vpop.eup %10333  ;;  %10347 = vpow2.f32 %v8068_v9  ;;  %v8069_v15 = vmul.f32 -1.442695, %v9275_v13  ;;  %v471_v16 = vpop.f32.mrb[15].mxu1 }
 0x237   :  { %v10336_v17 = vpop.eup %10335  ;;  %10349 = vpow2.f32 %v8066_v12  ;;  %v8067_v18 = vmul.f32 -1.442695, %v471_v16 }
 0x238   :  { %v10338_v19 = vpop.eup %10337  ;;  %10351 = vpow2.f32 %v8069_v15 }
 0x239   :  { %v10340_v20 = vpop.eup %10339  ;;  %10353 = vpow2.f32 %v8067_v18 }
 0x23a   :  { %v10342_v21 = vpop.eup %10341  ;;  %v537_v22 = vmul.f32 %v10340_v20, %v10332_v11 }
 0x23b   :  { %v10344_v23 = vpop.eup %10343  ;;  %v535_v25 = vmul.f32 %v10342_v21, %v10334_v14  ;;  %v9294_v26 = vpop.f32.mrb[16].mxu1 }
 0x23c   :  { %v10346_v27 = vpop.eup %10345  ;;  %10355 = vtanh.f32 %v537_v22  ;;  %v538_v28 = vmul.f32 %v10344_v23, %v10336_v17  ;;  %v8090_v30 = vmul.f32 -1.442695, %v9294_v26  ;;  %v755_v31 = vpop.f32.mrb[17].mxu1 }
 0x23d   :  { %10357 = vtanh.f32 %v535_v25  ;;  %v536_v32 = vmul.f32 %v10346_v27, %v10338_v19  ;;  %v8088_v33 = vmul.f32 -1.442695, %v755_v31  ;;  %v9295_v34 = vpop.f32.mrb[18].mxu1 }
 0x23e   :  { %10359 = vtanh.f32 %v538_v28  ;;  %v8091_v35 = vmul.f32 -1.442695, %v9295_v34  ;;  %v758_v36 = vpop.f32.mrb[19].mxu1 }
 0x23f   :  { %10361 = vtanh.f32 %v536_v32  ;;  %v8089_v53 = vmul.f32 -1.442695, %v758_v36 }
 0x240   :  { %v10348_v37 = vpop.eup %10347  ;;  %10363 = vpow2.f32 %v8090_v30 }
 0x241   :  { %v10350_v47 = vpop.eup %10349  ;;  %v525_v48 = vadd.f32 1.0, %v10348_v37  ;;  %10365 = vpow2.f32 %v8088_v33 }
 0x242   :  { %v10352_v49 = vpop.eup %10351  ;;  %v523_v50 = vadd.f32 1.0, %v10350_v47  ;;  %10367 = vpow2.f32 %v8091_v35 }
 0x243   :  { %v10354_v51 = vpop.eup %10353  ;;  %10369 = vrcp.f32 %v525_v48  ;;  %v526_v52 = vadd.f32 1.0, %v10352_v49  ;;  %v9298_v54 = vpop.f32.mrb[20].mxu1 }
 0x244   :  { %10371 = vrcp.f32 %v523_v50  ;;  %v524_v55 = vadd.f32 1.0, %v10354_v51  ;;  %v8094_v56 = vmul.f32 -1.442695, %v9298_v54  ;;  %v771_v57 = vpop.f32.mrb[21].mxu1 }
 0x245   :  { %10373 = vrcp.f32 %v526_v52  ;;  %v8092_v58 = vmul.f32 -1.442695, %v771_v57  ;;  %v9299_v59 = vpop.f32.mrb[22].mxu1 }
 0x246   :  { %v10356_v60 = vpop.eup %10355  ;;  %10375 = vrcp.f32 %v524_v55  ;;  %v8095_v61 = vmul.f32 -1.442695, %v9299_v59  ;;  %v774_v62 = vpop.f32.mrb[23].mxu1 }
 0x247   :  { %v10358_v63 = vpop.eup %10357  ;;  %10377 = vpow2.f32 %v8089_v53  ;;  %v8093_v0 = vmul.f32 -1.442695, %v774_v62 }
 0x248   :  { %v10360_v1 = vpop.eup %10359  ;;  %10379 = vpow2.f32 %v8094_v56 }
 0x249   :  { %v10362_v2 = vpop.eup %10361  ;;  %10381 = vpow2.f32 %v8092_v58 }
 0x24a   :  { %v10364_v3 = vpop.eup %10363  ;;  %10383 = vpow2.f32 %v8095_v61 }
 0x24b   :  { %v10366_v5 = vpop.eup %10365  ;;  %v832_v6 = vadd.f32 1.0, %v10364_v3  ;;  %10385 = vpow2.f32 %v8093_v0  ;;  %v9302_v7 = vpop.f32.mrb[24].mxu1  ;;  %v12785_v0 = vld [vmem:[%s14847_s7] sm:$0xff]  }
 0x24c   :  { %v10368_v8 = vpop.eup %10367  ;;  %v830_v9 = vadd.f32 1.0, %v10366_v5  ;;  %10387 = vtanh.f32 %v9302_v7  ;;  %v787_v10 = vpop.f32.mrb[25].mxu1 }
 0x24d   :  { %v10370_v11 = vpop.eup %10369  ;;  %10389 = vrcp.f32 %v832_v6  ;;  %v833_v12 = vadd.f32 1.0, %v10368_v8  ;;  %v9303_v13 = vpop.f32.mrb[26].mxu1 }
 0x24e   :  { %v10372_v14 = vpop.eup %10371  ;;  %10391 = vrcp.f32 %v830_v9  ;;  %v790_v15 = vpop.f32.mrb[27].mxu1  ;;  %v545_v16 = vmul.f32 %v10370_v11, %v10356_v60 }
 0x24f   :  { %v10374_v17 = vpop.eup %10373  ;;  %10393 = vrcp.f32 %v833_v12  ;;  %v543_v18 = vmul.f32 %v10372_v14, %v10358_v63  ;;  %v10262_v63 = vld [vmem:[%s14845_s5] sm:$0xff]  }
 0x250   :  { %v10376_v19 = vpop.eup %10375  ;;  %10395 = vtanh.f32 %v787_v10  ;;  %v546_v20 = vmul.f32 %v10374_v17, %v10360_v1 }
 0x251   :  { %v10378_v21 = vpop.eup %10377  ;;  %10397 = vtanh.f32 %v9303_v13  ;;  %v544_v22 = vmul.f32 %v10376_v19, %v10362_v2 }
 0x252   :  { %v10380_v23 = vpop.eup %10379  ;;  %v831_v25 = vadd.f32 1.0, %v10378_v21  ;;  %10399 = vtanh.f32 %v790_v15  ;;  %v550_v26 = vpack.c.bf16 %v546_v20, %v545_v16 }
 0x253   :  { %v10382_v27 = vpop.eup %10381  ;;  %v856_v28 = vadd.f32 1.0, %v10380_v23  ;;  %v9306_v30 = vpop.f32.mrb[28].mxu1  ;;  %v549_v31 = vpack.c.bf16 %v544_v22, %v543_v18 }
 0x254   :  { %v10384_v32 = vpop.eup %10383  ;;  %10401 = vrcp.f32 %v831_v25  ;;  %v854_v33 = vadd.f32 1.0, %v10382_v27  ;;  %v803_v34 = vpop.f32.mrb[29].mxu1  ;;  %v8098_v37 = vmul.f32 -1.442695, %v9306_v30 }
 0x255   :  { %v10386_v35 = vpop.eup %10385  ;;  %10403 = vrcp.f32 %v856_v28  ;;  %v857_v36 = vadd.f32 1.0, %v10384_v32  ;;  %9277 = vmatpush3.bf16.msra.mxu0 %v549_v31  ;;  %v9307_v47 = vpop.f32.mrb[30].mxu1  ;;  %v8096_v50 = vmul.f32 -1.442695, %v803_v34 }
 0x256   :  { %v10388_v48 = vpop.eup %10387  ;;  %10405 = vrcp.f32 %v854_v33  ;;  %v855_v49 = vadd.f32 1.0, %v10386_v35  ;;  %v806_v51 = vpop.f32.mrb[31].mxu1  ;;  %9278 = vmatprep.subr.bf16.mxu0 %v12565_v46  ;;  %v8099_v53 = vmul.f32 -1.442695, %v9307_v47 }
 0x257   :  { %v10390_v52 = vpop.eup %10389  ;;  %10407 = vrcp.f32 %v857_v36  ;;  %v8097_v56 = vmul.f32 -1.442695, %v806_v51  ;;  %v12838_v51 = vld [vmem:[%s14847_s7 + $0x20] sm:$0xff]  }
 0x258   :  { %v10392_v54 = vpop.eup %10391  ;;  %10409 = vrcp.f32 %v855_v49  ;;  %v900_v55 = vmul.f32 %v10390_v52, %v10388_v48  ;;  %v12818_v48 = vld [vmem:[%s14847_s7 + $0x8] sm:$0xff]   ;;  %v12824_v49 = vld [vmem:[%s14847_s7 + $0x10] sm:$0xff]  }
 0x259   :  { %v10394_v57 = vpop.eup %10393  ;;  %10411 = vpow2.f32 %v8098_v37  ;;  %9279 = vmatpush3.bf16.msra.mxu0 %v550_v26  ;;  %v12847_v52 = vld [vmem:[%s14847_s7 + $0x28] sm:$0xff]  }
 0x25a   :  { %v10396_v58 = vpop.eup %10395  ;;  %10413 = vpow2.f32 %v8096_v50  ;;  %9280 = vmatprep.subr.bf16.mxu0 %v12565_v46  ;;  %v12833_v50 = vld [vmem:[%s14847_s7 + $0x18] sm:$0xff]  }
 0x25b   :  { %v10398_v59 = vpop.eup %10397  ;;  %v898_v60 = vmul.f32 %v10396_v58, %v10392_v54  ;;  %10415 = vpow2.f32 %v8099_v53  ;;  %v12852_v53 = vld [vmem:[%s14847_s7 + $0x30] sm:$0xff]   ;;  %v12861_v54 = vld [vmem:[%s14847_s7 + $0x38] sm:$0xff]  }
 0x25c   :  { %v10400_v61 = vpop.eup %10399  ;;  %v901_v62 = vmul.f32 %v10398_v59, %v10394_v57  ;;  %10417 = vpow2.f32 %v8097_v56  ;;  %v602_v56 = vstv %s12867_s25 }
 0x25d   :  { %9281 = vmatpush3.bf16.msra.mxu0 %v12629_v4 }
 0x25e   :  { %v10402_v1 = vpop.eup %10401  ;;  %9308 = vmatprep.subr.bf16.mxu0 %v12564_v29 }
 0x25f   :  { %v10404_v2 = vpop.eup %10403  ;;  %v899_v3 = vmul.f32 %v10402_v1, %v10400_v61 }
 0x260   :  { %v10406_v5 = vpop.eup %10405  ;;  %v896_v6 = vmul.f32 0.0, %v10404_v2  ;;  %9283 = vmatmul.mubr.msk.bf16.vlgmr.msra.gmra.mrb[16].mxu0 %vm365_vm2, %v10262_v63 }
 0x261   :  { %v10408_v7 = vpop.eup %10407  ;;  %v894_v8 = vmul.f32 0.0, %v10406_v5  ;;  %9309 = vmatpush3.bf16.msra.mxu0 %v12564_v29  ;;  %9318 = vmatprep.mubr.msk.bf16.mxu0 %vm956_vm7, %v12785_v0 }
 0x262   :  { %v10410_v9 = vpop.eup %10409  ;;  %v897_v10 = vmul.f32 0.0, %v10408_v7  ;;  %v12792_v11 = vadd.f32 %v900_v55, %v896_v6  ;;  %9310 = vmatprep.subr.bf16.mxu0 %v12564_v29 }
 0x263   :  { %v10412_v12 = vpop.eup %10411  ;;  %v895_v13 = vmul.f32 0.0, %v10410_v9  ;;  %v12795_v14 = vadd.f32 %v898_v60, %v894_v8 }
 0x264   :  { %v10414_v15 = vpop.eup %10413  ;;  %10419 = vtanh.f32 %v12792_v11  ;;  %v12798_v16 = vadd.f32 %v901_v62, %v897_v10  ;;  %v884_v17 = vadd.f32 1.0, %v10412_v12  ;;  %v644_v62 = vld [vmem:[%s14849_s9] sm:$0x7f] }
 0x265   :  { %v10416_v18 = vpop.eup %10415  ;;  %10421 = vtanh.f32 %v12795_v14  ;;  %v12801_v19 = vadd.f32 %v899_v3, %v895_v13  ;;  %v882_v20 = vadd.f32 1.0, %v10414_v15  ;;  %9311 = vmatpush3.bf16.msra.mxu0 %v12564_v29  ;;  %1225 = vperm.xlu0 %10237, %v644_v62  }
 0x266   :  { %v10418_v21 = vpop.eup %10417  ;;  %10423 = vtanh.f32 %v12798_v16  ;;  %v885_v22 = vadd.f32 1.0, %v10416_v18 }
 0x267   :  { %10425 = vtanh.f32 %v12801_v19  ;;  %v883_v23 = vadd.f32 1.0, %v10418_v21 }
 0x268   :  { %10427 = vrcp.f32 %v884_v17 }
 0x269   :  { %10429 = vrcp.f32 %v882_v20 }
 0x26a   :  { %10431 = vrcp.f32 %v885_v22 }
 0x26b   :  { %10433 = vrcp.f32 %v883_v23 }
 0x26e   :  { %v10420_v25 = vpop.eup %10419 }
 0x26f   :  { %v10422_v26 = vpop.eup %10421 }
 0x270   :  { %v10424_v27 = vpop.eup %10423 }
 0x271   :  { %v10426_v28 = vpop.eup %10425 }
 0x272   :  { %v10428_v30 = vpop.eup %10427 }
 0x273   :  { %v10430_v31 = vpop.eup %10429  ;;  %v912_v29 = vmul.f32 %v10428_v30, %v10420_v25 }
 0x274   :  { %v10432_v32 = vpop.eup %10431  ;;  %v910_v35 = vmul.f32 %v10430_v31, %v10422_v26 }
 0x275   :  { %v10434_v33 = vpop.eup %10433  ;;  %v913_v34 = vmul.f32 %v10432_v32, %v10424_v27 }
 0x276   :  { %v911_v36 = vmul.f32 %v10434_v33, %v10426_v28 }
 0x277   :  { %v12806_v37 = vpack.c.bf16 %v913_v34, %v912_v29 }
 0x278   :  { %v12808_v47 = vpack.c.bf16 %v911_v36, %v910_v35 }
 0x27a   :  { %9312 = vmatprep.subr.bf16.mxu0 %v12808_v47 }
 0x27b   :  { %9313 = vmatpush3.bf16.msra.mxu0 %v12808_v47 }
 0x27c   :  { %9314 = vmatprep.subr.bf16.mxu0 %v12806_v37 }
 0x27f   :  { %9315 = vmatpush3.bf16.msra.mxu0 %v12806_v37 }
 0x280   :  { %9316 = vmatprep.subr.bf16.mxu0 %v12629_v4 }
 0x283   :  { %9317 = vmatpush3.bf16.msra.mxu0 %v12629_v4 }
 0x286   :  { %9319 = vmatmul.mubr.msk.bf16.vlgmr.msra.gmra.mrb[20].mxu0 %vm956_vm7, %v12818_v48 }
 0x287   :  { %9322 = vmatprep.mubr.msk.bf16.mxu0 %vm956_vm7, %v12824_v49 }
 0x28e   :  { %9323 = vmatmul.mubr.msk.bf16.gmra.mrb[24].mxu0 %vm956_vm7, %v12833_v50 }
 0x28f   :  { %9326 = vmatprep.mubr.msk.bf16.mxu0 %vm956_vm7, %v12838_v51 }
 0x296   :  { %9327 = vmatmul.mubr.msk.bf16.gmra.mrb[28].mxu0 %vm956_vm7, %v12847_v52 }
 0x297   :  { %9330 = vmatprep.mubr.msk.bf16.mxu0 %vm956_vm7, %v12852_v53 }
 0x29e   :  { %9331 = vmatmul.mubr.msk.bf16.gmra.mrb[32].mxu0 %vm956_vm7, %v12861_v54 }
 0x29f   :  { %9376 = vmatprep.mubr.msk.bf16.mxu0 %vm956_vm7, %v12785_v0 }
 0x333   :  { %v12869_v55 = vpop.f32.mrb[16].mxu0 }
 0x334   :  { %v9284_v57 = vpop.f32.mrb[17].mxu0 }
 0x335   :  { %v596_v58 = vpop.f32.mrb[18].mxu0 }
 0x336   :  { %vm601_vm8 = vcmp.ge.f32.partialorder %v596_v58, 0.0  ;;  %v604_v59 = vmul.f32 %v602_v56, %v596_v58  ;;  %v9285_v60 = vpop.f32.mrb[19].mxu0 }
 0x338   :  { %v12874_v61 = vsel %vm601_vm8, %v596_v58, %v604_v59 }
 0x359   :  { %v9320_v63 = vpop.f32.mrb[20].mxu0 }
 0x35a   :  { %v8118_v0 = vmul.f32 -1.442695, %v9320_v63  ;;  %v1015_v1 = vpop.f32.mrb[21].mxu0 }
 0x35b   :  { %v8116_v2 = vmul.f32 -1.442695, %v1015_v1  ;;  %v9321_v3 = vpop.f32.mrb[22].mxu0 }
 0x35c   :  { %10435 = vpow2.f32 %v8118_v0  ;;  %v8119_v5 = vmul.f32 -1.442695, %v9321_v3  ;;  %v1018_v6 = vpop.f32.mrb[23].mxu0 }
 0x35d   :  { %10437 = vpow2.f32 %v8116_v2  ;;  %v8117_v7 = vmul.f32 -1.442695, %v1018_v6 }
 0x35e   :  { %10439 = vpow2.f32 %v8119_v5 }
 0x35f   :  { %10441 = vpow2.f32 %v8117_v7 }
 0x361   :  { %v9324_v8 = vpop.f32.mrb[24].mxu0 }
 0x362   :  { %v8122_v9 = vmul.f32 -1.442695, %v9324_v8  ;;  %v1031_v10 = vpop.f32.mrb[25].mxu0 }
 0x363   :  { %v8120_v12 = vmul.f32 -1.442695, %v1031_v10  ;;  %v9325_v13 = vpop.f32.mrb[26].mxu0 }
 0x364   :  { %10443 = vpow2.f32 %v8122_v9  ;;  %v8123_v15 = vmul.f32 -1.442695, %v9325_v13  ;;  %v1034_v17 = vpop.f32.mrb[27].mxu0 }
 0x365   :  { %10445 = vpow2.f32 %v8120_v12  ;;  %v8121_v18 = vmul.f32 -1.442695, %v1034_v17 }
 0x366   :  { %v10436_v20 = vpop.eup %10435  ;;  %10447 = vpow2.f32 %v8123_v15 }
 0x367   :  { %v10438_v21 = vpop.eup %10437  ;;  %v1092_v22 = vadd.f32 1.0, %v10436_v20  ;;  %10449 = vpow2.f32 %v8121_v18 }
 0x368   :  { %v10440_v23 = vpop.eup %10439  ;;  %v1090_v25 = vadd.f32 1.0, %v10438_v21 }
 0x369   :  { %v10442_v26 = vpop.eup %10441  ;;  %10451 = vrcp.f32 %v1092_v22  ;;  %v1093_v27 = vadd.f32 1.0, %v10440_v23  ;;  %v9328_v28 = vpop.f32.mrb[28].mxu0 }
 0x36a   :  { %10453 = vrcp.f32 %v1090_v25  ;;  %v1091_v30 = vadd.f32 1.0, %v10442_v26  ;;  %v1047_v31 = vpop.f32.mrb[29].mxu0 }
 0x36b   :  { %10455 = vrcp.f32 %v1093_v27  ;;  %v9329_v32 = vpop.f32.mrb[30].mxu0 }
 0x36c   :  { %10457 = vrcp.f32 %v1091_v30  ;;  %v1050_v33 = vpop.f32.mrb[31].mxu0 }
 0x36d   :  { %10459 = vtanh.f32 %v9328_v28 }
 0x36e   :  { %v10444_v29 = vpop.eup %10443  ;;  %10461 = vtanh.f32 %v1047_v31 }
 0x36f   :  { %v10446_v34 = vpop.eup %10445  ;;  %v1116_v35 = vadd.f32 1.0, %v10444_v29  ;;  %10463 = vtanh.f32 %v9329_v32 }
 0x370   :  { %v10448_v36 = vpop.eup %10447  ;;  %v1114_v57 = vadd.f32 1.0, %v10446_v34  ;;  %10465 = vtanh.f32 %v1050_v33 }
 0x371   :  { %v10450_v58 = vpop.eup %10449  ;;  %10467 = vrcp.f32 %v1116_v35  ;;  %v1117_v59 = vadd.f32 1.0, %v10448_v36  ;;  %v9332_v60 = vpop.f32.mrb[32].mxu0 }
 0x372   :  { %10469 = vrcp.f32 %v1114_v57  ;;  %v1115_v62 = vadd.f32 1.0, %v10450_v58  ;;  %v8126_v63 = vmul.f32 -1.442695, %v9332_v60  ;;  %v1063_v0 = vpop.f32.mrb[33].mxu0 }
 0x373   :  { %v10452_v1 = vpop.eup %10451  ;;  %10471 = vrcp.f32 %v1117_v59  ;;  %v8124_v2 = vmul.f32 -1.442695, %v1063_v0  ;;  %v9333_v3 = vpop.f32.mrb[34].mxu0 }
 0x374   :  { %v10454_v5 = vpop.eup %10453  ;;  %10473 = vrcp.f32 %v1115_v62  ;;  %v8127_v6 = vmul.f32 -1.442695, %v9333_v3  ;;  %v1066_v7 = vpop.f32.mrb[35].mxu0 }
 0x375   :  { %v10456_v8 = vpop.eup %10455  ;;  %10475 = vpow2.f32 %v8126_v63  ;;  %v8125_v9 = vmul.f32 -1.442695, %v1066_v7 }
 0x376   :  { %v10458_v10 = vpop.eup %10457  ;;  %10477 = vpow2.f32 %v8124_v2 }
 0x377   :  { %v10460_v12 = vpop.eup %10459  ;;  %10479 = vpow2.f32 %v8127_v6 }
 0x378   :  { %v10462_v13 = vpop.eup %10461  ;;  %v1160_v15 = vmul.f32 %v10460_v12, %v10452_v1  ;;  %10481 = vpow2.f32 %v8125_v9 }
 0x379   :  { %v10464_v17 = vpop.eup %10463  ;;  %v1158_v18 = vmul.f32 %v10462_v13, %v10454_v5 }
 0x37a   :  { %v10466_v20 = vpop.eup %10465  ;;  %v1161_v21 = vmul.f32 %v10464_v17, %v10456_v8 }
 0x37b   :  { %v10468_v22 = vpop.eup %10467  ;;  %v1159_v23 = vmul.f32 %v10466_v20, %v10458_v10  ;;  %v8129_v20 = vld [vmem:[%s14842_s2 + $0x8] sm:$0x7f] }
 0x37c   :  { %v10470_v25 = vpop.eup %10469  ;;  %v1156_v26 = vmul.f32 0.0, %v10468_v22  ;;  %v1241_v22 = vmul.f32 %v8129_v20, %v12671_v24 }
 0x37d   :  { %v10472_v27 = vpop.eup %10471  ;;  %v1154_v28 = vmul.f32 0.0, %v10470_v25 }
 0x37e   :  { %v10474_v30 = vpop.eup %10473  ;;  %v1157_v31 = vmul.f32 0.0, %v10472_v27  ;;  %v12879_v32 = vadd.f32 %v1160_v15, %v1156_v26 }
 0x37f   :  { %v10476_v33 = vpop.eup %10475  ;;  %v1155_v29 = vmul.f32 0.0, %v10474_v30  ;;  %v12881_v34 = vadd.f32 %v1158_v18, %v1154_v28 }
 0x380   :  { %v10478_v35 = vpop.eup %10477  ;;  %v12883_v36 = vadd.f32 %v1161_v21, %v1157_v31  ;;  %v1144_v57 = vadd.f32 1.0, %v10476_v33  ;;  %10483 = vtanh.f32 %v12879_v32  ;;  %v12900_v21 = vld [vmem:[%s14848_s8] sm:$0xf] }
 0x381   :  { %v10480_v58 = vpop.eup %10479  ;;  %10485 = vtanh.f32 %v12881_v34  ;;  %v12887_v59 = vadd.f32 %v1159_v23, %v1155_v29  ;;  %v1142_v60 = vadd.f32 1.0, %v10478_v35  ;;  %v1242_v23 = vsel %vm648_vm3, %v1241_v22, 1.0 }
 0x382   :  { %v10482_v62 = vpop.eup %10481  ;;  %10487 = vrcp.f32 %v1144_v57  ;;  %v1145_v63 = vadd.f32 1.0, %v10480_v58  ;;  %v1243_v25 = vpack.c.bf16 %v1242_v23, %v1242_v23 }
 0x383   :  { %10489 = vtanh.f32 %v12887_v59  ;;  %v1143_v0 = vadd.f32 1.0, %v10482_v62 }
 0x384   :  { %10491 = vrcp.f32 %v1142_v60  ;;  %v1245_v26 = vsel %vm717_vm4, %v1243_v25, 0 }
 0x385   :  { %10493 = vrcp.f32 %v1145_v63 }
 0x386   :  { %10495 = vrcp.f32 %v1143_v0 }
 0x387   :  { %10497 = vtanh.f32 %v12883_v36 }
 0x38a   :  { %v10484_v1 = vpop.eup %10483 }
 0x38b   :  { %v10486_v2 = vpop.eup %10485 }
 0x38c   :  { %v10488_v3 = vpop.eup %10487 }
 0x38d   :  { %v10490_v5 = vpop.eup %10489  ;;  %v1172_v13 = vmul.f32 %v10488_v3, %v10484_v1 }
 0x38e   :  { %v10492_v6 = vpop.eup %10491 }
 0x38f   :  { %v10494_v7 = vpop.eup %10493  ;;  %v1170_v10 = vmul.f32 %v10492_v6, %v10486_v2 }
 0x390   :  { %v10496_v8 = vpop.eup %10495 }
 0x391   :  { %v10498_v9 = vpop.eup %10497  ;;  %v1171_v12 = vmul.f32 %v10496_v8, %v10490_v5 }
 0x392   :  { %v1173_v15 = vmul.f32 %v10498_v9, %v10494_v7 }
 0x393   :  { %v1174_v17 = vpack.c.bf16 %v1171_v12, %v1170_v10 }
 0x394   :  { %v1175_v18 = vpack.c.bf16 %v1173_v15, %v1172_v13 }
 0x395   :  { %9335 = vmatpush3.bf16.msra.mxu1 %v1174_v17  ;;  %9366 = vmatprep.subr.bf16.mxu0 %v1174_v17 }
 0x396   :  { %9367 = vmatpush3.bf16.msra.mxu0 %v1174_v17  ;;  %9336 = vmatprep.subr.bf16.mxu1 %v12565_v46 }
 0x397   :  { %9368 = vmatprep.subr.bf16.mxu0 %v1175_v18 }
 0x399   :  { %9337 = vmatpush3.bf16.msra.mxu1 %v1175_v18 }
 0x39a   :  { %9369 = vmatpush3.bf16.msra.mxu0 %v1175_v18  ;;  %9338 = vmatprep.subr.bf16.mxu1 %v12565_v46 }
 0x39d   :  { %9339 = vmatpush3.bf16.msra.mxu1 %v12629_v4 }
 0x39e   :  { %9344 = vmatprep.subr.bf16.mxu1 %v12808_v47 }
 0x3a0   :  { %9341 = vmatmul.mubr.msk.bf16.vlgmr.msra.gmra.mrb[32].mxu1 %vm365_vm2, %v12900_v21 }
 0x3a1   :  { %9345 = vmatpush3.bf16.msra.mxu1 %v12808_v47  ;;  %9350 = vmatprep.mubr.msk.bf16.mxu1 %vm692_vm5, %v12716_v38  ;;  %v12931_v38 = vstv %s8020_s11 }
 0x3a2   :  { %9346 = vmatprep.subr.bf16.mxu1 %v12806_v37 }
 0x3a5   :  { %9347 = vmatpush3.bf16.msra.mxu1 %v12806_v37 }
 0x3a6   :  { %10215 = vmatprep.subr.msk.bf16.mxu1 %vm717_vm4, %v1243_v25 }
 0x3a9   :  { %9349 = vmatpush3.bf16.msra.mxu1 %v1245_v26 }
 0x3aa   :  { %9392 = vmatprep.subr.bf16.mxu1 %v12565_v46 }
 0x3ac   :  { %9351 = vmatmul.mubr.msk.bf16.vlgmr.msra.gmra.mrb[36].mxu1 %vm692_vm5, %v12724_v39 }
 0x3ad   :  { %9354 = vmatprep.mubr.msk.bf16.mxu1 %vm692_vm5, %v12729_v40 }
 0x3b4   :  { %9355 = vmatmul.mubr.msk.bf16.gmra.mrb[40].mxu1 %vm692_vm5, %v12738_v41 }
 0x3b5   :  { %9358 = vmatprep.mubr.msk.bf16.mxu1 %vm692_vm5, %v12743_v42  ;;  %v12934_v42 = vpop.permute.xlu0 %1225 }
 0x3bc   :  { %9359 = vmatmul.mubr.msk.bf16.gmra.mrb[44].mxu1 %vm692_vm5, %v12752_v43 }
 0x3bd   :  { %9362 = vmatprep.mubr.msk.bf16.mxu1 %vm692_vm5, %v12757_v44 }
 0x3c4   :  { %9363 = vmatmul.mubr.msk.bf16.gmra.mrb[48].mxu1 %vm692_vm5, %v12766_v45 }
 0x3c5   :  { %9398 = vmatprep.mubr.msk.bf16.mxu1 %vm12566_vm6, %v12565_v46 }
 0x473   :  { %v1213_v39 = vpop.f32.mrb[32].mxu1 }
 0x474   :  { %vm1219_vm9 = vcmp.ge.f32.partialorder %v1213_v39, 0.0  ;;  %v1221_v40 = vmul.f32 %v12931_v38, %v1213_v39  ;;  %v9342_v41 = vpop.f32.mrb[33].mxu1 }
 0x475   :  { %v1216_v43 = vpop.f32.mrb[34].mxu1 }
 0x476   :  { %v1222_v37 = vsel %vm1219_vm9, %v1213_v39, %v1221_v40  ;;  %v9343_v44 = vpop.f32.mrb[35].mxu1  ;;  %vm600_vm9 = vcmp.ge.f32.partialorder %v12869_v55, 0.0 }
 0x477   :  { %v1228_v47 = vmul.f32 %v12934_v42, %v1222_v37 }
 0x479   :  { %v1230_v45 = vsel %vm1229_vm10, %v1228_v47, 0.0 }
 0x47a   :  { %v1231_v27 = vrot.slane %v1230_v45, 4 }
 0x47c   :  { %v1232_v28 = vadd.f32 %v1231_v27, %v1230_v45 }
 0x47e   :  { %v1233_v30 = vrot.slane %v1232_v28, 2 }
 0x47f   :  { %v9352_v31 = vpop.f32.mrb[36].mxu1 }
 0x480   :  { %v1234_v33 = vadd.f32 %v1233_v30, %v1232_v28  ;;  %v8140_v29 = vmul.f32 -1.442695, %v9352_v31  ;;  %v1281_v35 = vpop.f32.mrb[37].mxu1 }
 0x481   :  { %v8138_v57 = vmul.f32 -1.442695, %v1281_v35  ;;  %v9353_v58 = vpop.f32.mrb[38].mxu1 }
 0x482   :  { %v1235_v60 = vrot.slane %v1234_v33, 1  ;;  %10499 = vpow2.f32 %v8140_v29  ;;  %v8141_v62 = vmul.f32 -1.442695, %v9353_v58  ;;  %v1284_v63 = vpop.f32.mrb[39].mxu1 }
 0x483   :  { %10501 = vpow2.f32 %v8138_v57  ;;  %v8139_v0 = vmul.f32 -1.442695, %v1284_v63 }
 0x484   :  { %v1236_v1 = vadd.f32 %v1235_v60, %v1234_v33  ;;  %10503 = vpow2.f32 %v8141_v62 }
 0x485   :  { %10505 = vpow2.f32 %v8139_v0 }
 0x486   :  { %1238 = vst.msk [vmem:[#allocation2] sm:$0x1] %vm1237_vm11, %v1236_v1 }
 0x487   :  { %v9356_v2 = vpop.f32.mrb[40].mxu1 }
 0x488   :  { %v8144_v3 = vmul.f32 -1.442695, %v9356_v2  ;;  %v1297_v5 = vpop.f32.mrb[41].mxu1 }
 0x489   :  { %v8142_v6 = vmul.f32 -1.442695, %v1297_v5  ;;  %v9357_v7 = vpop.f32.mrb[42].mxu1 }
 0x48a   :  { %10507 = vpow2.f32 %v8144_v3  ;;  %v8145_v8 = vmul.f32 -1.442695, %v9357_v7  ;;  %v1300_v9 = vpop.f32.mrb[43].mxu1 }
 0x48b   :  { %10509 = vpow2.f32 %v8142_v6  ;;  %v8143_v10 = vmul.f32 -1.442695, %v1300_v9 }
 0x48c   :  { %v10500_v12 = vpop.eup %10499  ;;  %10511 = vpow2.f32 %v8145_v8 }
 0x48d   :  { %v10502_v13 = vpop.eup %10501  ;;  %v1358_v15 = vadd.f32 1.0, %v10500_v12  ;;  %10513 = vpow2.f32 %v8143_v10 }
 0x48e   :  { %v10504_v17 = vpop.eup %10503  ;;  %v1356_v18 = vadd.f32 1.0, %v10502_v13 }
 0x48f   :  { %v10506_v20 = vpop.eup %10505  ;;  %10515 = vrcp.f32 %v1358_v15  ;;  %v1359_v22 = vadd.f32 1.0, %v10504_v17  ;;  %v9360_v23 = vpop.f32.mrb[44].mxu1 }
 0x490   :  { %10517 = vrcp.f32 %v1356_v18  ;;  %v1357_v25 = vadd.f32 1.0, %v10506_v20  ;;  %v1313_v26 = vpop.f32.mrb[45].mxu1 }
 0x491   :  { %10519 = vrcp.f32 %v1359_v22  ;;  %v9361_v39 = vpop.f32.mrb[46].mxu1 }
 0x492   :  { %10521 = vrcp.f32 %v1357_v25  ;;  %v1316_v40 = vpop.f32.mrb[47].mxu1 }
 0x493   :  { %10523 = vtanh.f32 %v9360_v23 }
 0x494   :  { %v10508_v41 = vpop.eup %10507  ;;  %10525 = vtanh.f32 %v1313_v26 }
 0x495   :  { %v10510_v43 = vpop.eup %10509  ;;  %v1382_v37 = vadd.f32 1.0, %v10508_v41  ;;  %10527 = vtanh.f32 %v9361_v39 }
 0x496   :  { %v10512_v44 = vpop.eup %10511  ;;  %v1380_v47 = vadd.f32 1.0, %v10510_v43  ;;  %10529 = vtanh.f32 %v1316_v40 }
 0x497   :  { %v10514_v45 = vpop.eup %10513  ;;  %10531 = vrcp.f32 %v1382_v37  ;;  %v1383_v27 = vadd.f32 1.0, %v10512_v44  ;;  %v9364_v28 = vpop.f32.mrb[48].mxu1 }
 0x498   :  { %10533 = vrcp.f32 %v1380_v47  ;;  %v1381_v30 = vadd.f32 1.0, %v10514_v45  ;;  %v8148_v31 = vmul.f32 -1.442695, %v9364_v28  ;;  %v1329_v33 = vpop.f32.mrb[49].mxu1 }
 0x499   :  { %v10516_v29 = vpop.eup %10515  ;;  %10535 = vrcp.f32 %v1383_v27  ;;  %v8146_v35 = vmul.f32 -1.442695, %v1329_v33  ;;  %v9365_v57 = vpop.f32.mrb[50].mxu1 }
 0x49a   :  { %v10518_v58 = vpop.eup %10517  ;;  %10537 = vrcp.f32 %v1381_v30  ;;  %v8149_v60 = vmul.f32 -1.442695, %v9365_v57  ;;  %v1332_v62 = vpop.f32.mrb[51].mxu1 }
 0x49b   :  { %v10520_v63 = vpop.eup %10519  ;;  %10539 = vpow2.f32 %v8148_v31  ;;  %v8147_v0 = vmul.f32 -1.442695, %v1332_v62 }
 0x49c   :  { %v10522_v1 = vpop.eup %10521  ;;  %10541 = vpow2.f32 %v8146_v35 }
 0x49d   :  { %v10524_v2 = vpop.eup %10523  ;;  %10543 = vpow2.f32 %v8149_v60 }
 0x49e   :  { %v10526_v3 = vpop.eup %10525  ;;  %v1426_v5 = vmul.f32 %v10524_v2, %v10516_v29  ;;  %10545 = vpow2.f32 %v8147_v0  ;;  %v8171_v0 = vld [vmem:[%s14842_s2 + $0x10] sm:$0x7f] }
 0x49f   :  { %v10528_v6 = vpop.eup %10527  ;;  %v1424_v7 = vmul.f32 %v10526_v3, %v10518_v58 }
 0x4a0   :  { %v10530_v8 = vpop.eup %10529  ;;  %v1427_v9 = vmul.f32 %v10528_v6, %v10520_v63  ;;  %v13031_v6 = vld [vmem:[%s14846_s6 + $0x38] sm:$0xff]  }
 0x4a1   :  { %v10532_v10 = vpop.eup %10531  ;;  %v1425_v12 = vmul.f32 %v10530_v8, %v10522_v1  ;;  %v1691_v1 = vmul.f32 %v8171_v0, %v12671_v24 }
 0x4a2   :  { %v10534_v13 = vpop.eup %10533  ;;  %v1422_v15 = vmul.f32 %v10532_v10, %v12792_v11 }
 0x4a3   :  { %v10536_v17 = vpop.eup %10535  ;;  %v1420_v18 = vmul.f32 %v10534_v13, %v12795_v14  ;;  %v1692_v2 = vsel %vm648_vm3, %v1691_v1, 1.0 }
 0x4a4   :  { %v10538_v20 = vpop.eup %10537  ;;  %v1423_v22 = vmul.f32 %v10536_v17, %v12798_v16  ;;  %v12942_v23 = vadd.f32 %v1426_v5, %v1422_v15  ;;  %v1693_v3 = vpack.c.bf16 %v1692_v2, %v1692_v2 }
 0x4a5   :  { %v10540_v25 = vpop.eup %10539  ;;  %v1421_v26 = vmul.f32 %v10538_v20, %v12801_v19  ;;  %v12945_v39 = vadd.f32 %v1424_v7, %v1420_v18 }
 0x4a6   :  { %v10542_v40 = vpop.eup %10541  ;;  %10547 = vtanh.f32 %v12942_v23  ;;  %v12948_v41 = vadd.f32 %v1427_v9, %v1423_v22  ;;  %v1410_v43 = vadd.f32 1.0, %v10540_v25  ;;  %v1695_v5 = vsel %vm717_vm4, %v1693_v3, 0 }
 0x4a7   :  { %v10544_v11 = vpop.eup %10543  ;;  %10549 = vtanh.f32 %v12945_v39  ;;  %v12951_v14 = vadd.f32 %v1425_v12, %v1421_v26  ;;  %v1408_v37 = vadd.f32 1.0, %v10542_v40 }
 0x4a8   :  { %v10546_v16 = vpop.eup %10545  ;;  %10551 = vtanh.f32 %v12948_v41  ;;  %v1411_v44 = vadd.f32 1.0, %v10544_v11 }
 0x4a9   :  { %10553 = vtanh.f32 %v12951_v14  ;;  %v1409_v19 = vadd.f32 1.0, %v10546_v16 }
 0x4aa   :  { %10555 = vrcp.f32 %v1410_v43 }
 0x4ab   :  { %10557 = vrcp.f32 %v1408_v37 }
 0x4ac   :  { %10559 = vrcp.f32 %v1411_v44 }
 0x4ad   :  { %10561 = vrcp.f32 %v1409_v19 }
 0x4b0   :  { %v10548_v47 = vpop.eup %10547 }
 0x4b1   :  { %v10550_v45 = vpop.eup %10549 }
 0x4b2   :  { %v10552_v27 = vpop.eup %10551 }
 0x4b3   :  { %v10554_v28 = vpop.eup %10553 }
 0x4b4   :  { %v10556_v30 = vpop.eup %10555 }
 0x4b5   :  { %v10558_v31 = vpop.eup %10557  ;;  %v1438_v35 = vmul.f32 %v10556_v30, %v10548_v47 }
 0x4b6   :  { %v10560_v33 = vpop.eup %10559  ;;  %v1436_v58 = vmul.f32 %v10558_v31, %v10550_v45 }
 0x4b7   :  { %v10562_v29 = vpop.eup %10561  ;;  %v1439_v57 = vmul.f32 %v10560_v33, %v10552_v27 }
 0x4b8   :  { %v1437_v60 = vmul.f32 %v10562_v29, %v10554_v28 }
 0x4b9   :  { %v1441_v62 = vpack.c.bf16 %v1439_v57, %v1438_v35 }
 0x4ba   :  { %v1440_v63 = vpack.c.bf16 %v1437_v60, %v1436_v58 }
 0x4bc   :  { %9370 = vmatprep.subr.bf16.mxu0 %v1440_v63 }
 0x4bd   :  { %9371 = vmatpush3.bf16.msra.mxu0 %v1440_v63 }
 0x4be   :  { %9372 = vmatprep.subr.bf16.mxu0 %v1441_v62 }
 0x4c1   :  { %9373 = vmatpush3.bf16.msra.mxu0 %v1441_v62 }
 0x4c2   :  { %9374 = vmatprep.subr.bf16.mxu0 %v12629_v4 }
 0x4c5   :  { %9375 = vmatpush3.bf16.msra.mxu0 %v12629_v4 }
 0x4c6   :  { %9402 = vmatprep.subr.bf16.mxu0 %v1440_v63 }
 0x4c8   :  { %9377 = vmatmul.mubr.msk.bf16.vlgmr.msra.gmra.mrb[36].mxu0 %vm956_vm7, %v12818_v48  ;;  %v12982_v48 = vld [vmem:[%s14846_s6] sm:$0xff]  }
 0x4c9   :  { %9403 = vmatpush3.bf16.msra.mxu0 %v1440_v63  ;;  %9380 = vmatprep.mubr.msk.bf16.mxu0 %vm956_vm7, %v12824_v49  ;;  %v12989_v49 = vld [vmem:[%s14846_s6 + $0x8] sm:$0xff]  }
 0x4ca   :  { %9404 = vmatprep.subr.bf16.mxu0 %v1441_v62 }
 0x4cd   :  { %9405 = vmatpush3.bf16.msra.mxu0 %v1441_v62 }
 0x4ce   :  { %10216 = vmatprep.subr.msk.bf16.mxu0 %vm717_vm4, %v1693_v3 }
 0x4d0   :  { %9381 = vmatmul.mubr.msk.bf16.gmra.mrb[40].mxu0 %vm956_vm7, %v12833_v50  ;;  %v12996_v50 = vld [vmem:[%s14846_s6 + $0x10] sm:$0xff]  }
 0x4d1   :  { %9407 = vmatpush3.bf16.msra.mxu0 %v1695_v5  ;;  %9384 = vmatprep.mubr.msk.bf16.mxu0 %vm956_vm7, %v12838_v51  ;;  %v13003_v51 = vld [vmem:[%s14846_s6 + $0x18] sm:$0xff]  }
 0x4d2   :  { %9450 = vmatprep.subr.bf16.mxu0 %v12565_v46 }
 0x4d8   :  { %9385 = vmatmul.mubr.msk.bf16.gmra.mrb[44].mxu0 %vm956_vm7, %v12847_v52  ;;  %v13010_v52 = vld [vmem:[%s14846_s6 + $0x20] sm:$0xff]  }
 0x4d9   :  { %9388 = vmatprep.mubr.msk.bf16.mxu0 %vm956_vm7, %v12852_v53  ;;  %v13017_v53 = vld [vmem:[%s14846_s6 + $0x28] sm:$0xff]  }
 0x4e0   :  { %9389 = vmatmul.mubr.msk.bf16.gmra.mrb[48].mxu0 %vm956_vm7, %v12861_v54  ;;  %v13024_v54 = vld [vmem:[%s14846_s6 + $0x30] sm:$0xff]  }
 0x4e1   :  { %9408 = vmatprep.mubr.msk.bf16.mxu0 %vm692_vm5, %v12982_v48 }
 0x4e8   :  { %9409 = vmatmul.mubr.msk.bf16.vlgmr.msra.gmra.mrb[52].mxu0 %vm692_vm5, %v12989_v49 }
 0x4e9   :  { %9412 = vmatprep.mubr.msk.bf16.mxu0 %vm692_vm5, %v12996_v50 }
 0x4f0   :  { %9413 = vmatmul.mubr.msk.bf16.gmra.mrb[56].mxu0 %vm692_vm5, %v13003_v51 }
 0x4f1   :  { %9416 = vmatprep.mubr.msk.bf16.mxu0 %vm692_vm5, %v13010_v52 }
 0x4f8   :  { %9417 = vmatmul.mubr.msk.bf16.gmra.mrb[60].mxu0 %vm692_vm5, %v13017_v53 }
 0x4f9   :  { %9420 = vmatprep.mubr.msk.bf16.mxu0 %vm692_vm5, %v13024_v54 }
 0x500   :  { %9421 = vmatmul.mubr.msk.bf16.gmra.mrb[64].mxu0 %vm692_vm5, %v13031_v6 }
 0x501   :  { %9456 = vmatprep.mubr.msk.bf16.mxu0 %vm12566_vm6, %v12565_v46 }
 0x59b   :  { %v9378_v7 = vpop.f32.mrb[36].mxu0 }
 0x59c   :  { %v8160_v8 = vmul.f32 -1.442695, %v9378_v7  ;;  %v1476_v9 = vpop.f32.mrb[37].mxu0 }
 0x59d   :  { %v8158_v10 = vmul.f32 -1.442695, %v1476_v9  ;;  %v9379_v12 = vpop.f32.mrb[38].mxu0 }
 0x59e   :  { %10563 = vpow2.f32 %v8160_v8  ;;  %v8161_v13 = vmul.f32 -1.442695, %v9379_v12  ;;  %v1479_v15 = vpop.f32.mrb[39].mxu0 }
 0x59f   :  { %10565 = vpow2.f32 %v8158_v10  ;;  %v8159_v17 = vmul.f32 -1.442695, %v1479_v15 }
 0x5a0   :  { %10567 = vpow2.f32 %v8161_v13 }
 0x5a1   :  { %10569 = vpow2.f32 %v8159_v17 }
 0x5a3   :  { %v9382_v18 = vpop.f32.mrb[40].mxu0 }
 0x5a4   :  { %v8164_v20 = vmul.f32 -1.442695, %v9382_v18  ;;  %v1492_v22 = vpop.f32.mrb[41].mxu0 }
 0x5a5   :  { %v8162_v25 = vmul.f32 -1.442695, %v1492_v22  ;;  %v9383_v26 = vpop.f32.mrb[42].mxu0 }
 0x5a6   :  { %10571 = vpow2.f32 %v8164_v20  ;;  %v8165_v40 = vmul.f32 -1.442695, %v9383_v26  ;;  %v1495_v43 = vpop.f32.mrb[43].mxu0 }
 0x5a7   :  { %10573 = vpow2.f32 %v8162_v25  ;;  %v8163_v11 = vmul.f32 -1.442695, %v1495_v43 }
 0x5a8   :  { %v10564_v37 = vpop.eup %10563  ;;  %10575 = vpow2.f32 %v8165_v40 }
 0x5a9   :  { %v10566_v16 = vpop.eup %10565  ;;  %v1553_v44 = vadd.f32 1.0, %v10564_v37  ;;  %10577 = vpow2.f32 %v8163_v11 }
 0x5aa   :  { %v10568_v19 = vpop.eup %10567  ;;  %v1551_v47 = vadd.f32 1.0, %v10566_v16 }
 0x5ab   :  { %v10570_v45 = vpop.eup %10569  ;;  %10579 = vrcp.f32 %v1553_v44  ;;  %v1554_v27 = vadd.f32 1.0, %v10568_v19  ;;  %v9386_v28 = vpop.f32.mrb[44].mxu0 }
 0x5ac   :  { %10581 = vrcp.f32 %v1551_v47  ;;  %v1552_v30 = vadd.f32 1.0, %v10570_v45  ;;  %v1508_v31 = vpop.f32.mrb[45].mxu0 }
 0x5ad   :  { %10583 = vrcp.f32 %v1554_v27  ;;  %v9387_v33 = vpop.f32.mrb[46].mxu0 }
 0x5ae   :  { %10585 = vrcp.f32 %v1552_v30  ;;  %v1511_v29 = vpop.f32.mrb[47].mxu0 }
 0x5af   :  { %10587 = vtanh.f32 %v9386_v28 }
 0x5b0   :  { %v10572_v35 = vpop.eup %10571  ;;  %10589 = vtanh.f32 %v1508_v31 }
 0x5b1   :  { %v10574_v57 = vpop.eup %10573  ;;  %v1577_v58 = vadd.f32 1.0, %v10572_v35  ;;  %10591 = vtanh.f32 %v9387_v33 }
 0x5b2   :  { %v10576_v60 = vpop.eup %10575  ;;  %v1575_v62 = vadd.f32 1.0, %v10574_v57  ;;  %10593 = vtanh.f32 %v1511_v29 }
 0x5b3   :  { %v10578_v63 = vpop.eup %10577  ;;  %10595 = vrcp.f32 %v1577_v58  ;;  %v1578_v0 = vadd.f32 1.0, %v10576_v60  ;;  %v9390_v1 = vpop.f32.mrb[48].mxu0 }
 0x5b4   :  { %10597 = vrcp.f32 %v1575_v62  ;;  %v1576_v2 = vadd.f32 1.0, %v10578_v63  ;;  %v8168_v3 = vmul.f32 -1.442695, %v9390_v1  ;;  %v1524_v5 = vpop.f32.mrb[49].mxu0 }
 0x5b5   :  { %v10580_v7 = vpop.eup %10579  ;;  %10599 = vrcp.f32 %v1578_v0  ;;  %v8166_v8 = vmul.f32 -1.442695, %v1524_v5  ;;  %v9391_v9 = vpop.f32.mrb[50].mxu0 }
 0x5b6   :  { %v10582_v10 = vpop.eup %10581  ;;  %10601 = vrcp.f32 %v1576_v2  ;;  %v8169_v12 = vmul.f32 -1.442695, %v9391_v9  ;;  %v1527_v13 = vpop.f32.mrb[51].mxu0 }
 0x5b7   :  { %v10584_v15 = vpop.eup %10583  ;;  %10603 = vpow2.f32 %v8168_v3  ;;  %v8167_v17 = vmul.f32 -1.442695, %v1527_v13 }
 0x5b8   :  { %v10586_v18 = vpop.eup %10585  ;;  %10605 = vpow2.f32 %v8166_v8 }
 0x5b9   :  { %v10588_v20 = vpop.eup %10587  ;;  %10607 = vpow2.f32 %v8169_v12 }
 0x5ba   :  { %v10590_v22 = vpop.eup %10589  ;;  %v1621_v25 = vmul.f32 %v10588_v20, %v10580_v7  ;;  %10609 = vpow2.f32 %v8167_v17 }
 0x5bb   :  { %v10592_v26 = vpop.eup %10591  ;;  %v1619_v40 = vmul.f32 %v10590_v22, %v10582_v10  ;;  %v9410_v43 = vpop.f32.mrb[52].mxu0 }
 0x5bc   :  { %v10594_v11 = vpop.eup %10593  ;;  %v1622_v37 = vmul.f32 %v10592_v26, %v10584_v15  ;;  %v8182_v16 = vmul.f32 -1.442695, %v9410_v43  ;;  %v1731_v44 = vpop.f32.mrb[53].mxu0 }
 0x5bd   :  { %v10596_v19 = vpop.eup %10595  ;;  %v1620_v47 = vmul.f32 %v10594_v11, %v10586_v18  ;;  %v8180_v45 = vmul.f32 -1.442695, %v1731_v44  ;;  %v9411_v27 = vpop.f32.mrb[54].mxu0 }
 0x5be   :  { %v10598_v28 = vpop.eup %10597  ;;  %v1617_v30 = vmul.f32 %v10596_v19, %v12879_v32  ;;  %10611 = vpow2.f32 %v8182_v16  ;;  %v8183_v31 = vmul.f32 -1.442695, %v9411_v27  ;;  %v1734_v33 = vpop.f32.mrb[55].mxu0 }
 0x5bf   :  { %v10600_v29 = vpop.eup %10599  ;;  %v1615_v35 = vmul.f32 %v10598_v28, %v12881_v34  ;;  %10613 = vpow2.f32 %v8180_v45  ;;  %v8181_v57 = vmul.f32 -1.442695, %v1734_v33 }
 0x5c0   :  { %v10602_v58 = vpop.eup %10601  ;;  %v1618_v60 = vmul.f32 %v10600_v29, %v12883_v36  ;;  %v13040_v62 = vadd.f32 %v1621_v25, %v1617_v30  ;;  %10615 = vpow2.f32 %v8183_v31 }
 0x5c1   :  { %v10604_v63 = vpop.eup %10603  ;;  %v1616_v0 = vmul.f32 %v10602_v58, %v12887_v59  ;;  %v13043_v1 = vadd.f32 %v1619_v40, %v1615_v35  ;;  %10617 = vpow2.f32 %v8181_v57 }
 0x5c2   :  { %v10606_v32 = vpop.eup %10605  ;;  %10619 = vtanh.f32 %v13040_v62  ;;  %v13046_v2 = vadd.f32 %v1622_v37, %v1618_v60  ;;  %v1605_v34 = vadd.f32 1.0, %v10604_v63 }
 0x5c3   :  { %v10608_v3 = vpop.eup %10607  ;;  %10621 = vtanh.f32 %v13043_v1  ;;  %v13049_v5 = vadd.f32 %v1620_v47, %v1616_v0  ;;  %v1603_v36 = vadd.f32 1.0, %v10606_v32  ;;  %v9414_v7 = vpop.f32.mrb[56].mxu0 }
 0x5c4   :  { %v10610_v8 = vpop.eup %10609  ;;  %10623 = vtanh.f32 %v13046_v2  ;;  %v1606_v59 = vadd.f32 1.0, %v10608_v3  ;;  %v1747_v9 = vpop.f32.mrb[57].mxu0  ;;  %v8186_v13 = vmul.f32 -1.442695, %v9414_v7 }
 0x5c5   :  { %10625 = vtanh.f32 %v13049_v5  ;;  %v1604_v10 = vadd.f32 1.0, %v10610_v8  ;;  %v9415_v12 = vpop.f32.mrb[58].mxu0  ;;  %v8184_v43 = vmul.f32 -1.442695, %v1747_v9 }
 0x5c6   :  { %10627 = vrcp.f32 %v1605_v34  ;;  %v1750_v15 = vpop.f32.mrb[59].mxu0  ;;  %v8187_v44 = vmul.f32 -1.442695, %v9415_v12 }
 0x5c7   :  { %10629 = vrcp.f32 %v1603_v36  ;;  %v8185_v45 = vmul.f32 -1.442695, %v1750_v15 }
 0x5c8   :  { %v10612_v17 = vpop.eup %10611  ;;  %10631 = vrcp.f32 %v1606_v59 }
 0x5c9   :  { %v10614_v18 = vpop.eup %10613  ;;  %10633 = vrcp.f32 %v1604_v10  ;;  %v1808_v20 = vadd.f32 1.0, %v10612_v17 }
 0x5ca   :  { %v10616_v22 = vpop.eup %10615  ;;  %v1806_v25 = vadd.f32 1.0, %v10614_v18  ;;  %10635 = vpow2.f32 %v8186_v13 }
 0x5cb   :  { %v10618_v26 = vpop.eup %10617  ;;  %10637 = vrcp.f32 %v1808_v20  ;;  %v1809_v40 = vadd.f32 1.0, %v10616_v22  ;;  %v9418_v11 = vpop.f32.mrb[60].mxu0 }
 0x5cc   :  { %v10620_v37 = vpop.eup %10619  ;;  %10639 = vrcp.f32 %v1806_v25  ;;  %v1807_v16 = vadd.f32 1.0, %v10618_v26  ;;  %v1763_v19 = vpop.f32.mrb[61].mxu0 }
 0x5cd   :  { %v10622_v47 = vpop.eup %10621  ;;  %10641 = vrcp.f32 %v1809_v40  ;;  %v9419_v27 = vpop.f32.mrb[62].mxu0 }
 0x5ce   :  { %v10624_v28 = vpop.eup %10623  ;;  %10643 = vrcp.f32 %v1807_v16  ;;  %v1766_v30 = vpop.f32.mrb[63].mxu0 }
 0x5cf   :  { %v10626_v31 = vpop.eup %10625  ;;  %10645 = vpow2.f32 %v8184_v43 }
 0x5d0   :  { %v10628_v33 = vpop.eup %10627  ;;  %10647 = vpow2.f32 %v8187_v44 }
 0x5d1   :  { %v10630_v29 = vpop.eup %10629  ;;  %10649 = vpow2.f32 %v8185_v45  ;;  %v1633_v60 = vmul.f32 %v10628_v33, %v10620_v37 }
 0x5d2   :  { %v10632_v35 = vpop.eup %10631  ;;  %10651 = vtanh.f32 %v9418_v11  ;;  %v1631_v3 = vmul.f32 %v10630_v29, %v10622_v47 }
 0x5d3   :  { %v10634_v57 = vpop.eup %10633  ;;  %10653 = vtanh.f32 %v1763_v19  ;;  %v9422_v58 = vpop.f32.mrb[64].mxu0  ;;  %v1634_v63 = vmul.f32 %v10632_v35, %v10624_v28 }
 0x5d4   :  { %v10636_v0 = vpop.eup %10635  ;;  %10655 = vtanh.f32 %v9419_v27  ;;  %v8190_v32 = vmul.f32 -1.442695, %v9422_v58  ;;  %v1779_v34 = vpop.f32.mrb[65].mxu0  ;;  %v1632_v36 = vmul.f32 %v10634_v57, %v10626_v31 }
 0x5d5   :  { %v10638_v7 = vpop.eup %10637  ;;  %v1832_v8 = vadd.f32 1.0, %v10636_v0  ;;  %10657 = vtanh.f32 %v1766_v30  ;;  %v8188_v59 = vmul.f32 -1.442695, %v1779_v34  ;;  %v9423_v9 = vpop.f32.mrb[66].mxu0  ;;  %v1636_v10 = vpack.c.bf16 %v1634_v63, %v1633_v60 }
 0x5d6   :  { %v10640_v12 = vpop.eup %10639  ;;  %10659 = vpow2.f32 %v8190_v32  ;;  %v1635_v13 = vpack.c.bf16 %v1632_v36, %v1631_v3  ;;  %v8191_v15 = vmul.f32 -1.442695, %v9423_v9  ;;  %v1782_v17 = vpop.f32.mrb[67].mxu0  ;;  %v12435_v32 = vld [vmem:[%s14847_s7] sm:$0xff]  }
 0x5d7   :  { %v10642_v18 = vpop.eup %10641  ;;  %10661 = vrcp.f32 %v1832_v8  ;;  %v8189_v20 = vmul.f32 -1.442695, %v1782_v17 }
 0x5d8   :  { %v10644_v22 = vpop.eup %10643  ;;  %10663 = vpow2.f32 %v8188_v59  ;;  %9393 = vmatpush3.bf16.msra.mxu1 %v1635_v13 }
 0x5d9   :  { %v10646_v25 = vpop.eup %10645  ;;  %10665 = vpow2.f32 %v8191_v15  ;;  %9394 = vmatprep.subr.bf16.mxu1 %v12565_v46 }
 0x5da   :  { %v10648_v26 = vpop.eup %10647  ;;  %v1830_v40 = vadd.f32 1.0, %v10646_v25  ;;  %10667 = vpow2.f32 %v8189_v20 }
 0x5db   :  { %v10650_v43 = vpop.eup %10649  ;;  %v1833_v11 = vadd.f32 1.0, %v10648_v26 }
 0x5dc   :  { %v10652_v37 = vpop.eup %10651  ;;  %10669 = vrcp.f32 %v1830_v40  ;;  %v1831_v16 = vadd.f32 1.0, %v10650_v43  ;;  %9395 = vmatpush3.bf16.msra.mxu1 %v1636_v10 }
 0x5dd   :  { %v10654_v44 = vpop.eup %10653  ;;  %10671 = vrcp.f32 %v1833_v11  ;;  %v1876_v19 = vmul.f32 %v10652_v37, %v10638_v7  ;;  %9396 = vmatprep.subr.bf16.mxu1 %v12565_v46  ;;  %v13091_v37 = vld [vmem:[%s14847_s7 + $0x8] sm:$0xff]  }
 0x5de   :  { %v10656_v47 = vpop.eup %10655  ;;  %10673 = vrcp.f32 %v1831_v16  ;;  %v1874_v45 = vmul.f32 %v10654_v44, %v10640_v12  ;;  %v13098_v16 = vld [vmem:[%s14847_s7 + $0x10] sm:$0xff]   ;;  %v13105_v44 = vld [vmem:[%s14847_s7 + $0x18] sm:$0xff]  }
 0x5df   :  { %v10658_v27 = vpop.eup %10657  ;;  %v1877_v28 = vmul.f32 %v10656_v47, %v10642_v18  ;;  %v13119_v47 = vld [vmem:[%s14847_s7 + $0x28] sm:$0xff]  }
 0x5e0   :  { %v10660_v30 = vpop.eup %10659  ;;  %v1875_v31 = vmul.f32 %v10658_v27, %v10644_v22  ;;  %9397 = vmatpush3.bf16.msra.mxu1 %v12629_v4  ;;  %v13133_v27 = vld [vmem:[%s14847_s7 + $0x38] sm:$0xff]  }
 0x5e1   :  { %v10662_v33 = vpop.eup %10661  ;;  %9424 = vmatprep.subr.bf16.mxu1 %v1635_v13  ;;  %v1860_v57 = vadd.f32 1.0, %v10660_v30 }
 0x5e2   :  { %v10664_v29 = vpop.eup %10663  ;;  %v1872_v35 = vmul.f32 %v10662_v33, %v12942_v23 }
 0x5e3   :  { %v10666_v58 = vpop.eup %10665  ;;  %v1858_v60 = vadd.f32 1.0, %v10664_v29  ;;  %9399 = vmatmul.mubr.msk.bf16.vlgmr.msra.gmra.mrb[52].mxu1 %vm365_vm2, %v12900_v21  ;;  %10675 = vrcp.f32 %v1860_v57 }
 0x5e4   :  { %v10668_v63 = vpop.eup %10667  ;;  %v13059_v0 = vadd.f32 %v1876_v19, %v1872_v35  ;;  %9425 = vmatpush3.bf16.msra.mxu1 %v1635_v13  ;;  %9434 = vmatprep.mubr.msk.bf16.mxu1 %vm956_vm7, %v12435_v32  ;;  %v1861_v34 = vadd.f32 1.0, %v10666_v58  ;;  %v13112_v19 = vld [vmem:[%s14847_s7 + $0x20] sm:$0xff]  }
 0x5e5   :  { %9426 = vmatprep.subr.bf16.mxu1 %v1636_v10  ;;  %v1859_v23 = vadd.f32 1.0, %v10668_v63  ;;  %10677 = vrcp.f32 %v1858_v60 }
 0x5e6   :  { %v10670_v3 = vpop.eup %10669  ;;  %10679 = vtanh.f32 %v13059_v0 }
 0x5e7   :  { %v10672_v36 = vpop.eup %10671  ;;  %v1870_v7 = vmul.f32 %v10670_v3, %v12945_v39  ;;  %10681 = vrcp.f32 %v1861_v34 }
 0x5e8   :  { %v10674_v21 = vpop.eup %10673  ;;  %v1873_v8 = vmul.f32 %v10672_v36, %v12948_v41  ;;  %9427 = vmatpush3.bf16.msra.mxu1 %v1636_v10  ;;  %10683 = vrcp.f32 %v1859_v23 }
 0x5e9   :  { %v1871_v59 = vmul.f32 %v10674_v21, %v12951_v14  ;;  %v13069_v9 = vadd.f32 %v1874_v45, %v1870_v7  ;;  %v13126_v45 = vld [vmem:[%s14847_s7 + $0x30] sm:$0xff]  }
 0x5ea   :  { %v13071_v12 = vadd.f32 %v1877_v28, %v1873_v8 }
 0x5eb   :  { %10685 = vtanh.f32 %v13069_v9  ;;  %v13074_v13 = vadd.f32 %v1875_v31, %v1871_v59 }
 0x5ec   :  { %10687 = vtanh.f32 %v13071_v12 }
 0x5ed   :  { %10689 = vtanh.f32 %v13074_v13  ;;  %v10676_v39 = vpop.eup %10675 }
 0x5ef   :  { %v10678_v41 = vpop.eup %10677 }
 0x5f0   :  { %v10680_v15 = vpop.eup %10679 }
 0x5f1   :  { %v10682_v10 = vpop.eup %10681  ;;  %v1888_v22 = vmul.f32 %v10680_v15, %v10676_v39 }
 0x5f2   :  { %v10684_v17 = vpop.eup %10683 }
 0x5f5   :  { %v10686_v14 = vpop.eup %10685 }
 0x5f6   :  { %v10688_v18 = vpop.eup %10687  ;;  %v1886_v26 = vmul.f32 %v10686_v14, %v10678_v41 }
 0x5f7   :  { %v10690_v20 = vpop.eup %10689  ;;  %v1889_v25 = vmul.f32 %v10688_v18, %v10682_v10 }
 0x5f8   :  { %v1887_v40 = vmul.f32 %v10690_v20, %v10684_v17 }
 0x5f9   :  { %v13078_v43 = vpack.c.bf16 %v1889_v25, %v1888_v22 }
 0x5fa   :  { %v13080_v11 = vpack.c.bf16 %v1887_v40, %v1886_v26 }
 0x5fc   :  { %9428 = vmatprep.subr.bf16.mxu1 %v13080_v11 }
 0x5fd   :  { %9429 = vmatpush3.bf16.msra.mxu1 %v13080_v11 }
 0x5fe   :  { %9430 = vmatprep.subr.bf16.mxu1 %v13078_v43 }
 0x601   :  { %9431 = vmatpush3.bf16.msra.mxu1 %v13078_v43 }
 0x602   :  { %9432 = vmatprep.subr.bf16.mxu1 %v12629_v4 }
 0x605   :  { %9433 = vmatpush3.bf16.msra.mxu1 %v12629_v4 }
 0x608   :  { %9435 = vmatmul.mubr.msk.bf16.vlgmr.msra.gmra.mrb[56].mxu1 %vm956_vm7, %v13091_v37 }
 0x609   :  { %9438 = vmatprep.mubr.msk.bf16.mxu1 %vm956_vm7, %v13098_v16 }
 0x610   :  { %9439 = vmatmul.mubr.msk.bf16.gmra.mrb[60].mxu1 %vm956_vm7, %v13105_v44 }
 0x611   :  { %9442 = vmatprep.mubr.msk.bf16.mxu1 %vm956_vm7, %v13112_v19 }
 0x618   :  { %9443 = vmatmul.mubr.msk.bf16.gmra.mrb[64].mxu1 %vm956_vm7, %v13119_v47 }
 0x619   :  { %9446 = vmatprep.mubr.msk.bf16.mxu1 %vm956_vm7, %v13126_v45 }
 0x620   :  { %9447 = vmatmul.mubr.msk.bf16.gmra.mrb[68].mxu1 %vm956_vm7, %v13133_v27 }
 0x621   :  { %9492 = vmatprep.mubr.msk.bf16.mxu1 %vm956_vm7, %v12435_v32 }
 0x6b6   :  { %v1671_v28 = vpop.f32.mrb[52].mxu1 }
 0x6b7   :  { %vm1677_vm12 = vcmp.ge.f32.partialorder %v1671_v28, 0.0  ;;  %v1678_v30 = vmul.f32 %v1671_v28, %v12931_v38  ;;  %v9400_v31 = vpop.f32.mrb[53].mxu1 }
 0x6b8   :  { %v1674_v33 = vpop.f32.mrb[54].mxu1 }
 0x6b9   :  { %v1679_v29 = vsel %vm1677_vm12, %v1671_v28, %v1678_v30  ;;  %v9401_v35 = vpop.f32.mrb[55].mxu1  ;;  %vm8010_vm12 = vcmask 64512  }
 0x6ba   :  { %v1680_v57 = vmul.f32 %v1679_v29, %v12934_v42 }
 0x6bc   :  { %v1681_v58 = vsel %vm1229_vm10, %v1680_v57, 0.0 }
 0x6bd   :  { %v1682_v60 = vrot.slane %v1681_v58, 4 }
 0x6bf   :  { %v1683_v63 = vadd.f32 %v1682_v60, %v1681_v58 }
 0x6c1   :  { %v1684_v34 = vrot.slane %v1683_v63, 2 }
 0x6c3   :  { %v1685_v3 = vadd.f32 %v1684_v34, %v1683_v63 }
 0x6c5   :  { %v1686_v23 = vrot.slane %v1685_v3, 1 }
 0x6c7   :  { %v1687_v36 = vadd.f32 %v1686_v23, %v1685_v3 }
 0x6c9   :  { %1688 = vst.msk [vmem:[#allocation2 + $0x1] sm:$0x1] %vm1237_vm11, %v1687_v36 }
 0x6db   :  { %v9436_v32 = vpop.f32.mrb[56].mxu1 }
 0x6dc   :  { %v8202_v7 = vmul.f32 -1.442695, %v9436_v32  ;;  %v1926_v21 = vpop.f32.mrb[57].mxu1 }
 0x6dd   :  { %v8200_v8 = vmul.f32 -1.442695, %v1926_v21  ;;  %v9437_v59 = vpop.f32.mrb[58].mxu1 }
 0x6de   :  { %10691 = vpow2.f32 %v8202_v7  ;;  %v8203_v39 = vmul.f32 -1.442695, %v9437_v59  ;;  %v1929_v41 = vpop.f32.mrb[59].mxu1 }
 0x6df   :  { %10693 = vpow2.f32 %v8200_v8  ;;  %v8201_v15 = vmul.f32 -1.442695, %v1929_v41 }
 0x6e0   :  { %10695 = vpow2.f32 %v8203_v39 }
 0x6e1   :  { %10697 = vpow2.f32 %v8201_v15 }
 0x6e3   :  { %v9440_v10 = vpop.f32.mrb[60].mxu1 }
 0x6e4   :  { %v8206_v17 = vmul.f32 -1.442695, %v9440_v10  ;;  %v1942_v14 = vpop.f32.mrb[61].mxu1 }
 0x6e5   :  { %v8204_v18 = vmul.f32 -1.442695, %v1942_v14  ;;  %v9441_v20 = vpop.f32.mrb[62].mxu1 }
 0x6e6   :  { %10699 = vpow2.f32 %v8206_v17  ;;  %v8207_v22 = vmul.f32 -1.442695, %v9441_v20  ;;  %v1945_v25 = vpop.f32.mrb[63].mxu1 }
 0x6e7   :  { %10701 = vpow2.f32 %v8204_v18  ;;  %v8205_v26 = vmul.f32 -1.442695, %v1945_v25 }
 0x6e8   :  { %v10692_v40 = vpop.eup %10691  ;;  %10703 = vpow2.f32 %v8207_v22 }
 0x6e9   :  { %v10694_v28 = vpop.eup %10693  ;;  %v2003_v30 = vadd.f32 1.0, %v10692_v40  ;;  %10705 = vpow2.f32 %v8205_v26 }
 0x6ea   :  { %v10696_v31 = vpop.eup %10695  ;;  %v2001_v33 = vadd.f32 1.0, %v10694_v28 }
 0x6eb   :  { %v10698_v29 = vpop.eup %10697  ;;  %10707 = vrcp.f32 %v2003_v30  ;;  %v2004_v35 = vadd.f32 1.0, %v10696_v31  ;;  %v9444_v57 = vpop.f32.mrb[64].mxu1 }
 0x6ec   :  { %10709 = vrcp.f32 %v2001_v33  ;;  %v2002_v58 = vadd.f32 1.0, %v10698_v29  ;;  %v1958_v60 = vpop.f32.mrb[65].mxu1 }
 0x6ed   :  { %10711 = vrcp.f32 %v2004_v35  ;;  %v9445_v63 = vpop.f32.mrb[66].mxu1 }
 0x6ee   :  { %10713 = vrcp.f32 %v2002_v58  ;;  %v1961_v34 = vpop.f32.mrb[67].mxu1 }
 0x6ef   :  { %10715 = vtanh.f32 %v9444_v57 }
 0x6f0   :  { %v10700_v3 = vpop.eup %10699  ;;  %10717 = vtanh.f32 %v1958_v60 }
 0x6f1   :  { %v10702_v23 = vpop.eup %10701  ;;  %v2027_v36 = vadd.f32 1.0, %v10700_v3  ;;  %10719 = vtanh.f32 %v9445_v63 }
 0x6f2   :  { %v10704_v32 = vpop.eup %10703  ;;  %v2025_v7 = vadd.f32 1.0, %v10702_v23  ;;  %10721 = vtanh.f32 %v1961_v34 }
 0x6f3   :  { %v10706_v21 = vpop.eup %10705  ;;  %10723 = vrcp.f32 %v2027_v36  ;;  %v2028_v8 = vadd.f32 1.0, %v10704_v32  ;;  %v9448_v59 = vpop.f32.mrb[68].mxu1 }
 0x6f4   :  { %10725 = vrcp.f32 %v2025_v7  ;;  %v2026_v39 = vadd.f32 1.0, %v10706_v21  ;;  %v8210_v41 = vmul.f32 -1.442695, %v9448_v59  ;;  %v1974_v15 = vpop.f32.mrb[69].mxu1 }
 0x6f5   :  { %v10708_v10 = vpop.eup %10707  ;;  %10727 = vrcp.f32 %v2028_v8  ;;  %v8208_v17 = vmul.f32 -1.442695, %v1974_v15  ;;  %v9449_v14 = vpop.f32.mrb[70].mxu1 }
 0x6f6   :  { %v10710_v18 = vpop.eup %10709  ;;  %10729 = vrcp.f32 %v2026_v39  ;;  %v8211_v20 = vmul.f32 -1.442695, %v9449_v14  ;;  %v1977_v22 = vpop.f32.mrb[71].mxu1 }
 0x6f7   :  { %v10712_v25 = vpop.eup %10711  ;;  %10731 = vpow2.f32 %v8210_v41  ;;  %v8209_v26 = vmul.f32 -1.442695, %v1977_v22 }
 0x6f8   :  { %v10714_v40 = vpop.eup %10713  ;;  %10733 = vpow2.f32 %v8208_v17 }
 0x6f9   :  { %v10716_v28 = vpop.eup %10715  ;;  %10735 = vpow2.f32 %v8211_v20 }
 0x6fa   :  { %v10718_v30 = vpop.eup %10717  ;;  %v2071_v31 = vmul.f32 %v10716_v28, %v10708_v10  ;;  %10737 = vpow2.f32 %v8209_v26 }
 0x6fb   :  { %v10720_v33 = vpop.eup %10719  ;;  %v2069_v29 = vmul.f32 %v10718_v30, %v10710_v18 }
 0x6fc   :  { %v10722_v35 = vpop.eup %10721  ;;  %v2072_v57 = vmul.f32 %v10720_v33, %v10712_v25 }
 0x6fd   :  { %v10724_v58 = vpop.eup %10723  ;;  %v2070_v60 = vmul.f32 %v10722_v35, %v10714_v40 }
 0x6fe   :  { %v10726_v63 = vpop.eup %10725  ;;  %v2067_v34 = vmul.f32 %v10724_v58, %v13040_v62  ;;  %v8213_v58 = vld [vmem:[%s14842_s2 + $0x18] sm:$0x7f] }
 0x6ff   :  { %v10728_v3 = vpop.eup %10727  ;;  %v2065_v23 = vmul.f32 %v10726_v63, %v13043_v1  ;;  %v13169_v63 = vld [vmem:[%s14848_s8] sm:$0xf] }
 0x700   :  { %v10730_v36 = vpop.eup %10729  ;;  %v2068_v32 = vmul.f32 %v10728_v3, %v13046_v2  ;;  %v13145_v7 = vadd.f32 %v2071_v31, %v2067_v34 }
 0x701   :  { %v10732_v21 = vpop.eup %10731  ;;  %v2066_v8 = vmul.f32 %v10730_v36, %v13049_v5  ;;  %v13148_v59 = vadd.f32 %v2069_v29, %v2065_v23 }
 0x702   :  { %v10734_v39 = vpop.eup %10733  ;;  %10739 = vtanh.f32 %v13145_v7  ;;  %v13151_v41 = vadd.f32 %v2072_v57, %v2068_v32  ;;  %v2055_v15 = vadd.f32 1.0, %v10732_v21 }
 0x703   :  { %v10736_v62 = vpop.eup %10735  ;;  %10741 = vtanh.f32 %v13148_v59  ;;  %v13154_v1 = vadd.f32 %v2070_v60, %v2066_v8  ;;  %v2053_v10 = vadd.f32 1.0, %v10734_v39  ;;  %v2141_v60 = vmul.f32 %v8213_v58, %v12671_v24 }
 0x704   :  { %v10738_v2 = vpop.eup %10737  ;;  %10743 = vtanh.f32 %v13151_v41  ;;  %v2056_v17 = vadd.f32 1.0, %v10736_v62 }
 0x705   :  { %10745 = vtanh.f32 %v13154_v1  ;;  %v2054_v5 = vadd.f32 1.0, %v10738_v2  ;;  %v2142_v34 = vsel %vm648_vm3, %v2141_v60, 1.0 }
 0x706   :  { %10747 = vrcp.f32 %v2055_v15  ;;  %v2143_v3 = vpack.c.bf16 %v2142_v34, %v2142_v34 }
 0x707   :  { %10749 = vrcp.f32 %v2053_v10 }
 0x708   :  { %10751 = vrcp.f32 %v2056_v17  ;;  %v2145_v23 = vsel %vm717_vm4, %v2143_v3, 0 }
 0x709   :  { %10753 = vrcp.f32 %v2054_v5 }
 0x70c   :  { %v10740_v14 = vpop.eup %10739 }
 0x70d   :  { %v10742_v18 = vpop.eup %10741 }
 0x70e   :  { %v10744_v20 = vpop.eup %10743 }
 0x70f   :  { %v10746_v22 = vpop.eup %10745 }
 0x710   :  { %v10748_v25 = vpop.eup %10747 }
 0x711   :  { %v10750_v26 = vpop.eup %10749  ;;  %v2083_v30 = vmul.f32 %v10748_v25, %v10740_v14 }
 0x712   :  { %v10752_v40 = vpop.eup %10751  ;;  %v2081_v33 = vmul.f32 %v10750_v26, %v10742_v18 }
 0x713   :  { %v10754_v28 = vpop.eup %10753  ;;  %v2084_v31 = vmul.f32 %v10752_v40, %v10744_v20 }
 0x714   :  { %v2082_v29 = vmul.f32 %v10754_v28, %v10746_v22 }
 0x715   :  { %v2086_v35 = vpack.c.bf16 %v2084_v31, %v2083_v30 }
 0x716   :  { %v2085_v57 = vpack.c.bf16 %v2082_v29, %v2081_v33 }
 0x718   :  { %9451 = vmatpush3.bf16.msra.mxu0 %v2085_v57  ;;  %9482 = vmatprep.subr.bf16.mxu1 %v2085_v57 }
 0x719   :  { %9483 = vmatpush3.bf16.msra.mxu1 %v2085_v57  ;;  %9452 = vmatprep.subr.bf16.mxu0 %v12565_v46 }
 0x71a   :  { %9484 = vmatprep.subr.bf16.mxu1 %v2086_v35 }
 0x71c   :  { %9453 = vmatpush3.bf16.msra.mxu0 %v2086_v35 }
 0x71d   :  { %9485 = vmatpush3.bf16.msra.mxu1 %v2086_v35  ;;  %9454 = vmatprep.subr.bf16.mxu0 %v12565_v46 }
 0x720   :  { %9455 = vmatpush3.bf16.msra.mxu0 %v12629_v4 }
 0x721   :  { %9460 = vmatprep.subr.bf16.mxu0 %v13080_v11 }
 0x723   :  { %9457 = vmatmul.mubr.msk.bf16.vlgmr.msra.gmra.mrb[68].mxu0 %vm365_vm2, %v13169_v63 }
 0x724   :  { %9461 = vmatpush3.bf16.msra.mxu0 %v13080_v11  ;;  %9466 = vmatprep.mubr.msk.bf16.mxu0 %vm692_vm5, %v12982_v48 }
 0x725   :  { %9462 = vmatprep.subr.bf16.mxu0 %v13078_v43 }
 0x728   :  { %9463 = vmatpush3.bf16.msra.mxu0 %v13078_v43 }
 0x729   :  { %10217 = vmatprep.subr.msk.bf16.mxu0 %vm717_vm4, %v2143_v3 }
 0x72c   :  { %9465 = vmatpush3.bf16.msra.mxu0 %v2145_v23 }
 0x72d   :  { %9508 = vmatprep.subr.bf16.mxu0 %v12565_v46 }
 0x72f   :  { %9467 = vmatmul.mubr.msk.bf16.vlgmr.msra.gmra.mrb[72].mxu0 %vm692_vm5, %v12989_v49 }
 0x730   :  { %9470 = vmatprep.mubr.msk.bf16.mxu0 %vm692_vm5, %v12996_v50 }
 0x737   :  { %9471 = vmatmul.mubr.msk.bf16.gmra.mrb[76].mxu0 %vm692_vm5, %v13003_v51 }
 0x738   :  { %9474 = vmatprep.mubr.msk.bf16.mxu0 %vm692_vm5, %v13010_v52 }
 0x73f   :  { %9475 = vmatmul.mubr.msk.bf16.gmra.mrb[80].mxu0 %vm692_vm5, %v13017_v53 }
 0x740   :  { %9478 = vmatprep.mubr.msk.bf16.mxu0 %vm692_vm5, %v13024_v54 }
 0x747   :  { %9479 = vmatmul.mubr.msk.bf16.gmra.mrb[84].mxu0 %vm692_vm5, %v13031_v6 }
 0x748   :  { %9514 = vmatprep.mubr.msk.bf16.mxu0 %vm12566_vm6, %v12565_v46 }
 0x7f6   :  { %v2121_v48 = vpop.f32.mrb[68].mxu0 }
 0x7f7   :  { %vm2127_vm13 = vcmp.ge.f32.partialorder %v2121_v48, 0.0  ;;  %v2128_v49 = vmul.f32 %v2121_v48, %v12931_v38  ;;  %v9458_v50 = vpop.f32.mrb[69].mxu0 }
 0x7f8   :  { %v2124_v51 = vpop.f32.mrb[70].mxu0 }
 0x7f9   :  { %v2129_v43 = vsel %vm2127_vm13, %v2121_v48, %v2128_v49  ;;  %v9459_v52 = vpop.f32.mrb[71].mxu0 }
 0x7fa   :  { %v2130_v11 = vmul.f32 %v2129_v43, %v12934_v42 }
 0x7fc   :  { %v2131_v53 = vsel %vm1229_vm10, %v2130_v11, 0.0 }
 0x7fd   :  { %v2132_v36 = vrot.slane %v2131_v53, 4 }
 0x7ff   :  { %v2133_v54 = vadd.f32 %v2132_v36, %v2131_v53 }
 0x801   :  { %v2134_v32 = vrot.slane %v2133_v54, 2 }
 0x802   :  { %v9468_v21 = vpop.f32.mrb[72].mxu0 }
 0x803   :  { %v2135_v6 = vadd.f32 %v2134_v32, %v2133_v54  ;;  %v8224_v8 = vmul.f32 -1.442695, %v9468_v21  ;;  %v2181_v39 = vpop.f32.mrb[73].mxu0 }
 0x804   :  { %v8222_v15 = vmul.f32 -1.442695, %v2181_v39  ;;  %v9469_v62 = vpop.f32.mrb[74].mxu0 }
 0x805   :  { %v2136_v10 = vrot.slane %v2135_v6, 1  ;;  %10755 = vpow2.f32 %v8224_v8  ;;  %v8225_v2 = vmul.f32 -1.442695, %v9469_v62  ;;  %v2184_v17 = vpop.f32.mrb[75].mxu0 }
 0x806   :  { %10757 = vpow2.f32 %v8222_v15  ;;  %v8223_v5 = vmul.f32 -1.442695, %v2184_v17 }
 0x807   :  { %v2137_v14 = vadd.f32 %v2136_v10, %v2135_v6  ;;  %10759 = vpow2.f32 %v8225_v2 }
 0x808   :  { %10761 = vpow2.f32 %v8223_v5 }
 0x809   :  { %2138 = vst.msk [vmem:[#allocation2 + $0x2] sm:$0x1] %vm1237_vm11, %v2137_v14 }
 0x80a   :  { %v9472_v18 = vpop.f32.mrb[76].mxu0 }
 0x80b   :  { %v8228_v20 = vmul.f32 -1.442695, %v9472_v18  ;;  %v2197_v22 = vpop.f32.mrb[77].mxu0 }
 0x80c   :  { %v8226_v25 = vmul.f32 -1.442695, %v2197_v22  ;;  %v9473_v26 = vpop.f32.mrb[78].mxu0 }
 0x80d   :  { %10763 = vpow2.f32 %v8228_v20  ;;  %v8229_v40 = vmul.f32 -1.442695, %v9473_v26  ;;  %v2200_v28 = vpop.f32.mrb[79].mxu0 }
 0x80e   :  { %10765 = vpow2.f32 %v8226_v25  ;;  %v8227_v30 = vmul.f32 -1.442695, %v2200_v28 }
 0x80f   :  { %v10756_v31 = vpop.eup %10755  ;;  %10767 = vpow2.f32 %v8229_v40 }
 0x810   :  { %v10758_v33 = vpop.eup %10757  ;;  %v2258_v29 = vadd.f32 1.0, %v10756_v31  ;;  %10769 = vpow2.f32 %v8227_v30 }
 0x811   :  { %v10760_v35 = vpop.eup %10759  ;;  %v2256_v57 = vadd.f32 1.0, %v10758_v33 }
 0x812   :  { %v10762_v58 = vpop.eup %10761  ;;  %10771 = vrcp.f32 %v2258_v29  ;;  %v2259_v60 = vadd.f32 1.0, %v10760_v35  ;;  %v9476_v34 = vpop.f32.mrb[80].mxu0 }
 0x813   :  { %10773 = vrcp.f32 %v2256_v57  ;;  %v2257_v3 = vadd.f32 1.0, %v10762_v58  ;;  %v2213_v23 = vpop.f32.mrb[81].mxu0 }
 0x814   :  { %10775 = vrcp.f32 %v2259_v60  ;;  %v9477_v48 = vpop.f32.mrb[82].mxu0 }
 0x815   :  { %10777 = vrcp.f32 %v2257_v3  ;;  %v2216_v49 = vpop.f32.mrb[83].mxu0 }
 0x816   :  { %10779 = vtanh.f32 %v9476_v34 }
 0x817   :  { %v10764_v50 = vpop.eup %10763  ;;  %10781 = vtanh.f32 %v2213_v23 }
 0x818   :  { %v10766_v51 = vpop.eup %10765  ;;  %v2282_v43 = vadd.f32 1.0, %v10764_v50  ;;  %10783 = vtanh.f32 %v9477_v48 }
 0x819   :  { %v10768_v52 = vpop.eup %10767  ;;  %v2280_v11 = vadd.f32 1.0, %v10766_v51  ;;  %10785 = vtanh.f32 %v2216_v49 }
 0x81a   :  { %v10770_v53 = vpop.eup %10769  ;;  %10787 = vrcp.f32 %v2282_v43  ;;  %v2283_v36 = vadd.f32 1.0, %v10768_v52  ;;  %v9480_v54 = vpop.f32.mrb[84].mxu0 }
 0x81b   :  { %10789 = vrcp.f32 %v2280_v11  ;;  %v2281_v32 = vadd.f32 1.0, %v10770_v53  ;;  %v8232_v21 = vmul.f32 -1.442695, %v9480_v54  ;;  %v2229_v6 = vpop.f32.mrb[85].mxu0 }
 0x81c   :  { %v10772_v8 = vpop.eup %10771  ;;  %10791 = vrcp.f32 %v2283_v36  ;;  %v8230_v39 = vmul.f32 -1.442695, %v2229_v6  ;;  %v9481_v15 = vpop.f32.mrb[86].mxu0 }
 0x81d   :  { %v10774_v62 = vpop.eup %10773  ;;  %10793 = vrcp.f32 %v2281_v32  ;;  %v8233_v10 = vmul.f32 -1.442695, %v9481_v15  ;;  %v2232_v2 = vpop.f32.mrb[87].mxu0 }
 0x81e   :  { %v10776_v17 = vpop.eup %10775  ;;  %10795 = vpow2.f32 %v8232_v21  ;;  %v8231_v5 = vmul.f32 -1.442695, %v2232_v2 }
 0x81f   :  { %v10778_v14 = vpop.eup %10777  ;;  %10797 = vpow2.f32 %v8230_v39 }
 0x820   :  { %v10780_v18 = vpop.eup %10779  ;;  %10799 = vpow2.f32 %v8233_v10 }
 0x821   :  { %v10782_v20 = vpop.eup %10781  ;;  %v2326_v22 = vmul.f32 %v10780_v18, %v10772_v8  ;;  %10801 = vpow2.f32 %v8231_v5  ;;  %v8255_v5 = vld [vmem:[%s14842_s2 + $0x20] sm:$0x7f] }
 0x822   :  { %v10784_v25 = vpop.eup %10783  ;;  %v2324_v26 = vmul.f32 %v10782_v20, %v10774_v62 }
 0x823   :  { %v10786_v40 = vpop.eup %10785  ;;  %v2327_v28 = vmul.f32 %v10784_v25, %v10776_v17  ;;  %v13294_v25 = vld [vmem:[%s14846_s6 + $0x38] sm:$0xff]  }
 0x824   :  { %v10788_v30 = vpop.eup %10787  ;;  %v2325_v31 = vmul.f32 %v10786_v40, %v10778_v14  ;;  %v2591_v14 = vmul.f32 %v8255_v5, %v12671_v24 }
 0x825   :  { %v10790_v33 = vpop.eup %10789  ;;  %v2322_v29 = vmul.f32 %v10788_v30, %v13059_v0 }
 0x826   :  { %v10792_v35 = vpop.eup %10791  ;;  %v2320_v57 = vmul.f32 %v10790_v33, %v13069_v9  ;;  %v2592_v18 = vsel %vm648_vm3, %v2591_v14, 1.0 }
 0x827   :  { %v10794_v58 = vpop.eup %10793  ;;  %v2323_v60 = vmul.f32 %v10792_v35, %v13071_v12  ;;  %v13205_v34 = vadd.f32 %v2326_v22, %v2322_v29  ;;  %v2593_v20 = vpack.c.bf16 %v2592_v18, %v2592_v18 }
 0x828   :  { %v10796_v3 = vpop.eup %10795  ;;  %v2321_v23 = vmul.f32 %v10794_v58, %v13074_v13  ;;  %v13208_v48 = vadd.f32 %v2324_v26, %v2320_v57 }
 0x829   :  { %v10798_v49 = vpop.eup %10797  ;;  %10803 = vtanh.f32 %v13205_v34  ;;  %v13211_v50 = vadd.f32 %v2327_v28, %v2323_v60  ;;  %v2310_v51 = vadd.f32 1.0, %v10796_v3  ;;  %v2595_v22 = vsel %vm717_vm4, %v2593_v20, 0 }
 0x82a   :  { %v10800_v0 = vpop.eup %10799  ;;  %10805 = vtanh.f32 %v13208_v48  ;;  %v13214_v9 = vadd.f32 %v2325_v31, %v2321_v23  ;;  %v2308_v43 = vadd.f32 1.0, %v10798_v49 }
 0x82b   :  { %v10802_v12 = vpop.eup %10801  ;;  %10807 = vtanh.f32 %v13211_v50  ;;  %v2311_v52 = vadd.f32 1.0, %v10800_v0 }
 0x82c   :  { %10809 = vtanh.f32 %v13214_v9  ;;  %v2309_v13 = vadd.f32 1.0, %v10802_v12 }
 0x82d   :  { %10811 = vrcp.f32 %v2310_v51 }
 0x82e   :  { %10813 = vrcp.f32 %v2308_v43 }
 0x82f   :  { %10815 = vrcp.f32 %v2311_v52 }
 0x830   :  { %10817 = vrcp.f32 %v2309_v13 }
 0x833   :  { %v10804_v11 = vpop.eup %10803 }
 0x834   :  { %v10806_v53 = vpop.eup %10805 }
 0x835   :  { %v10808_v36 = vpop.eup %10807 }
 0x836   :  { %v10810_v54 = vpop.eup %10809 }
 0x837   :  { %v10812_v32 = vpop.eup %10811 }
 0x838   :  { %v10814_v21 = vpop.eup %10813  ;;  %v2338_v39 = vmul.f32 %v10812_v32, %v10804_v11 }
 0x839   :  { %v10816_v6 = vpop.eup %10815  ;;  %v2336_v62 = vmul.f32 %v10814_v21, %v10806_v53 }
 0x83a   :  { %v10818_v8 = vpop.eup %10817  ;;  %v2339_v15 = vmul.f32 %v10816_v6, %v10808_v36 }
 0x83b   :  { %v2337_v10 = vmul.f32 %v10818_v8, %v10810_v54 }
 0x83c   :  { %v2341_v2 = vpack.c.bf16 %v2339_v15, %v2338_v39 }
 0x83d   :  { %v2340_v17 = vpack.c.bf16 %v2337_v10, %v2336_v62 }
 0x83f   :  { %9486 = vmatprep.subr.bf16.mxu1 %v2340_v17 }
 0x840   :  { %9487 = vmatpush3.bf16.msra.mxu1 %v2340_v17 }
 0x841   :  { %9488 = vmatprep.subr.bf16.mxu1 %v2341_v2 }
 0x844   :  { %9489 = vmatpush3.bf16.msra.mxu1 %v2341_v2 }
 0x845   :  { %9490 = vmatprep.subr.bf16.mxu1 %v12629_v4 }
 0x848   :  { %9491 = vmatpush3.bf16.msra.mxu1 %v12629_v4 }
 0x849   :  { %9518 = vmatprep.subr.bf16.mxu1 %v2340_v17 }
 0x84b   :  { %9493 = vmatmul.mubr.msk.bf16.vlgmr.msra.gmra.mrb[72].mxu1 %vm956_vm7, %v13091_v37  ;;  %v13245_v37 = vld [vmem:[%s14846_s6] sm:$0xff]  }
 0x84c   :  { %9519 = vmatpush3.bf16.msra.mxu1 %v2340_v17  ;;  %9496 = vmatprep.mubr.msk.bf16.mxu1 %vm956_vm7, %v13098_v16  ;;  %v13252_v16 = vld [vmem:[%s14846_s6 + $0x8] sm:$0xff]  }
 0x84d   :  { %9520 = vmatprep.subr.bf16.mxu1 %v2341_v2 }
 0x850   :  { %9521 = vmatpush3.bf16.msra.mxu1 %v2341_v2 }
 0x851   :  { %10218 = vmatprep.subr.msk.bf16.mxu1 %vm717_vm4, %v2593_v20 }
 0x853   :  { %9497 = vmatmul.mubr.msk.bf16.gmra.mrb[76].mxu1 %vm956_vm7, %v13105_v44  ;;  %v13259_v44 = vld [vmem:[%s14846_s6 + $0x10] sm:$0xff]  }
 0x854   :  { %9523 = vmatpush3.bf16.msra.mxu1 %v2595_v22  ;;  %9500 = vmatprep.mubr.msk.bf16.mxu1 %vm956_vm7, %v13112_v19  ;;  %v13266_v19 = vld [vmem:[%s14846_s6 + $0x18] sm:$0xff]  }
 0x855   :  { %9566 = vmatprep.subr.bf16.mxu1 %v12565_v46 }
 0x85b   :  { %9501 = vmatmul.mubr.msk.bf16.gmra.mrb[80].mxu1 %vm956_vm7, %v13119_v47  ;;  %v13273_v47 = vld [vmem:[%s14846_s6 + $0x20] sm:$0xff]  }
 0x85c   :  { %9504 = vmatprep.mubr.msk.bf16.mxu1 %vm956_vm7, %v13126_v45  ;;  %v13280_v45 = vld [vmem:[%s14846_s6 + $0x28] sm:$0xff]  }
 0x863   :  { %9505 = vmatmul.mubr.msk.bf16.gmra.mrb[84].mxu1 %vm956_vm7, %v13133_v27  ;;  %v13287_v27 = vld [vmem:[%s14846_s6 + $0x30] sm:$0xff]  }
 0x864   :  { %9524 = vmatprep.mubr.msk.bf16.mxu1 %vm692_vm5, %v13245_v37 }
 0x86b   :  { %9525 = vmatmul.mubr.msk.bf16.vlgmr.msra.gmra.mrb[88].mxu1 %vm692_vm5, %v13252_v16 }
 0x86c   :  { %9528 = vmatprep.mubr.msk.bf16.mxu1 %vm692_vm5, %v13259_v44 }
 0x873   :  { %9529 = vmatmul.mubr.msk.bf16.gmra.mrb[92].mxu1 %vm692_vm5, %v13266_v19 }
 0x874   :  { %9532 = vmatprep.mubr.msk.bf16.mxu1 %vm692_vm5, %v13273_v47 }
 0x87b   :  { %9533 = vmatmul.mubr.msk.bf16.gmra.mrb[96].mxu1 %vm692_vm5, %v13280_v45 }
 0x87c   :  { %9536 = vmatprep.mubr.msk.bf16.mxu1 %vm692_vm5, %v13287_v27 }
 0x883   :  { %9537 = vmatmul.mubr.msk.bf16.gmra.mrb[100].mxu1 %vm692_vm5, %v13294_v25 }
 0x884   :  { %9572 = vmatprep.mubr.msk.bf16.mxu1 %vm12566_vm6, %v12565_v46 }
 0x91e   :  { %v9494_v26 = vpop.f32.mrb[72].mxu1 }
 0x91f   :  { %v8244_v40 = vmul.f32 -1.442695, %v9494_v26  ;;  %v2376_v28 = vpop.f32.mrb[73].mxu1 }
 0x920   :  { %v8242_v30 = vmul.f32 -1.442695, %v2376_v28  ;;  %v9495_v31 = vpop.f32.mrb[74].mxu1 }
 0x921   :  { %10819 = vpow2.f32 %v8244_v40  ;;  %v8245_v33 = vmul.f32 -1.442695, %v9495_v31  ;;  %v2379_v29 = vpop.f32.mrb[75].mxu1 }
 0x922   :  { %10821 = vpow2.f32 %v8242_v30  ;;  %v8243_v35 = vmul.f32 -1.442695, %v2379_v29 }
 0x923   :  { %10823 = vpow2.f32 %v8245_v33 }
 0x924   :  { %10825 = vpow2.f32 %v8243_v35 }
 0x926   :  { %v9498_v57 = vpop.f32.mrb[76].mxu1 }
 0x927   :  { %v8248_v58 = vmul.f32 -1.442695, %v9498_v57  ;;  %v2392_v60 = vpop.f32.mrb[77].mxu1 }
 0x928   :  { %v8246_v3 = vmul.f32 -1.442695, %v2392_v60  ;;  %v9499_v23 = vpop.f32.mrb[78].mxu1 }
 0x929   :  { %10827 = vpow2.f32 %v8248_v58  ;;  %v8249_v49 = vmul.f32 -1.442695, %v9499_v23  ;;  %v2395_v51 = vpop.f32.mrb[79].mxu1 }
 0x92a   :  { %10829 = vpow2.f32 %v8246_v3  ;;  %v8247_v0 = vmul.f32 -1.442695, %v2395_v51 }
 0x92b   :  { %v10820_v43 = vpop.eup %10819  ;;  %10831 = vpow2.f32 %v8249_v49 }
 0x92c   :  { %v10822_v12 = vpop.eup %10821  ;;  %v2453_v52 = vadd.f32 1.0, %v10820_v43  ;;  %10833 = vpow2.f32 %v8247_v0 }
 0x92d   :  { %v10824_v13 = vpop.eup %10823  ;;  %v2451_v11 = vadd.f32 1.0, %v10822_v12 }
 0x92e   :  { %v10826_v53 = vpop.eup %10825  ;;  %10835 = vrcp.f32 %v2453_v52  ;;  %v2454_v36 = vadd.f32 1.0, %v10824_v13  ;;  %v9502_v54 = vpop.f32.mrb[80].mxu1 }
 0x92f   :  { %10837 = vrcp.f32 %v2451_v11  ;;  %v2452_v32 = vadd.f32 1.0, %v10826_v53  ;;  %v2408_v21 = vpop.f32.mrb[81].mxu1 }
 0x930   :  { %10839 = vrcp.f32 %v2454_v36  ;;  %v9503_v6 = vpop.f32.mrb[82].mxu1 }
 0x931   :  { %10841 = vrcp.f32 %v2452_v32  ;;  %v2411_v8 = vpop.f32.mrb[83].mxu1 }
 0x932   :  { %10843 = vtanh.f32 %v9502_v54 }
 0x933   :  { %v10828_v39 = vpop.eup %10827  ;;  %10845 = vtanh.f32 %v2408_v21 }
 0x934   :  { %v10830_v15 = vpop.eup %10829  ;;  %v2477_v62 = vadd.f32 1.0, %v10828_v39  ;;  %10847 = vtanh.f32 %v9503_v6 }
 0x935   :  { %v10832_v10 = vpop.eup %10831  ;;  %v2475_v2 = vadd.f32 1.0, %v10830_v15  ;;  %10849 = vtanh.f32 %v2411_v8 }
 0x936   :  { %v10834_v17 = vpop.eup %10833  ;;  %10851 = vrcp.f32 %v2477_v62  ;;  %v2478_v5 = vadd.f32 1.0, %v10832_v10  ;;  %v9506_v14 = vpop.f32.mrb[84].mxu1 }
 0x937   :  { %10853 = vrcp.f32 %v2475_v2  ;;  %v2476_v18 = vadd.f32 1.0, %v10834_v17  ;;  %v8252_v20 = vmul.f32 -1.442695, %v9506_v14  ;;  %v2424_v22 = vpop.f32.mrb[85].mxu1 }
 0x938   :  { %v10836_v26 = vpop.eup %10835  ;;  %10855 = vrcp.f32 %v2478_v5  ;;  %v8250_v40 = vmul.f32 -1.442695, %v2424_v22  ;;  %v9507_v28 = vpop.f32.mrb[86].mxu1 }
 0x939   :  { %v10838_v30 = vpop.eup %10837  ;;  %10857 = vrcp.f32 %v2476_v18  ;;  %v8253_v31 = vmul.f32 -1.442695, %v9507_v28  ;;  %v2427_v33 = vpop.f32.mrb[87].mxu1 }
 0x93a   :  { %v10840_v29 = vpop.eup %10839  ;;  %10859 = vpow2.f32 %v8252_v20  ;;  %v8251_v35 = vmul.f32 -1.442695, %v2427_v33 }
 0x93b   :  { %v10842_v57 = vpop.eup %10841  ;;  %10861 = vpow2.f32 %v8250_v40 }
 0x93c   :  { %v10844_v58 = vpop.eup %10843  ;;  %10863 = vpow2.f32 %v8253_v31 }
 0x93d   :  { %v10846_v60 = vpop.eup %10845  ;;  %v2521_v3 = vmul.f32 %v10844_v58, %v10836_v26  ;;  %10865 = vpow2.f32 %v8251_v35 }
 0x93e   :  { %v10848_v23 = vpop.eup %10847  ;;  %v2519_v49 = vmul.f32 %v10846_v60, %v10838_v30  ;;  %v9526_v51 = vpop.f32.mrb[88].mxu1 }
 0x93f   :  { %v10850_v0 = vpop.eup %10849  ;;  %v2522_v43 = vmul.f32 %v10848_v23, %v10840_v29  ;;  %v8266_v12 = vmul.f32 -1.442695, %v9526_v51  ;;  %v2631_v52 = vpop.f32.mrb[89].mxu1 }
 0x940   :  { %v10852_v13 = vpop.eup %10851  ;;  %v2520_v11 = vmul.f32 %v10850_v0, %v10842_v57  ;;  %v8264_v53 = vmul.f32 -1.442695, %v2631_v52  ;;  %v9527_v36 = vpop.f32.mrb[90].mxu1 }
 0x941   :  { %v10854_v54 = vpop.eup %10853  ;;  %v2517_v32 = vmul.f32 %v10852_v13, %v13145_v7  ;;  %10867 = vpow2.f32 %v8266_v12  ;;  %v8267_v21 = vmul.f32 -1.442695, %v9527_v36  ;;  %v2634_v6 = vpop.f32.mrb[91].mxu1 }
 0x942   :  { %v10856_v8 = vpop.eup %10855  ;;  %v2515_v39 = vmul.f32 %v10854_v54, %v13148_v59  ;;  %10869 = vpow2.f32 %v8264_v53  ;;  %v8265_v15 = vmul.f32 -1.442695, %v2634_v6 }
 0x943   :  { %v10858_v62 = vpop.eup %10857  ;;  %v2518_v10 = vmul.f32 %v10856_v8, %v13151_v41  ;;  %v13303_v2 = vadd.f32 %v2521_v3, %v2517_v32  ;;  %10871 = vpow2.f32 %v8267_v21 }
 0x944   :  { %v10860_v17 = vpop.eup %10859  ;;  %v2516_v5 = vmul.f32 %v10858_v62, %v13154_v1  ;;  %v13306_v14 = vadd.f32 %v2519_v49, %v2515_v39  ;;  %10873 = vpow2.f32 %v8265_v15 }
 0x945   :  { %v10862_v7 = vpop.eup %10861  ;;  %10875 = vtanh.f32 %v13303_v2  ;;  %v13309_v18 = vadd.f32 %v2522_v43, %v2518_v10  ;;  %v2505_v59 = vadd.f32 1.0, %v10860_v17 }
 0x946   :  { %v10864_v20 = vpop.eup %10863  ;;  %10877 = vtanh.f32 %v13306_v14  ;;  %v13312_v22 = vadd.f32 %v2520_v11, %v2516_v5  ;;  %v2503_v41 = vadd.f32 1.0, %v10862_v7  ;;  %v9530_v26 = vpop.f32.mrb[92].mxu1 }
 0x947   :  { %v10866_v40 = vpop.eup %10865  ;;  %10879 = vtanh.f32 %v13309_v18  ;;  %v2506_v1 = vadd.f32 1.0, %v10864_v20  ;;  %v2647_v28 = vpop.f32.mrb[93].mxu1  ;;  %v8270_v33 = vmul.f32 -1.442695, %v9530_v26 }
 0x948   :  { %10881 = vtanh.f32 %v13312_v22  ;;  %v2504_v30 = vadd.f32 1.0, %v10866_v40  ;;  %v9531_v31 = vpop.f32.mrb[94].mxu1  ;;  %v8268_v51 = vmul.f32 -1.442695, %v2647_v28 }
 0x949   :  { %10883 = vrcp.f32 %v2505_v59  ;;  %v2650_v29 = vpop.f32.mrb[95].mxu1  ;;  %v8271_v52 = vmul.f32 -1.442695, %v9531_v31 }
 0x94a   :  { %10885 = vrcp.f32 %v2503_v41  ;;  %v8269_v53 = vmul.f32 -1.442695, %v2650_v29 }
 0x94b   :  { %v10868_v35 = vpop.eup %10867  ;;  %10887 = vrcp.f32 %v2506_v1 }
 0x94c   :  { %v10870_v57 = vpop.eup %10869  ;;  %10889 = vrcp.f32 %v2504_v30  ;;  %v2708_v58 = vadd.f32 1.0, %v10868_v35 }
 0x94d   :  { %v10872_v60 = vpop.eup %10871  ;;  %v2706_v3 = vadd.f32 1.0, %v10870_v57  ;;  %10891 = vpow2.f32 %v8270_v33 }
 0x94e   :  { %v10874_v23 = vpop.eup %10873  ;;  %10893 = vrcp.f32 %v2708_v58  ;;  %v2709_v49 = vadd.f32 1.0, %v10872_v60  ;;  %v9534_v0 = vpop.f32.mrb[96].mxu1 }
 0x94f   :  { %v10876_v43 = vpop.eup %10875  ;;  %10895 = vrcp.f32 %v2706_v3  ;;  %v2707_v12 = vadd.f32 1.0, %v10874_v23  ;;  %v2663_v13 = vpop.f32.mrb[97].mxu1 }
 0x950   :  { %v10878_v11 = vpop.eup %10877  ;;  %10897 = vrcp.f32 %v2709_v49  ;;  %v9535_v36 = vpop.f32.mrb[98].mxu1 }
 0x951   :  { %v10880_v54 = vpop.eup %10879  ;;  %10899 = vrcp.f32 %v2707_v12  ;;  %v2666_v32 = vpop.f32.mrb[99].mxu1 }
 0x952   :  { %v10882_v21 = vpop.eup %10881  ;;  %10901 = vpow2.f32 %v8268_v51 }
 0x953   :  { %v10884_v6 = vpop.eup %10883  ;;  %10903 = vpow2.f32 %v8271_v52 }
 0x954   :  { %v10886_v8 = vpop.eup %10885  ;;  %10905 = vpow2.f32 %v8269_v53  ;;  %v2533_v10 = vmul.f32 %v10884_v6, %v10876_v43 }
 0x955   :  { %v10888_v39 = vpop.eup %10887  ;;  %10907 = vtanh.f32 %v9534_v0  ;;  %v2531_v20 = vmul.f32 %v10886_v8, %v10878_v11 }
 0x956   :  { %v10890_v15 = vpop.eup %10889  ;;  %10909 = vtanh.f32 %v2663_v13  ;;  %v9538_v62 = vpop.f32.mrb[100].mxu1  ;;  %v2534_v17 = vmul.f32 %v10888_v39, %v10880_v54 }
 0x957   :  { %v10892_v5 = vpop.eup %10891  ;;  %10911 = vtanh.f32 %v9535_v36  ;;  %v8274_v7 = vmul.f32 -1.442695, %v9538_v62  ;;  %v2679_v59 = vpop.f32.mrb[101].mxu1  ;;  %v2532_v41 = vmul.f32 %v10890_v15, %v10882_v21 }
 0x958   :  { %v10894_v26 = vpop.eup %10893  ;;  %v2732_v40 = vadd.f32 1.0, %v10892_v5  ;;  %10913 = vtanh.f32 %v2666_v32  ;;  %v8272_v1 = vmul.f32 -1.442695, %v2679_v59  ;;  %v9539_v28 = vpop.f32.mrb[102].mxu1  ;;  %v2536_v30 = vpack.c.bf16 %v2534_v17, %v2533_v10 }
 0x959   :  { %v10896_v31 = vpop.eup %10895  ;;  %10915 = vpow2.f32 %v8274_v7  ;;  %v2535_v33 = vpack.c.bf16 %v2532_v41, %v2531_v20  ;;  %v8275_v29 = vmul.f32 -1.442695, %v9539_v28  ;;  %v2682_v35 = vpop.f32.mrb[103].mxu1  ;;  %v12452_v7 = vld [vmem:[%s14847_s7] sm:$0xff]  }
 0x95a   :  { %v10898_v57 = vpop.eup %10897  ;;  %10917 = vrcp.f32 %v2732_v40  ;;  %v8273_v58 = vmul.f32 -1.442695, %v2682_v35 }
 0x95b   :  { %v10900_v60 = vpop.eup %10899  ;;  %10919 = vpow2.f32 %v8272_v1  ;;  %9509 = vmatpush3.bf16.msra.mxu0 %v2535_v33 }
 0x95c   :  { %v10902_v3 = vpop.eup %10901  ;;  %10921 = vpow2.f32 %v8275_v29  ;;  %9510 = vmatprep.subr.bf16.mxu0 %v12565_v46 }
 0x95d   :  { %v10904_v23 = vpop.eup %10903  ;;  %v2730_v49 = vadd.f32 1.0, %v10902_v3  ;;  %10923 = vpow2.f32 %v8273_v58 }
 0x95e   :  { %v10906_v51 = vpop.eup %10905  ;;  %v2733_v0 = vadd.f32 1.0, %v10904_v23 }
 0x95f   :  { %v10908_v43 = vpop.eup %10907  ;;  %10925 = vrcp.f32 %v2730_v49  ;;  %v2731_v12 = vadd.f32 1.0, %v10906_v51  ;;  %9511 = vmatpush3.bf16.msra.mxu0 %v2536_v30 }
 0x960   :  { %v10910_v52 = vpop.eup %10909  ;;  %10927 = vrcp.f32 %v2733_v0  ;;  %v2776_v13 = vmul.f32 %v10908_v43, %v10894_v26  ;;  %9512 = vmatprep.subr.bf16.mxu0 %v12565_v46  ;;  %v13354_v43 = vld [vmem:[%s14847_s7 + $0x8] sm:$0xff]  }
 0x961   :  { %v10912_v11 = vpop.eup %10911  ;;  %10929 = vrcp.f32 %v2731_v12  ;;  %v2774_v53 = vmul.f32 %v10910_v52, %v10896_v31  ;;  %v13361_v12 = vld [vmem:[%s14847_s7 + $0x10] sm:$0xff]   ;;  %v13368_v52 = vld [vmem:[%s14847_s7 + $0x18] sm:$0xff]  }
 0x962   :  { %v10914_v36 = vpop.eup %10913  ;;  %v2777_v54 = vmul.f32 %v10912_v11, %v10898_v57  ;;  %v13382_v11 = vld [vmem:[%s14847_s7 + $0x28] sm:$0xff]  }
 0x963   :  { %v10916_v32 = vpop.eup %10915  ;;  %v2775_v21 = vmul.f32 %v10914_v36, %v10900_v60  ;;  %9513 = vmatpush3.bf16.msra.mxu0 %v12629_v4  ;;  %v13396_v36 = vld [vmem:[%s14847_s7 + $0x38] sm:$0xff]  }
 0x964   :  { %v10918_v6 = vpop.eup %10917  ;;  %9540 = vmatprep.subr.bf16.mxu0 %v2535_v33  ;;  %v2760_v15 = vadd.f32 1.0, %v10916_v32 }
 0x965   :  { %v10920_v8 = vpop.eup %10919  ;;  %v2772_v39 = vmul.f32 %v10918_v6, %v13205_v34 }
 0x966   :  { %v10922_v62 = vpop.eup %10921  ;;  %v2758_v10 = vadd.f32 1.0, %v10920_v8  ;;  %9515 = vmatmul.mubr.msk.bf16.vlgmr.msra.gmra.mrb[88].mxu0 %vm365_vm2, %v13169_v63  ;;  %10931 = vrcp.f32 %v2760_v15 }
 0x967   :  { %v10924_v17 = vpop.eup %10923  ;;  %v13322_v5 = vadd.f32 %v2776_v13, %v2772_v39  ;;  %9541 = vmatpush3.bf16.msra.mxu0 %v2535_v33  ;;  %9550 = vmatprep.mubr.msk.bf16.mxu0 %vm956_vm7, %v12452_v7  ;;  %v2761_v59 = vadd.f32 1.0, %v10922_v62  ;;  %v13375_v13 = vld [vmem:[%s14847_s7 + $0x20] sm:$0xff]  }
 0x968   :  { %9542 = vmatprep.subr.bf16.mxu0 %v2536_v30  ;;  %v2759_v34 = vadd.f32 1.0, %v10924_v17  ;;  %10933 = vrcp.f32 %v2758_v10 }
 0x969   :  { %v10926_v20 = vpop.eup %10925  ;;  %10935 = vtanh.f32 %v13322_v5 }
 0x96a   :  { %v10928_v41 = vpop.eup %10927  ;;  %v2770_v26 = vmul.f32 %v10926_v20, %v13208_v48  ;;  %10937 = vrcp.f32 %v2761_v59 }
 0x96b   :  { %v10930_v63 = vpop.eup %10929  ;;  %v2773_v40 = vmul.f32 %v10928_v41, %v13211_v50  ;;  %9543 = vmatpush3.bf16.msra.mxu0 %v2536_v30  ;;  %10939 = vrcp.f32 %v2759_v34 }
 0x96c   :  { %v2771_v1 = vmul.f32 %v10930_v63, %v13214_v9  ;;  %v13332_v28 = vadd.f32 %v2774_v53, %v2770_v26  ;;  %v13389_v53 = vld [vmem:[%s14847_s7 + $0x30] sm:$0xff]  }
 0x96d   :  { %v13334_v31 = vadd.f32 %v2777_v54, %v2773_v40 }
 0x96e   :  { %10941 = vtanh.f32 %v13332_v28  ;;  %v13337_v33 = vadd.f32 %v2775_v21, %v2771_v1 }
 0x96f   :  { %10943 = vtanh.f32 %v13334_v31 }
 0x970   :  { %10945 = vtanh.f32 %v13337_v33  ;;  %v10932_v48 = vpop.eup %10931 }
 0x972   :  { %v10934_v50 = vpop.eup %10933 }
 0x973   :  { %v10936_v29 = vpop.eup %10935 }
 0x974   :  { %v10938_v30 = vpop.eup %10937  ;;  %v2788_v60 = vmul.f32 %v10936_v29, %v10932_v48 }
 0x975   :  { %v10940_v35 = vpop.eup %10939 }
 0x978   :  { %v10942_v9 = vpop.eup %10941 }
 0x979   :  { %v10944_v57 = vpop.eup %10943  ;;  %v2786_v23 = vmul.f32 %v10942_v9, %v10934_v50 }
 0x97a   :  { %v10946_v58 = vpop.eup %10945  ;;  %v2789_v3 = vmul.f32 %v10944_v57, %v10938_v30 }
 0x97b   :  { %v2787_v49 = vmul.f32 %v10946_v58, %v10940_v35 }
 0x97c   :  { %v13341_v51 = vpack.c.bf16 %v2789_v3, %v2788_v60 }
 0x97d   :  { %v13343_v0 = vpack.c.bf16 %v2787_v49, %v2786_v23 }
 0x97f   :  { %9544 = vmatprep.subr.bf16.mxu0 %v13343_v0 }
 0x980   :  { %9545 = vmatpush3.bf16.msra.mxu0 %v13343_v0 }
 0x981   :  { %9546 = vmatprep.subr.bf16.mxu0 %v13341_v51 }
 0x984   :  { %9547 = vmatpush3.bf16.msra.mxu0 %v13341_v51 }
 0x985   :  { %9548 = vmatprep.subr.bf16.mxu0 %v12629_v4 }
 0x988   :  { %9549 = vmatpush3.bf16.msra.mxu0 %v12629_v4 }
 0x98b   :  { %9551 = vmatmul.mubr.msk.bf16.vlgmr.msra.gmra.mrb[92].mxu0 %vm956_vm7, %v13354_v43 }
 0x98c   :  { %9554 = vmatprep.mubr.msk.bf16.mxu0 %vm956_vm7, %v13361_v12 }
 0x993   :  { %9555 = vmatmul.mubr.msk.bf16.gmra.mrb[96].mxu0 %vm956_vm7, %v13368_v52 }
 0x994   :  { %9558 = vmatprep.mubr.msk.bf16.mxu0 %vm956_vm7, %v13375_v13 }
 0x99b   :  { %9559 = vmatmul.mubr.msk.bf16.gmra.mrb[100].mxu0 %vm956_vm7, %v13382_v11 }
 0x99c   :  { %9562 = vmatprep.mubr.msk.bf16.mxu0 %vm956_vm7, %v13389_v53 }
 0x9a3   :  { %9563 = vmatmul.mubr.msk.bf16.gmra.mrb[104].mxu0 %vm956_vm7, %v13396_v36 }
 0x9a4   :  { %9608 = vmatprep.mubr.msk.bf16.mxu0 %vm956_vm7, %v12452_v7 }
 0xa39   :  { %v2571_v54 = vpop.f32.mrb[88].mxu0 }
 0xa3a   :  { %vm2577_vm14 = vcmp.ge.f32.partialorder %v2571_v54, 0.0  ;;  %v2578_v32 = vmul.f32 %v2571_v54, %v12931_v38  ;;  %v9516_v21 = vpop.f32.mrb[89].mxu0 }
 0xa3b   :  { %v2574_v6 = vpop.f32.mrb[90].mxu0 }
 0xa3c   :  { %v2579_v8 = vsel %vm2577_vm14, %v2571_v54, %v2578_v32  ;;  %v9517_v39 = vpop.f32.mrb[91].mxu0 }
 0xa3d   :  { %v2580_v15 = vmul.f32 %v2579_v8, %v12934_v42 }
 0xa3f   :  { %v2581_v62 = vsel %vm1229_vm10, %v2580_v15, 0.0 }
 0xa40   :  { %v2582_v10 = vrot.slane %v2581_v62, 4 }
 0xa42   :  { %v2583_v17 = vadd.f32 %v2582_v10, %v2581_v62 }
 0xa44   :  { %v2584_v59 = vrot.slane %v2583_v17, 2 }
 0xa46   :  { %v2585_v20 = vadd.f32 %v2584_v59, %v2583_v17 }
 0xa48   :  { %v2586_v34 = vrot.slane %v2585_v20, 1 }
 0xa4a   :  { %v2587_v41 = vadd.f32 %v2586_v34, %v2585_v20 }
 0xa4c   :  { %2588 = vst.msk [vmem:[#allocation2 + $0x3] sm:$0x1] %vm1237_vm11, %v2587_v41 }
 0xa5e   :  { %v9552_v7 = vpop.f32.mrb[92].mxu0 }
 0xa5f   :  { %v8286_v26 = vmul.f32 -1.442695, %v9552_v7  ;;  %v2826_v63 = vpop.f32.mrb[93].mxu0 }
 0xa60   :  { %v8284_v40 = vmul.f32 -1.442695, %v2826_v63  ;;  %v9553_v1 = vpop.f32.mrb[94].mxu0 }
 0xa61   :  { %10947 = vpow2.f32 %v8286_v26  ;;  %v8287_v48 = vmul.f32 -1.442695, %v9553_v1  ;;  %v2829_v50 = vpop.f32.mrb[95].mxu0 }
 0xa62   :  { %10949 = vpow2.f32 %v8284_v40  ;;  %v8285_v29 = vmul.f32 -1.442695, %v2829_v50 }
 0xa63   :  { %10951 = vpow2.f32 %v8287_v48 }
 0xa64   :  { %10953 = vpow2.f32 %v8285_v29 }
 0xa66   :  { %v9556_v30 = vpop.f32.mrb[96].mxu0 }
 0xa67   :  { %v8290_v35 = vmul.f32 -1.442695, %v9556_v30  ;;  %v2842_v9 = vpop.f32.mrb[97].mxu0 }
 0xa68   :  { %v8288_v57 = vmul.f32 -1.442695, %v2842_v9  ;;  %v9557_v58 = vpop.f32.mrb[98].mxu0 }
 0xa69   :  { %10955 = vpow2.f32 %v8290_v35  ;;  %v8291_v60 = vmul.f32 -1.442695, %v9557_v58  ;;  %v2845_v3 = vpop.f32.mrb[99].mxu0 }
 0xa6a   :  { %10957 = vpow2.f32 %v8288_v57  ;;  %v8289_v23 = vmul.f32 -1.442695, %v2845_v3 }
 0xa6b   :  { %v10948_v49 = vpop.eup %10947  ;;  %10959 = vpow2.f32 %v8291_v60 }
 0xa6c   :  { %v10950_v54 = vpop.eup %10949  ;;  %v2903_v32 = vadd.f32 1.0, %v10948_v49  ;;  %10961 = vpow2.f32 %v8289_v23 }
 0xa6d   :  { %v10952_v21 = vpop.eup %10951  ;;  %v2901_v6 = vadd.f32 1.0, %v10950_v54 }
 0xa6e   :  { %v10954_v8 = vpop.eup %10953  ;;  %10963 = vrcp.f32 %v2903_v32  ;;  %v2904_v39 = vadd.f32 1.0, %v10952_v21  ;;  %v9560_v15 = vpop.f32.mrb[100].mxu0 }
 0xa6f   :  { %10965 = vrcp.f32 %v2901_v6  ;;  %v2902_v62 = vadd.f32 1.0, %v10954_v8  ;;  %v2858_v10 = vpop.f32.mrb[101].mxu0 }
 0xa70   :  { %10967 = vrcp.f32 %v2904_v39  ;;  %v9561_v17 = vpop.f32.mrb[102].mxu0 }
 0xa71   :  { %10969 = vrcp.f32 %v2902_v62  ;;  %v2861_v59 = vpop.f32.mrb[103].mxu0 }
 0xa72   :  { %10971 = vtanh.f32 %v9560_v15 }
 0xa73   :  { %v10956_v20 = vpop.eup %10955  ;;  %10973 = vtanh.f32 %v2858_v10 }
 0xa74   :  { %v10958_v34 = vpop.eup %10957  ;;  %v2927_v41 = vadd.f32 1.0, %v10956_v20  ;;  %10975 = vtanh.f32 %v9561_v17 }
 0xa75   :  { %v10960_v7 = vpop.eup %10959  ;;  %v2925_v26 = vadd.f32 1.0, %v10958_v34  ;;  %10977 = vtanh.f32 %v2861_v59 }
 0xa76   :  { %v10962_v63 = vpop.eup %10961  ;;  %10979 = vrcp.f32 %v2927_v41  ;;  %v2928_v40 = vadd.f32 1.0, %v10960_v7  ;;  %v9564_v1 = vpop.f32.mrb[104].mxu0 }
 0xa77   :  { %10981 = vrcp.f32 %v2925_v26  ;;  %v2926_v48 = vadd.f32 1.0, %v10962_v63  ;;  %v8294_v50 = vmul.f32 -1.442695, %v9564_v1  ;;  %v2874_v29 = vpop.f32.mrb[105].mxu0 }
 0xa78   :  { %v10964_v30 = vpop.eup %10963  ;;  %10983 = vrcp.f32 %v2928_v40  ;;  %v8292_v35 = vmul.f32 -1.442695, %v2874_v29  ;;  %v9565_v9 = vpop.f32.mrb[106].mxu0 }
 0xa79   :  { %v10966_v57 = vpop.eup %10965  ;;  %10985 = vrcp.f32 %v2926_v48  ;;  %v8295_v58 = vmul.f32 -1.442695, %v9565_v9  ;;  %v2877_v60 = vpop.f32.mrb[107].mxu0 }
 0xa7a   :  { %v10968_v3 = vpop.eup %10967  ;;  %10987 = vpow2.f32 %v8294_v50  ;;  %v8293_v23 = vmul.f32 -1.442695, %v2877_v60 }
 0xa7b   :  { %v10970_v49 = vpop.eup %10969  ;;  %10989 = vpow2.f32 %v8292_v35 }
 0xa7c   :  { %v10972_v54 = vpop.eup %10971  ;;  %10991 = vpow2.f32 %v8295_v58 }
 0xa7d   :  { %v10974_v32 = vpop.eup %10973  ;;  %v2971_v21 = vmul.f32 %v10972_v54, %v10964_v30  ;;  %10993 = vpow2.f32 %v8293_v23 }
 0xa7e   :  { %v10976_v6 = vpop.eup %10975  ;;  %v2969_v8 = vmul.f32 %v10974_v32, %v10966_v57 }
 0xa7f   :  { %v10978_v39 = vpop.eup %10977  ;;  %v2972_v15 = vmul.f32 %v10976_v6, %v10968_v3 }
 0xa80   :  { %v10980_v62 = vpop.eup %10979  ;;  %v2970_v10 = vmul.f32 %v10978_v39, %v10970_v49 }
 0xa81   :  { %v10982_v17 = vpop.eup %10981  ;;  %v2967_v59 = vmul.f32 %v10980_v62, %v13303_v2  ;;  %v8297_v62 = vld [vmem:[%s14842_s2 + $0x28] sm:$0x7f] }
 0xa82   :  { %v10984_v20 = vpop.eup %10983  ;;  %v2965_v34 = vmul.f32 %v10982_v17, %v13306_v14  ;;  %v13432_v17 = vld [vmem:[%s14848_s8] sm:$0xf] }
 0xa83   :  { %v10986_v41 = vpop.eup %10985  ;;  %v2968_v7 = vmul.f32 %v10984_v20, %v13309_v18  ;;  %v13408_v26 = vadd.f32 %v2971_v21, %v2967_v59 }
 0xa84   :  { %v10988_v63 = vpop.eup %10987  ;;  %v2966_v40 = vmul.f32 %v10986_v41, %v13312_v22  ;;  %v13411_v1 = vadd.f32 %v2969_v8, %v2965_v34 }
 0xa85   :  { %v10990_v48 = vpop.eup %10989  ;;  %10995 = vtanh.f32 %v13408_v26  ;;  %v13414_v50 = vadd.f32 %v2972_v15, %v2968_v7  ;;  %v2955_v29 = vadd.f32 1.0, %v10988_v63 }
 0xa86   :  { %v10992_v2 = vpop.eup %10991  ;;  %10997 = vtanh.f32 %v13411_v1  ;;  %v13417_v14 = vadd.f32 %v2970_v10, %v2966_v40  ;;  %v2953_v30 = vadd.f32 1.0, %v10990_v48  ;;  %v3041_v10 = vmul.f32 %v8297_v62, %v12671_v24 }
 0xa87   :  { %v10994_v18 = vpop.eup %10993  ;;  %10999 = vtanh.f32 %v13414_v50  ;;  %v2956_v35 = vadd.f32 1.0, %v10992_v2 }
 0xa88   :  { %11001 = vtanh.f32 %v13417_v14  ;;  %v2954_v22 = vadd.f32 1.0, %v10994_v18  ;;  %v3042_v59 = vsel %vm648_vm3, %v3041_v10, 1.0 }
 0xa89   :  { %11003 = vrcp.f32 %v2955_v29  ;;  %v3043_v20 = vpack.c.bf16 %v3042_v59, %v3042_v59 }
 0xa8a   :  { %11005 = vrcp.f32 %v2953_v30 }
 0xa8b   :  { %11007 = vrcp.f32 %v2956_v35  ;;  %v3045_v34 = vsel %vm717_vm4, %v3043_v20, 0 }
 0xa8c   :  { %11009 = vrcp.f32 %v2954_v22 }
 0xa8f   :  { %v10996_v9 = vpop.eup %10995 }
 0xa90   :  { %v10998_v57 = vpop.eup %10997 }
 0xa91   :  { %v11000_v58 = vpop.eup %10999 }
 0xa92   :  { %v11002_v60 = vpop.eup %11001 }
 0xa93   :  { %v11004_v3 = vpop.eup %11003 }
 0xa94   :  { %v11006_v23 = vpop.eup %11005  ;;  %v2983_v32 = vmul.f32 %v11004_v3, %v10996_v9 }
 0xa95   :  { %v11008_v49 = vpop.eup %11007  ;;  %v2981_v6 = vmul.f32 %v11006_v23, %v10998_v57 }
 0xa96   :  { %v11010_v54 = vpop.eup %11009  ;;  %v2984_v21 = vmul.f32 %v11008_v49, %v11000_v58 }
 0xa97   :  { %v2982_v8 = vmul.f32 %v11010_v54, %v11002_v60 }
 0xa98   :  { %v2986_v39 = vpack.c.bf16 %v2984_v21, %v2983_v32 }
 0xa99   :  { %v2985_v15 = vpack.c.bf16 %v2982_v8, %v2981_v6 }
 0xa9b   :  { %9567 = vmatpush3.bf16.msra.mxu1 %v2985_v15  ;;  %9598 = vmatprep.subr.bf16.mxu0 %v2985_v15 }
 0xa9c   :  { %9599 = vmatpush3.bf16.msra.mxu0 %v2985_v15  ;;  %9568 = vmatprep.subr.bf16.mxu1 %v12565_v46 }
 0xa9d   :  { %9600 = vmatprep.subr.bf16.mxu0 %v2986_v39 }
 0xa9f   :  { %9569 = vmatpush3.bf16.msra.mxu1 %v2986_v39 }
 0xaa0   :  { %9601 = vmatpush3.bf16.msra.mxu0 %v2986_v39  ;;  %9570 = vmatprep.subr.bf16.mxu1 %v12565_v46 }
 0xaa3   :  { %9571 = vmatpush3.bf16.msra.mxu1 %v12629_v4 }
 0xaa4   :  { %9576 = vmatprep.subr.bf16.mxu1 %v13343_v0 }
 0xaa6   :  { %9573 = vmatmul.mubr.msk.bf16.vlgmr.msra.gmra.mrb[104].mxu1 %vm365_vm2, %v13432_v17 }
 0xaa7   :  { %9577 = vmatpush3.bf16.msra.mxu1 %v13343_v0  ;;  %9582 = vmatprep.mubr.msk.bf16.mxu1 %vm692_vm5, %v13245_v37 }
 0xaa8   :  { %9578 = vmatprep.subr.bf16.mxu1 %v13341_v51 }
 0xaab   :  { %9579 = vmatpush3.bf16.msra.mxu1 %v13341_v51 }
 0xaac   :  { %10219 = vmatprep.subr.msk.bf16.mxu1 %vm717_vm4, %v3043_v20 }
 0xaaf   :  { %9581 = vmatpush3.bf16.msra.mxu1 %v3045_v34 }
 0xab0   :  { %9624 = vmatprep.subr.bf16.mxu1 %v12565_v46 }
 0xab2   :  { %9583 = vmatmul.mubr.msk.bf16.vlgmr.msra.gmra.mrb[108].mxu1 %vm692_vm5, %v13252_v16 }
 0xab3   :  { %9586 = vmatprep.mubr.msk.bf16.mxu1 %vm692_vm5, %v13259_v44 }
 0xaba   :  { %9587 = vmatmul.mubr.msk.bf16.gmra.mrb[112].mxu1 %vm692_vm5, %v13266_v19 }
 0xabb   :  { %9590 = vmatprep.mubr.msk.bf16.mxu1 %vm692_vm5, %v13273_v47 }
 0xac2   :  { %9591 = vmatmul.mubr.msk.bf16.gmra.mrb[116].mxu1 %vm692_vm5, %v13280_v45 }
 0xac3   :  { %9594 = vmatprep.mubr.msk.bf16.mxu1 %vm692_vm5, %v13287_v27 }
 0xaca   :  { %9595 = vmatmul.mubr.msk.bf16.gmra.mrb[120].mxu1 %vm692_vm5, %v13294_v25 }
 0xacb   :  { %9630 = vmatprep.mubr.msk.bf16.mxu1 %vm12566_vm6, %v12565_v46 }
 0xb79   :  { %v3021_v37 = vpop.f32.mrb[104].mxu1 }
 0xb7a   :  { %vm3027_vm15 = vcmp.ge.f32.partialorder %v3021_v37, 0.0  ;;  %v3028_v16 = vmul.f32 %v3021_v37, %v12931_v38  ;;  %v9574_v44 = vpop.f32.mrb[105].mxu1 }
 0xb7b   :  { %v3024_v19 = vpop.f32.mrb[106].mxu1 }
 0xb7c   :  { %v3029_v51 = vsel %vm3027_vm15, %v3021_v37, %v3028_v16  ;;  %v9575_v47 = vpop.f32.mrb[107].mxu1 }
 0xb7d   :  { %v3030_v0 = vmul.f32 %v3029_v51, %v12934_v42 }
 0xb7f   :  { %v3031_v45 = vsel %vm1229_vm10, %v3030_v0, 0.0 }
 0xb80   :  { %v3032_v41 = vrot.slane %v3031_v45, 4 }
 0xb82   :  { %v3033_v27 = vadd.f32 %v3032_v41, %v3031_v45 }
 0xb84   :  { %v3034_v7 = vrot.slane %v3033_v27, 2 }
 0xb85   :  { %v9584_v63 = vpop.f32.mrb[108].mxu1 }
 0xb86   :  { %v3035_v25 = vadd.f32 %v3034_v7, %v3033_v27  ;;  %v8308_v40 = vmul.f32 -1.442695, %v9584_v63  ;;  %v3081_v48 = vpop.f32.mrb[109].mxu1 }
 0xb87   :  { %v8306_v29 = vmul.f32 -1.442695, %v3081_v48  ;;  %v9585_v2 = vpop.f32.mrb[110].mxu1 }
 0xb88   :  { %v3036_v30 = vrot.slane %v3035_v25, 1  ;;  %11011 = vpow2.f32 %v8308_v40  ;;  %v8309_v18 = vmul.f32 -1.442695, %v9585_v2  ;;  %v3084_v35 = vpop.f32.mrb[111].mxu1 }
 0xb89   :  { %11013 = vpow2.f32 %v8306_v29  ;;  %v8307_v22 = vmul.f32 -1.442695, %v3084_v35 }
 0xb8a   :  { %v3037_v9 = vadd.f32 %v3036_v30, %v3035_v25  ;;  %11015 = vpow2.f32 %v8309_v18 }
 0xb8b   :  { %11017 = vpow2.f32 %v8307_v22 }
 0xb8c   :  { %3038 = vst.msk [vmem:[#allocation2 + $0x4] sm:$0x1] %vm1237_vm11, %v3037_v9 }
 0xb8d   :  { %v9588_v57 = vpop.f32.mrb[112].mxu1 }
 0xb8e   :  { %v8312_v58 = vmul.f32 -1.442695, %v9588_v57  ;;  %v3097_v60 = vpop.f32.mrb[113].mxu1 }
 0xb8f   :  { %v8310_v3 = vmul.f32 -1.442695, %v3097_v60  ;;  %v9589_v23 = vpop.f32.mrb[114].mxu1 }
 0xb90   :  { %11019 = vpow2.f32 %v8312_v58  ;;  %v8313_v49 = vmul.f32 -1.442695, %v9589_v23  ;;  %v3100_v54 = vpop.f32.mrb[115].mxu1 }
 0xb91   :  { %11021 = vpow2.f32 %v8310_v3  ;;  %v8311_v32 = vmul.f32 -1.442695, %v3100_v54 }
 0xb92   :  { %v11012_v21 = vpop.eup %11011  ;;  %11023 = vpow2.f32 %v8313_v49 }
 0xb93   :  { %v11014_v6 = vpop.eup %11013  ;;  %v3158_v8 = vadd.f32 1.0, %v11012_v21  ;;  %11025 = vpow2.f32 %v8311_v32 }
 0xb94   :  { %v11016_v39 = vpop.eup %11015  ;;  %v3156_v15 = vadd.f32 1.0, %v11014_v6 }
 0xb95   :  { %v11018_v62 = vpop.eup %11017  ;;  %11027 = vrcp.f32 %v3158_v8  ;;  %v3159_v10 = vadd.f32 1.0, %v11016_v39  ;;  %v9592_v59 = vpop.f32.mrb[116].mxu1 }
 0xb96   :  { %11029 = vrcp.f32 %v3156_v15  ;;  %v3157_v20 = vadd.f32 1.0, %v11018_v62  ;;  %v3113_v34 = vpop.f32.mrb[117].mxu1 }
 0xb97   :  { %11031 = vrcp.f32 %v3159_v10  ;;  %v9593_v37 = vpop.f32.mrb[118].mxu1 }
 0xb98   :  { %11033 = vrcp.f32 %v3157_v20  ;;  %v3116_v16 = vpop.f32.mrb[119].mxu1 }
 0xb99   :  { %11035 = vtanh.f32 %v9592_v59 }
 0xb9a   :  { %v11020_v44 = vpop.eup %11019  ;;  %11037 = vtanh.f32 %v3113_v34 }
 0xb9b   :  { %v11022_v19 = vpop.eup %11021  ;;  %v3182_v51 = vadd.f32 1.0, %v11020_v44  ;;  %11039 = vtanh.f32 %v9593_v37 }
 0xb9c   :  { %v11024_v47 = vpop.eup %11023  ;;  %v3180_v0 = vadd.f32 1.0, %v11022_v19  ;;  %11041 = vtanh.f32 %v3116_v16 }
 0xb9d   :  { %v11026_v45 = vpop.eup %11025  ;;  %11043 = vrcp.f32 %v3182_v51  ;;  %v3183_v41 = vadd.f32 1.0, %v11024_v47  ;;  %v9596_v27 = vpop.f32.mrb[120].mxu1 }
 0xb9e   :  { %11045 = vrcp.f32 %v3180_v0  ;;  %v3181_v7 = vadd.f32 1.0, %v11026_v45  ;;  %v8316_v63 = vmul.f32 -1.442695, %v9596_v27  ;;  %v3129_v25 = vpop.f32.mrb[121].mxu1 }
 0xb9f   :  { %v11028_v40 = vpop.eup %11027  ;;  %11047 = vrcp.f32 %v3183_v41  ;;  %v8314_v48 = vmul.f32 -1.442695, %v3129_v25  ;;  %v9597_v29 = vpop.f32.mrb[122].mxu1 }
 0xba0   :  { %v11030_v2 = vpop.eup %11029  ;;  %11049 = vrcp.f32 %v3181_v7  ;;  %v8317_v30 = vmul.f32 -1.442695, %v9597_v29  ;;  %v3132_v18 = vpop.f32.mrb[123].mxu1 }
 0xba1   :  { %v11032_v35 = vpop.eup %11031  ;;  %11051 = vpow2.f32 %v8316_v63  ;;  %v8315_v22 = vmul.f32 -1.442695, %v3132_v18 }
 0xba2   :  { %v11034_v9 = vpop.eup %11033  ;;  %11053 = vpow2.f32 %v8314_v48 }
 0xba3   :  { %v11036_v57 = vpop.eup %11035  ;;  %11055 = vpow2.f32 %v8317_v30 }
 0xba4   :  { %v11038_v58 = vpop.eup %11037  ;;  %v3226_v60 = vmul.f32 %v11036_v57, %v11028_v40  ;;  %11057 = vpow2.f32 %v8315_v22  ;;  %v8339_v22 = vld [vmem:[%s14842_s2 + $0x30] sm:$0x7f] }
 0xba5   :  { %v11040_v3 = vpop.eup %11039  ;;  %v3224_v23 = vmul.f32 %v11038_v58, %v11030_v2 }
 0xba6   :  { %v11042_v49 = vpop.eup %11041  ;;  %v3227_v54 = vmul.f32 %v11040_v3, %v11032_v35  ;;  %v13557_v3 = vld [vmem:[%s14846_s6 + $0x38] sm:$0xff]  }
 0xba7   :  { %v11044_v32 = vpop.eup %11043  ;;  %v3225_v21 = vmul.f32 %v11042_v49, %v11034_v9  ;;  %v3491_v9 = vmul.f32 %v8339_v22, %v12671_v24 }
 0xba8   :  { %v11046_v6 = vpop.eup %11045  ;;  %v3222_v8 = vmul.f32 %v11044_v32, %v13322_v5 }
 0xba9   :  { %v11048_v39 = vpop.eup %11047  ;;  %v3220_v15 = vmul.f32 %v11046_v6, %v13332_v28  ;;  %v3492_v57 = vsel %vm648_vm3, %v3491_v9, 1.0 }
 0xbaa   :  { %v11050_v62 = vpop.eup %11049  ;;  %v3223_v10 = vmul.f32 %v11048_v39, %v13334_v31  ;;  %v13468_v59 = vadd.f32 %v3226_v60, %v3222_v8  ;;  %v3493_v58 = vpack.c.bf16 %v3492_v57, %v3492_v57 }
 0xbab   :  { %v11052_v20 = vpop.eup %11051  ;;  %v3221_v34 = vmul.f32 %v11050_v62, %v13337_v33  ;;  %v13471_v37 = vadd.f32 %v3224_v23, %v3220_v15 }
 0xbac   :  { %v11054_v16 = vpop.eup %11053  ;;  %11059 = vtanh.f32 %v13468_v59  ;;  %v13474_v44 = vadd.f32 %v3227_v54, %v3223_v10  ;;  %v3210_v19 = vadd.f32 1.0, %v11052_v20  ;;  %v3495_v60 = vsel %vm717_vm4, %v3493_v58, 0 }
 0xbad   :  { %v11056_v5 = vpop.eup %11055  ;;  %11061 = vtanh.f32 %v13471_v37  ;;  %v13477_v28 = vadd.f32 %v3225_v21, %v3221_v34  ;;  %v3208_v51 = vadd.f32 1.0, %v11054_v16 }
 0xbae   :  { %v11058_v31 = vpop.eup %11057  ;;  %11063 = vtanh.f32 %v13474_v44  ;;  %v3211_v47 = vadd.f32 1.0, %v11056_v5 }
 0xbaf   :  { %11065 = vtanh.f32 %v13477_v28  ;;  %v3209_v33 = vadd.f32 1.0, %v11058_v31 }
 0xbb0   :  { %11067 = vrcp.f32 %v3210_v19 }
 0xbb1   :  { %11069 = vrcp.f32 %v3208_v51 }
 0xbb2   :  { %11071 = vrcp.f32 %v3211_v47 }
 0xbb3   :  { %11073 = vrcp.f32 %v3209_v33 }
 0xbb6   :  { %v11060_v0 = vpop.eup %11059 }
 0xbb7   :  { %v11062_v45 = vpop.eup %11061 }
 0xbb8   :  { %v11064_v41 = vpop.eup %11063 }
 0xbb9   :  { %v11066_v27 = vpop.eup %11065 }
 0xbba   :  { %v11068_v7 = vpop.eup %11067 }
 0xbbb   :  { %v11070_v63 = vpop.eup %11069  ;;  %v3238_v48 = vmul.f32 %v11068_v7, %v11060_v0 }
 0xbbc   :  { %v11072_v25 = vpop.eup %11071  ;;  %v3236_v2 = vmul.f32 %v11070_v63, %v11062_v45 }
 0xbbd   :  { %v11074_v40 = vpop.eup %11073  ;;  %v3239_v29 = vmul.f32 %v11072_v25, %v11064_v41 }
 0xbbe   :  { %v3237_v30 = vmul.f32 %v11074_v40, %v11066_v27 }
 0xbbf   :  { %v3241_v18 = vpack.c.bf16 %v3239_v29, %v3238_v48 }
 0xbc0   :  { %v3240_v35 = vpack.c.bf16 %v3237_v30, %v3236_v2 }
 0xbc2   :  { %9602 = vmatprep.subr.bf16.mxu0 %v3240_v35 }
 0xbc3   :  { %9603 = vmatpush3.bf16.msra.mxu0 %v3240_v35 }
 0xbc4   :  { %9604 = vmatprep.subr.bf16.mxu0 %v3241_v18 }
 0xbc7   :  { %9605 = vmatpush3.bf16.msra.mxu0 %v3241_v18 }
 0xbc8   :  { %9606 = vmatprep.subr.bf16.mxu0 %v12629_v4 }
 0xbcb   :  { %9607 = vmatpush3.bf16.msra.mxu0 %v12629_v4 }
 0xbcc   :  { %9634 = vmatprep.subr.bf16.mxu0 %v3240_v35 }
 0xbce   :  { %9609 = vmatmul.mubr.msk.bf16.vlgmr.msra.gmra.mrb[108].mxu0 %vm956_vm7, %v13354_v43  ;;  %v13508_v43 = vld [vmem:[%s14846_s6] sm:$0xff]  }
 0xbcf   :  { %9635 = vmatpush3.bf16.msra.mxu0 %v3240_v35  ;;  %9612 = vmatprep.mubr.msk.bf16.mxu0 %vm956_vm7, %v13361_v12  ;;  %v13515_v12 = vld [vmem:[%s14846_s6 + $0x8] sm:$0xff]  }
 0xbd0   :  { %9636 = vmatprep.subr.bf16.mxu0 %v3241_v18 }
 0xbd3   :  { %9637 = vmatpush3.bf16.msra.mxu0 %v3241_v18 }
 0xbd4   :  { %10220 = vmatprep.subr.msk.bf16.mxu0 %vm717_vm4, %v3493_v58 }
 0xbd6   :  { %9613 = vmatmul.mubr.msk.bf16.gmra.mrb[112].mxu0 %vm956_vm7, %v13368_v52  ;;  %v13522_v52 = vld [vmem:[%s14846_s6 + $0x10] sm:$0xff]  }
 0xbd7   :  { %9639 = vmatpush3.bf16.msra.mxu0 %v3495_v60  ;;  %9616 = vmatprep.mubr.msk.bf16.mxu0 %vm956_vm7, %v13375_v13  ;;  %v13529_v13 = vld [vmem:[%s14846_s6 + $0x18] sm:$0xff]  }
 0xbd8   :  { %9682 = vmatprep.subr.bf16.mxu0 %v12565_v46 }
 0xbde   :  { %9617 = vmatmul.mubr.msk.bf16.gmra.mrb[116].mxu0 %vm956_vm7, %v13382_v11  ;;  %v13536_v11 = vld [vmem:[%s14846_s6 + $0x20] sm:$0xff]  }
 0xbdf   :  { %9620 = vmatprep.mubr.msk.bf16.mxu0 %vm956_vm7, %v13389_v53  ;;  %v13543_v53 = vld [vmem:[%s14846_s6 + $0x28] sm:$0xff]  }
 0xbe6   :  { %9621 = vmatmul.mubr.msk.bf16.gmra.mrb[120].mxu0 %vm956_vm7, %v13396_v36  ;;  %v13550_v36 = vld [vmem:[%s14846_s6 + $0x30] sm:$0xff]  }
 0xbe7   :  { %9640 = vmatprep.mubr.msk.bf16.mxu0 %vm692_vm5, %v13508_v43 }
 0xbee   :  { %9641 = vmatmul.mubr.msk.bf16.vlgmr.msra.gmra.mrb[124].mxu0 %vm692_vm5, %v13515_v12 }
 0xbef   :  { %9644 = vmatprep.mubr.msk.bf16.mxu0 %vm692_vm5, %v13522_v52 }
 0xbf6   :  { %9645 = vmatmul.mubr.msk.bf16.gmra.mrb[128].mxu0 %vm692_vm5, %v13529_v13 }
 0xbf7   :  { %9648 = vmatprep.mubr.msk.bf16.mxu0 %vm692_vm5, %v13536_v11 }
 0xbfe   :  { %9649 = vmatmul.mubr.msk.bf16.gmra.mrb[132].mxu0 %vm692_vm5, %v13543_v53 }
 0xbff   :  { %9652 = vmatprep.mubr.msk.bf16.mxu0 %vm692_vm5, %v13550_v36 }
 0xc06   :  { %9653 = vmatmul.mubr.msk.bf16.gmra.mrb[136].mxu0 %vm692_vm5, %v13557_v3 }
 0xc07   :  { %9688 = vmatprep.mubr.msk.bf16.mxu0 %vm12566_vm6, %v12565_v46 }
 0xca1   :  { %v9610_v23 = vpop.f32.mrb[108].mxu0 }
 0xca2   :  { %v8328_v49 = vmul.f32 -1.442695, %v9610_v23  ;;  %v3276_v54 = vpop.f32.mrb[109].mxu0 }
 0xca3   :  { %v8326_v32 = vmul.f32 -1.442695, %v3276_v54  ;;  %v9611_v21 = vpop.f32.mrb[110].mxu0 }
 0xca4   :  { %11075 = vpow2.f32 %v8328_v49  ;;  %v8329_v6 = vmul.f32 -1.442695, %v9611_v21  ;;  %v3279_v8 = vpop.f32.mrb[111].mxu0 }
 0xca5   :  { %11077 = vpow2.f32 %v8326_v32  ;;  %v8327_v39 = vmul.f32 -1.442695, %v3279_v8 }
 0xca6   :  { %11079 = vpow2.f32 %v8329_v6 }
 0xca7   :  { %11081 = vpow2.f32 %v8327_v39 }
 0xca9   :  { %v9614_v15 = vpop.f32.mrb[112].mxu0 }
 0xcaa   :  { %v8332_v62 = vmul.f32 -1.442695, %v9614_v15  ;;  %v3292_v10 = vpop.f32.mrb[113].mxu0 }
 0xcab   :  { %v8330_v20 = vmul.f32 -1.442695, %v3292_v10  ;;  %v9615_v34 = vpop.f32.mrb[114].mxu0 }
 0xcac   :  { %11083 = vpow2.f32 %v8332_v62  ;;  %v8333_v16 = vmul.f32 -1.442695, %v9615_v34  ;;  %v3295_v19 = vpop.f32.mrb[115].mxu0 }
 0xcad   :  { %11085 = vpow2.f32 %v8330_v20  ;;  %v8331_v5 = vmul.f32 -1.442695, %v3295_v19 }
 0xcae   :  { %v11076_v51 = vpop.eup %11075  ;;  %11087 = vpow2.f32 %v8333_v16 }
 0xcaf   :  { %v11078_v31 = vpop.eup %11077  ;;  %v3353_v47 = vadd.f32 1.0, %v11076_v51  ;;  %11089 = vpow2.f32 %v8331_v5 }
 0xcb0   :  { %v11080_v33 = vpop.eup %11079  ;;  %v3351_v0 = vadd.f32 1.0, %v11078_v31 }
 0xcb1   :  { %v11082_v45 = vpop.eup %11081  ;;  %11091 = vrcp.f32 %v3353_v47  ;;  %v3354_v41 = vadd.f32 1.0, %v11080_v33  ;;  %v9618_v27 = vpop.f32.mrb[116].mxu0 }
 0xcb2   :  { %11093 = vrcp.f32 %v3351_v0  ;;  %v3352_v7 = vadd.f32 1.0, %v11082_v45  ;;  %v3308_v63 = vpop.f32.mrb[117].mxu0 }
 0xcb3   :  { %11095 = vrcp.f32 %v3354_v41  ;;  %v9619_v25 = vpop.f32.mrb[118].mxu0 }
 0xcb4   :  { %11097 = vrcp.f32 %v3352_v7  ;;  %v3311_v40 = vpop.f32.mrb[119].mxu0 }
 0xcb5   :  { %11099 = vtanh.f32 %v9618_v27 }
 0xcb6   :  { %v11084_v48 = vpop.eup %11083  ;;  %11101 = vtanh.f32 %v3308_v63 }
 0xcb7   :  { %v11086_v29 = vpop.eup %11085  ;;  %v3377_v2 = vadd.f32 1.0, %v11084_v48  ;;  %11103 = vtanh.f32 %v9619_v25 }
 0xcb8   :  { %v11088_v30 = vpop.eup %11087  ;;  %v3375_v18 = vadd.f32 1.0, %v11086_v29  ;;  %11105 = vtanh.f32 %v3311_v40 }
 0xcb9   :  { %v11090_v35 = vpop.eup %11089  ;;  %11107 = vrcp.f32 %v3377_v2  ;;  %v3378_v22 = vadd.f32 1.0, %v11088_v30  ;;  %v9622_v9 = vpop.f32.mrb[120].mxu0 }
 0xcba   :  { %11109 = vrcp.f32 %v3375_v18  ;;  %v3376_v57 = vadd.f32 1.0, %v11090_v35  ;;  %v8336_v58 = vmul.f32 -1.442695, %v9622_v9  ;;  %v3324_v60 = vpop.f32.mrb[121].mxu0 }
 0xcbb   :  { %v11092_v23 = vpop.eup %11091  ;;  %11111 = vrcp.f32 %v3378_v22  ;;  %v8334_v49 = vmul.f32 -1.442695, %v3324_v60  ;;  %v9623_v54 = vpop.f32.mrb[122].mxu0 }
 0xcbc   :  { %v11094_v32 = vpop.eup %11093  ;;  %11113 = vrcp.f32 %v3376_v57  ;;  %v8337_v21 = vmul.f32 -1.442695, %v9623_v54  ;;  %v3327_v6 = vpop.f32.mrb[123].mxu0 }
 0xcbd   :  { %v11096_v8 = vpop.eup %11095  ;;  %11115 = vpow2.f32 %v8336_v58  ;;  %v8335_v39 = vmul.f32 -1.442695, %v3327_v6 }
 0xcbe   :  { %v11098_v15 = vpop.eup %11097  ;;  %11117 = vpow2.f32 %v8334_v49 }
 0xcbf   :  { %v11100_v62 = vpop.eup %11099  ;;  %11119 = vpow2.f32 %v8337_v21 }
 0xcc0   :  { %v11102_v10 = vpop.eup %11101  ;;  %v3421_v20 = vmul.f32 %v11100_v62, %v11092_v23  ;;  %11121 = vpow2.f32 %v8335_v39 }
 0xcc1   :  { %v11104_v34 = vpop.eup %11103  ;;  %v3419_v16 = vmul.f32 %v11102_v10, %v11094_v32  ;;  %v9642_v19 = vpop.f32.mrb[124].mxu0 }
 0xcc2   :  { %v11106_v5 = vpop.eup %11105  ;;  %v3422_v51 = vmul.f32 %v11104_v34, %v11096_v8  ;;  %v8350_v31 = vmul.f32 -1.442695, %v9642_v19  ;;  %v3531_v47 = vpop.f32.mrb[125].mxu0 }
 0xcc3   :  { %v11108_v33 = vpop.eup %11107  ;;  %v3420_v0 = vmul.f32 %v11106_v5, %v11098_v15  ;;  %v8348_v45 = vmul.f32 -1.442695, %v3531_v47  ;;  %v9643_v41 = vpop.f32.mrb[126].mxu0 }
 0xcc4   :  { %v11110_v27 = vpop.eup %11109  ;;  %v3417_v7 = vmul.f32 %v11108_v33, %v13408_v26  ;;  %11123 = vpow2.f32 %v8350_v31  ;;  %v8351_v63 = vmul.f32 -1.442695, %v9643_v41  ;;  %v3534_v25 = vpop.f32.mrb[127].mxu0 }
 0xcc5   :  { %v11112_v40 = vpop.eup %11111  ;;  %v3415_v48 = vmul.f32 %v11110_v27, %v13411_v1  ;;  %11125 = vpow2.f32 %v8348_v45  ;;  %v8349_v29 = vmul.f32 -1.442695, %v3534_v25 }
 0xcc6   :  { %v11114_v2 = vpop.eup %11113  ;;  %v3418_v30 = vmul.f32 %v11112_v40, %v13414_v50  ;;  %v13566_v18 = vadd.f32 %v3421_v20, %v3417_v7  ;;  %11127 = vpow2.f32 %v8351_v63 }
 0xcc7   :  { %v11116_v35 = vpop.eup %11115  ;;  %v3416_v22 = vmul.f32 %v11114_v2, %v13417_v14  ;;  %v13569_v9 = vadd.f32 %v3419_v16, %v3415_v48  ;;  %11129 = vpow2.f32 %v8349_v29 }
 0xcc8   :  { %v11118_v26 = vpop.eup %11117  ;;  %11131 = vtanh.f32 %v13566_v18  ;;  %v13572_v57 = vadd.f32 %v3422_v51, %v3418_v30  ;;  %v3405_v1 = vadd.f32 1.0, %v11116_v35 }
 0xcc9   :  { %v11120_v58 = vpop.eup %11119  ;;  %11133 = vtanh.f32 %v13569_v9  ;;  %v13575_v60 = vadd.f32 %v3420_v0, %v3416_v22  ;;  %v3403_v50 = vadd.f32 1.0, %v11118_v26  ;;  %v9646_v23 = vpop.f32.mrb[128].mxu0 }
 0xcca   :  { %v11122_v49 = vpop.eup %11121  ;;  %11135 = vtanh.f32 %v13572_v57  ;;  %v3406_v14 = vadd.f32 1.0, %v11120_v58  ;;  %v3547_v54 = vpop.f32.mrb[129].mxu0  ;;  %v8354_v6 = vmul.f32 -1.442695, %v9646_v23 }
 0xccb   :  { %11137 = vtanh.f32 %v13575_v60  ;;  %v3404_v32 = vadd.f32 1.0, %v11122_v49  ;;  %v9647_v21 = vpop.f32.mrb[130].mxu0  ;;  %v8352_v19 = vmul.f32 -1.442695, %v3547_v54 }
 0xccc   :  { %11139 = vrcp.f32 %v3405_v1  ;;  %v3550_v8 = vpop.f32.mrb[131].mxu0  ;;  %v8355_v47 = vmul.f32 -1.442695, %v9647_v21 }
 0xccd   :  { %11141 = vrcp.f32 %v3403_v50  ;;  %v8353_v45 = vmul.f32 -1.442695, %v3550_v8 }
 0xcce   :  { %v11124_v39 = vpop.eup %11123  ;;  %11143 = vrcp.f32 %v3406_v14 }
 0xccf   :  { %v11126_v15 = vpop.eup %11125  ;;  %11145 = vrcp.f32 %v3404_v32  ;;  %v3608_v62 = vadd.f32 1.0, %v11124_v39 }
 0xcd0   :  { %v11128_v10 = vpop.eup %11127  ;;  %v3606_v20 = vadd.f32 1.0, %v11126_v15  ;;  %11147 = vpow2.f32 %v8354_v6 }
 0xcd1   :  { %v11130_v34 = vpop.eup %11129  ;;  %11149 = vrcp.f32 %v3608_v62  ;;  %v3609_v16 = vadd.f32 1.0, %v11128_v10  ;;  %v9650_v5 = vpop.f32.mrb[132].mxu0 }
 0xcd2   :  { %v11132_v51 = vpop.eup %11131  ;;  %11151 = vrcp.f32 %v3606_v20  ;;  %v3607_v31 = vadd.f32 1.0, %v11130_v34  ;;  %v3563_v33 = vpop.f32.mrb[133].mxu0 }
 0xcd3   :  { %v11134_v0 = vpop.eup %11133  ;;  %11153 = vrcp.f32 %v3609_v16  ;;  %v9651_v41 = vpop.f32.mrb[134].mxu0 }
 0xcd4   :  { %v11136_v27 = vpop.eup %11135  ;;  %11155 = vrcp.f32 %v3607_v31  ;;  %v3566_v7 = vpop.f32.mrb[135].mxu0 }
 0xcd5   :  { %v11138_v63 = vpop.eup %11137  ;;  %11157 = vpow2.f32 %v8352_v19 }
 0xcd6   :  { %v11140_v25 = vpop.eup %11139  ;;  %11159 = vpow2.f32 %v8355_v47 }
 0xcd7   :  { %v11142_v40 = vpop.eup %11141  ;;  %11161 = vpow2.f32 %v8353_v45  ;;  %v3433_v30 = vmul.f32 %v11140_v25, %v11132_v51 }
 0xcd8   :  { %v11144_v48 = vpop.eup %11143  ;;  %11163 = vtanh.f32 %v9650_v5  ;;  %v3431_v58 = vmul.f32 %v11142_v40, %v11134_v0 }
 0xcd9   :  { %v11146_v29 = vpop.eup %11145  ;;  %11165 = vtanh.f32 %v3563_v33  ;;  %v9654_v2 = vpop.f32.mrb[136].mxu0  ;;  %v3434_v35 = vmul.f32 %v11144_v48, %v11136_v27 }
 0xcda   :  { %v11148_v22 = vpop.eup %11147  ;;  %11167 = vtanh.f32 %v9651_v41  ;;  %v8358_v26 = vmul.f32 -1.442695, %v9654_v2  ;;  %v3579_v1 = vpop.f32.mrb[137].mxu0  ;;  %v3432_v50 = vmul.f32 %v11146_v29, %v11138_v63 }
 0xcdb   :  { %v11150_v23 = vpop.eup %11149  ;;  %v3632_v49 = vadd.f32 1.0, %v11148_v22  ;;  %11169 = vtanh.f32 %v3566_v7  ;;  %v8356_v14 = vmul.f32 -1.442695, %v3579_v1  ;;  %v9655_v54 = vpop.f32.mrb[138].mxu0  ;;  %v3436_v32 = vpack.c.bf16 %v3434_v35, %v3433_v30 }
 0xcdc   :  { %v11152_v21 = vpop.eup %11151  ;;  %11171 = vpow2.f32 %v8358_v26  ;;  %v3435_v6 = vpack.c.bf16 %v3432_v50, %v3431_v58  ;;  %v8359_v8 = vmul.f32 -1.442695, %v9655_v54  ;;  %v3582_v39 = vpop.f32.mrb[139].mxu0  ;;  %v12469_v26 = vld [vmem:[%s14847_s7] sm:$0xff]  }
 0xcdd   :  { %v11154_v15 = vpop.eup %11153  ;;  %11173 = vrcp.f32 %v3632_v49  ;;  %v8357_v62 = vmul.f32 -1.442695, %v3582_v39 }
 0xcde   :  { %v11156_v10 = vpop.eup %11155  ;;  %11175 = vpow2.f32 %v8356_v14  ;;  %9625 = vmatpush3.bf16.msra.mxu1 %v3435_v6 }
 0xcdf   :  { %v11158_v20 = vpop.eup %11157  ;;  %11177 = vpow2.f32 %v8359_v8  ;;  %9626 = vmatprep.subr.bf16.mxu1 %v12565_v46 }
 0xce0   :  { %v11160_v34 = vpop.eup %11159  ;;  %v3630_v16 = vadd.f32 1.0, %v11158_v20  ;;  %11179 = vpow2.f32 %v8357_v62 }
 0xce1   :  { %v11162_v19 = vpop.eup %11161  ;;  %v3633_v5 = vadd.f32 1.0, %v11160_v34 }
 0xce2   :  { %v11164_v51 = vpop.eup %11163  ;;  %11181 = vrcp.f32 %v3630_v16  ;;  %v3631_v31 = vadd.f32 1.0, %v11162_v19  ;;  %9627 = vmatpush3.bf16.msra.mxu1 %v3436_v32 }
 0xce3   :  { %v11166_v47 = vpop.eup %11165  ;;  %11183 = vrcp.f32 %v3633_v5  ;;  %v3676_v33 = vmul.f32 %v11164_v51, %v11150_v23  ;;  %9628 = vmatprep.subr.bf16.mxu1 %v12565_v46  ;;  %v13617_v51 = vld [vmem:[%s14847_s7 + $0x8] sm:$0xff]  }
 0xce4   :  { %v11168_v0 = vpop.eup %11167  ;;  %11185 = vrcp.f32 %v3631_v31  ;;  %v3674_v45 = vmul.f32 %v11166_v47, %v11152_v21  ;;  %v13624_v31 = vld [vmem:[%s14847_s7 + $0x10] sm:$0xff]   ;;  %v13631_v47 = vld [vmem:[%s14847_s7 + $0x18] sm:$0xff]  }
 0xce5   :  { %v11170_v41 = vpop.eup %11169  ;;  %v3677_v27 = vmul.f32 %v11168_v0, %v11154_v15  ;;  %v13645_v0 = vld [vmem:[%s14847_s7 + $0x28] sm:$0xff]  }
 0xce6   :  { %v11172_v7 = vpop.eup %11171  ;;  %v3675_v63 = vmul.f32 %v11170_v41, %v11156_v10  ;;  %9629 = vmatpush3.bf16.msra.mxu1 %v12629_v4  ;;  %v13659_v41 = vld [vmem:[%s14847_s7 + $0x38] sm:$0xff]  }
 0xce7   :  { %v11174_v25 = vpop.eup %11173  ;;  %9656 = vmatprep.subr.bf16.mxu1 %v3435_v6  ;;  %v3660_v29 = vadd.f32 1.0, %v11172_v7 }
 0xce8   :  { %v11176_v40 = vpop.eup %11175  ;;  %v3672_v48 = vmul.f32 %v11174_v25, %v13468_v59 }
 0xce9   :  { %v11178_v2 = vpop.eup %11177  ;;  %v3658_v30 = vadd.f32 1.0, %v11176_v40  ;;  %9631 = vmatmul.mubr.msk.bf16.vlgmr.msra.gmra.mrb[124].mxu1 %vm365_vm2, %v13432_v17  ;;  %11187 = vrcp.f32 %v3660_v29 }
 0xcea   :  { %v11180_v35 = vpop.eup %11179  ;;  %v13585_v22 = vadd.f32 %v3676_v33, %v3672_v48  ;;  %9657 = vmatpush3.bf16.msra.mxu1 %v3435_v6  ;;  %9666 = vmatprep.mubr.msk.bf16.mxu1 %vm956_vm7, %v12469_v26  ;;  %v3661_v1 = vadd.f32 1.0, %v11178_v2  ;;  %v13638_v33 = vld [vmem:[%s14847_s7 + $0x20] sm:$0xff]  }
 0xceb   :  { %9658 = vmatprep.subr.bf16.mxu1 %v3436_v32  ;;  %v3659_v59 = vadd.f32 1.0, %v11180_v35  ;;  %11189 = vrcp.f32 %v3658_v30 }
 0xcec   :  { %v11182_v58 = vpop.eup %11181  ;;  %11191 = vtanh.f32 %v13585_v22 }
 0xced   :  { %v11184_v50 = vpop.eup %11183  ;;  %v3670_v23 = vmul.f32 %v11182_v58, %v13471_v37  ;;  %11193 = vrcp.f32 %v3661_v1 }
 0xcee   :  { %v11186_v17 = vpop.eup %11185  ;;  %v3673_v49 = vmul.f32 %v11184_v50, %v13474_v44  ;;  %9659 = vmatpush3.bf16.msra.mxu1 %v3436_v32  ;;  %11195 = vrcp.f32 %v3659_v59 }
 0xcef   :  { %v3671_v14 = vmul.f32 %v11186_v17, %v13477_v28  ;;  %v13595_v54 = vadd.f32 %v3674_v45, %v3670_v23  ;;  %v13652_v45 = vld [vmem:[%s14847_s7 + $0x30] sm:$0xff]  }
 0xcf0   :  { %v13597_v21 = vadd.f32 %v3677_v27, %v3673_v49 }
 0xcf1   :  { %11197 = vtanh.f32 %v13595_v54  ;;  %v13600_v6 = vadd.f32 %v3675_v63, %v3671_v14 }
 0xcf2   :  { %11199 = vtanh.f32 %v13597_v21 }
 0xcf3   :  { %11201 = vtanh.f32 %v13600_v6  ;;  %v11188_v37 = vpop.eup %11187 }
 0xcf5   :  { %v11190_v44 = vpop.eup %11189 }
 0xcf6   :  { %v11192_v8 = vpop.eup %11191 }
 0xcf7   :  { %v11194_v32 = vpop.eup %11193  ;;  %v3688_v10 = vmul.f32 %v11192_v8, %v11188_v37 }
 0xcf8   :  { %v11196_v39 = vpop.eup %11195 }
 0xcfb   :  { %v11198_v28 = vpop.eup %11197 }
 0xcfc   :  { %v11200_v15 = vpop.eup %11199  ;;  %v3686_v34 = vmul.f32 %v11198_v28, %v11190_v44 }
 0xcfd   :  { %v11202_v62 = vpop.eup %11201  ;;  %v3689_v20 = vmul.f32 %v11200_v15, %v11194_v32 }
 0xcfe   :  { %v3687_v16 = vmul.f32 %v11202_v62, %v11196_v39 }
 0xcff   :  { %v13604_v19 = vpack.c.bf16 %v3689_v20, %v3688_v10 }
 0xd00   :  { %v13606_v5 = vpack.c.bf16 %v3687_v16, %v3686_v34 }
 0xd02   :  { %9660 = vmatprep.subr.bf16.mxu1 %v13606_v5 }
 0xd03   :  { %9661 = vmatpush3.bf16.msra.mxu1 %v13606_v5 }
 0xd04   :  { %9662 = vmatprep.subr.bf16.mxu1 %v13604_v19 }
 0xd07   :  { %9663 = vmatpush3.bf16.msra.mxu1 %v13604_v19 }
 0xd08   :  { %9664 = vmatprep.subr.bf16.mxu1 %v12629_v4 }
 0xd0b   :  { %9665 = vmatpush3.bf16.msra.mxu1 %v12629_v4 }
 0xd0e   :  { %9667 = vmatmul.mubr.msk.bf16.vlgmr.msra.gmra.mrb[128].mxu1 %vm956_vm7, %v13617_v51 }
 0xd0f   :  { %9670 = vmatprep.mubr.msk.bf16.mxu1 %vm956_vm7, %v13624_v31 }
 0xd16   :  { %9671 = vmatmul.mubr.msk.bf16.gmra.mrb[132].mxu1 %vm956_vm7, %v13631_v47 }
 0xd17   :  { %9674 = vmatprep.mubr.msk.bf16.mxu1 %vm956_vm7, %v13638_v33 }
 0xd1e   :  { %9675 = vmatmul.mubr.msk.bf16.gmra.mrb[136].mxu1 %vm956_vm7, %v13645_v0 }
 0xd1f   :  { %9678 = vmatprep.mubr.msk.bf16.mxu1 %vm956_vm7, %v13652_v45 }
 0xd26   :  { %9679 = vmatmul.mubr.msk.bf16.gmra.mrb[140].mxu1 %vm956_vm7, %v13659_v41 }
 0xd27   :  { %9724 = vmatprep.mubr.msk.bf16.mxu1 %vm956_vm7, %v12469_v26 }
 0xdbc   :  { %v3471_v27 = vpop.f32.mrb[124].mxu1 }
 0xdbd   :  { %vm3477_vm0 = vcmp.ge.f32.partialorder %v3471_v27, 0.0  ;;  %v3478_v7 = vmul.f32 %v3471_v27, %v12931_v38  ;;  %v9632_v63 = vpop.f32.mrb[125].mxu1 }
 0xdbe   :  { %v3474_v25 = vpop.f32.mrb[126].mxu1 }
 0xdbf   :  { %v3479_v40 = vsel %vm3477_vm0, %v3471_v27, %v3478_v7  ;;  %v9633_v48 = vpop.f32.mrb[127].mxu1 }
 0xdc0   :  { %v3480_v29 = vmul.f32 %v3479_v40, %v12934_v42 }
 0xdc2   :  { %v3481_v2 = vsel %vm1229_vm10, %v3480_v29, 0.0 }
 0xdc3   :  { %v3482_v30 = vrot.slane %v3481_v2, 4 }
 0xdc5   :  { %v3483_v35 = vadd.f32 %v3482_v30, %v3481_v2 }
 0xdc7   :  { %v3484_v1 = vrot.slane %v3483_v35, 2 }
 0xdc9   :  { %v3485_v58 = vadd.f32 %v3484_v1, %v3483_v35 }
 0xdcb   :  { %v3486_v59 = vrot.slane %v3485_v58, 1 }
 0xdcd   :  { %v3487_v50 = vadd.f32 %v3486_v59, %v3485_v58 }
 0xdcf   :  { %3488 = vst.msk [vmem:[#allocation2 + $0x5] sm:$0x1] %vm1237_vm11, %v3487_v50 }
 0xde1   :  { %v9668_v26 = vpop.f32.mrb[128].mxu1 }
 0xde2   :  { %v8370_v23 = vmul.f32 -1.442695, %v9668_v26  ;;  %v3726_v17 = vpop.f32.mrb[129].mxu1 }
 0xde3   :  { %v8368_v49 = vmul.f32 -1.442695, %v3726_v17  ;;  %v9669_v14 = vpop.f32.mrb[130].mxu1 }
 0xde4   :  { %11203 = vpow2.f32 %v8370_v23  ;;  %v8371_v37 = vmul.f32 -1.442695, %v9669_v14  ;;  %v3729_v44 = vpop.f32.mrb[131].mxu1 }
 0xde5   :  { %11205 = vpow2.f32 %v8368_v49  ;;  %v8369_v8 = vmul.f32 -1.442695, %v3729_v44 }
 0xde6   :  { %11207 = vpow2.f32 %v8371_v37 }
 0xde7   :  { %11209 = vpow2.f32 %v8369_v8 }
 0xde9   :  { %v9672_v32 = vpop.f32.mrb[132].mxu1 }
 0xdea   :  { %v8374_v39 = vmul.f32 -1.442695, %v9672_v32  ;;  %v3742_v28 = vpop.f32.mrb[133].mxu1 }
 0xdeb   :  { %v8372_v15 = vmul.f32 -1.442695, %v3742_v28  ;;  %v9673_v62 = vpop.f32.mrb[134].mxu1 }
 0xdec   :  { %11211 = vpow2.f32 %v8374_v39  ;;  %v8375_v10 = vmul.f32 -1.442695, %v9673_v62  ;;  %v3745_v20 = vpop.f32.mrb[135].mxu1 }
 0xded   :  { %11213 = vpow2.f32 %v8372_v15  ;;  %v8373_v34 = vmul.f32 -1.442695, %v3745_v20 }
 0xdee   :  { %v11204_v16 = vpop.eup %11203  ;;  %11215 = vpow2.f32 %v8375_v10 }
 0xdef   :  { %v11206_v27 = vpop.eup %11205  ;;  %v3803_v7 = vadd.f32 1.0, %v11204_v16  ;;  %11217 = vpow2.f32 %v8373_v34 }
 0xdf0   :  { %v11208_v63 = vpop.eup %11207  ;;  %v3801_v25 = vadd.f32 1.0, %v11206_v27 }
 0xdf1   :  { %v11210_v40 = vpop.eup %11209  ;;  %11219 = vrcp.f32 %v3803_v7  ;;  %v3804_v48 = vadd.f32 1.0, %v11208_v63  ;;  %v9676_v29 = vpop.f32.mrb[136].mxu1 }
 0xdf2   :  { %11221 = vrcp.f32 %v3801_v25  ;;  %v3802_v2 = vadd.f32 1.0, %v11210_v40  ;;  %v3758_v30 = vpop.f32.mrb[137].mxu1 }
 0xdf3   :  { %11223 = vrcp.f32 %v3804_v48  ;;  %v9677_v35 = vpop.f32.mrb[138].mxu1 }
 0xdf4   :  { %11225 = vrcp.f32 %v3802_v2  ;;  %v3761_v1 = vpop.f32.mrb[139].mxu1 }
 0xdf5   :  { %11227 = vtanh.f32 %v9676_v29 }
 0xdf6   :  { %v11212_v58 = vpop.eup %11211  ;;  %11229 = vtanh.f32 %v3758_v30 }
 0xdf7   :  { %v11214_v59 = vpop.eup %11213  ;;  %v3827_v50 = vadd.f32 1.0, %v11212_v58  ;;  %11231 = vtanh.f32 %v9677_v35 }
 0xdf8   :  { %v11216_v26 = vpop.eup %11215  ;;  %v3825_v23 = vadd.f32 1.0, %v11214_v59  ;;  %11233 = vtanh.f32 %v3761_v1 }
 0xdf9   :  { %v11218_v17 = vpop.eup %11217  ;;  %11235 = vrcp.f32 %v3827_v50  ;;  %v3828_v49 = vadd.f32 1.0, %v11216_v26  ;;  %v9680_v14 = vpop.f32.mrb[140].mxu1 }
 0xdfa   :  { %11237 = vrcp.f32 %v3825_v23  ;;  %v3826_v37 = vadd.f32 1.0, %v11218_v17  ;;  %v8378_v44 = vmul.f32 -1.442695, %v9680_v14  ;;  %v3774_v8 = vpop.f32.mrb[141].mxu1 }
 0xdfb   :  { %v11220_v32 = vpop.eup %11219  ;;  %11239 = vrcp.f32 %v3828_v49  ;;  %v8376_v39 = vmul.f32 -1.442695, %v3774_v8  ;;  %v9681_v28 = vpop.f32.mrb[142].mxu1 }
 0xdfc   :  { %v11222_v15 = vpop.eup %11221  ;;  %11241 = vrcp.f32 %v3826_v37  ;;  %v8379_v62 = vmul.f32 -1.442695, %v9681_v28  ;;  %v3777_v10 = vpop.f32.mrb[143].mxu1 }
 0xdfd   :  { %v11224_v20 = vpop.eup %11223  ;;  %11243 = vpow2.f32 %v8378_v44  ;;  %v8377_v34 = vmul.f32 -1.442695, %v3777_v10 }
 0xdfe   :  { %v11226_v16 = vpop.eup %11225  ;;  %11245 = vpow2.f32 %v8376_v39 }
 0xdff   :  { %v11228_v27 = vpop.eup %11227  ;;  %11247 = vpow2.f32 %v8379_v62 }
 0xe00   :  { %v11230_v7 = vpop.eup %11229  ;;  %v3871_v63 = vmul.f32 %v11228_v27, %v11220_v32  ;;  %11249 = vpow2.f32 %v8377_v34 }
 0xe01   :  { %v11232_v25 = vpop.eup %11231  ;;  %v3869_v40 = vmul.f32 %v11230_v7, %v11222_v15 }
 0xe02   :  { %v11234_v48 = vpop.eup %11233  ;;  %v3872_v29 = vmul.f32 %v11232_v25, %v11224_v20 }
 0xe03   :  { %v11236_v2 = vpop.eup %11235  ;;  %v3870_v30 = vmul.f32 %v11234_v48, %v11226_v16 }
 0xe04   :  { %v11238_v35 = vpop.eup %11237  ;;  %v3867_v1 = vmul.f32 %v11236_v2, %v13566_v18  ;;  %v8381_v2 = vld [vmem:[%s14842_s2 + $0x38] sm:$0x7f] }
 0xe05   :  { %v11240_v58 = vpop.eup %11239  ;;  %v3865_v59 = vmul.f32 %v11238_v35, %v13569_v9  ;;  %v13695_v35 = vld [vmem:[%s14848_s8] sm:$0xf] }
 0xe06   :  { %v11242_v50 = vpop.eup %11241  ;;  %v3868_v26 = vmul.f32 %v11240_v58, %v13572_v57  ;;  %v13671_v23 = vadd.f32 %v3871_v63, %v3867_v1 }
 0xe07   :  { %v11244_v17 = vpop.eup %11243  ;;  %v3866_v49 = vmul.f32 %v11242_v50, %v13575_v60  ;;  %v13674_v14 = vadd.f32 %v3869_v40, %v3865_v59 }
 0xe08   :  { %v11246_v37 = vpop.eup %11245  ;;  %11251 = vtanh.f32 %v13671_v23  ;;  %v13677_v44 = vadd.f32 %v3872_v29, %v3868_v26  ;;  %v3855_v8 = vadd.f32 1.0, %v11244_v17 }
 0xe09   :  { %v11248_v18 = vpop.eup %11247  ;;  %11253 = vtanh.f32 %v13674_v14  ;;  %v13680_v9 = vadd.f32 %v3870_v30, %v3866_v49  ;;  %v3853_v32 = vadd.f32 1.0, %v11246_v37  ;;  %v3941_v30 = vmul.f32 %v8381_v2, %v12671_v24 }
 0xe0a   :  { %v11250_v57 = vpop.eup %11249  ;;  %11255 = vtanh.f32 %v13677_v44  ;;  %v3856_v39 = vadd.f32 1.0, %v11248_v18 }
 0xe0b   :  { %11257 = vtanh.f32 %v13680_v9  ;;  %v3854_v60 = vadd.f32 1.0, %v11250_v57  ;;  %v3942_v1 = vsel %vm648_vm3, %v3941_v30, 1.0 }
 0xe0c   :  { %11259 = vrcp.f32 %v3855_v8  ;;  %v3943_v58 = vpack.c.bf16 %v3942_v1, %v3942_v1 }
 0xe0d   :  { %11261 = vrcp.f32 %v3853_v32 }
 0xe0e   :  { %11263 = vrcp.f32 %v3856_v39  ;;  %v3945_v59 = vsel %vm717_vm4, %v3943_v58, 0 }
 0xe0f   :  { %11265 = vrcp.f32 %v3854_v60 }
 0xe12   :  { %v11252_v28 = vpop.eup %11251 }
 0xe13   :  { %v11254_v15 = vpop.eup %11253 }
 0xe14   :  { %v11256_v62 = vpop.eup %11255 }
 0xe15   :  { %v11258_v10 = vpop.eup %11257 }
 0xe16   :  { %v11260_v20 = vpop.eup %11259 }
 0xe17   :  { %v11262_v34 = vpop.eup %11261  ;;  %v3883_v7 = vmul.f32 %v11260_v20, %v11252_v28 }
 0xe18   :  { %v11264_v16 = vpop.eup %11263  ;;  %v3881_v25 = vmul.f32 %v11262_v34, %v11254_v15 }
 0xe19   :  { %v11266_v27 = vpop.eup %11265  ;;  %v3884_v63 = vmul.f32 %v11264_v16, %v11256_v62 }
 0xe1a   :  { %v3882_v40 = vmul.f32 %v11266_v27, %v11258_v10 }
 0xe1b   :  { %v3886_v48 = vpack.c.bf16 %v3884_v63, %v3883_v7 }
 0xe1c   :  { %v3885_v29 = vpack.c.bf16 %v3882_v40, %v3881_v25 }
 0xe1e   :  { %9683 = vmatpush3.bf16.msra.mxu0 %v3885_v29  ;;  %9714 = vmatprep.subr.bf16.mxu1 %v3885_v29 }
 0xe1f   :  { %9715 = vmatpush3.bf16.msra.mxu1 %v3885_v29  ;;  %9684 = vmatprep.subr.bf16.mxu0 %v12565_v46 }
 0xe20   :  { %9716 = vmatprep.subr.bf16.mxu1 %v3886_v48 }
 0xe22   :  { %9685 = vmatpush3.bf16.msra.mxu0 %v3886_v48 }
 0xe23   :  { %9717 = vmatpush3.bf16.msra.mxu1 %v3886_v48  ;;  %9686 = vmatprep.subr.bf16.mxu0 %v12565_v46 }
 0xe26   :  { %9687 = vmatpush3.bf16.msra.mxu0 %v12629_v4 }
 0xe27   :  { %9692 = vmatprep.subr.bf16.mxu0 %v13606_v5 }
 0xe29   :  { %9689 = vmatmul.mubr.msk.bf16.vlgmr.msra.gmra.mrb[140].mxu0 %vm365_vm2, %v13695_v35 }
 0xe2a   :  { %9693 = vmatpush3.bf16.msra.mxu0 %v13606_v5  ;;  %9698 = vmatprep.mubr.msk.bf16.mxu0 %vm692_vm5, %v13508_v43 }
 0xe2b   :  { %9694 = vmatprep.subr.bf16.mxu0 %v13604_v19 }
 0xe2e   :  { %9695 = vmatpush3.bf16.msra.mxu0 %v13604_v19 }
 0xe2f   :  { %10221 = vmatprep.subr.msk.bf16.mxu0 %vm717_vm4, %v3943_v58 }
 0xe32   :  { %9697 = vmatpush3.bf16.msra.mxu0 %v3945_v59 }
 0xe33   :  { %9740 = vmatprep.subr.bf16.mxu0 %v12565_v46 }
 0xe35   :  { %9699 = vmatmul.mubr.msk.bf16.vlgmr.msra.gmra.mrb[144].mxu0 %vm692_vm5, %v13515_v12 }
 0xe36   :  { %9702 = vmatprep.mubr.msk.bf16.mxu0 %vm692_vm5, %v13522_v52 }
 0xe3d   :  { %9703 = vmatmul.mubr.msk.bf16.gmra.mrb[148].mxu0 %vm692_vm5, %v13529_v13 }
 0xe3e   :  { %9706 = vmatprep.mubr.msk.bf16.mxu0 %vm692_vm5, %v13536_v11 }
 0xe45   :  { %9707 = vmatmul.mubr.msk.bf16.gmra.mrb[152].mxu0 %vm692_vm5, %v13543_v53 }
 0xe46   :  { %9710 = vmatprep.mubr.msk.bf16.mxu0 %vm692_vm5, %v13550_v36 }
 0xe4d   :  { %9711 = vmatmul.mubr.msk.bf16.gmra.mrb[156].mxu0 %vm692_vm5, %v13557_v3 }
 0xe4e   :  { %9746 = vmatprep.mubr.msk.bf16.mxu0 %vm12566_vm6, %v12565_v46 }
 0xefc   :  { %v3921_v43 = vpop.f32.mrb[140].mxu0 }
 0xefd   :  { %vm3927_vm1 = vcmp.ge.f32.partialorder %v3921_v43, 0.0  ;;  %v3928_v12 = vmul.f32 %v3921_v43, %v12931_v38  ;;  %v9690_v52 = vpop.f32.mrb[141].mxu0 }
 0xefe   :  { %v3924_v13 = vpop.f32.mrb[142].mxu0 }
 0xeff   :  { %v3929_v19 = vsel %vm3927_vm1, %v3921_v43, %v3928_v12  ;;  %v9691_v11 = vpop.f32.mrb[143].mxu0 }
 0xf00   :  { %v3930_v5 = vmul.f32 %v3929_v19, %v12934_v42 }
 0xf02   :  { %v3931_v53 = vsel %vm1229_vm10, %v3930_v5, 0.0 }
 0xf03   :  { %v3932_v50 = vrot.slane %v3931_v53, 4 }
 0xf05   :  { %v3933_v36 = vadd.f32 %v3932_v50, %v3931_v53 }
 0xf07   :  { %v3934_v26 = vrot.slane %v3933_v36, 2 }
 0xf08   :  { %v9700_v17 = vpop.f32.mrb[144].mxu0 }
 0xf09   :  { %v3935_v3 = vadd.f32 %v3934_v26, %v3933_v36  ;;  %v8392_v49 = vmul.f32 -1.442695, %v9700_v17  ;;  %v3981_v37 = vpop.f32.mrb[145].mxu0 }
 0xf0a   :  { %v8390_v8 = vmul.f32 -1.442695, %v3981_v37  ;;  %v9701_v18 = vpop.f32.mrb[146].mxu0 }
 0xf0b   :  { %v3936_v32 = vrot.slane %v3935_v3, 1  ;;  %11267 = vpow2.f32 %v8392_v49  ;;  %v8393_v57 = vmul.f32 -1.442695, %v9701_v18  ;;  %v3984_v39 = vpop.f32.mrb[147].mxu0 }
 0xf0c   :  { %11269 = vpow2.f32 %v8390_v8  ;;  %v8391_v60 = vmul.f32 -1.442695, %v3984_v39 }
 0xf0d   :  { %v3937_v28 = vadd.f32 %v3936_v32, %v3935_v3  ;;  %11271 = vpow2.f32 %v8393_v57 }
 0xf0e   :  { %11273 = vpow2.f32 %v8391_v60 }
 0xf0f   :  { %3938 = vst.msk [vmem:[#allocation2 + $0x6] sm:$0x1] %vm1237_vm11, %v3937_v28 }
 0xf10   :  { %v9704_v15 = vpop.f32.mrb[148].mxu0 }
 0xf11   :  { %v8396_v62 = vmul.f32 -1.442695, %v9704_v15  ;;  %v3997_v10 = vpop.f32.mrb[149].mxu0 }
 0xf12   :  { %v8394_v20 = vmul.f32 -1.442695, %v3997_v10  ;;  %v9705_v34 = vpop.f32.mrb[150].mxu0 }
 0xf13   :  { %11275 = vpow2.f32 %v8396_v62  ;;  %v8397_v16 = vmul.f32 -1.442695, %v9705_v34  ;;  %v4000_v27 = vpop.f32.mrb[151].mxu0 }
 0xf14   :  { %11277 = vpow2.f32 %v8394_v20  ;;  %v8395_v7 = vmul.f32 -1.442695, %v4000_v27 }
 0xf15   :  { %v11268_v63 = vpop.eup %11267  ;;  %11279 = vpow2.f32 %v8397_v16 }
 0xf16   :  { %v11270_v25 = vpop.eup %11269  ;;  %v4058_v40 = vadd.f32 1.0, %v11268_v63  ;;  %11281 = vpow2.f32 %v8395_v7 }
 0xf17   :  { %v11272_v48 = vpop.eup %11271  ;;  %v4056_v29 = vadd.f32 1.0, %v11270_v25 }
 0xf18   :  { %v11274_v2 = vpop.eup %11273  ;;  %11283 = vrcp.f32 %v4058_v40  ;;  %v4059_v30 = vadd.f32 1.0, %v11272_v48  ;;  %v9708_v1 = vpop.f32.mrb[152].mxu0 }
 0xf19   :  { %11285 = vrcp.f32 %v4056_v29  ;;  %v4057_v58 = vadd.f32 1.0, %v11274_v2  ;;  %v4013_v59 = vpop.f32.mrb[153].mxu0 }
 0xf1a   :  { %11287 = vrcp.f32 %v4059_v30  ;;  %v9709_v43 = vpop.f32.mrb[154].mxu0 }
 0xf1b   :  { %11289 = vrcp.f32 %v4057_v58  ;;  %v4016_v12 = vpop.f32.mrb[155].mxu0 }
 0xf1c   :  { %11291 = vtanh.f32 %v9708_v1 }
 0xf1d   :  { %v11276_v52 = vpop.eup %11275  ;;  %11293 = vtanh.f32 %v4013_v59 }
 0xf1e   :  { %v11278_v13 = vpop.eup %11277  ;;  %v4082_v19 = vadd.f32 1.0, %v11276_v52  ;;  %11295 = vtanh.f32 %v9709_v43 }
 0xf1f   :  { %v11280_v11 = vpop.eup %11279  ;;  %v4080_v5 = vadd.f32 1.0, %v11278_v13  ;;  %11297 = vtanh.f32 %v4016_v12 }
 0xf20   :  { %v11282_v53 = vpop.eup %11281  ;;  %11299 = vrcp.f32 %v4082_v19  ;;  %v4083_v50 = vadd.f32 1.0, %v11280_v11  ;;  %v9712_v36 = vpop.f32.mrb[156].mxu0 }
 0xf21   :  { %11301 = vrcp.f32 %v4080_v5  ;;  %v4081_v26 = vadd.f32 1.0, %v11282_v53  ;;  %v8400_v17 = vmul.f32 -1.442695, %v9712_v36  ;;  %v4029_v3 = vpop.f32.mrb[157].mxu0 }
 0xf22   :  { %v11284_v49 = vpop.eup %11283  ;;  %11303 = vrcp.f32 %v4083_v50  ;;  %v8398_v37 = vmul.f32 -1.442695, %v4029_v3  ;;  %v9713_v8 = vpop.f32.mrb[158].mxu0 }
 0xf23   :  { %v11286_v18 = vpop.eup %11285  ;;  %11305 = vrcp.f32 %v4081_v26  ;;  %v8401_v32 = vmul.f32 -1.442695, %v9713_v8  ;;  %v4032_v57 = vpop.f32.mrb[159].mxu0 }
 0xf24   :  { %v11288_v39 = vpop.eup %11287  ;;  %11307 = vpow2.f32 %v8400_v17  ;;  %v8399_v60 = vmul.f32 -1.442695, %v4032_v57 }
 0xf25   :  { %v11290_v28 = vpop.eup %11289  ;;  %11309 = vpow2.f32 %v8398_v37 }
 0xf26   :  { %v11292_v15 = vpop.eup %11291  ;;  %11311 = vpow2.f32 %v8401_v32 }
 0xf27   :  { %v11294_v62 = vpop.eup %11293  ;;  %v4126_v10 = vmul.f32 %v11292_v15, %v11284_v49  ;;  %11313 = vpow2.f32 %v8399_v60  ;;  %v8423_v60 = vld [vmem:[%s14842_s2 + $0x40] sm:$0x7f] }
 0xf28   :  { %v11296_v20 = vpop.eup %11295  ;;  %v4124_v34 = vmul.f32 %v11294_v62, %v11286_v18 }
 0xf29   :  { %v11298_v16 = vpop.eup %11297  ;;  %v4127_v27 = vmul.f32 %v11296_v20, %v11288_v39  ;;  %v13820_v20 = vld [vmem:[%s14846_s6 + $0x38] sm:$0xff]  }
 0xf2a   :  { %v11300_v7 = vpop.eup %11299  ;;  %v4125_v63 = vmul.f32 %v11298_v16, %v11290_v28  ;;  %v4391_v28 = vmul.f32 %v8423_v60, %v12671_v24 }
 0xf2b   :  { %v11302_v25 = vpop.eup %11301  ;;  %v4122_v40 = vmul.f32 %v11300_v7, %v13585_v22 }
 0xf2c   :  { %v11304_v48 = vpop.eup %11303  ;;  %v4120_v29 = vmul.f32 %v11302_v25, %v13595_v54  ;;  %v4392_v15 = vsel %vm648_vm3, %v4391_v28, 1.0 }
 0xf2d   :  { %v11306_v2 = vpop.eup %11305  ;;  %v4123_v30 = vmul.f32 %v11304_v48, %v13597_v21  ;;  %v13731_v1 = vadd.f32 %v4126_v10, %v4122_v40  ;;  %v4393_v62 = vpack.c.bf16 %v4392_v15, %v4392_v15 }
 0xf2e   :  { %v11308_v58 = vpop.eup %11307  ;;  %v4121_v59 = vmul.f32 %v11306_v2, %v13600_v6  ;;  %v13734_v43 = vadd.f32 %v4124_v34, %v4120_v29 }
 0xf2f   :  { %v11310_v12 = vpop.eup %11309  ;;  %11315 = vtanh.f32 %v13731_v1  ;;  %v13737_v52 = vadd.f32 %v4127_v27, %v4123_v30  ;;  %v4110_v13 = vadd.f32 1.0, %v11308_v58  ;;  %v4395_v10 = vsel %vm717_vm4, %v4393_v62, 0 }
 0xf30   :  { %v11312_v22 = vpop.eup %11311  ;;  %11317 = vtanh.f32 %v13734_v43  ;;  %v13740_v54 = vadd.f32 %v4125_v63, %v4121_v59  ;;  %v4108_v19 = vadd.f32 1.0, %v11310_v12 }
 0xf31   :  { %v11314_v21 = vpop.eup %11313  ;;  %11319 = vtanh.f32 %v13737_v52  ;;  %v4111_v11 = vadd.f32 1.0, %v11312_v22 }
 0xf32   :  { %11321 = vtanh.f32 %v13740_v54  ;;  %v4109_v6 = vadd.f32 1.0, %v11314_v21 }
 0xf33   :  { %11323 = vrcp.f32 %v4110_v13 }
 0xf34   :  { %11325 = vrcp.f32 %v4108_v19 }
 0xf35   :  { %11327 = vrcp.f32 %v4111_v11 }
 0xf36   :  { %11329 = vrcp.f32 %v4109_v6 }
 0xf39   :  { %v11316_v5 = vpop.eup %11315 }
 0xf3a   :  { %v11318_v53 = vpop.eup %11317 }
 0xf3b   :  { %v11320_v50 = vpop.eup %11319 }
 0xf3c   :  { %v11322_v36 = vpop.eup %11321 }
 0xf3d   :  { %v11324_v26 = vpop.eup %11323 }
 0xf3e   :  { %v11326_v17 = vpop.eup %11325  ;;  %v4138_v37 = vmul.f32 %v11324_v26, %v11316_v5 }
 0xf3f   :  { %v11328_v3 = vpop.eup %11327  ;;  %v4136_v18 = vmul.f32 %v11326_v17, %v11318_v53 }
 0xf40   :  { %v11330_v49 = vpop.eup %11329  ;;  %v4139_v8 = vmul.f32 %v11328_v3, %v11320_v50 }
 0xf41   :  { %v4137_v32 = vmul.f32 %v11330_v49, %v11322_v36 }
 0xf42   :  { %v4141_v57 = vpack.c.bf16 %v4139_v8, %v4138_v37 }
 0xf43   :  { %v4140_v39 = vpack.c.bf16 %v4137_v32, %v4136_v18 }
 0xf45   :  { %9718 = vmatprep.subr.bf16.mxu1 %v4140_v39 }
 0xf46   :  { %9719 = vmatpush3.bf16.msra.mxu1 %v4140_v39 }
 0xf47   :  { %9720 = vmatprep.subr.bf16.mxu1 %v4141_v57 }
 0xf4a   :  { %9721 = vmatpush3.bf16.msra.mxu1 %v4141_v57 }
 0xf4b   :  { %9722 = vmatprep.subr.bf16.mxu1 %v12629_v4 }
 0xf4e   :  { %9723 = vmatpush3.bf16.msra.mxu1 %v12629_v4 }
 0xf4f   :  { %9750 = vmatprep.subr.bf16.mxu1 %v4140_v39 }
 0xf51   :  { %9725 = vmatmul.mubr.msk.bf16.vlgmr.msra.gmra.mrb[144].mxu1 %vm956_vm7, %v13617_v51  ;;  %v13771_v51 = vld [vmem:[%s14846_s6] sm:$0xff]  }
 0xf52   :  { %9751 = vmatpush3.bf16.msra.mxu1 %v4140_v39  ;;  %9728 = vmatprep.mubr.msk.bf16.mxu1 %vm956_vm7, %v13624_v31  ;;  %v13778_v31 = vld [vmem:[%s14846_s6 + $0x8] sm:$0xff]  }
 0xf53   :  { %9752 = vmatprep.subr.bf16.mxu1 %v4141_v57 }
 0xf56   :  { %9753 = vmatpush3.bf16.msra.mxu1 %v4141_v57 }
 0xf57   :  { %10222 = vmatprep.subr.msk.bf16.mxu1 %vm717_vm4, %v4393_v62 }
 0xf59   :  { %9729 = vmatmul.mubr.msk.bf16.gmra.mrb[148].mxu1 %vm956_vm7, %v13631_v47  ;;  %v13785_v47 = vld [vmem:[%s14846_s6 + $0x10] sm:$0xff]  }
 0xf5a   :  { %9755 = vmatpush3.bf16.msra.mxu1 %v4395_v10  ;;  %9732 = vmatprep.mubr.msk.bf16.mxu1 %vm956_vm7, %v13638_v33  ;;  %v13792_v33 = vld [vmem:[%s14846_s6 + $0x18] sm:$0xff]  }
 0xf5b   :  { %9798 = vmatprep.subr.bf16.mxu1 %v12565_v46 }
 0xf61   :  { %9733 = vmatmul.mubr.msk.bf16.gmra.mrb[152].mxu1 %vm956_vm7, %v13645_v0  ;;  %v13799_v0 = vld [vmem:[%s14846_s6 + $0x20] sm:$0xff]  }
 0xf62   :  { %9736 = vmatprep.mubr.msk.bf16.mxu1 %vm956_vm7, %v13652_v45  ;;  %v13806_v45 = vld [vmem:[%s14846_s6 + $0x28] sm:$0xff]  }
 0xf69   :  { %9737 = vmatmul.mubr.msk.bf16.gmra.mrb[156].mxu1 %vm956_vm7, %v13659_v41  ;;  %v13813_v41 = vld [vmem:[%s14846_s6 + $0x30] sm:$0xff]  }
 0xf6a   :  { %9756 = vmatprep.mubr.msk.bf16.mxu1 %vm692_vm5, %v13771_v51 }
 0xf71   :  { %9757 = vmatmul.mubr.msk.bf16.vlgmr.msra.gmra.mrb[160].mxu1 %vm692_vm5, %v13778_v31 }
 0xf72   :  { %9760 = vmatprep.mubr.msk.bf16.mxu1 %vm692_vm5, %v13785_v47 }
 0xf79   :  { %9761 = vmatmul.mubr.msk.bf16.gmra.mrb[164].mxu1 %vm692_vm5, %v13792_v33 }
 0xf7a   :  { %9764 = vmatprep.mubr.msk.bf16.mxu1 %vm692_vm5, %v13799_v0 }
 0xf81   :  { %9765 = vmatmul.mubr.msk.bf16.gmra.mrb[168].mxu1 %vm692_vm5, %v13806_v45 }
 0xf82   :  { %9768 = vmatprep.mubr.msk.bf16.mxu1 %vm692_vm5, %v13813_v41 }
 0xf89   :  { %9769 = vmatmul.mubr.msk.bf16.gmra.mrb[172].mxu1 %vm692_vm5, %v13820_v20 }
 0xf8a   :  { %9804 = vmatprep.mubr.msk.bf16.mxu1 %vm12566_vm6, %v12565_v46 }
0x1024   :  { %v9726_v34 = vpop.f32.mrb[144].mxu1 }
0x1025   :  { %v8412_v16 = vmul.f32 -1.442695, %v9726_v34  ;;  %v4176_v27 = vpop.f32.mrb[145].mxu1 }
0x1026   :  { %v8410_v7 = vmul.f32 -1.442695, %v4176_v27  ;;  %v9727_v63 = vpop.f32.mrb[146].mxu1 }
0x1027   :  { %11331 = vpow2.f32 %v8412_v16  ;;  %v8413_v25 = vmul.f32 -1.442695, %v9727_v63  ;;  %v4179_v40 = vpop.f32.mrb[147].mxu1 }
0x1028   :  { %11333 = vpow2.f32 %v8410_v7  ;;  %v8411_v48 = vmul.f32 -1.442695, %v4179_v40 }
0x1029   :  { %11335 = vpow2.f32 %v8413_v25 }
0x102a   :  { %11337 = vpow2.f32 %v8411_v48 }
0x102c   :  { %v9730_v29 = vpop.f32.mrb[148].mxu1 }
0x102d   :  { %v8416_v2 = vmul.f32 -1.442695, %v9730_v29  ;;  %v4192_v30 = vpop.f32.mrb[149].mxu1 }
0x102e   :  { %v8414_v58 = vmul.f32 -1.442695, %v4192_v30  ;;  %v9731_v59 = vpop.f32.mrb[150].mxu1 }
0x102f   :  { %11339 = vpow2.f32 %v8416_v2  ;;  %v8417_v12 = vmul.f32 -1.442695, %v9731_v59  ;;  %v4195_v13 = vpop.f32.mrb[151].mxu1 }
0x1030   :  { %11341 = vpow2.f32 %v8414_v58  ;;  %v8415_v22 = vmul.f32 -1.442695, %v4195_v13 }
0x1031   :  { %v11332_v19 = vpop.eup %11331  ;;  %11343 = vpow2.f32 %v8417_v12 }
0x1032   :  { %v11334_v21 = vpop.eup %11333  ;;  %v4253_v11 = vadd.f32 1.0, %v11332_v19  ;;  %11345 = vpow2.f32 %v8415_v22 }
0x1033   :  { %v11336_v6 = vpop.eup %11335  ;;  %v4251_v5 = vadd.f32 1.0, %v11334_v21 }
0x1034   :  { %v11338_v53 = vpop.eup %11337  ;;  %11347 = vrcp.f32 %v4253_v11  ;;  %v4254_v50 = vadd.f32 1.0, %v11336_v6  ;;  %v9734_v36 = vpop.f32.mrb[152].mxu1 }
0x1035   :  { %11349 = vrcp.f32 %v4251_v5  ;;  %v4252_v26 = vadd.f32 1.0, %v11338_v53  ;;  %v4208_v17 = vpop.f32.mrb[153].mxu1 }
0x1036   :  { %11351 = vrcp.f32 %v4254_v50  ;;  %v9735_v3 = vpop.f32.mrb[154].mxu1 }
0x1037   :  { %11353 = vrcp.f32 %v4252_v26  ;;  %v4211_v49 = vpop.f32.mrb[155].mxu1 }
0x1038   :  { %11355 = vtanh.f32 %v9734_v36 }
0x1039   :  { %v11340_v37 = vpop.eup %11339  ;;  %11357 = vtanh.f32 %v4208_v17 }
0x103a   :  { %v11342_v8 = vpop.eup %11341  ;;  %v4277_v18 = vadd.f32 1.0, %v11340_v37  ;;  %11359 = vtanh.f32 %v9735_v3 }
0x103b   :  { %v11344_v32 = vpop.eup %11343  ;;  %v4275_v57 = vadd.f32 1.0, %v11342_v8  ;;  %11361 = vtanh.f32 %v4211_v49 }
0x103c   :  { %v11346_v39 = vpop.eup %11345  ;;  %11363 = vrcp.f32 %v4277_v18  ;;  %v4278_v60 = vadd.f32 1.0, %v11344_v32  ;;  %v9738_v28 = vpop.f32.mrb[156].mxu1 }
0x103d   :  { %11365 = vrcp.f32 %v4275_v57  ;;  %v4276_v15 = vadd.f32 1.0, %v11346_v39  ;;  %v8420_v62 = vmul.f32 -1.442695, %v9738_v28  ;;  %v4224_v10 = vpop.f32.mrb[157].mxu1 }
0x103e   :  { %v11348_v34 = vpop.eup %11347  ;;  %11367 = vrcp.f32 %v4278_v60  ;;  %v8418_v16 = vmul.f32 -1.442695, %v4224_v10  ;;  %v9739_v27 = vpop.f32.mrb[158].mxu1 }
0x103f   :  { %v11350_v7 = vpop.eup %11349  ;;  %11369 = vrcp.f32 %v4276_v15  ;;  %v8421_v63 = vmul.f32 -1.442695, %v9739_v27  ;;  %v4227_v25 = vpop.f32.mrb[159].mxu1 }
0x1040   :  { %v11352_v40 = vpop.eup %11351  ;;  %11371 = vpow2.f32 %v8420_v62  ;;  %v8419_v48 = vmul.f32 -1.442695, %v4227_v25 }
0x1041   :  { %v11354_v29 = vpop.eup %11353  ;;  %11373 = vpow2.f32 %v8418_v16 }
0x1042   :  { %v11356_v2 = vpop.eup %11355  ;;  %11375 = vpow2.f32 %v8421_v63 }
0x1043   :  { %v11358_v30 = vpop.eup %11357  ;;  %v4321_v58 = vmul.f32 %v11356_v2, %v11348_v34  ;;  %11377 = vpow2.f32 %v8419_v48 }
0x1044   :  { %v11360_v59 = vpop.eup %11359  ;;  %v4319_v12 = vmul.f32 %v11358_v30, %v11350_v7  ;;  %v9758_v13 = vpop.f32.mrb[160].mxu1 }
0x1045   :  { %v11362_v22 = vpop.eup %11361  ;;  %v4322_v19 = vmul.f32 %v11360_v59, %v11352_v40  ;;  %v8434_v21 = vmul.f32 -1.442695, %v9758_v13  ;;  %v4431_v11 = vpop.f32.mrb[161].mxu1 }
0x1046   :  { %v11364_v6 = vpop.eup %11363  ;;  %v4320_v5 = vmul.f32 %v11362_v22, %v11354_v29  ;;  %v8432_v53 = vmul.f32 -1.442695, %v4431_v11  ;;  %v9759_v50 = vpop.f32.mrb[162].mxu1 }
0x1047   :  { %v11366_v36 = vpop.eup %11365  ;;  %v4317_v26 = vmul.f32 %v11364_v6, %v13671_v23  ;;  %11379 = vpow2.f32 %v8434_v21  ;;  %v8435_v17 = vmul.f32 -1.442695, %v9759_v50  ;;  %v4434_v3 = vpop.f32.mrb[163].mxu1 }
0x1048   :  { %v11368_v49 = vpop.eup %11367  ;;  %v4315_v37 = vmul.f32 %v11366_v36, %v13674_v14  ;;  %11381 = vpow2.f32 %v8432_v53  ;;  %v8433_v8 = vmul.f32 -1.442695, %v4434_v3 }
0x1049   :  { %v11370_v18 = vpop.eup %11369  ;;  %v4318_v32 = vmul.f32 %v11368_v49, %v13677_v44  ;;  %v13829_v57 = vadd.f32 %v4321_v58, %v4317_v26  ;;  %11383 = vpow2.f32 %v8435_v17 }
0x104a   :  { %v11372_v39 = vpop.eup %11371  ;;  %v4316_v60 = vmul.f32 %v11370_v18, %v13680_v9  ;;  %v13832_v28 = vadd.f32 %v4319_v12, %v4315_v37  ;;  %11385 = vpow2.f32 %v8433_v8 }
0x104b   :  { %v11374_v23 = vpop.eup %11373  ;;  %11387 = vtanh.f32 %v13829_v57  ;;  %v13835_v15 = vadd.f32 %v4322_v19, %v4318_v32  ;;  %v4305_v14 = vadd.f32 1.0, %v11372_v39 }
0x104c   :  { %v11376_v62 = vpop.eup %11375  ;;  %11389 = vtanh.f32 %v13832_v28  ;;  %v13838_v10 = vadd.f32 %v4320_v5, %v4316_v60  ;;  %v4303_v44 = vadd.f32 1.0, %v11374_v23  ;;  %v9762_v34 = vpop.f32.mrb[164].mxu1 }
0x104d   :  { %v11378_v16 = vpop.eup %11377  ;;  %11391 = vtanh.f32 %v13835_v15  ;;  %v4306_v9 = vadd.f32 1.0, %v11376_v62  ;;  %v4447_v27 = vpop.f32.mrb[165].mxu1  ;;  %v8438_v25 = vmul.f32 -1.442695, %v9762_v34 }
0x104e   :  { %11393 = vtanh.f32 %v13838_v10  ;;  %v4304_v7 = vadd.f32 1.0, %v11378_v16  ;;  %v9763_v63 = vpop.f32.mrb[166].mxu1  ;;  %v8436_v13 = vmul.f32 -1.442695, %v4447_v27 }
0x104f   :  { %11395 = vrcp.f32 %v4305_v14  ;;  %v4450_v40 = vpop.f32.mrb[167].mxu1  ;;  %v8439_v11 = vmul.f32 -1.442695, %v9763_v63 }
0x1050   :  { %11397 = vrcp.f32 %v4303_v44  ;;  %v8437_v53 = vmul.f32 -1.442695, %v4450_v40 }
0x1051   :  { %v11380_v48 = vpop.eup %11379  ;;  %11399 = vrcp.f32 %v4306_v9 }
0x1052   :  { %v11382_v29 = vpop.eup %11381  ;;  %11401 = vrcp.f32 %v4304_v7  ;;  %v4508_v2 = vadd.f32 1.0, %v11380_v48 }
0x1053   :  { %v11384_v30 = vpop.eup %11383  ;;  %v4506_v58 = vadd.f32 1.0, %v11382_v29  ;;  %11403 = vpow2.f32 %v8438_v25 }
0x1054   :  { %v11386_v59 = vpop.eup %11385  ;;  %11405 = vrcp.f32 %v4508_v2  ;;  %v4509_v12 = vadd.f32 1.0, %v11384_v30  ;;  %v9766_v22 = vpop.f32.mrb[168].mxu1 }
0x1055   :  { %v11388_v19 = vpop.eup %11387  ;;  %11407 = vrcp.f32 %v4506_v58  ;;  %v4507_v21 = vadd.f32 1.0, %v11386_v59  ;;  %v4463_v6 = vpop.f32.mrb[169].mxu1 }
0x1056   :  { %v11390_v5 = vpop.eup %11389  ;;  %11409 = vrcp.f32 %v4509_v12  ;;  %v9767_v50 = vpop.f32.mrb[170].mxu1 }
0x1057   :  { %v11392_v36 = vpop.eup %11391  ;;  %11411 = vrcp.f32 %v4507_v21  ;;  %v4466_v26 = vpop.f32.mrb[171].mxu1 }
0x1058   :  { %v11394_v17 = vpop.eup %11393  ;;  %11413 = vpow2.f32 %v8436_v13 }
0x1059   :  { %v11396_v3 = vpop.eup %11395  ;;  %11415 = vpow2.f32 %v8439_v11 }
0x105a   :  { %v11398_v49 = vpop.eup %11397  ;;  %11417 = vpow2.f32 %v8437_v53  ;;  %v4333_v32 = vmul.f32 %v11396_v3, %v11388_v19 }
0x105b   :  { %v11400_v37 = vpop.eup %11399  ;;  %11419 = vtanh.f32 %v9766_v22  ;;  %v4331_v62 = vmul.f32 %v11398_v49, %v11390_v5 }
0x105c   :  { %v11402_v8 = vpop.eup %11401  ;;  %11421 = vtanh.f32 %v4463_v6  ;;  %v9770_v18 = vpop.f32.mrb[172].mxu1  ;;  %v4334_v39 = vmul.f32 %v11400_v37, %v11392_v36 }
0x105d   :  { %v11404_v60 = vpop.eup %11403  ;;  %11423 = vtanh.f32 %v9767_v50  ;;  %v8442_v23 = vmul.f32 -1.442695, %v9770_v18  ;;  %v4479_v14 = vpop.f32.mrb[173].mxu1  ;;  %v4332_v44 = vmul.f32 %v11402_v8, %v11394_v17 }
0x105e   :  { %v11406_v34 = vpop.eup %11405  ;;  %v4532_v16 = vadd.f32 1.0, %v11404_v60  ;;  %11425 = vtanh.f32 %v4466_v26  ;;  %v8440_v9 = vmul.f32 -1.442695, %v4479_v14  ;;  %v9771_v27 = vpop.f32.mrb[174].mxu1  ;;  %v4336_v7 = vpack.c.bf16 %v4334_v39, %v4333_v32 }
0x105f   :  { %v11408_v63 = vpop.eup %11407  ;;  %11427 = vpow2.f32 %v8442_v23  ;;  %v4335_v25 = vpack.c.bf16 %v4332_v44, %v4331_v62  ;;  %v8443_v40 = vmul.f32 -1.442695, %v9771_v27  ;;  %v4482_v48 = vpop.f32.mrb[175].mxu1  ;;  %v12486_v23 = vld [vmem:[%s14847_s7] sm:$0xff]  }
0x1060   :  { %v11410_v29 = vpop.eup %11409  ;;  %11429 = vrcp.f32 %v4532_v16  ;;  %v8441_v2 = vmul.f32 -1.442695, %v4482_v48 }
0x1061   :  { %v11412_v30 = vpop.eup %11411  ;;  %11431 = vpow2.f32 %v8440_v9  ;;  %9741 = vmatpush3.bf16.msra.mxu0 %v4335_v25 }
0x1062   :  { %v11414_v58 = vpop.eup %11413  ;;  %11433 = vpow2.f32 %v8443_v40  ;;  %9742 = vmatprep.subr.bf16.mxu0 %v12565_v46 }
0x1063   :  { %v11416_v59 = vpop.eup %11415  ;;  %v4530_v12 = vadd.f32 1.0, %v11414_v58  ;;  %11435 = vpow2.f32 %v8441_v2 }
0x1064   :  { %v11418_v13 = vpop.eup %11417  ;;  %v4533_v22 = vadd.f32 1.0, %v11416_v59 }
0x1065   :  { %v11420_v19 = vpop.eup %11419  ;;  %11437 = vrcp.f32 %v4530_v12  ;;  %v4531_v21 = vadd.f32 1.0, %v11418_v13  ;;  %9743 = vmatpush3.bf16.msra.mxu0 %v4336_v7 }
0x1066   :  { %v11422_v11 = vpop.eup %11421  ;;  %11439 = vrcp.f32 %v4533_v22  ;;  %v4576_v6 = vmul.f32 %v11420_v19, %v11406_v34  ;;  %9744 = vmatprep.subr.bf16.mxu0 %v12565_v46  ;;  %v13880_v19 = vld [vmem:[%s14847_s7 + $0x8] sm:$0xff]  }
0x1067   :  { %v11424_v5 = vpop.eup %11423  ;;  %11441 = vrcp.f32 %v4531_v21  ;;  %v4574_v53 = vmul.f32 %v11422_v11, %v11408_v63  ;;  %v13887_v21 = vld [vmem:[%s14847_s7 + $0x10] sm:$0xff]   ;;  %v13894_v11 = vld [vmem:[%s14847_s7 + $0x18] sm:$0xff]  }
0x1068   :  { %v11426_v50 = vpop.eup %11425  ;;  %v4577_v36 = vmul.f32 %v11424_v5, %v11410_v29  ;;  %v13908_v5 = vld [vmem:[%s14847_s7 + $0x28] sm:$0xff]  }
0x1069   :  { %v11428_v26 = vpop.eup %11427  ;;  %v4575_v17 = vmul.f32 %v11426_v50, %v11412_v30  ;;  %9745 = vmatpush3.bf16.msra.mxu0 %v12629_v4  ;;  %v13922_v50 = vld [vmem:[%s14847_s7 + $0x38] sm:$0xff]  }
0x106a   :  { %v11430_v3 = vpop.eup %11429  ;;  %9772 = vmatprep.subr.bf16.mxu0 %v4335_v25  ;;  %v4560_v8 = vadd.f32 1.0, %v11428_v26 }
0x106b   :  { %v11432_v49 = vpop.eup %11431  ;;  %v4572_v37 = vmul.f32 %v11430_v3, %v13731_v1 }
0x106c   :  { %v11434_v18 = vpop.eup %11433  ;;  %v4558_v32 = vadd.f32 1.0, %v11432_v49  ;;  %9747 = vmatmul.mubr.msk.bf16.vlgmr.msra.gmra.mrb[160].mxu0 %vm365_vm2, %v13695_v35  ;;  %11443 = vrcp.f32 %v4560_v8 }
0x106d   :  { %v11436_v39 = vpop.eup %11435  ;;  %v13848_v60 = vadd.f32 %v4576_v6, %v4572_v37  ;;  %9773 = vmatpush3.bf16.msra.mxu0 %v4335_v25  ;;  %9782 = vmatprep.mubr.msk.bf16.mxu0 %vm956_vm7, %v12486_v23  ;;  %v4561_v14 = vadd.f32 1.0, %v11434_v18  ;;  %v13901_v6 = vld [vmem:[%s14847_s7 + $0x20] sm:$0xff]  }
0x106e   :  { %9774 = vmatprep.subr.bf16.mxu0 %v4336_v7  ;;  %v4559_v1 = vadd.f32 1.0, %v11436_v39  ;;  %11445 = vrcp.f32 %v4558_v32 }
0x106f   :  { %v11438_v62 = vpop.eup %11437  ;;  %11447 = vtanh.f32 %v13848_v60 }
0x1070   :  { %v11440_v44 = vpop.eup %11439  ;;  %v4570_v34 = vmul.f32 %v11438_v62, %v13734_v43  ;;  %11449 = vrcp.f32 %v4561_v14 }
0x1071   :  { %v11442_v35 = vpop.eup %11441  ;;  %v4573_v16 = vmul.f32 %v11440_v44, %v13737_v52  ;;  %9775 = vmatpush3.bf16.msra.mxu0 %v4336_v7  ;;  %11451 = vrcp.f32 %v4559_v1 }
0x1072   :  { %v4571_v9 = vmul.f32 %v11442_v35, %v13740_v54  ;;  %v13858_v27 = vadd.f32 %v4574_v53, %v4570_v34  ;;  %v13915_v53 = vld [vmem:[%s14847_s7 + $0x30] sm:$0xff]  }
0x1073   :  { %v13860_v63 = vadd.f32 %v4577_v36, %v4573_v16  ;;  %v7993_v16 = vstv %s13930_s15 }
0x1074   :  { %11453 = vtanh.f32 %v13858_v27  ;;  %v13863_v25 = vadd.f32 %v4575_v17, %v4571_v9 }
0x1075   :  { %11455 = vtanh.f32 %v13860_v63 }
0x1076   :  { %11457 = vtanh.f32 %v13863_v25  ;;  %v11444_v43 = vpop.eup %11443 }
0x1078   :  { %v11446_v52 = vpop.eup %11445 }
0x1079   :  { %v11448_v40 = vpop.eup %11447 }
0x107a   :  { %v11450_v7 = vpop.eup %11449  ;;  %v4588_v30 = vmul.f32 %v11448_v40, %v11444_v43 }
0x107b   :  { %v11452_v48 = vpop.eup %11451 }
0x107e   :  { %v11454_v54 = vpop.eup %11453 }
0x107f   :  { %v11456_v29 = vpop.eup %11455  ;;  %v4586_v59 = vmul.f32 %v11454_v54, %v11446_v52 }
0x1080   :  { %v11458_v2 = vpop.eup %11457  ;;  %v4589_v58 = vmul.f32 %v11456_v29, %v11450_v7 }
0x1081   :  { %v4587_v12 = vmul.f32 %v11458_v2, %v11452_v48 }
0x1082   :  { %v13867_v13 = vpack.c.bf16 %v4589_v58, %v4588_v30 }
0x1083   :  { %v13869_v22 = vpack.c.bf16 %v4587_v12, %v4586_v59 }
0x1085   :  { %9776 = vmatprep.subr.bf16.mxu0 %v13869_v22 }
0x1086   :  { %9777 = vmatpush3.bf16.msra.mxu0 %v13869_v22 }
0x1087   :  { %9778 = vmatprep.subr.bf16.mxu0 %v13867_v13 }
0x108a   :  { %9779 = vmatpush3.bf16.msra.mxu0 %v13867_v13 }
0x108b   :  { %9780 = vmatprep.subr.bf16.mxu0 %v12629_v4 }
0x108e   :  { %9781 = vmatpush3.bf16.msra.mxu0 %v12629_v4 }
0x1091   :  { %9783 = vmatmul.mubr.msk.bf16.vlgmr.msra.gmra.mrb[164].mxu0 %vm956_vm7, %v13880_v19 }
0x1092   :  { %9786 = vmatprep.mubr.msk.bf16.mxu0 %vm956_vm7, %v13887_v21 }
0x1099   :  { %9787 = vmatmul.mubr.msk.bf16.gmra.mrb[168].mxu0 %vm956_vm7, %v13894_v11 }
0x109a   :  { %9790 = vmatprep.mubr.msk.bf16.mxu0 %vm956_vm7, %v13901_v6 }
0x10a1   :  { %9791 = vmatmul.mubr.msk.bf16.gmra.mrb[172].mxu0 %vm956_vm7, %v13908_v5 }
0x10a2   :  { %9794 = vmatprep.mubr.msk.bf16.mxu0 %vm956_vm7, %v13915_v53 }
0x10a9   :  { %9795 = vmatmul.mubr.msk.bf16.gmra.mrb[176].mxu0 %vm956_vm7, %v13922_v50 }
0x10aa   :  { %9840 = vmatprep.mubr.msk.bf16.mxu0 %vm956_vm7, %v12486_v23  ;;  %v603_v23 = vmul.f32 %v602_v56, %v12869_v55 }
0x10ac   :  { %v605_v34 = vsel %vm600_vm9, %v12869_v55, %v603_v23 }
0x113f   :  { %v4371_v36 = vpop.f32.mrb[160].mxu0 }
0x1140   :  { %vm4377_vm8 = vcmp.ge.f32.partialorder %v4371_v36, 0.0  ;;  %v4378_v26 = vmul.f32 %v4371_v36, %v12931_v38  ;;  %v9748_v17 = vpop.f32.mrb[161].mxu0 }
0x1141   :  { %v4374_v3 = vpop.f32.mrb[162].mxu0 }
0x1142   :  { %v4379_v49 = vsel %vm4377_vm8, %v4371_v36, %v4378_v26  ;;  %v9749_v37 = vpop.f32.mrb[163].mxu0 }
0x1143   :  { %v4380_v8 = vmul.f32 %v4379_v49, %v12934_v42 }
0x1145   :  { %v4381_v18 = vsel %vm1229_vm10, %v4380_v8, 0.0 }
0x1146   :  { %v4382_v32 = vrot.slane %v4381_v18, 4 }
0x1148   :  { %v4383_v39 = vadd.f32 %v4382_v32, %v4381_v18 }
0x114a   :  { %v4384_v14 = vrot.slane %v4383_v39, 2 }
0x114c   :  { %v4385_v62 = vadd.f32 %v4384_v14, %v4383_v39 }
0x114e   :  { %v4386_v1 = vrot.slane %v4385_v62, 1 }
0x1150   :  { %v4387_v44 = vadd.f32 %v4386_v1, %v4385_v62 }
0x1152   :  { %4388 = vst.msk [vmem:[#allocation2 + $0x7] sm:$0x1] %vm1237_vm11, %v4387_v44 }
0x1159   :  { %v7989_v35 = vld [vmem:[#allocation2] sm:$0xff] }
0x115a   :  { %v7991_v9 = vmul.f32 %v7989_v35, %v605_v34 }
0x115c   :  { %v7994_v43 = vadd.f32 %v7993_v16, %v7991_v9 }
0x115e   :  { %v8759_v52 = vmul.f32 -1.442695, %v7994_v43 }
0x1160   :  { %11459 = vpow2.f32 %v8759_v52  ;;  %v12494_v52 = vld [vmem:[%s14841_s1] sm:$0xff] }
0x1164   :  { %v9784_v40 = vpop.f32.mrb[164].mxu0 }
0x1165   :  { %v8454_v7 = vmul.f32 -1.442695, %v9784_v40  ;;  %v4626_v48 = vpop.f32.mrb[165].mxu0 }
0x1166   :  { %v8452_v54 = vmul.f32 -1.442695, %v4626_v48  ;;  %v9785_v29 = vpop.f32.mrb[166].mxu0 }
0x1167   :  { %11461 = vpow2.f32 %v8454_v7  ;;  %v8455_v2 = vmul.f32 -1.442695, %v9785_v29  ;;  %v4629_v30 = vpop.f32.mrb[167].mxu0 }
0x1168   :  { %11463 = vpow2.f32 %v8452_v54  ;;  %v8453_v56 = vmul.f32 -1.442695, %v4629_v30 }
0x1169   :  { %11465 = vpow2.f32 %v8455_v2 }
0x116a   :  { %v11460_v58 = vpop.eup %11459  ;;  %11467 = vpow2.f32 %v8453_v56 }
0x116b   :  { %v8002_v55 = vadd.f32 1.0, %v11460_v58 }
0x116c   :  { %v9788_v59 = vpop.f32.mrb[168].mxu0 }
0x116d   :  { %11469 = vrcp.f32 %v8002_v55  ;;  %v8458_v12 = vmul.f32 -1.442695, %v9788_v59  ;;  %v4642_v36 = vpop.f32.mrb[169].mxu0 }
0x116e   :  { %v8456_v26 = vmul.f32 -1.442695, %v4642_v36  ;;  %v9789_v17 = vpop.f32.mrb[170].mxu0 }
0x116f   :  { %11471 = vpow2.f32 %v8458_v12  ;;  %v8459_v3 = vmul.f32 -1.442695, %v9789_v17  ;;  %v4645_v49 = vpop.f32.mrb[171].mxu0 }
0x1170   :  { %11473 = vpow2.f32 %v8456_v26  ;;  %v8457_v37 = vmul.f32 -1.442695, %v4645_v49 }
0x1171   :  { %v11462_v8 = vpop.eup %11461  ;;  %11475 = vpow2.f32 %v8459_v3 }
0x1172   :  { %v11464_v18 = vpop.eup %11463  ;;  %v4703_v32 = vadd.f32 1.0, %v11462_v8  ;;  %11477 = vpow2.f32 %v8457_v37 }
0x1173   :  { %v11466_v39 = vpop.eup %11465  ;;  %v4701_v14 = vadd.f32 1.0, %v11464_v18 }
0x1174   :  { %v11468_v62 = vpop.eup %11467  ;;  %11479 = vrcp.f32 %v4703_v32  ;;  %v4704_v1 = vadd.f32 1.0, %v11466_v39  ;;  %v9792_v44 = vpop.f32.mrb[172].mxu0 }
0x1175   :  { %11481 = vrcp.f32 %v4701_v14  ;;  %v4702_v23 = vadd.f32 1.0, %v11468_v62  ;;  %v4658_v34 = vpop.f32.mrb[173].mxu0 }
0x1176   :  { %11483 = vrcp.f32 %v4704_v1  ;;  %v9793_v35 = vpop.f32.mrb[174].mxu0 }
0x1177   :  { %v11470_v9 = vpop.eup %11469  ;;  %11485 = vrcp.f32 %v4702_v23  ;;  %v4661_v43 = vpop.f32.mrb[175].mxu0 }
0x1178   :  { %v8008_v40 = vmul.f32 %v12494_v52, %v11470_v9  ;;  %11487 = vtanh.f32 %v9792_v44 }
0x1179   :  { %v11472_v7 = vpop.eup %11471  ;;  %11489 = vtanh.f32 %v4658_v34 }
0x117a   :  { %v11474_v48 = vpop.eup %11473  ;;  %8011 = vst.msk [vmem:[%s14850_s10] sm:$0xff] %vm8010_vm12, %v8008_v40  ;;  %v4727_v54 = vadd.f32 1.0, %v11472_v7  ;;  %11491 = vtanh.f32 %v9793_v35 }
0x117b   :  { %v11476_v29 = vpop.eup %11475  ;;  %v4725_v2 = vadd.f32 1.0, %v11474_v48  ;;  %11493 = vtanh.f32 %v4661_v43 }
0x117c   :  { %v11478_v30 = vpop.eup %11477  ;;  %11495 = vrcp.f32 %v4727_v54  ;;  %v4728_v56 = vadd.f32 1.0, %v11476_v29  ;;  %v9796_v58 = vpop.f32.mrb[176].mxu0 }
0x117d   :  { %11497 = vrcp.f32 %v4725_v2  ;;  %v4726_v55 = vadd.f32 1.0, %v11478_v30  ;;  %v8462_v59 = vmul.f32 -1.442695, %v9796_v58  ;;  %v4674_v12 = vpop.f32.mrb[177].mxu0 }
0x117e   :  { %v11480_v36 = vpop.eup %11479  ;;  %11499 = vrcp.f32 %v4728_v56  ;;  %v8460_v26 = vmul.f32 -1.442695, %v4674_v12  ;;  %v9797_v17 = vpop.f32.mrb[178].mxu0 }
0x117f   :  { %v11482_v3 = vpop.eup %11481  ;;  %11501 = vrcp.f32 %v4726_v55  ;;  %v8463_v49 = vmul.f32 -1.442695, %v9797_v17  ;;  %v4677_v37 = vpop.f32.mrb[179].mxu0 }
0x1180   :  { %v11484_v8 = vpop.eup %11483  ;;  %11503 = vpow2.f32 %v8462_v59  ;;  %v8461_v18 = vmul.f32 -1.442695, %v4677_v37 }
0x1181   :  { %v11486_v32 = vpop.eup %11485  ;;  %11505 = vpow2.f32 %v8460_v26 }
0x1182   :  { %v11488_v39 = vpop.eup %11487  ;;  %11507 = vpow2.f32 %v8463_v49 }
0x1183   :  { %v11490_v14 = vpop.eup %11489  ;;  %v4771_v62 = vmul.f32 %v11488_v39, %v11480_v36  ;;  %11509 = vpow2.f32 %v8461_v18 }
0x1184   :  { %v11492_v1 = vpop.eup %11491  ;;  %v4769_v44 = vmul.f32 %v11490_v14, %v11482_v3 }
0x1185   :  { %v11494_v23 = vpop.eup %11493  ;;  %v4772_v34 = vmul.f32 %v11492_v1, %v11484_v8 }
0x1186   :  { %v11496_v35 = vpop.eup %11495  ;;  %v4770_v9 = vmul.f32 %v11494_v23, %v11486_v32 }
0x1187   :  { %v11498_v43 = vpop.eup %11497  ;;  %v4767_v52 = vmul.f32 %v11496_v35, %v13829_v57 }
0x1188   :  { %v11500_v40 = vpop.eup %11499  ;;  %v4765_v7 = vmul.f32 %v11498_v43, %v13832_v28 }
0x1189   :  { %v11502_v48 = vpop.eup %11501  ;;  %v4768_v54 = vmul.f32 %v11500_v40, %v13835_v15  ;;  %v13951_v29 = vadd.f32 %v4771_v62, %v4767_v52 }
0x118a   :  { %v11504_v2 = vpop.eup %11503  ;;  %v4766_v30 = vmul.f32 %v11502_v48, %v13838_v10  ;;  %v13954_v56 = vadd.f32 %v4769_v44, %v4765_v7 }
0x118b   :  { %v11506_v58 = vpop.eup %11505  ;;  %11511 = vtanh.f32 %v13951_v29  ;;  %v13957_v55 = vadd.f32 %v4772_v34, %v4768_v54  ;;  %v4755_v59 = vadd.f32 1.0, %v11504_v2  ;;  %v8465_v34 = vld [vmem:[%s14842_s2 + $0x48] sm:$0x7f] }
0x118c   :  { %v11508_v57 = vpop.eup %11507  ;;  %11513 = vtanh.f32 %v13954_v56  ;;  %v13960_v28 = vadd.f32 %v4770_v9, %v4766_v30  ;;  %v4753_v12 = vadd.f32 1.0, %v11506_v58  ;;  %v4841_v35 = vmul.f32 %v8465_v34, %v12671_v24  ;;  %v13975_v9 = vld [vmem:[%s14848_s8] sm:$0xf] }
0x118d   :  { %v11510_v15 = vpop.eup %11509  ;;  %11515 = vtanh.f32 %v13957_v55  ;;  %v4756_v36 = vadd.f32 1.0, %v11508_v57 }
0x118e   :  { %11517 = vtanh.f32 %v13960_v28  ;;  %v4754_v10 = vadd.f32 1.0, %v11510_v15  ;;  %v4842_v43 = vsel %vm648_vm3, %v4841_v35, 1.0 }
0x118f   :  { %11519 = vrcp.f32 %v4755_v59  ;;  %v4843_v52 = vpack.c.bf16 %v4842_v43, %v4842_v43 }
0x1190   :  { %11521 = vrcp.f32 %v4753_v12 }
0x1191   :  { %11523 = vrcp.f32 %v4756_v36  ;;  %v4845_v40 = vsel %vm717_vm4, %v4843_v52, 0 }
0x1192   :  { %11525 = vrcp.f32 %v4754_v10 }
0x1195   :  { %v11512_v26 = vpop.eup %11511 }
0x1196   :  { %v11514_v17 = vpop.eup %11513 }
0x1197   :  { %v11516_v3 = vpop.eup %11515 }
0x1198   :  { %v11518_v49 = vpop.eup %11517 }
0x1199   :  { %v11520_v37 = vpop.eup %11519 }
0x119a   :  { %v11522_v8 = vpop.eup %11521  ;;  %v4783_v39 = vmul.f32 %v11520_v37, %v11512_v26 }
0x119b   :  { %v11524_v18 = vpop.eup %11523  ;;  %v4781_v62 = vmul.f32 %v11522_v8, %v11514_v17 }
0x119c   :  { %v11526_v32 = vpop.eup %11525  ;;  %v4784_v14 = vmul.f32 %v11524_v18, %v11516_v3 }
0x119d   :  { %v4782_v1 = vmul.f32 %v11526_v32, %v11518_v49 }
0x119e   :  { %v4786_v44 = vpack.c.bf16 %v4784_v14, %v4783_v39 }
0x119f   :  { %v4785_v23 = vpack.c.bf16 %v4782_v1, %v4781_v62 }
0x11a1   :  { %9799 = vmatpush3.bf16.msra.mxu1 %v4785_v23  ;;  %9830 = vmatprep.subr.bf16.mxu0 %v4785_v23 }
0x11a2   :  { %9831 = vmatpush3.bf16.msra.mxu0 %v4785_v23  ;;  %9800 = vmatprep.subr.bf16.mxu1 %v12565_v46 }
0x11a3   :  { %9832 = vmatprep.subr.bf16.mxu0 %v4786_v44 }
0x11a5   :  { %9801 = vmatpush3.bf16.msra.mxu1 %v4786_v44 }
0x11a6   :  { %9833 = vmatpush3.bf16.msra.mxu0 %v4786_v44  ;;  %9802 = vmatprep.subr.bf16.mxu1 %v12565_v46 }
0x11a9   :  { %9803 = vmatpush3.bf16.msra.mxu1 %v12629_v4 }
0x11aa   :  { %9808 = vmatprep.subr.bf16.mxu1 %v13869_v22 }
0x11ac   :  { %9805 = vmatmul.mubr.msk.bf16.vlgmr.msra.gmra.mrb[176].mxu1 %vm365_vm2, %v13975_v9 }
0x11ad   :  { %9809 = vmatpush3.bf16.msra.mxu1 %v13869_v22  ;;  %9814 = vmatprep.mubr.msk.bf16.mxu1 %vm692_vm5, %v13771_v51 }
0x11ae   :  { %9810 = vmatprep.subr.bf16.mxu1 %v13867_v13 }
0x11b1   :  { %9811 = vmatpush3.bf16.msra.mxu1 %v13867_v13 }
0x11b2   :  { %10223 = vmatprep.subr.msk.bf16.mxu1 %vm717_vm4, %v4843_v52 }
0x11b5   :  { %9813 = vmatpush3.bf16.msra.mxu1 %v4845_v40 }
0x11b6   :  { %9856 = vmatprep.subr.bf16.mxu1 %v12565_v46 }
0x11b8   :  { %9815 = vmatmul.mubr.msk.bf16.vlgmr.msra.gmra.mrb[180].mxu1 %vm692_vm5, %v13778_v31 }
0x11b9   :  { %9818 = vmatprep.mubr.msk.bf16.mxu1 %vm692_vm5, %v13785_v47 }
0x11c0   :  { %9819 = vmatmul.mubr.msk.bf16.gmra.mrb[184].mxu1 %vm692_vm5, %v13792_v33 }
0x11c1   :  { %9822 = vmatprep.mubr.msk.bf16.mxu1 %vm692_vm5, %v13799_v0 }
0x11c8   :  { %9823 = vmatmul.mubr.msk.bf16.gmra.mrb[188].mxu1 %vm692_vm5, %v13806_v45 }
0x11c9   :  { %9826 = vmatprep.mubr.msk.bf16.mxu1 %vm692_vm5, %v13813_v41 }
0x11d0   :  { %9827 = vmatmul.mubr.msk.bf16.gmra.mrb[192].mxu1 %vm692_vm5, %v13820_v20 }
0x11d1   :  { %9862 = vmatprep.mubr.msk.bf16.mxu1 %vm12566_vm6, %v12565_v46 }
0x127f   :  { %v4821_v51 = vpop.f32.mrb[176].mxu1 }
0x1280   :  { %vm4827_vm13 = vcmp.ge.f32.partialorder %v4821_v51, 0.0  ;;  %v4828_v31 = vmul.f32 %v4821_v51, %v12931_v38  ;;  %v9806_v47 = vpop.f32.mrb[177].mxu1 }
0x1281   :  { %v4824_v33 = vpop.f32.mrb[178].mxu1 }
0x1282   :  { %v4829_v13 = vsel %vm4827_vm13, %v4821_v51, %v4828_v31  ;;  %v9807_v0 = vpop.f32.mrb[179].mxu1 }
0x1283   :  { %v4830_v22 = vmul.f32 %v4829_v13, %v12934_v42 }
0x1285   :  { %v4831_v45 = vsel %vm1229_vm10, %v4830_v22, 0.0 }
0x1286   :  { %v4832_v7 = vrot.slane %v4831_v45, 4 }
0x1288   :  { %v4833_v41 = vadd.f32 %v4832_v7, %v4831_v45 }
0x128a   :  { %v4834_v48 = vrot.slane %v4833_v41, 2 }
0x128b   :  { %v9816_v54 = vpop.f32.mrb[180].mxu1 }
0x128c   :  { %v4835_v20 = vadd.f32 %v4834_v48, %v4833_v41  ;;  %v8476_v2 = vmul.f32 -1.442695, %v9816_v54  ;;  %v4881_v30 = vpop.f32.mrb[181].mxu1 }
0x128d   :  { %v8474_v58 = vmul.f32 -1.442695, %v4881_v30  ;;  %v9817_v59 = vpop.f32.mrb[182].mxu1 }
0x128e   :  { %v4836_v57 = vrot.slane %v4835_v20, 1  ;;  %11527 = vpow2.f32 %v8476_v2  ;;  %v8477_v12 = vmul.f32 -1.442695, %v9817_v59  ;;  %v4884_v15 = vpop.f32.mrb[183].mxu1 }
0x128f   :  { %11529 = vpow2.f32 %v8474_v58  ;;  %v8475_v36 = vmul.f32 -1.442695, %v4884_v15 }
0x1290   :  { %v4837_v10 = vadd.f32 %v4836_v57, %v4835_v20  ;;  %11531 = vpow2.f32 %v8477_v12 }
0x1291   :  { %11533 = vpow2.f32 %v8475_v36 }
0x1292   :  { %4838 = vst.msk [vmem:[#allocation2 + $0x8] sm:$0x1] %vm1237_vm11, %v4837_v10 }
0x1293   :  { %v9820_v26 = vpop.f32.mrb[184].mxu1 }
0x1294   :  { %v8480_v17 = vmul.f32 -1.442695, %v9820_v26  ;;  %v4897_v3 = vpop.f32.mrb[185].mxu1 }
0x1295   :  { %v8478_v49 = vmul.f32 -1.442695, %v4897_v3  ;;  %v9821_v37 = vpop.f32.mrb[186].mxu1 }
0x1296   :  { %11535 = vpow2.f32 %v8480_v17  ;;  %v8481_v8 = vmul.f32 -1.442695, %v9821_v37  ;;  %v4900_v18 = vpop.f32.mrb[187].mxu1 }
0x1297   :  { %11537 = vpow2.f32 %v8478_v49  ;;  %v8479_v32 = vmul.f32 -1.442695, %v4900_v18 }
0x1298   :  { %v11528_v39 = vpop.eup %11527  ;;  %11539 = vpow2.f32 %v8481_v8 }
0x1299   :  { %v11530_v14 = vpop.eup %11529  ;;  %v4958_v62 = vadd.f32 1.0, %v11528_v39  ;;  %11541 = vpow2.f32 %v8479_v32 }
0x129a   :  { %v11532_v1 = vpop.eup %11531  ;;  %v4956_v44 = vadd.f32 1.0, %v11530_v14 }
0x129b   :  { %v11534_v23 = vpop.eup %11533  ;;  %11543 = vrcp.f32 %v4958_v62  ;;  %v4959_v34 = vadd.f32 1.0, %v11532_v1  ;;  %v9824_v35 = vpop.f32.mrb[188].mxu1 }
0x129c   :  { %11545 = vrcp.f32 %v4956_v44  ;;  %v4957_v43 = vadd.f32 1.0, %v11534_v23  ;;  %v4913_v52 = vpop.f32.mrb[189].mxu1 }
0x129d   :  { %11547 = vrcp.f32 %v4959_v34  ;;  %v9825_v40 = vpop.f32.mrb[190].mxu1 }
0x129e   :  { %11549 = vrcp.f32 %v4957_v43  ;;  %v4916_v51 = vpop.f32.mrb[191].mxu1 }
0x129f   :  { %11551 = vtanh.f32 %v9824_v35 }
0x12a0   :  { %v11536_v31 = vpop.eup %11535  ;;  %11553 = vtanh.f32 %v4913_v52 }
0x12a1   :  { %v11538_v47 = vpop.eup %11537  ;;  %v4982_v33 = vadd.f32 1.0, %v11536_v31  ;;  %11555 = vtanh.f32 %v9825_v40 }
0x12a2   :  { %v11540_v13 = vpop.eup %11539  ;;  %v4980_v0 = vadd.f32 1.0, %v11538_v47  ;;  %11557 = vtanh.f32 %v4916_v51 }
0x12a3   :  { %v11542_v22 = vpop.eup %11541  ;;  %11559 = vrcp.f32 %v4982_v33  ;;  %v4983_v45 = vadd.f32 1.0, %v11540_v13  ;;  %v9828_v7 = vpop.f32.mrb[192].mxu1 }
0x12a4   :  { %11561 = vrcp.f32 %v4980_v0  ;;  %v4981_v41 = vadd.f32 1.0, %v11542_v22  ;;  %v8484_v48 = vmul.f32 -1.442695, %v9828_v7  ;;  %v4929_v54 = vpop.f32.mrb[193].mxu1 }
0x12a5   :  { %v11544_v20 = vpop.eup %11543  ;;  %11563 = vrcp.f32 %v4983_v45  ;;  %v8482_v2 = vmul.f32 -1.442695, %v4929_v54  ;;  %v9829_v30 = vpop.f32.mrb[194].mxu1 }
0x12a6   :  { %v11546_v58 = vpop.eup %11545  ;;  %11565 = vrcp.f32 %v4981_v41  ;;  %v8485_v59 = vmul.f32 -1.442695, %v9829_v30  ;;  %v4932_v57 = vpop.f32.mrb[195].mxu1 }
0x12a7   :  { %v11548_v12 = vpop.eup %11547  ;;  %11567 = vpow2.f32 %v8484_v48  ;;  %v8483_v15 = vmul.f32 -1.442695, %v4932_v57 }
0x12a8   :  { %v11550_v36 = vpop.eup %11549  ;;  %11569 = vpow2.f32 %v8482_v2 }
0x12a9   :  { %v11552_v10 = vpop.eup %11551  ;;  %11571 = vpow2.f32 %v8485_v59 }
0x12aa   :  { %v11554_v26 = vpop.eup %11553  ;;  %v5026_v17 = vmul.f32 %v11552_v10, %v11544_v20  ;;  %11573 = vpow2.f32 %v8483_v15 }
0x12ab   :  { %v11556_v3 = vpop.eup %11555  ;;  %v5024_v49 = vmul.f32 %v11554_v26, %v11546_v58 }
0x12ac   :  { %v11558_v37 = vpop.eup %11557  ;;  %v5027_v8 = vmul.f32 %v11556_v3, %v11548_v12  ;;  %v8507_v12 = vld [vmem:[%s14842_s2 + $0x50] sm:$0x7f] }
0x12ad   :  { %v11560_v18 = vpop.eup %11559  ;;  %v5025_v32 = vmul.f32 %v11558_v37, %v11550_v36  ;;  %v5291_v15 = vmul.f32 %v8507_v12, %v12671_v24 }
0x12ae   :  { %v11562_v39 = vpop.eup %11561  ;;  %v5022_v14 = vmul.f32 %v11560_v18, %v13848_v60 }
0x12af   :  { %v11564_v62 = vpop.eup %11563  ;;  %v5020_v1 = vmul.f32 %v11562_v39, %v13858_v27  ;;  %v5292_v36 = vsel %vm648_vm3, %v5291_v15, 1.0 }
0x12b0   :  { %v11566_v44 = vpop.eup %11565  ;;  %v5023_v23 = vmul.f32 %v11564_v62, %v13860_v63  ;;  %v14011_v34 = vadd.f32 %v5026_v17, %v5022_v14  ;;  %v5293_v10 = vpack.c.bf16 %v5292_v36, %v5292_v36  ;;  %v14100_v17 = vld [vmem:[%s14846_s6 + $0x38] sm:$0xff]  }
0x12b1   :  { %v11568_v35 = vpop.eup %11567  ;;  %v5021_v43 = vmul.f32 %v11566_v44, %v13863_v25  ;;  %v14014_v52 = vadd.f32 %v5024_v49, %v5020_v1 }
0x12b2   :  { %v11570_v40 = vpop.eup %11569  ;;  %11575 = vtanh.f32 %v14011_v34  ;;  %v14017_v51 = vadd.f32 %v5027_v8, %v5023_v23  ;;  %v5010_v31 = vadd.f32 1.0, %v11568_v35  ;;  %v5295_v26 = vsel %vm717_vm4, %v5293_v10, 0 }
0x12b3   :  { %v11572_v60 = vpop.eup %11571  ;;  %11577 = vtanh.f32 %v14014_v52  ;;  %v14020_v27 = vadd.f32 %v5025_v32, %v5021_v43  ;;  %v5008_v47 = vadd.f32 1.0, %v11570_v40 }
0x12b4   :  { %v11574_v63 = vpop.eup %11573  ;;  %11579 = vtanh.f32 %v14017_v51  ;;  %v5011_v33 = vadd.f32 1.0, %v11572_v60 }
0x12b5   :  { %11581 = vtanh.f32 %v14020_v27  ;;  %v5009_v25 = vadd.f32 1.0, %v11574_v63 }
0x12b6   :  { %11583 = vrcp.f32 %v5010_v31 }
0x12b7   :  { %11585 = vrcp.f32 %v5008_v47 }
0x12b8   :  { %11587 = vrcp.f32 %v5011_v33 }
0x12b9   :  { %11589 = vrcp.f32 %v5009_v25 }
0x12bc   :  { %v11576_v13 = vpop.eup %11575 }
0x12bd   :  { %v11578_v0 = vpop.eup %11577 }
0x12be   :  { %v11580_v22 = vpop.eup %11579 }
0x12bf   :  { %v11582_v45 = vpop.eup %11581 }
0x12c0   :  { %v11584_v7 = vpop.eup %11583 }
0x12c1   :  { %v11586_v41 = vpop.eup %11585  ;;  %v5038_v20 = vmul.f32 %v11584_v7, %v11576_v13 }
0x12c2   :  { %v11588_v48 = vpop.eup %11587  ;;  %v5036_v30 = vmul.f32 %v11586_v41, %v11578_v0 }
0x12c3   :  { %v11590_v54 = vpop.eup %11589  ;;  %v5039_v2 = vmul.f32 %v11588_v48, %v11580_v22 }
0x12c4   :  { %v5037_v58 = vmul.f32 %v11590_v54, %v11582_v45 }
0x12c5   :  { %v5041_v59 = vpack.c.bf16 %v5039_v2, %v5038_v20 }
0x12c6   :  { %v5040_v57 = vpack.c.bf16 %v5037_v58, %v5036_v30 }
0x12c8   :  { %9834 = vmatprep.subr.bf16.mxu0 %v5040_v57 }
0x12c9   :  { %9835 = vmatpush3.bf16.msra.mxu0 %v5040_v57 }
0x12ca   :  { %9836 = vmatprep.subr.bf16.mxu0 %v5041_v59 }
0x12cd   :  { %9837 = vmatpush3.bf16.msra.mxu0 %v5041_v59 }
0x12ce   :  { %9838 = vmatprep.subr.bf16.mxu0 %v12629_v4 }
0x12d1   :  { %9839 = vmatpush3.bf16.msra.mxu0 %v12629_v4 }
0x12d2   :  { %9866 = vmatprep.subr.bf16.mxu0 %v5040_v57 }
0x12d4   :  { %9841 = vmatmul.mubr.msk.bf16.vlgmr.msra.gmra.mrb[180].mxu0 %vm956_vm7, %v13880_v19  ;;  %v14051_v19 = vld [vmem:[%s14846_s6] sm:$0xff]  }
0x12d5   :  { %9867 = vmatpush3.bf16.msra.mxu0 %v5040_v57  ;;  %9844 = vmatprep.mubr.msk.bf16.mxu0 %vm956_vm7, %v13887_v21  ;;  %v14058_v21 = vld [vmem:[%s14846_s6 + $0x8] sm:$0xff]  }
0x12d6   :  { %9868 = vmatprep.subr.bf16.mxu0 %v5041_v59 }
0x12d9   :  { %9869 = vmatpush3.bf16.msra.mxu0 %v5041_v59 }
0x12da   :  { %10224 = vmatprep.subr.msk.bf16.mxu0 %vm717_vm4, %v5293_v10 }
0x12dc   :  { %9845 = vmatmul.mubr.msk.bf16.gmra.mrb[184].mxu0 %vm956_vm7, %v13894_v11  ;;  %v14065_v11 = vld [vmem:[%s14846_s6 + $0x10] sm:$0xff]  }
0x12dd   :  { %9871 = vmatpush3.bf16.msra.mxu0 %v5295_v26  ;;  %9848 = vmatprep.mubr.msk.bf16.mxu0 %vm956_vm7, %v13901_v6  ;;  %v14072_v6 = vld [vmem:[%s14846_s6 + $0x18] sm:$0xff]  }
0x12de   :  { %9914 = vmatprep.subr.bf16.mxu0 %v12565_v46 }
0x12e4   :  { %9849 = vmatmul.mubr.msk.bf16.gmra.mrb[188].mxu0 %vm956_vm7, %v13908_v5  ;;  %v14079_v5 = vld [vmem:[%s14846_s6 + $0x20] sm:$0xff]  }
0x12e5   :  { %9852 = vmatprep.mubr.msk.bf16.mxu0 %vm956_vm7, %v13915_v53  ;;  %v14086_v53 = vld [vmem:[%s14846_s6 + $0x28] sm:$0xff]  }
0x12ec   :  { %9853 = vmatmul.mubr.msk.bf16.gmra.mrb[192].mxu0 %vm956_vm7, %v13922_v50  ;;  %v14093_v50 = vld [vmem:[%s14846_s6 + $0x30] sm:$0xff]  }
0x12ed   :  { %9872 = vmatprep.mubr.msk.bf16.mxu0 %vm692_vm5, %v14051_v19 }
0x12f4   :  { %9873 = vmatmul.mubr.msk.bf16.vlgmr.msra.gmra.mrb[196].mxu0 %vm692_vm5, %v14058_v21 }
0x12f5   :  { %9876 = vmatprep.mubr.msk.bf16.mxu0 %vm692_vm5, %v14065_v11 }
0x12fc   :  { %9877 = vmatmul.mubr.msk.bf16.gmra.mrb[200].mxu0 %vm692_vm5, %v14072_v6 }
0x12fd   :  { %9880 = vmatprep.mubr.msk.bf16.mxu0 %vm692_vm5, %v14079_v5 }
0x1304   :  { %9881 = vmatmul.mubr.msk.bf16.gmra.mrb[204].mxu0 %vm692_vm5, %v14086_v53 }
0x1305   :  { %9884 = vmatprep.mubr.msk.bf16.mxu0 %vm692_vm5, %v14093_v50 }
0x130c   :  { %9885 = vmatmul.mubr.msk.bf16.gmra.mrb[208].mxu0 %vm692_vm5, %v14100_v17 }
0x130d   :  { %9920 = vmatprep.mubr.msk.bf16.mxu0 %vm12566_vm6, %v12565_v46 }
0x13a7   :  { %v9842_v3 = vpop.f32.mrb[180].mxu0 }
0x13a8   :  { %v8496_v49 = vmul.f32 -1.442695, %v9842_v3  ;;  %v5076_v37 = vpop.f32.mrb[181].mxu0 }
0x13a9   :  { %v8494_v8 = vmul.f32 -1.442695, %v5076_v37  ;;  %v9843_v18 = vpop.f32.mrb[182].mxu0 }
0x13aa   :  { %11591 = vpow2.f32 %v8496_v49  ;;  %v8497_v32 = vmul.f32 -1.442695, %v9843_v18  ;;  %v5079_v39 = vpop.f32.mrb[183].mxu0 }
0x13ab   :  { %11593 = vpow2.f32 %v8494_v8  ;;  %v8495_v14 = vmul.f32 -1.442695, %v5079_v39 }
0x13ac   :  { %11595 = vpow2.f32 %v8497_v32 }
0x13ad   :  { %11597 = vpow2.f32 %v8495_v14 }
0x13af   :  { %v9846_v62 = vpop.f32.mrb[184].mxu0 }
0x13b0   :  { %v8500_v1 = vmul.f32 -1.442695, %v9846_v62  ;;  %v5092_v44 = vpop.f32.mrb[185].mxu0 }
0x13b1   :  { %v8498_v23 = vmul.f32 -1.442695, %v5092_v44  ;;  %v9847_v35 = vpop.f32.mrb[186].mxu0 }
0x13b2   :  { %11599 = vpow2.f32 %v8500_v1  ;;  %v8501_v43 = vmul.f32 -1.442695, %v9847_v35  ;;  %v5095_v40 = vpop.f32.mrb[187].mxu0 }
0x13b3   :  { %11601 = vpow2.f32 %v8498_v23  ;;  %v8499_v31 = vmul.f32 -1.442695, %v5095_v40 }
0x13b4   :  { %v11592_v60 = vpop.eup %11591  ;;  %11603 = vpow2.f32 %v8501_v43 }
0x13b5   :  { %v11594_v47 = vpop.eup %11593  ;;  %v5153_v63 = vadd.f32 1.0, %v11592_v60  ;;  %11605 = vpow2.f32 %v8499_v31 }
0x13b6   :  { %v11596_v33 = vpop.eup %11595  ;;  %v5151_v25 = vadd.f32 1.0, %v11594_v47 }
0x13b7   :  { %v11598_v13 = vpop.eup %11597  ;;  %11607 = vrcp.f32 %v5153_v63  ;;  %v5154_v0 = vadd.f32 1.0, %v11596_v33  ;;  %v9850_v22 = vpop.f32.mrb[188].mxu0 }
0x13b8   :  { %11609 = vrcp.f32 %v5151_v25  ;;  %v5152_v45 = vadd.f32 1.0, %v11598_v13  ;;  %v5108_v7 = vpop.f32.mrb[189].mxu0 }
0x13b9   :  { %11611 = vrcp.f32 %v5154_v0  ;;  %v9851_v41 = vpop.f32.mrb[190].mxu0 }
0x13ba   :  { %11613 = vrcp.f32 %v5152_v45  ;;  %v5111_v48 = vpop.f32.mrb[191].mxu0 }
0x13bb   :  { %11615 = vtanh.f32 %v9850_v22 }
0x13bc   :  { %v11600_v54 = vpop.eup %11599  ;;  %11617 = vtanh.f32 %v5108_v7 }
0x13bd   :  { %v11602_v20 = vpop.eup %11601  ;;  %v5177_v2 = vadd.f32 1.0, %v11600_v54  ;;  %11619 = vtanh.f32 %v9851_v41 }
0x13be   :  { %v11604_v30 = vpop.eup %11603  ;;  %v5175_v58 = vadd.f32 1.0, %v11602_v20  ;;  %11621 = vtanh.f32 %v5111_v48 }
0x13bf   :  { %v11606_v59 = vpop.eup %11605  ;;  %11623 = vrcp.f32 %v5177_v2  ;;  %v5178_v57 = vadd.f32 1.0, %v11604_v30  ;;  %v9854_v12 = vpop.f32.mrb[192].mxu0 }
0x13c0   :  { %11625 = vrcp.f32 %v5175_v58  ;;  %v5176_v15 = vadd.f32 1.0, %v11606_v59  ;;  %v8504_v36 = vmul.f32 -1.442695, %v9854_v12  ;;  %v5124_v10 = vpop.f32.mrb[193].mxu0 }
0x13c1   :  { %v11608_v26 = vpop.eup %11607  ;;  %11627 = vrcp.f32 %v5178_v57  ;;  %v8502_v3 = vmul.f32 -1.442695, %v5124_v10  ;;  %v9855_v49 = vpop.f32.mrb[194].mxu0 }
0x13c2   :  { %v11610_v37 = vpop.eup %11609  ;;  %11629 = vrcp.f32 %v5176_v15  ;;  %v8505_v8 = vmul.f32 -1.442695, %v9855_v49  ;;  %v5127_v18 = vpop.f32.mrb[195].mxu0 }
0x13c3   :  { %v11612_v32 = vpop.eup %11611  ;;  %11631 = vpow2.f32 %v8504_v36  ;;  %v8503_v39 = vmul.f32 -1.442695, %v5127_v18 }
0x13c4   :  { %v11614_v14 = vpop.eup %11613  ;;  %11633 = vpow2.f32 %v8502_v3 }
0x13c5   :  { %v11616_v62 = vpop.eup %11615  ;;  %11635 = vpow2.f32 %v8505_v8 }
0x13c6   :  { %v11618_v1 = vpop.eup %11617  ;;  %v5221_v44 = vmul.f32 %v11616_v62, %v11608_v26  ;;  %11637 = vpow2.f32 %v8503_v39 }
0x13c7   :  { %v11620_v23 = vpop.eup %11619  ;;  %v5219_v35 = vmul.f32 %v11618_v1, %v11610_v37  ;;  %v9874_v43 = vpop.f32.mrb[196].mxu0 }
0x13c8   :  { %v11622_v40 = vpop.eup %11621  ;;  %v5222_v31 = vmul.f32 %v11620_v23, %v11612_v32  ;;  %v8518_v60 = vmul.f32 -1.442695, %v9874_v43  ;;  %v5331_v47 = vpop.f32.mrb[197].mxu0 }
0x13c9   :  { %v11624_v63 = vpop.eup %11623  ;;  %v5220_v33 = vmul.f32 %v11622_v40, %v11614_v14  ;;  %v8516_v25 = vmul.f32 -1.442695, %v5331_v47  ;;  %v9875_v13 = vpop.f32.mrb[198].mxu0 }
0x13ca   :  { %v11626_v0 = vpop.eup %11625  ;;  %v5217_v22 = vmul.f32 %v11624_v63, %v13951_v29  ;;  %11639 = vpow2.f32 %v8518_v60  ;;  %v8519_v45 = vmul.f32 -1.442695, %v9875_v13  ;;  %v5334_v7 = vpop.f32.mrb[199].mxu0 }
0x13cb   :  { %v11628_v41 = vpop.eup %11627  ;;  %v5215_v48 = vmul.f32 %v11626_v0, %v13954_v56  ;;  %11641 = vpow2.f32 %v8516_v25  ;;  %v8517_v54 = vmul.f32 -1.442695, %v5334_v7 }
0x13cc   :  { %v11630_v20 = vpop.eup %11629  ;;  %v5218_v2 = vmul.f32 %v11628_v41, %v13957_v55  ;;  %v14109_v30 = vadd.f32 %v5221_v44, %v5217_v22  ;;  %11643 = vpow2.f32 %v8519_v45 }
0x13cd   :  { %v11632_v58 = vpop.eup %11631  ;;  %v5216_v59 = vmul.f32 %v11630_v20, %v13960_v28  ;;  %v14112_v57 = vadd.f32 %v5219_v35, %v5215_v48  ;;  %11645 = vpow2.f32 %v8517_v54 }
0x13ce   :  { %v11634_v29 = vpop.eup %11633  ;;  %11647 = vtanh.f32 %v14109_v30  ;;  %v14115_v12 = vadd.f32 %v5222_v31, %v5218_v2  ;;  %v5205_v56 = vadd.f32 1.0, %v11632_v58 }
0x13cf   :  { %v11636_v15 = vpop.eup %11635  ;;  %11649 = vtanh.f32 %v14112_v57  ;;  %v14118_v36 = vadd.f32 %v5220_v33, %v5216_v59  ;;  %v5203_v55 = vadd.f32 1.0, %v11634_v29  ;;  %v9878_v10 = vpop.f32.mrb[200].mxu0 }
0x13d0   :  { %v11638_v26 = vpop.eup %11637  ;;  %11651 = vtanh.f32 %v14115_v12  ;;  %v5206_v28 = vadd.f32 1.0, %v11636_v15  ;;  %v5347_v3 = vpop.f32.mrb[201].mxu0  ;;  %v8522_v8 = vmul.f32 -1.442695, %v9878_v10 }
0x13d1   :  { %11653 = vtanh.f32 %v14118_v36  ;;  %v5204_v49 = vadd.f32 1.0, %v11638_v26  ;;  %v9879_v37 = vpop.f32.mrb[202].mxu0  ;;  %v8520_v35 = vmul.f32 -1.442695, %v5347_v3 }
0x13d2   :  { %11655 = vrcp.f32 %v5205_v56  ;;  %v5350_v18 = vpop.f32.mrb[203].mxu0  ;;  %v8523_v60 = vmul.f32 -1.442695, %v9879_v37 }
0x13d3   :  { %11657 = vrcp.f32 %v5203_v55  ;;  %v8521_v33 = vmul.f32 -1.442695, %v5350_v18 }
0x13d4   :  { %v11640_v32 = vpop.eup %11639  ;;  %11659 = vrcp.f32 %v5206_v28 }
0x13d5   :  { %v11642_v39 = vpop.eup %11641  ;;  %11661 = vrcp.f32 %v5204_v49  ;;  %v5408_v14 = vadd.f32 1.0, %v11640_v32 }
0x13d6   :  { %v11644_v62 = vpop.eup %11643  ;;  %v5406_v1 = vadd.f32 1.0, %v11642_v39  ;;  %11663 = vpow2.f32 %v8522_v8 }
0x13d7   :  { %v11646_v44 = vpop.eup %11645  ;;  %11665 = vrcp.f32 %v5408_v14  ;;  %v5409_v23 = vadd.f32 1.0, %v11644_v62  ;;  %v9882_v43 = vpop.f32.mrb[204].mxu0 }
0x13d8   :  { %v11648_v40 = vpop.eup %11647  ;;  %11667 = vrcp.f32 %v5406_v1  ;;  %v5407_v31 = vadd.f32 1.0, %v11646_v44  ;;  %v5363_v47 = vpop.f32.mrb[205].mxu0 }
0x13d9   :  { %v11650_v63 = vpop.eup %11649  ;;  %11669 = vrcp.f32 %v5409_v23  ;;  %v9883_v25 = vpop.f32.mrb[206].mxu0 }
0x13da   :  { %v11652_v13 = vpop.eup %11651  ;;  %11671 = vrcp.f32 %v5407_v31  ;;  %v5366_v0 = vpop.f32.mrb[207].mxu0 }
0x13db   :  { %v11654_v22 = vpop.eup %11653  ;;  %11673 = vpow2.f32 %v8520_v35 }
0x13dc   :  { %v11656_v45 = vpop.eup %11655  ;;  %11675 = vpow2.f32 %v8523_v60 }
0x13dd   :  { %v11658_v7 = vpop.eup %11657  ;;  %11677 = vpow2.f32 %v8521_v33  ;;  %v5233_v20 = vmul.f32 %v11656_v45, %v11648_v40 }
0x13de   :  { %v11660_v41 = vpop.eup %11659  ;;  %11679 = vtanh.f32 %v9882_v43  ;;  %v5231_v56 = vmul.f32 %v11658_v7, %v11650_v63 }
0x13df   :  { %v11662_v48 = vpop.eup %11661  ;;  %11681 = vtanh.f32 %v5363_v47  ;;  %v9886_v54 = vpop.f32.mrb[208].mxu0  ;;  %v5234_v2 = vmul.f32 %v11660_v41, %v11652_v13 }
0x13e0   :  { %v11664_v58 = vpop.eup %11663  ;;  %11683 = vtanh.f32 %v9883_v25  ;;  %v8526_v59 = vmul.f32 -1.442695, %v9886_v54  ;;  %v5379_v29 = vpop.f32.mrb[209].mxu0  ;;  %v5232_v15 = vmul.f32 %v11662_v48, %v11654_v22 }
0x13e1   :  { %v11666_v55 = vpop.eup %11665  ;;  %v5432_v10 = vadd.f32 1.0, %v11664_v58  ;;  %11685 = vtanh.f32 %v5366_v0  ;;  %v8524_v26 = vmul.f32 -1.442695, %v5379_v29  ;;  %v9887_v28 = vpop.f32.mrb[210].mxu0  ;;  %v5236_v3 = vpack.c.bf16 %v5234_v2, %v5233_v20  ;;  %v12504_v58 = vld [vmem:[%s14847_s7] sm:$0xff]  }
0x13e2   :  { %v11668_v49 = vpop.eup %11667  ;;  %11687 = vpow2.f32 %v8526_v59  ;;  %v5235_v37 = vpack.c.bf16 %v5232_v15, %v5231_v56  ;;  %v8527_v8 = vmul.f32 -1.442695, %v9887_v28  ;;  %v5382_v18 = vpop.f32.mrb[211].mxu0 }
0x13e3   :  { %v11670_v32 = vpop.eup %11669  ;;  %11689 = vrcp.f32 %v5432_v10  ;;  %v8525_v39 = vmul.f32 -1.442695, %v5382_v18 }
0x13e4   :  { %v11672_v14 = vpop.eup %11671  ;;  %11691 = vpow2.f32 %v8524_v26  ;;  %9857 = vmatpush3.bf16.msra.mxu1 %v5235_v37 }
0x13e5   :  { %v11674_v62 = vpop.eup %11673  ;;  %11693 = vpow2.f32 %v8527_v8  ;;  %9858 = vmatprep.subr.bf16.mxu1 %v12565_v46 }
0x13e6   :  { %v11676_v1 = vpop.eup %11675  ;;  %v5430_v44 = vadd.f32 1.0, %v11674_v62  ;;  %11695 = vpow2.f32 %v8525_v39 }
0x13e7   :  { %v11678_v23 = vpop.eup %11677  ;;  %v5433_v35 = vadd.f32 1.0, %v11676_v1 }
0x13e8   :  { %v11680_v43 = vpop.eup %11679  ;;  %11697 = vrcp.f32 %v5430_v44  ;;  %v5431_v40 = vadd.f32 1.0, %v11678_v23  ;;  %9859 = vmatpush3.bf16.msra.mxu1 %v5236_v3 }
0x13e9   :  { %v11682_v31 = vpop.eup %11681  ;;  %11699 = vrcp.f32 %v5433_v35  ;;  %v5476_v60 = vmul.f32 %v11680_v43, %v11666_v55  ;;  %9860 = vmatprep.subr.bf16.mxu1 %v12565_v46  ;;  %v14160_v35 = vld [vmem:[%s14847_s7 + $0x8] sm:$0xff]   ;;  %v14167_v43 = vld [vmem:[%s14847_s7 + $0x10] sm:$0xff]  }
0x13ea   :  { %v11684_v47 = vpop.eup %11683  ;;  %11701 = vrcp.f32 %v5431_v40  ;;  %v5474_v63 = vmul.f32 %v11682_v31, %v11668_v49  ;;  %v14174_v40 = vld [vmem:[%s14847_s7 + $0x18] sm:$0xff]   ;;  %v14181_v31 = vld [vmem:[%s14847_s7 + $0x20] sm:$0xff]  }
0x13eb   :  { %v11686_v33 = vpop.eup %11685  ;;  %v5477_v25 = vmul.f32 %v11684_v47, %v11670_v32  ;;  %v14195_v47 = vld [vmem:[%s14847_s7 + $0x30] sm:$0xff]  }
0x13ec   :  { %v11688_v13 = vpop.eup %11687  ;;  %v5475_v0 = vmul.f32 %v11686_v33, %v11672_v14  ;;  %9861 = vmatpush3.bf16.msra.mxu1 %v12629_v4 }
0x13ed   :  { %v11690_v22 = vpop.eup %11689  ;;  %9888 = vmatprep.subr.bf16.mxu1 %v5235_v37  ;;  %v5460_v41 = vadd.f32 1.0, %v11688_v13 }
0x13ee   :  { %v11692_v45 = vpop.eup %11691  ;;  %v5472_v7 = vmul.f32 %v11690_v22, %v14011_v34 }
0x13ef   :  { %v11694_v48 = vpop.eup %11693  ;;  %v5458_v54 = vadd.f32 1.0, %v11692_v45  ;;  %9863 = vmatmul.mubr.msk.bf16.vlgmr.msra.gmra.mrb[196].mxu1 %vm365_vm2, %v13975_v9  ;;  %11703 = vrcp.f32 %v5460_v41 }
0x13f0   :  { %v11696_v20 = vpop.eup %11695  ;;  %v14128_v2 = vadd.f32 %v5476_v60, %v5472_v7  ;;  %9889 = vmatpush3.bf16.msra.mxu1 %v5235_v37  ;;  %9898 = vmatprep.mubr.msk.bf16.mxu1 %vm956_vm7, %v12504_v58  ;;  %v5461_v59 = vadd.f32 1.0, %v11694_v48  ;;  %v14188_v60 = vld [vmem:[%s14847_s7 + $0x28] sm:$0xff]  }
0x13f1   :  { %9890 = vmatprep.subr.bf16.mxu1 %v5236_v3  ;;  %v5459_v34 = vadd.f32 1.0, %v11696_v20  ;;  %11705 = vrcp.f32 %v5458_v54 }
0x13f2   :  { %v11698_v29 = vpop.eup %11697  ;;  %11707 = vtanh.f32 %v14128_v2 }
0x13f3   :  { %v11700_v56 = vpop.eup %11699  ;;  %v5470_v15 = vmul.f32 %v11698_v29, %v14014_v52  ;;  %11709 = vrcp.f32 %v5461_v59 }
0x13f4   :  { %v11702_v9 = vpop.eup %11701  ;;  %v5473_v55 = vmul.f32 %v11700_v56, %v14017_v51  ;;  %9891 = vmatpush3.bf16.msra.mxu1 %v5236_v3  ;;  %11711 = vrcp.f32 %v5459_v34 }
0x13f5   :  { %v5471_v10 = vmul.f32 %v11702_v9, %v14020_v27  ;;  %v14138_v26 = vadd.f32 %v5474_v63, %v5470_v15  ;;  %v14202_v63 = vld [vmem:[%s14847_s7 + $0x38] sm:$0xff]  }
0x13f6   :  { %v14140_v28 = vadd.f32 %v5477_v25, %v5473_v55 }
0x13f7   :  { %11713 = vtanh.f32 %v14138_v26  ;;  %v14143_v49 = vadd.f32 %v5475_v0, %v5471_v10 }
0x13f8   :  { %11715 = vtanh.f32 %v14140_v28 }
0x13f9   :  { %11717 = vtanh.f32 %v14143_v49  ;;  %v11704_v52 = vpop.eup %11703 }
0x13fb   :  { %v11706_v51 = vpop.eup %11705 }
0x13fc   :  { %v11708_v37 = vpop.eup %11707 }
0x13fd   :  { %v11710_v3 = vpop.eup %11709  ;;  %v5488_v39 = vmul.f32 %v11708_v37, %v11704_v52 }
0x13fe   :  { %v11712_v8 = vpop.eup %11711 }
0x1401   :  { %v11714_v27 = vpop.eup %11713 }
0x1402   :  { %v11716_v18 = vpop.eup %11715  ;;  %v5486_v62 = vmul.f32 %v11714_v27, %v11706_v51 }
0x1403   :  { %v11718_v32 = vpop.eup %11717  ;;  %v5489_v14 = vmul.f32 %v11716_v18, %v11710_v3 }
0x1404   :  { %v5487_v1 = vmul.f32 %v11718_v32, %v11712_v8 }
0x1405   :  { %v14147_v44 = vpack.c.bf16 %v5489_v14, %v5488_v39 }
0x1406   :  { %v14149_v23 = vpack.c.bf16 %v5487_v1, %v5486_v62 }
0x1408   :  { %9892 = vmatprep.subr.bf16.mxu1 %v14149_v23 }
0x1409   :  { %9893 = vmatpush3.bf16.msra.mxu1 %v14149_v23 }
0x140a   :  { %9894 = vmatprep.subr.bf16.mxu1 %v14147_v44 }
0x140d   :  { %9895 = vmatpush3.bf16.msra.mxu1 %v14147_v44 }
0x140e   :  { %9896 = vmatprep.subr.bf16.mxu1 %v12629_v4 }
0x1411   :  { %9897 = vmatpush3.bf16.msra.mxu1 %v12629_v4 }
0x1414   :  { %9899 = vmatmul.mubr.msk.bf16.vlgmr.msra.gmra.mrb[200].mxu1 %vm956_vm7, %v14160_v35 }
0x1415   :  { %9902 = vmatprep.mubr.msk.bf16.mxu1 %vm956_vm7, %v14167_v43 }
0x141c   :  { %9903 = vmatmul.mubr.msk.bf16.gmra.mrb[204].mxu1 %vm956_vm7, %v14174_v40 }
0x141d   :  { %9906 = vmatprep.mubr.msk.bf16.mxu1 %vm956_vm7, %v14181_v31 }
0x1424   :  { %9907 = vmatmul.mubr.msk.bf16.gmra.mrb[208].mxu1 %vm956_vm7, %v14188_v60 }
0x1425   :  { %9910 = vmatprep.mubr.msk.bf16.mxu1 %vm956_vm7, %v14195_v47 }
0x142c   :  { %9911 = vmatmul.mubr.msk.bf16.gmra.mrb[212].mxu1 %vm956_vm7, %v14202_v63 }
0x142d   :  { %9956 = vmatprep.mubr.msk.bf16.mxu1 %vm956_vm7, %v12504_v58 }
0x14c2   :  { %v5271_v33 = vpop.f32.mrb[196].mxu1 }
0x14c3   :  { %vm5277_vm14 = vcmp.ge.f32.partialorder %v5271_v33, 0.0  ;;  %v5278_v25 = vmul.f32 %v5271_v33, %v12931_v38  ;;  %v9864_v13 = vpop.f32.mrb[197].mxu1 }
0x14c4   :  { %v5274_v0 = vpop.f32.mrb[198].mxu1 }
0x14c5   :  { %v5279_v22 = vsel %vm5277_vm14, %v5271_v33, %v5278_v25  ;;  %v9865_v45 = vpop.f32.mrb[199].mxu1 }
0x14c6   :  { %v5280_v7 = vmul.f32 %v5279_v22, %v12934_v42 }
0x14c8   :  { %v5281_v41 = vsel %vm1229_vm10, %v5280_v7, 0.0 }
0x14c9   :  { %v5282_v48 = vrot.slane %v5281_v41, 4 }
0x14cb   :  { %v5283_v54 = vadd.f32 %v5282_v48, %v5281_v41 }
0x14cd   :  { %v5284_v20 = vrot.slane %v5283_v54, 2 }
0x14cf   :  { %v5285_v59 = vadd.f32 %v5284_v20, %v5283_v54 }
0x14d1   :  { %v5286_v29 = vrot.slane %v5285_v59, 1 }
0x14d3   :  { %v5287_v34 = vadd.f32 %v5286_v29, %v5285_v59 }
0x14d5   :  { %5288 = vst.msk [vmem:[#allocation2 + $0x9] sm:$0x1] %vm1237_vm11, %v5287_v34 }
0x14e7   :  { %v9900_v58 = vpop.f32.mrb[200].mxu1 }
0x14e8   :  { %v8538_v56 = vmul.f32 -1.442695, %v9900_v58  ;;  %v5526_v15 = vpop.f32.mrb[201].mxu1 }
0x14e9   :  { %v8536_v9 = vmul.f32 -1.442695, %v5526_v15  ;;  %v9901_v55 = vpop.f32.mrb[202].mxu1 }
0x14ea   :  { %11719 = vpow2.f32 %v8538_v56  ;;  %v8539_v10 = vmul.f32 -1.442695, %v9901_v55  ;;  %v5529_v52 = vpop.f32.mrb[203].mxu1 }
0x14eb   :  { %11721 = vpow2.f32 %v8536_v9  ;;  %v8537_v51 = vmul.f32 -1.442695, %v5529_v52 }
0x14ec   :  { %11723 = vpow2.f32 %v8539_v10 }
0x14ed   :  { %11725 = vpow2.f32 %v8537_v51 }
0x14ef   :  { %v9904_v37 = vpop.f32.mrb[204].mxu1 }
0x14f0   :  { %v8542_v3 = vmul.f32 -1.442695, %v9904_v37  ;;  %v5542_v8 = vpop.f32.mrb[205].mxu1 }
0x14f1   :  { %v8540_v27 = vmul.f32 -1.442695, %v5542_v8  ;;  %v9905_v18 = vpop.f32.mrb[206].mxu1 }
0x14f2   :  { %11727 = vpow2.f32 %v8542_v3  ;;  %v8543_v32 = vmul.f32 -1.442695, %v9905_v18  ;;  %v5545_v39 = vpop.f32.mrb[207].mxu1 }
0x14f3   :  { %11729 = vpow2.f32 %v8540_v27  ;;  %v8541_v14 = vmul.f32 -1.442695, %v5545_v39 }
0x14f4   :  { %v11720_v62 = vpop.eup %11719  ;;  %11731 = vpow2.f32 %v8543_v32 }
0x14f5   :  { %v11722_v1 = vpop.eup %11721  ;;  %v5603_v33 = vadd.f32 1.0, %v11720_v62  ;;  %11733 = vpow2.f32 %v8541_v14 }
0x14f6   :  { %v11724_v25 = vpop.eup %11723  ;;  %v5601_v13 = vadd.f32 1.0, %v11722_v1 }
0x14f7   :  { %v11726_v0 = vpop.eup %11725  ;;  %11735 = vrcp.f32 %v5603_v33  ;;  %v5604_v22 = vadd.f32 1.0, %v11724_v25  ;;  %v9908_v45 = vpop.f32.mrb[208].mxu1 }
0x14f8   :  { %11737 = vrcp.f32 %v5601_v13  ;;  %v5602_v7 = vadd.f32 1.0, %v11726_v0  ;;  %v5558_v41 = vpop.f32.mrb[209].mxu1 }
0x14f9   :  { %11739 = vrcp.f32 %v5604_v22  ;;  %v9909_v48 = vpop.f32.mrb[210].mxu1 }
0x14fa   :  { %11741 = vrcp.f32 %v5602_v7  ;;  %v5561_v54 = vpop.f32.mrb[211].mxu1 }
0x14fb   :  { %11743 = vtanh.f32 %v9908_v45 }
0x14fc   :  { %v11728_v20 = vpop.eup %11727  ;;  %11745 = vtanh.f32 %v5558_v41 }
0x14fd   :  { %v11730_v59 = vpop.eup %11729  ;;  %v5627_v29 = vadd.f32 1.0, %v11728_v20  ;;  %11747 = vtanh.f32 %v9909_v48 }
0x14fe   :  { %v11732_v34 = vpop.eup %11731  ;;  %v5625_v58 = vadd.f32 1.0, %v11730_v59  ;;  %11749 = vtanh.f32 %v5561_v54 }
0x14ff   :  { %v11734_v56 = vpop.eup %11733  ;;  %11751 = vrcp.f32 %v5627_v29  ;;  %v5628_v15 = vadd.f32 1.0, %v11732_v34  ;;  %v9912_v9 = vpop.f32.mrb[212].mxu1 }
0x1500   :  { %11753 = vrcp.f32 %v5625_v58  ;;  %v5626_v55 = vadd.f32 1.0, %v11734_v56  ;;  %v8546_v10 = vmul.f32 -1.442695, %v9912_v9  ;;  %v5574_v52 = vpop.f32.mrb[213].mxu1 }
0x1501   :  { %v11736_v51 = vpop.eup %11735  ;;  %11755 = vrcp.f32 %v5628_v15  ;;  %v8544_v37 = vmul.f32 -1.442695, %v5574_v52  ;;  %v9913_v3 = vpop.f32.mrb[214].mxu1 }
0x1502   :  { %v11738_v8 = vpop.eup %11737  ;;  %11757 = vrcp.f32 %v5626_v55  ;;  %v8547_v27 = vmul.f32 -1.442695, %v9913_v3  ;;  %v5577_v18 = vpop.f32.mrb[215].mxu1 }
0x1503   :  { %v11740_v32 = vpop.eup %11739  ;;  %11759 = vpow2.f32 %v8546_v10  ;;  %v8545_v39 = vmul.f32 -1.442695, %v5577_v18 }
0x1504   :  { %v11742_v14 = vpop.eup %11741  ;;  %11761 = vpow2.f32 %v8544_v37 }
0x1505   :  { %v11744_v62 = vpop.eup %11743  ;;  %11763 = vpow2.f32 %v8547_v27 }
0x1506   :  { %v11746_v1 = vpop.eup %11745  ;;  %v5671_v33 = vmul.f32 %v11744_v62, %v11736_v51  ;;  %11765 = vpow2.f32 %v8545_v39 }
0x1507   :  { %v11748_v25 = vpop.eup %11747  ;;  %v5669_v13 = vmul.f32 %v11746_v1, %v11738_v8 }
0x1508   :  { %v11750_v0 = vpop.eup %11749  ;;  %v5672_v22 = vmul.f32 %v11748_v25, %v11740_v32 }
0x1509   :  { %v11752_v45 = vpop.eup %11751  ;;  %v5670_v7 = vmul.f32 %v11750_v0, %v11742_v14 }
0x150a   :  { %v11754_v41 = vpop.eup %11753  ;;  %v5667_v48 = vmul.f32 %v11752_v45, %v14109_v30 }
0x150b   :  { %v11756_v54 = vpop.eup %11755  ;;  %v5665_v20 = vmul.f32 %v11754_v41, %v14112_v57 }
0x150c   :  { %v11758_v59 = vpop.eup %11757  ;;  %v5668_v29 = vmul.f32 %v11756_v54, %v14115_v12  ;;  %v14214_v34 = vadd.f32 %v5671_v33, %v5667_v48 }
0x150d   :  { %v11760_v58 = vpop.eup %11759  ;;  %v5666_v56 = vmul.f32 %v11758_v59, %v14118_v36  ;;  %v14217_v15 = vadd.f32 %v5669_v13, %v5665_v20 }
0x150e   :  { %v11762_v9 = vpop.eup %11761  ;;  %11767 = vtanh.f32 %v14214_v34  ;;  %v14220_v55 = vadd.f32 %v5672_v22, %v5668_v29  ;;  %v5655_v10 = vadd.f32 1.0, %v11760_v58  ;;  %v8549_v22 = vld [vmem:[%s14842_s2 + $0x58] sm:$0x7f] }
0x150f   :  { %v11764_v30 = vpop.eup %11763  ;;  %11769 = vtanh.f32 %v14217_v15  ;;  %v14223_v57 = vadd.f32 %v5670_v7, %v5666_v56  ;;  %v5653_v52 = vadd.f32 1.0, %v11762_v9  ;;  %v5741_v45 = vmul.f32 %v8549_v22, %v12671_v24  ;;  %v14238_v7 = vld [vmem:[%s14848_s8] sm:$0xf] }
0x1510   :  { %v11766_v12 = vpop.eup %11765  ;;  %11771 = vtanh.f32 %v14220_v55  ;;  %v5656_v51 = vadd.f32 1.0, %v11764_v30 }
0x1511   :  { %11773 = vtanh.f32 %v14223_v57  ;;  %v5654_v36 = vadd.f32 1.0, %v11766_v12  ;;  %v5742_v41 = vsel %vm648_vm3, %v5741_v45, 1.0 }
0x1512   :  { %11775 = vrcp.f32 %v5655_v10  ;;  %v5743_v48 = vpack.c.bf16 %v5742_v41, %v5742_v41 }
0x1513   :  { %11777 = vrcp.f32 %v5653_v52 }
0x1514   :  { %11779 = vrcp.f32 %v5656_v51  ;;  %v5745_v54 = vsel %vm717_vm4, %v5743_v48, 0 }
0x1515   :  { %11781 = vrcp.f32 %v5654_v36 }
0x1518   :  { %v11768_v37 = vpop.eup %11767 }
0x1519   :  { %v11770_v3 = vpop.eup %11769 }
0x151a   :  { %v11772_v8 = vpop.eup %11771 }
0x151b   :  { %v11774_v27 = vpop.eup %11773 }
0x151c   :  { %v11776_v18 = vpop.eup %11775 }
0x151d   :  { %v11778_v32 = vpop.eup %11777  ;;  %v5683_v62 = vmul.f32 %v11776_v18, %v11768_v37 }
0x151e   :  { %v11780_v39 = vpop.eup %11779  ;;  %v5681_v33 = vmul.f32 %v11778_v32, %v11770_v3 }
0x151f   :  { %v11782_v14 = vpop.eup %11781  ;;  %v5684_v1 = vmul.f32 %v11780_v39, %v11772_v8 }
0x1520   :  { %v5682_v25 = vmul.f32 %v11782_v14, %v11774_v27 }
0x1521   :  { %v5686_v13 = vpack.c.bf16 %v5684_v1, %v5683_v62 }
0x1522   :  { %v5685_v0 = vpack.c.bf16 %v5682_v25, %v5681_v33 }
0x1524   :  { %9915 = vmatpush3.bf16.msra.mxu0 %v5685_v0  ;;  %9946 = vmatprep.subr.bf16.mxu1 %v5685_v0 }
0x1525   :  { %9947 = vmatpush3.bf16.msra.mxu1 %v5685_v0  ;;  %9916 = vmatprep.subr.bf16.mxu0 %v12565_v46 }
0x1526   :  { %9948 = vmatprep.subr.bf16.mxu1 %v5686_v13 }
0x1528   :  { %9917 = vmatpush3.bf16.msra.mxu0 %v5686_v13 }
0x1529   :  { %9949 = vmatpush3.bf16.msra.mxu1 %v5686_v13  ;;  %9918 = vmatprep.subr.bf16.mxu0 %v12565_v46 }
0x152c   :  { %9919 = vmatpush3.bf16.msra.mxu0 %v12629_v4 }
0x152d   :  { %9924 = vmatprep.subr.bf16.mxu0 %v14149_v23 }
0x152f   :  { %9921 = vmatmul.mubr.msk.bf16.vlgmr.msra.gmra.mrb[212].mxu0 %vm365_vm2, %v14238_v7 }
0x1530   :  { %9925 = vmatpush3.bf16.msra.mxu0 %v14149_v23  ;;  %9930 = vmatprep.mubr.msk.bf16.mxu0 %vm692_vm5, %v14051_v19 }
0x1531   :  { %9926 = vmatprep.subr.bf16.mxu0 %v14147_v44 }
0x1534   :  { %9927 = vmatpush3.bf16.msra.mxu0 %v14147_v44 }
0x1535   :  { %10225 = vmatprep.subr.msk.bf16.mxu0 %vm717_vm4, %v5743_v48 }
0x1538   :  { %9929 = vmatpush3.bf16.msra.mxu0 %v5745_v54 }
0x1539   :  { %9972 = vmatprep.subr.bf16.mxu0 %v12565_v46 }
0x153b   :  { %9931 = vmatmul.mubr.msk.bf16.vlgmr.msra.gmra.mrb[216].mxu0 %vm692_vm5, %v14058_v21 }
0x153c   :  { %9934 = vmatprep.mubr.msk.bf16.mxu0 %vm692_vm5, %v14065_v11 }
0x1543   :  { %9935 = vmatmul.mubr.msk.bf16.gmra.mrb[220].mxu0 %vm692_vm5, %v14072_v6 }
0x1544   :  { %9938 = vmatprep.mubr.msk.bf16.mxu0 %vm692_vm5, %v14079_v5 }
0x154b   :  { %9939 = vmatmul.mubr.msk.bf16.gmra.mrb[224].mxu0 %vm692_vm5, %v14086_v53 }
0x154c   :  { %9942 = vmatprep.mubr.msk.bf16.mxu0 %vm692_vm5, %v14093_v50 }
0x1553   :  { %9943 = vmatmul.mubr.msk.bf16.gmra.mrb[228].mxu0 %vm692_vm5, %v14100_v17 }
0x1554   :  { %9978 = vmatprep.mubr.msk.bf16.mxu0 %vm12566_vm6, %v12565_v46 }
0x1602   :  { %v5721_v19 = vpop.f32.mrb[212].mxu0 }
0x1603   :  { %vm5727_vm15 = vcmp.ge.f32.partialorder %v5721_v19, 0.0  ;;  %v5728_v21 = vmul.f32 %v5721_v19, %v12931_v38  ;;  %v9922_v11 = vpop.f32.mrb[213].mxu0 }
0x1604   :  { %v5724_v6 = vpop.f32.mrb[214].mxu0 }
0x1605   :  { %v5729_v44 = vsel %vm5727_vm15, %v5721_v19, %v5728_v21  ;;  %v9923_v5 = vpop.f32.mrb[215].mxu0 }
0x1606   :  { %v5730_v23 = vmul.f32 %v5729_v44, %v12934_v42 }
0x1608   :  { %v5731_v53 = vsel %vm1229_vm10, %v5730_v23, 0.0 }
0x1609   :  { %v5732_v20 = vrot.slane %v5731_v53, 4 }
0x160b   :  { %v5733_v50 = vadd.f32 %v5732_v20, %v5731_v53 }
0x160d   :  { %v5734_v59 = vrot.slane %v5733_v50, 2 }
0x160e   :  { %v9932_v29 = vpop.f32.mrb[216].mxu0 }
0x160f   :  { %v5735_v17 = vadd.f32 %v5734_v59, %v5733_v50  ;;  %v8560_v58 = vmul.f32 -1.442695, %v9932_v29  ;;  %v5781_v56 = vpop.f32.mrb[217].mxu0 }
0x1610   :  { %v8558_v9 = vmul.f32 -1.442695, %v5781_v56  ;;  %v9933_v10 = vpop.f32.mrb[218].mxu0 }
0x1611   :  { %v5736_v30 = vrot.slane %v5735_v17, 1  ;;  %11783 = vpow2.f32 %v8560_v58  ;;  %v8561_v52 = vmul.f32 -1.442695, %v9933_v10  ;;  %v5784_v12 = vpop.f32.mrb[219].mxu0 }
0x1612   :  { %11785 = vpow2.f32 %v8558_v9  ;;  %v8559_v51 = vmul.f32 -1.442695, %v5784_v12 }
0x1613   :  { %v5737_v36 = vadd.f32 %v5736_v30, %v5735_v17  ;;  %11787 = vpow2.f32 %v8561_v52 }
0x1614   :  { %11789 = vpow2.f32 %v8559_v51 }
0x1615   :  { %5738 = vst.msk [vmem:[#allocation2 + $0xa] sm:$0x1] %vm1237_vm11, %v5737_v36 }
0x1616   :  { %v9936_v37 = vpop.f32.mrb[220].mxu0 }
0x1617   :  { %v8564_v3 = vmul.f32 -1.442695, %v9936_v37  ;;  %v5797_v8 = vpop.f32.mrb[221].mxu0 }
0x1618   :  { %v8562_v27 = vmul.f32 -1.442695, %v5797_v8  ;;  %v9937_v18 = vpop.f32.mrb[222].mxu0 }
0x1619   :  { %11791 = vpow2.f32 %v8564_v3  ;;  %v8565_v32 = vmul.f32 -1.442695, %v9937_v18  ;;  %v5800_v39 = vpop.f32.mrb[223].mxu0 }
0x161a   :  { %11793 = vpow2.f32 %v8562_v27  ;;  %v8563_v14 = vmul.f32 -1.442695, %v5800_v39 }
0x161b   :  { %v11784_v62 = vpop.eup %11783  ;;  %11795 = vpow2.f32 %v8565_v32 }
0x161c   :  { %v11786_v1 = vpop.eup %11785  ;;  %v5858_v33 = vadd.f32 1.0, %v11784_v62  ;;  %11797 = vpow2.f32 %v8563_v14 }
0x161d   :  { %v11788_v25 = vpop.eup %11787  ;;  %v5856_v13 = vadd.f32 1.0, %v11786_v1 }
0x161e   :  { %v11790_v0 = vpop.eup %11789  ;;  %11799 = vrcp.f32 %v5858_v33  ;;  %v5859_v22 = vadd.f32 1.0, %v11788_v25  ;;  %v9940_v45 = vpop.f32.mrb[224].mxu0 }
0x161f   :  { %11801 = vrcp.f32 %v5856_v13  ;;  %v5857_v41 = vadd.f32 1.0, %v11790_v0  ;;  %v5813_v48 = vpop.f32.mrb[225].mxu0 }
0x1620   :  { %11803 = vrcp.f32 %v5859_v22  ;;  %v9941_v54 = vpop.f32.mrb[226].mxu0 }
0x1621   :  { %11805 = vrcp.f32 %v5857_v41  ;;  %v5816_v19 = vpop.f32.mrb[227].mxu0 }
0x1622   :  { %11807 = vtanh.f32 %v9940_v45 }
0x1623   :  { %v11792_v21 = vpop.eup %11791  ;;  %11809 = vtanh.f32 %v5813_v48 }
0x1624   :  { %v11794_v11 = vpop.eup %11793  ;;  %v5882_v6 = vadd.f32 1.0, %v11792_v21  ;;  %11811 = vtanh.f32 %v9941_v54 }
0x1625   :  { %v11796_v44 = vpop.eup %11795  ;;  %v5880_v5 = vadd.f32 1.0, %v11794_v11  ;;  %11813 = vtanh.f32 %v5816_v19 }
0x1626   :  { %v11798_v23 = vpop.eup %11797  ;;  %11815 = vrcp.f32 %v5882_v6  ;;  %v5883_v53 = vadd.f32 1.0, %v11796_v44  ;;  %v9944_v20 = vpop.f32.mrb[228].mxu0 }
0x1627   :  { %11817 = vrcp.f32 %v5880_v5  ;;  %v5881_v50 = vadd.f32 1.0, %v11798_v23  ;;  %v8568_v59 = vmul.f32 -1.442695, %v9944_v20  ;;  %v5829_v29 = vpop.f32.mrb[229].mxu0 }
0x1628   :  { %v11800_v17 = vpop.eup %11799  ;;  %11819 = vrcp.f32 %v5883_v53  ;;  %v8566_v58 = vmul.f32 -1.442695, %v5829_v29  ;;  %v9945_v56 = vpop.f32.mrb[230].mxu0 }
0x1629   :  { %v11802_v9 = vpop.eup %11801  ;;  %11821 = vrcp.f32 %v5881_v50  ;;  %v8569_v10 = vmul.f32 -1.442695, %v9945_v56  ;;  %v5832_v30 = vpop.f32.mrb[231].mxu0 }
0x162a   :  { %v11804_v52 = vpop.eup %11803  ;;  %11823 = vpow2.f32 %v8568_v59  ;;  %v8567_v12 = vmul.f32 -1.442695, %v5832_v30 }
0x162b   :  { %v11806_v51 = vpop.eup %11805  ;;  %11825 = vpow2.f32 %v8566_v58 }
0x162c   :  { %v11808_v36 = vpop.eup %11807  ;;  %11827 = vpow2.f32 %v8569_v10 }
0x162d   :  { %v11810_v37 = vpop.eup %11809  ;;  %v5926_v3 = vmul.f32 %v11808_v36, %v11800_v17  ;;  %11829 = vpow2.f32 %v8567_v12 }
0x162e   :  { %v11812_v8 = vpop.eup %11811  ;;  %v5924_v27 = vmul.f32 %v11810_v37, %v11802_v9 }
0x162f   :  { %v11814_v18 = vpop.eup %11813  ;;  %v5927_v32 = vmul.f32 %v11812_v8, %v11804_v52  ;;  %v8591_v52 = vld [vmem:[%s14842_s2 + $0x60] sm:$0x7f] }
0x1630   :  { %v11816_v39 = vpop.eup %11815  ;;  %v5925_v14 = vmul.f32 %v11814_v18, %v11806_v51  ;;  %v6191_v12 = vmul.f32 %v8591_v52, %v12671_v24 }
0x1631   :  { %v11818_v62 = vpop.eup %11817  ;;  %v5922_v1 = vmul.f32 %v11816_v39, %v14128_v2 }
0x1632   :  { %v11820_v33 = vpop.eup %11819  ;;  %v5920_v25 = vmul.f32 %v11818_v62, %v14138_v26  ;;  %v6192_v51 = vsel %vm648_vm3, %v6191_v12, 1.0 }
0x1633   :  { %v11822_v13 = vpop.eup %11821  ;;  %v5923_v0 = vmul.f32 %v11820_v33, %v14140_v28  ;;  %v14274_v22 = vadd.f32 %v5926_v3, %v5922_v1  ;;  %v6193_v36 = vpack.c.bf16 %v6192_v51, %v6192_v51  ;;  %v14363_v3 = vld [vmem:[%s14846_s6 + $0x38] sm:$0xff]  }
0x1634   :  { %v11824_v45 = vpop.eup %11823  ;;  %v5921_v41 = vmul.f32 %v11822_v13, %v14143_v49  ;;  %v14277_v48 = vadd.f32 %v5924_v27, %v5920_v25 }
0x1635   :  { %v11826_v54 = vpop.eup %11825  ;;  %11831 = vtanh.f32 %v14274_v22  ;;  %v14280_v19 = vadd.f32 %v5927_v32, %v5923_v0  ;;  %v5910_v21 = vadd.f32 1.0, %v11824_v45  ;;  %v6195_v37 = vsel %vm717_vm4, %v6193_v36, 0 }
0x1636   :  { %v11828_v2 = vpop.eup %11827  ;;  %11833 = vtanh.f32 %v14277_v48  ;;  %v14283_v26 = vadd.f32 %v5925_v14, %v5921_v41  ;;  %v5908_v11 = vadd.f32 1.0, %v11826_v54 }
0x1637   :  { %v11830_v28 = vpop.eup %11829  ;;  %11835 = vtanh.f32 %v14280_v19  ;;  %v5911_v6 = vadd.f32 1.0, %v11828_v2 }
0x1638   :  { %11837 = vtanh.f32 %v14283_v26  ;;  %v5909_v49 = vadd.f32 1.0, %v11830_v28 }
0x1639   :  { %11839 = vrcp.f32 %v5910_v21 }
0x163a   :  { %11841 = vrcp.f32 %v5908_v11 }
0x163b   :  { %11843 = vrcp.f32 %v5911_v6 }
0x163c   :  { %11845 = vrcp.f32 %v5909_v49 }
0x163f   :  { %v11832_v44 = vpop.eup %11831 }
0x1640   :  { %v11834_v5 = vpop.eup %11833 }
0x1641   :  { %v11836_v23 = vpop.eup %11835 }
0x1642   :  { %v11838_v53 = vpop.eup %11837 }
0x1643   :  { %v11840_v20 = vpop.eup %11839 }
0x1644   :  { %v11842_v50 = vpop.eup %11841  ;;  %v5938_v17 = vmul.f32 %v11840_v20, %v11832_v44 }
0x1645   :  { %v11844_v59 = vpop.eup %11843  ;;  %v5936_v56 = vmul.f32 %v11842_v50, %v11834_v5 }
0x1646   :  { %v11846_v29 = vpop.eup %11845  ;;  %v5939_v58 = vmul.f32 %v11844_v59, %v11836_v23 }
0x1647   :  { %v5937_v9 = vmul.f32 %v11846_v29, %v11838_v53 }
0x1648   :  { %v5941_v10 = vpack.c.bf16 %v5939_v58, %v5938_v17 }
0x1649   :  { %v5940_v30 = vpack.c.bf16 %v5937_v9, %v5936_v56 }
0x164b   :  { %9950 = vmatprep.subr.bf16.mxu1 %v5940_v30 }
0x164c   :  { %9951 = vmatpush3.bf16.msra.mxu1 %v5940_v30 }
0x164d   :  { %9952 = vmatprep.subr.bf16.mxu1 %v5941_v10 }
0x1650   :  { %9953 = vmatpush3.bf16.msra.mxu1 %v5941_v10 }
0x1651   :  { %9954 = vmatprep.subr.bf16.mxu1 %v12629_v4 }
0x1654   :  { %9955 = vmatpush3.bf16.msra.mxu1 %v12629_v4 }
0x1655   :  { %9982 = vmatprep.subr.bf16.mxu1 %v5940_v30 }
0x1657   :  { %9957 = vmatmul.mubr.msk.bf16.vlgmr.msra.gmra.mrb[216].mxu1 %vm956_vm7, %v14160_v35  ;;  %v14314_v35 = vld [vmem:[%s14846_s6] sm:$0xff]  }
0x1658   :  { %9983 = vmatpush3.bf16.msra.mxu1 %v5940_v30  ;;  %9960 = vmatprep.mubr.msk.bf16.mxu1 %vm956_vm7, %v14167_v43  ;;  %v14321_v43 = vld [vmem:[%s14846_s6 + $0x8] sm:$0xff]  }
0x1659   :  { %9984 = vmatprep.subr.bf16.mxu1 %v5941_v10 }
0x165c   :  { %9985 = vmatpush3.bf16.msra.mxu1 %v5941_v10 }
0x165d   :  { %10226 = vmatprep.subr.msk.bf16.mxu1 %vm717_vm4, %v6193_v36 }
0x165f   :  { %9961 = vmatmul.mubr.msk.bf16.gmra.mrb[220].mxu1 %vm956_vm7, %v14174_v40  ;;  %v14328_v40 = vld [vmem:[%s14846_s6 + $0x10] sm:$0xff]  }
0x1660   :  { %9987 = vmatpush3.bf16.msra.mxu1 %v6195_v37  ;;  %9964 = vmatprep.mubr.msk.bf16.mxu1 %vm956_vm7, %v14181_v31  ;;  %v14335_v31 = vld [vmem:[%s14846_s6 + $0x18] sm:$0xff]  }
0x1661   :  { %10030 = vmatprep.subr.bf16.mxu1 %v12565_v46 }
0x1667   :  { %9965 = vmatmul.mubr.msk.bf16.gmra.mrb[224].mxu1 %vm956_vm7, %v14188_v60  ;;  %v14342_v60 = vld [vmem:[%s14846_s6 + $0x20] sm:$0xff]  }
0x1668   :  { %9968 = vmatprep.mubr.msk.bf16.mxu1 %vm956_vm7, %v14195_v47  ;;  %v14349_v47 = vld [vmem:[%s14846_s6 + $0x28] sm:$0xff]  }
0x166f   :  { %9969 = vmatmul.mubr.msk.bf16.gmra.mrb[228].mxu1 %vm956_vm7, %v14202_v63  ;;  %v14356_v63 = vld [vmem:[%s14846_s6 + $0x30] sm:$0xff]  }
0x1670   :  { %9988 = vmatprep.mubr.msk.bf16.mxu1 %vm692_vm5, %v14314_v35 }
0x1677   :  { %9989 = vmatmul.mubr.msk.bf16.vlgmr.msra.gmra.mrb[232].mxu1 %vm692_vm5, %v14321_v43 }
0x1678   :  { %9992 = vmatprep.mubr.msk.bf16.mxu1 %vm692_vm5, %v14328_v40 }
0x167f   :  { %9993 = vmatmul.mubr.msk.bf16.gmra.mrb[236].mxu1 %vm692_vm5, %v14335_v31 }
0x1680   :  { %9996 = vmatprep.mubr.msk.bf16.mxu1 %vm692_vm5, %v14342_v60 }
0x1687   :  { %9997 = vmatmul.mubr.msk.bf16.gmra.mrb[240].mxu1 %vm692_vm5, %v14349_v47 }
0x1688   :  { %10000 = vmatprep.mubr.msk.bf16.mxu1 %vm692_vm5, %v14356_v63 }
0x168f   :  { %10001 = vmatmul.mubr.msk.bf16.gmra.mrb[244].mxu1 %vm692_vm5, %v14363_v3 }
0x1690   :  { %10036 = vmatprep.mubr.msk.bf16.mxu1 %vm12566_vm6, %v12565_v46 }
0x172a   :  { %v9958_v8 = vpop.f32.mrb[216].mxu1 }
0x172b   :  { %v8580_v27 = vmul.f32 -1.442695, %v9958_v8  ;;  %v5976_v18 = vpop.f32.mrb[217].mxu1 }
0x172c   :  { %v8578_v32 = vmul.f32 -1.442695, %v5976_v18  ;;  %v9959_v39 = vpop.f32.mrb[218].mxu1 }
0x172d   :  { %11847 = vpow2.f32 %v8580_v27  ;;  %v8581_v14 = vmul.f32 -1.442695, %v9959_v39  ;;  %v5979_v62 = vpop.f32.mrb[219].mxu1 }
0x172e   :  { %11849 = vpow2.f32 %v8578_v32  ;;  %v8579_v1 = vmul.f32 -1.442695, %v5979_v62 }
0x172f   :  { %11851 = vpow2.f32 %v8581_v14 }
0x1730   :  { %11853 = vpow2.f32 %v8579_v1 }
0x1732   :  { %v9962_v33 = vpop.f32.mrb[220].mxu1 }
0x1733   :  { %v8584_v25 = vmul.f32 -1.442695, %v9962_v33  ;;  %v5992_v13 = vpop.f32.mrb[221].mxu1 }
0x1734   :  { %v8582_v0 = vmul.f32 -1.442695, %v5992_v13  ;;  %v9963_v45 = vpop.f32.mrb[222].mxu1 }
0x1735   :  { %11855 = vpow2.f32 %v8584_v25  ;;  %v8585_v41 = vmul.f32 -1.442695, %v9963_v45  ;;  %v5995_v54 = vpop.f32.mrb[223].mxu1 }
0x1736   :  { %11857 = vpow2.f32 %v8582_v0  ;;  %v8583_v21 = vmul.f32 -1.442695, %v5995_v54 }
0x1737   :  { %v11848_v2 = vpop.eup %11847  ;;  %11859 = vpow2.f32 %v8585_v41 }
0x1738   :  { %v11850_v11 = vpop.eup %11849  ;;  %v6053_v28 = vadd.f32 1.0, %v11848_v2  ;;  %11861 = vpow2.f32 %v8583_v21 }
0x1739   :  { %v11852_v6 = vpop.eup %11851  ;;  %v6051_v49 = vadd.f32 1.0, %v11850_v11 }
0x173a   :  { %v11854_v44 = vpop.eup %11853  ;;  %11863 = vrcp.f32 %v6053_v28  ;;  %v6054_v5 = vadd.f32 1.0, %v11852_v6  ;;  %v9966_v23 = vpop.f32.mrb[224].mxu1 }
0x173b   :  { %11865 = vrcp.f32 %v6051_v49  ;;  %v6052_v53 = vadd.f32 1.0, %v11854_v44  ;;  %v6008_v20 = vpop.f32.mrb[225].mxu1 }
0x173c   :  { %11867 = vrcp.f32 %v6054_v5  ;;  %v9967_v50 = vpop.f32.mrb[226].mxu1 }
0x173d   :  { %11869 = vrcp.f32 %v6052_v53  ;;  %v6011_v59 = vpop.f32.mrb[227].mxu1 }
0x173e   :  { %11871 = vtanh.f32 %v9966_v23 }
0x173f   :  { %v11856_v29 = vpop.eup %11855  ;;  %11873 = vtanh.f32 %v6008_v20 }
0x1740   :  { %v11858_v17 = vpop.eup %11857  ;;  %v6077_v58 = vadd.f32 1.0, %v11856_v29  ;;  %11875 = vtanh.f32 %v9967_v50 }
0x1741   :  { %v11860_v56 = vpop.eup %11859  ;;  %v6075_v9 = vadd.f32 1.0, %v11858_v17  ;;  %11877 = vtanh.f32 %v6011_v59 }
0x1742   :  { %v11862_v10 = vpop.eup %11861  ;;  %11879 = vrcp.f32 %v6077_v58  ;;  %v6078_v30 = vadd.f32 1.0, %v11860_v56  ;;  %v9970_v52 = vpop.f32.mrb[228].mxu1 }
0x1743   :  { %11881 = vrcp.f32 %v6075_v9  ;;  %v6076_v12 = vadd.f32 1.0, %v11862_v10  ;;  %v8588_v51 = vmul.f32 -1.442695, %v9970_v52  ;;  %v6024_v36 = vpop.f32.mrb[229].mxu1 }
0x1744   :  { %v11864_v37 = vpop.eup %11863  ;;  %11883 = vrcp.f32 %v6078_v30  ;;  %v8586_v8 = vmul.f32 -1.442695, %v6024_v36  ;;  %v9971_v27 = vpop.f32.mrb[230].mxu1 }
0x1745   :  { %v11866_v18 = vpop.eup %11865  ;;  %11885 = vrcp.f32 %v6076_v12  ;;  %v8589_v32 = vmul.f32 -1.442695, %v9971_v27  ;;  %v6027_v39 = vpop.f32.mrb[231].mxu1 }
0x1746   :  { %v11868_v14 = vpop.eup %11867  ;;  %11887 = vpow2.f32 %v8588_v51  ;;  %v8587_v62 = vmul.f32 -1.442695, %v6027_v39 }
0x1747   :  { %v11870_v1 = vpop.eup %11869  ;;  %11889 = vpow2.f32 %v8586_v8 }
0x1748   :  { %v11872_v33 = vpop.eup %11871  ;;  %11891 = vpow2.f32 %v8589_v32 }
0x1749   :  { %v11874_v25 = vpop.eup %11873  ;;  %v6121_v13 = vmul.f32 %v11872_v33, %v11864_v37  ;;  %11893 = vpow2.f32 %v8587_v62 }
0x174a   :  { %v11876_v0 = vpop.eup %11875  ;;  %v6119_v45 = vmul.f32 %v11874_v25, %v11866_v18  ;;  %v9990_v41 = vpop.f32.mrb[232].mxu1 }
0x174b   :  { %v11878_v54 = vpop.eup %11877  ;;  %v6122_v21 = vmul.f32 %v11876_v0, %v11868_v14  ;;  %v8602_v2 = vmul.f32 -1.442695, %v9990_v41  ;;  %v6231_v11 = vpop.f32.mrb[233].mxu1 }
0x174c   :  { %v11880_v28 = vpop.eup %11879  ;;  %v6120_v6 = vmul.f32 %v11878_v54, %v11870_v1  ;;  %v8600_v49 = vmul.f32 -1.442695, %v6231_v11  ;;  %v9991_v44 = vpop.f32.mrb[234].mxu1 }
0x174d   :  { %v11882_v5 = vpop.eup %11881  ;;  %v6117_v23 = vmul.f32 %v11880_v28, %v14214_v34  ;;  %11895 = vpow2.f32 %v8602_v2  ;;  %v8603_v53 = vmul.f32 -1.442695, %v9991_v44  ;;  %v6234_v20 = vpop.f32.mrb[235].mxu1 }
0x174e   :  { %v11884_v50 = vpop.eup %11883  ;;  %v6115_v59 = vmul.f32 %v11882_v5, %v14217_v15  ;;  %11897 = vpow2.f32 %v8600_v49  ;;  %v8601_v29 = vmul.f32 -1.442695, %v6234_v20 }
0x174f   :  { %v11886_v17 = vpop.eup %11885  ;;  %v6118_v58 = vmul.f32 %v11884_v50, %v14220_v55  ;;  %v14372_v56 = vadd.f32 %v6121_v13, %v6117_v23  ;;  %11899 = vpow2.f32 %v8603_v53 }
0x1750   :  { %v11888_v9 = vpop.eup %11887  ;;  %v6116_v10 = vmul.f32 %v11886_v17, %v14223_v57  ;;  %v14375_v30 = vadd.f32 %v6119_v45, %v6115_v59  ;;  %11901 = vpow2.f32 %v8601_v29 }
0x1751   :  { %v11890_v34 = vpop.eup %11889  ;;  %11903 = vtanh.f32 %v14372_v56  ;;  %v14378_v52 = vadd.f32 %v6122_v21, %v6118_v58  ;;  %v6105_v15 = vadd.f32 1.0, %v11888_v9 }
0x1752   :  { %v11892_v12 = vpop.eup %11891  ;;  %11905 = vtanh.f32 %v14375_v30  ;;  %v14381_v51 = vadd.f32 %v6120_v6, %v6116_v10  ;;  %v6103_v55 = vadd.f32 1.0, %v11890_v34  ;;  %v9994_v36 = vpop.f32.mrb[236].mxu1 }
0x1753   :  { %v11894_v37 = vpop.eup %11893  ;;  %11907 = vtanh.f32 %v14378_v52  ;;  %v6106_v57 = vadd.f32 1.0, %v11892_v12  ;;  %v6247_v8 = vpop.f32.mrb[237].mxu1  ;;  %v8606_v32 = vmul.f32 -1.442695, %v9994_v36 }
0x1754   :  { %11909 = vtanh.f32 %v14381_v51  ;;  %v6104_v27 = vadd.f32 1.0, %v11894_v37  ;;  %v9995_v18 = vpop.f32.mrb[238].mxu1  ;;  %v8604_v45 = vmul.f32 -1.442695, %v6247_v8 }
0x1755   :  { %11911 = vrcp.f32 %v6105_v15  ;;  %v6250_v39 = vpop.f32.mrb[239].mxu1  ;;  %v8607_v2 = vmul.f32 -1.442695, %v9995_v18 }
0x1756   :  { %11913 = vrcp.f32 %v6103_v55  ;;  %v8605_v6 = vmul.f32 -1.442695, %v6250_v39 }
0x1757   :  { %v11896_v14 = vpop.eup %11895  ;;  %11915 = vrcp.f32 %v6106_v57 }
0x1758   :  { %v11898_v62 = vpop.eup %11897  ;;  %11917 = vrcp.f32 %v6104_v27  ;;  %v6308_v1 = vadd.f32 1.0, %v11896_v14 }
0x1759   :  { %v11900_v33 = vpop.eup %11899  ;;  %v6306_v25 = vadd.f32 1.0, %v11898_v62  ;;  %11919 = vpow2.f32 %v8606_v32 }
0x175a   :  { %v11902_v13 = vpop.eup %11901  ;;  %11921 = vrcp.f32 %v6308_v1  ;;  %v6309_v0 = vadd.f32 1.0, %v11900_v33  ;;  %v9998_v41 = vpop.f32.mrb[240].mxu1 }
0x175b   :  { %v11904_v54 = vpop.eup %11903  ;;  %11923 = vrcp.f32 %v6306_v25  ;;  %v6307_v21 = vadd.f32 1.0, %v11902_v13  ;;  %v6263_v11 = vpop.f32.mrb[241].mxu1 }
0x175c   :  { %v11906_v28 = vpop.eup %11905  ;;  %11925 = vrcp.f32 %v6309_v0  ;;  %v9999_v49 = vpop.f32.mrb[242].mxu1 }
0x175d   :  { %v11908_v44 = vpop.eup %11907  ;;  %11927 = vrcp.f32 %v6307_v21  ;;  %v6266_v5 = vpop.f32.mrb[243].mxu1 }
0x175e   :  { %v11910_v23 = vpop.eup %11909  ;;  %11929 = vpow2.f32 %v8604_v45 }
0x175f   :  { %v11912_v53 = vpop.eup %11911  ;;  %11931 = vpow2.f32 %v8607_v2 }
0x1760   :  { %v11914_v20 = vpop.eup %11913  ;;  %11933 = vpow2.f32 %v8605_v6  ;;  %v6133_v17 = vmul.f32 %v11912_v53, %v11904_v54 }
0x1761   :  { %v11916_v50 = vpop.eup %11915  ;;  %11935 = vtanh.f32 %v9998_v41  ;;  %v6131_v15 = vmul.f32 %v11914_v20, %v11906_v28 }
0x1762   :  { %v11918_v59 = vpop.eup %11917  ;;  %11937 = vtanh.f32 %v6263_v11  ;;  %v10002_v29 = vpop.f32.mrb[244].mxu1  ;;  %v6134_v58 = vmul.f32 %v11916_v50, %v11908_v44 }
0x1763   :  { %v11920_v9 = vpop.eup %11919  ;;  %11939 = vtanh.f32 %v9999_v49  ;;  %v8610_v10 = vmul.f32 -1.442695, %v10002_v29  ;;  %v6279_v34 = vpop.f32.mrb[245].mxu1  ;;  %v6132_v12 = vmul.f32 %v11918_v59, %v11910_v23 }
0x1764   :  { %v11922_v55 = vpop.eup %11921  ;;  %v6332_v36 = vadd.f32 1.0, %v11920_v9  ;;  %11941 = vtanh.f32 %v6266_v5  ;;  %v8608_v37 = vmul.f32 -1.442695, %v6279_v34  ;;  %v10003_v57 = vpop.f32.mrb[246].mxu1  ;;  %v6136_v8 = vpack.c.bf16 %v6134_v58, %v6133_v17  ;;  %v12521_v9 = vld [vmem:[%s14847_s7] sm:$0xff]  }
0x1765   :  { %v11924_v27 = vpop.eup %11923  ;;  %11943 = vpow2.f32 %v8610_v10  ;;  %v6135_v18 = vpack.c.bf16 %v6132_v12, %v6131_v15  ;;  %v8611_v32 = vmul.f32 -1.442695, %v10003_v57  ;;  %v6282_v39 = vpop.f32.mrb[247].mxu1 }
0x1766   :  { %v11926_v14 = vpop.eup %11925  ;;  %11945 = vrcp.f32 %v6332_v36  ;;  %v8609_v62 = vmul.f32 -1.442695, %v6282_v39 }
0x1767   :  { %v11928_v1 = vpop.eup %11927  ;;  %11947 = vpow2.f32 %v8608_v37  ;;  %9973 = vmatpush3.bf16.msra.mxu0 %v6135_v18 }
0x1768   :  { %v11930_v33 = vpop.eup %11929  ;;  %11949 = vpow2.f32 %v8611_v32  ;;  %9974 = vmatprep.subr.bf16.mxu0 %v12565_v46 }
0x1769   :  { %v11932_v25 = vpop.eup %11931  ;;  %v6330_v13 = vadd.f32 1.0, %v11930_v33  ;;  %11951 = vpow2.f32 %v8609_v62 }
0x176a   :  { %v11934_v0 = vpop.eup %11933  ;;  %v6333_v45 = vadd.f32 1.0, %v11932_v25 }
0x176b   :  { %v11936_v41 = vpop.eup %11935  ;;  %11953 = vrcp.f32 %v6330_v13  ;;  %v6331_v54 = vadd.f32 1.0, %v11934_v0  ;;  %9975 = vmatpush3.bf16.msra.mxu0 %v6136_v8 }
0x176c   :  { %v11938_v21 = vpop.eup %11937  ;;  %11955 = vrcp.f32 %v6333_v45  ;;  %v6376_v2 = vmul.f32 %v11936_v41, %v11922_v55  ;;  %9976 = vmatprep.subr.bf16.mxu0 %v12565_v46  ;;  %v14423_v45 = vld [vmem:[%s14847_s7 + $0x8] sm:$0xff]   ;;  %v14430_v41 = vld [vmem:[%s14847_s7 + $0x10] sm:$0xff]  }
0x176d   :  { %v11940_v11 = vpop.eup %11939  ;;  %11957 = vrcp.f32 %v6331_v54  ;;  %v6374_v28 = vmul.f32 %v11938_v21, %v11924_v27  ;;  %v14437_v54 = vld [vmem:[%s14847_s7 + $0x18] sm:$0xff]   ;;  %v14444_v21 = vld [vmem:[%s14847_s7 + $0x20] sm:$0xff]  }
0x176e   :  { %v11942_v6 = vpop.eup %11941  ;;  %v6377_v49 = vmul.f32 %v11940_v11, %v11926_v14  ;;  %v14458_v11 = vld [vmem:[%s14847_s7 + $0x30] sm:$0xff]  }
0x176f   :  { %v11944_v44 = vpop.eup %11943  ;;  %v6375_v5 = vmul.f32 %v11942_v6, %v11928_v1  ;;  %9977 = vmatpush3.bf16.msra.mxu0 %v12629_v4 }
0x1770   :  { %v11946_v23 = vpop.eup %11945  ;;  %10004 = vmatprep.subr.bf16.mxu0 %v6135_v18  ;;  %v6360_v50 = vadd.f32 1.0, %v11944_v44 }
0x1771   :  { %v11948_v53 = vpop.eup %11947  ;;  %v6372_v20 = vmul.f32 %v11946_v23, %v14274_v22 }
0x1772   :  { %v11950_v59 = vpop.eup %11949  ;;  %v6358_v29 = vadd.f32 1.0, %v11948_v53  ;;  %9979 = vmatmul.mubr.msk.bf16.vlgmr.msra.gmra.mrb[232].mxu0 %vm365_vm2, %v14238_v7  ;;  %11959 = vrcp.f32 %v6360_v50 }
0x1773   :  { %v11952_v17 = vpop.eup %11951  ;;  %v14391_v58 = vadd.f32 %v6376_v2, %v6372_v20  ;;  %10005 = vmatpush3.bf16.msra.mxu0 %v6135_v18  ;;  %10014 = vmatprep.mubr.msk.bf16.mxu0 %vm956_vm7, %v12521_v9  ;;  %v6361_v10 = vadd.f32 1.0, %v11950_v59  ;;  %v14451_v2 = vld [vmem:[%s14847_s7 + $0x28] sm:$0xff]  }
0x1774   :  { %10006 = vmatprep.subr.bf16.mxu0 %v6136_v8  ;;  %v6359_v22 = vadd.f32 1.0, %v11952_v17  ;;  %11961 = vrcp.f32 %v6358_v29 }
0x1775   :  { %v11954_v34 = vpop.eup %11953  ;;  %11963 = vtanh.f32 %v14391_v58 }
0x1776   :  { %v11956_v15 = vpop.eup %11955  ;;  %v6370_v12 = vmul.f32 %v11954_v34, %v14277_v48  ;;  %11965 = vrcp.f32 %v6361_v10 }
0x1777   :  { %v11958_v7 = vpop.eup %11957  ;;  %v6373_v55 = vmul.f32 %v11956_v15, %v14280_v19  ;;  %10007 = vmatpush3.bf16.msra.mxu0 %v6136_v8  ;;  %11967 = vrcp.f32 %v6359_v22 }
0x1778   :  { %v6371_v36 = vmul.f32 %v11958_v7, %v14283_v26  ;;  %v14401_v37 = vadd.f32 %v6374_v28, %v6370_v12  ;;  %v14465_v28 = vld [vmem:[%s14847_s7 + $0x38] sm:$0xff]  }
0x1779   :  { %v14403_v57 = vadd.f32 %v6377_v49, %v6373_v55 }
0x177a   :  { %11969 = vtanh.f32 %v14401_v37  ;;  %v14406_v27 = vadd.f32 %v6375_v5, %v6371_v36 }
0x177b   :  { %11971 = vtanh.f32 %v14403_v57 }
0x177c   :  { %11973 = vtanh.f32 %v14406_v27  ;;  %v11960_v48 = vpop.eup %11959 }
0x177e   :  { %v11962_v19 = vpop.eup %11961 }
0x177f   :  { %v11964_v18 = vpop.eup %11963 }
0x1780   :  { %v11966_v8 = vpop.eup %11965  ;;  %v6388_v62 = vmul.f32 %v11964_v18, %v11960_v48 }
0x1781   :  { %v11968_v32 = vpop.eup %11967 }
0x1784   :  { %v11970_v26 = vpop.eup %11969 }
0x1785   :  { %v11972_v39 = vpop.eup %11971  ;;  %v6386_v33 = vmul.f32 %v11970_v26, %v11962_v19 }
0x1786   :  { %v11974_v14 = vpop.eup %11973  ;;  %v6389_v1 = vmul.f32 %v11972_v39, %v11966_v8 }
0x1787   :  { %v6387_v25 = vmul.f32 %v11974_v14, %v11968_v32 }
0x1788   :  { %v14410_v13 = vpack.c.bf16 %v6389_v1, %v6388_v62 }
0x1789   :  { %v14412_v0 = vpack.c.bf16 %v6387_v25, %v6386_v33 }
0x178b   :  { %10008 = vmatprep.subr.bf16.mxu0 %v14412_v0 }
0x178c   :  { %10009 = vmatpush3.bf16.msra.mxu0 %v14412_v0 }
0x178d   :  { %10010 = vmatprep.subr.bf16.mxu0 %v14410_v13 }
0x1790   :  { %10011 = vmatpush3.bf16.msra.mxu0 %v14410_v13 }
0x1791   :  { %10012 = vmatprep.subr.bf16.mxu0 %v12629_v4 }
0x1794   :  { %10013 = vmatpush3.bf16.msra.mxu0 %v12629_v4 }
0x1797   :  { %10015 = vmatmul.mubr.msk.bf16.vlgmr.msra.gmra.mrb[236].mxu0 %vm956_vm7, %v14423_v45 }
0x1798   :  { %10018 = vmatprep.mubr.msk.bf16.mxu0 %vm956_vm7, %v14430_v41 }
0x179f   :  { %10019 = vmatmul.mubr.msk.bf16.gmra.mrb[240].mxu0 %vm956_vm7, %v14437_v54 }
0x17a0   :  { %10022 = vmatprep.mubr.msk.bf16.mxu0 %vm956_vm7, %v14444_v21 }
0x17a7   :  { %10023 = vmatmul.mubr.msk.bf16.gmra.mrb[244].mxu0 %vm956_vm7, %v14451_v2 }
0x17a8   :  { %10026 = vmatprep.mubr.msk.bf16.mxu0 %vm956_vm7, %v14458_v11 }
0x17af   :  { %10027 = vmatmul.mubr.msk.bf16.gmra.mrb[248].mxu0 %vm956_vm7, %v14465_v28 }
0x17b0   :  { %10072 = vmatprep.mubr.msk.bf16.mxu0 %vm956_vm7, %v12521_v9 }
0x1845   :  { %v6171_v6 = vpop.f32.mrb[232].mxu0 }
0x1846   :  { %vm6177_vm0 = vcmp.ge.f32.partialorder %v6171_v6, 0.0  ;;  %v6178_v49 = vmul.f32 %v6171_v6, %v12931_v38  ;;  %v9980_v44 = vpop.f32.mrb[233].mxu0 }
0x1847   :  { %v6174_v5 = vpop.f32.mrb[234].mxu0 }
0x1848   :  { %v6179_v23 = vsel %vm6177_vm0, %v6171_v6, %v6178_v49  ;;  %v9981_v53 = vpop.f32.mrb[235].mxu0 }
0x1849   :  { %v6180_v20 = vmul.f32 %v6179_v23, %v12934_v42 }
0x184b   :  { %v6181_v50 = vsel %vm1229_vm10, %v6180_v20, 0.0 }
0x184c   :  { %v6182_v59 = vrot.slane %v6181_v50, 4 }
0x184e   :  { %v6183_v29 = vadd.f32 %v6182_v59, %v6181_v50 }
0x1850   :  { %v6184_v17 = vrot.slane %v6183_v29, 2 }
0x1852   :  { %v6185_v10 = vadd.f32 %v6184_v17, %v6183_v29 }
0x1854   :  { %v6186_v34 = vrot.slane %v6185_v10, 1 }
0x1856   :  { %v6187_v22 = vadd.f32 %v6186_v34, %v6185_v10 }
0x1858   :  { %6188 = vst.msk [vmem:[#allocation2 + $0xb] sm:$0x1] %vm1237_vm11, %v6187_v22 }
0x186a   :  { %v10016_v9 = vpop.f32.mrb[236].mxu0 }
0x186b   :  { %v8622_v15 = vmul.f32 -1.442695, %v10016_v9  ;;  %v6426_v12 = vpop.f32.mrb[237].mxu0 }
0x186c   :  { %v8620_v7 = vmul.f32 -1.442695, %v6426_v12  ;;  %v10017_v55 = vpop.f32.mrb[238].mxu0 }
0x186d   :  { %11975 = vpow2.f32 %v8622_v15  ;;  %v8623_v36 = vmul.f32 -1.442695, %v10017_v55  ;;  %v6429_v48 = vpop.f32.mrb[239].mxu0 }
0x186e   :  { %11977 = vpow2.f32 %v8620_v7  ;;  %v8621_v19 = vmul.f32 -1.442695, %v6429_v48 }
0x186f   :  { %11979 = vpow2.f32 %v8623_v36 }
0x1870   :  { %11981 = vpow2.f32 %v8621_v19 }
0x1872   :  { %v10020_v18 = vpop.f32.mrb[240].mxu0 }
0x1873   :  { %v8626_v8 = vmul.f32 -1.442695, %v10020_v18  ;;  %v6442_v32 = vpop.f32.mrb[241].mxu0 }
0x1874   :  { %v8624_v26 = vmul.f32 -1.442695, %v6442_v32  ;;  %v10021_v39 = vpop.f32.mrb[242].mxu0 }
0x1875   :  { %11983 = vpow2.f32 %v8626_v8  ;;  %v8627_v14 = vmul.f32 -1.442695, %v10021_v39  ;;  %v6445_v62 = vpop.f32.mrb[243].mxu0 }
0x1876   :  { %11985 = vpow2.f32 %v8624_v26  ;;  %v8625_v1 = vmul.f32 -1.442695, %v6445_v62 }
0x1877   :  { %v11976_v33 = vpop.eup %11975  ;;  %11987 = vpow2.f32 %v8627_v14 }
0x1878   :  { %v11978_v25 = vpop.eup %11977  ;;  %v6503_v6 = vadd.f32 1.0, %v11976_v33  ;;  %11989 = vpow2.f32 %v8625_v1 }
0x1879   :  { %v11980_v49 = vpop.eup %11979  ;;  %v6501_v44 = vadd.f32 1.0, %v11978_v25 }
0x187a   :  { %v11982_v5 = vpop.eup %11981  ;;  %11991 = vrcp.f32 %v6503_v6  ;;  %v6504_v23 = vadd.f32 1.0, %v11980_v49  ;;  %v10024_v53 = vpop.f32.mrb[244].mxu0 }
0x187b   :  { %11993 = vrcp.f32 %v6501_v44  ;;  %v6502_v20 = vadd.f32 1.0, %v11982_v5  ;;  %v6458_v50 = vpop.f32.mrb[245].mxu0 }
0x187c   :  { %11995 = vrcp.f32 %v6504_v23  ;;  %v10025_v59 = vpop.f32.mrb[246].mxu0 }
0x187d   :  { %11997 = vrcp.f32 %v6502_v20  ;;  %v6461_v29 = vpop.f32.mrb[247].mxu0 }
0x187e   :  { %11999 = vtanh.f32 %v10024_v53 }
0x187f   :  { %v11984_v17 = vpop.eup %11983  ;;  %12001 = vtanh.f32 %v6458_v50 }
0x1880   :  { %v11986_v10 = vpop.eup %11985  ;;  %v6527_v34 = vadd.f32 1.0, %v11984_v17  ;;  %12003 = vtanh.f32 %v10025_v59 }
0x1881   :  { %v11988_v22 = vpop.eup %11987  ;;  %v6525_v9 = vadd.f32 1.0, %v11986_v10  ;;  %12005 = vtanh.f32 %v6461_v29 }
0x1882   :  { %v11990_v15 = vpop.eup %11989  ;;  %12007 = vrcp.f32 %v6527_v34  ;;  %v6528_v12 = vadd.f32 1.0, %v11988_v22  ;;  %v10028_v7 = vpop.f32.mrb[248].mxu0 }
0x1883   :  { %12009 = vrcp.f32 %v6525_v9  ;;  %v6526_v55 = vadd.f32 1.0, %v11990_v15  ;;  %v8630_v36 = vmul.f32 -1.442695, %v10028_v7  ;;  %v6474_v48 = vpop.f32.mrb[249].mxu0 }
0x1884   :  { %v11992_v19 = vpop.eup %11991  ;;  %12011 = vrcp.f32 %v6528_v12  ;;  %v8628_v18 = vmul.f32 -1.442695, %v6474_v48  ;;  %v10029_v8 = vpop.f32.mrb[250].mxu0 }
0x1885   :  { %v11994_v32 = vpop.eup %11993  ;;  %12013 = vrcp.f32 %v6526_v55  ;;  %v8631_v26 = vmul.f32 -1.442695, %v10029_v8  ;;  %v6477_v39 = vpop.f32.mrb[251].mxu0 }
0x1886   :  { %v11996_v14 = vpop.eup %11995  ;;  %12015 = vpow2.f32 %v8630_v36  ;;  %v8629_v62 = vmul.f32 -1.442695, %v6477_v39 }
0x1887   :  { %v11998_v1 = vpop.eup %11997  ;;  %12017 = vpow2.f32 %v8628_v18 }
0x1888   :  { %v12000_v33 = vpop.eup %11999  ;;  %12019 = vpow2.f32 %v8631_v26 }
0x1889   :  { %v12002_v25 = vpop.eup %12001  ;;  %v6571_v6 = vmul.f32 %v12000_v33, %v11992_v19  ;;  %12021 = vpow2.f32 %v8629_v62 }
0x188a   :  { %v12004_v49 = vpop.eup %12003  ;;  %v6569_v44 = vmul.f32 %v12002_v25, %v11994_v32 }
0x188b   :  { %v12006_v5 = vpop.eup %12005  ;;  %v6572_v23 = vmul.f32 %v12004_v49, %v11996_v14 }
0x188c   :  { %v12008_v53 = vpop.eup %12007  ;;  %v6570_v20 = vmul.f32 %v12006_v5, %v11998_v1 }
0x188d   :  { %v12010_v50 = vpop.eup %12009  ;;  %v6567_v59 = vmul.f32 %v12008_v53, %v14372_v56 }
0x188e   :  { %v12012_v29 = vpop.eup %12011  ;;  %v6565_v17 = vmul.f32 %v12010_v50, %v14375_v30 }
0x188f   :  { %v12014_v10 = vpop.eup %12013  ;;  %v6568_v34 = vmul.f32 %v12012_v29, %v14378_v52  ;;  %v14477_v22 = vadd.f32 %v6571_v6, %v6567_v59 }
0x1890   :  { %v12016_v9 = vpop.eup %12015  ;;  %v6566_v15 = vmul.f32 %v12014_v10, %v14381_v51  ;;  %v14480_v12 = vadd.f32 %v6569_v44, %v6565_v17 }
0x1891   :  { %v12018_v7 = vpop.eup %12017  ;;  %12023 = vtanh.f32 %v14477_v22  ;;  %v14483_v55 = vadd.f32 %v6572_v23, %v6568_v34  ;;  %v6555_v36 = vadd.f32 1.0, %v12016_v9  ;;  %v8633_v23 = vld [vmem:[%s14842_s2 + $0x68] sm:$0x7f] }
0x1892   :  { %v12020_v56 = vpop.eup %12019  ;;  %12025 = vtanh.f32 %v14480_v12  ;;  %v14486_v30 = vadd.f32 %v6570_v20, %v6566_v15  ;;  %v6553_v48 = vadd.f32 1.0, %v12018_v7  ;;  %v6641_v53 = vmul.f32 %v8633_v23, %v12671_v24  ;;  %v14501_v20 = vld [vmem:[%s14848_s8] sm:$0xf] }
0x1893   :  { %v12022_v52 = vpop.eup %12021  ;;  %12027 = vtanh.f32 %v14483_v55  ;;  %v6556_v19 = vadd.f32 1.0, %v12020_v56 }
0x1894   :  { %12029 = vtanh.f32 %v14486_v30  ;;  %v6554_v51 = vadd.f32 1.0, %v12022_v52  ;;  %v6642_v50 = vsel %vm648_vm3, %v6641_v53, 1.0 }
0x1895   :  { %12031 = vrcp.f32 %v6555_v36  ;;  %v6643_v59 = vpack.c.bf16 %v6642_v50, %v6642_v50 }
0x1896   :  { %12033 = vrcp.f32 %v6553_v48 }
0x1897   :  { %12035 = vrcp.f32 %v6556_v19  ;;  %v6645_v29 = vsel %vm717_vm4, %v6643_v59, 0 }
0x1898   :  { %12037 = vrcp.f32 %v6554_v51 }
0x189b   :  { %v12024_v18 = vpop.eup %12023 }
0x189c   :  { %v12026_v8 = vpop.eup %12025 }
0x189d   :  { %v12028_v32 = vpop.eup %12027 }
0x189e   :  { %v12030_v26 = vpop.eup %12029 }
0x189f   :  { %v12032_v39 = vpop.eup %12031 }
0x18a0   :  { %v12034_v14 = vpop.eup %12033  ;;  %v6583_v33 = vmul.f32 %v12032_v39, %v12024_v18 }
0x18a1   :  { %v12036_v62 = vpop.eup %12035  ;;  %v6581_v6 = vmul.f32 %v12034_v14, %v12026_v8 }
0x18a2   :  { %v12038_v1 = vpop.eup %12037  ;;  %v6584_v25 = vmul.f32 %v12036_v62, %v12028_v32 }
0x18a3   :  { %v6582_v49 = vmul.f32 %v12038_v1, %v12030_v26 }
0x18a4   :  { %v6586_v44 = vpack.c.bf16 %v6584_v25, %v6583_v33 }
0x18a5   :  { %v6585_v5 = vpack.c.bf16 %v6582_v49, %v6581_v6 }
0x18a7   :  { %10031 = vmatpush3.bf16.msra.mxu1 %v6585_v5  ;;  %10062 = vmatprep.subr.bf16.mxu0 %v6585_v5 }
0x18a8   :  { %10063 = vmatpush3.bf16.msra.mxu0 %v6585_v5  ;;  %10032 = vmatprep.subr.bf16.mxu1 %v12565_v46 }
0x18a9   :  { %10064 = vmatprep.subr.bf16.mxu0 %v6586_v44 }
0x18ab   :  { %10033 = vmatpush3.bf16.msra.mxu1 %v6586_v44 }
0x18ac   :  { %10065 = vmatpush3.bf16.msra.mxu0 %v6586_v44  ;;  %10034 = vmatprep.subr.bf16.mxu1 %v12565_v46 }
0x18af   :  { %10035 = vmatpush3.bf16.msra.mxu1 %v12629_v4 }
0x18b0   :  { %10040 = vmatprep.subr.bf16.mxu1 %v14412_v0 }
0x18b2   :  { %10037 = vmatmul.mubr.msk.bf16.vlgmr.msra.gmra.mrb[248].mxu1 %vm365_vm2, %v14501_v20 }
0x18b3   :  { %10041 = vmatpush3.bf16.msra.mxu1 %v14412_v0  ;;  %10046 = vmatprep.mubr.msk.bf16.mxu1 %vm692_vm5, %v14314_v35 }
0x18b4   :  { %10042 = vmatprep.subr.bf16.mxu1 %v14410_v13 }
0x18b7   :  { %10043 = vmatpush3.bf16.msra.mxu1 %v14410_v13 }
0x18b8   :  { %10227 = vmatprep.subr.msk.bf16.mxu1 %vm717_vm4, %v6643_v59 }
0x18bb   :  { %10045 = vmatpush3.bf16.msra.mxu1 %v6645_v29 }
0x18bc   :  { %10088 = vmatprep.subr.bf16.mxu1 %v12565_v46 }
0x18be   :  { %10047 = vmatmul.mubr.msk.bf16.vlgmr.msra.gmra.mrb[252].mxu1 %vm692_vm5, %v14321_v43 }
0x18bf   :  { %10050 = vmatprep.mubr.msk.bf16.mxu1 %vm692_vm5, %v14328_v40 }
0x18c6   :  { %10051 = vmatmul.mubr.msk.bf16.gmra.mrb[0].mxu1 %vm692_vm5, %v14335_v31 }
0x18c7   :  { %10054 = vmatprep.mubr.msk.bf16.mxu1 %vm692_vm5, %v14342_v60 }
0x18ce   :  { %10055 = vmatmul.mubr.msk.bf16.gmra.mrb[4].mxu1 %vm692_vm5, %v14349_v47 }
0x18cf   :  { %10058 = vmatprep.mubr.msk.bf16.mxu1 %vm692_vm5, %v14356_v63 }
0x18d6   :  { %10059 = vmatmul.mubr.msk.bf16.gmra.mrb[8].mxu1 %vm692_vm5, %v14363_v3 }
0x18d7   :  { %10094 = vmatprep.mubr.msk.bf16.mxu1 %vm12566_vm6, %v12565_v46 }
0x1985   :  { %v6621_v35 = vpop.f32.mrb[248].mxu1 }
0x1986   :  { %vm6627_vm1 = vcmp.ge.f32.partialorder %v6621_v35, 0.0  ;;  %v6628_v43 = vmul.f32 %v6621_v35, %v12931_v38  ;;  %v10038_v40 = vpop.f32.mrb[249].mxu1 }
0x1987   :  { %v6624_v31 = vpop.f32.mrb[250].mxu1 }
0x1988   :  { %v6629_v13 = vsel %vm6627_vm1, %v6621_v35, %v6628_v43  ;;  %v10039_v60 = vpop.f32.mrb[251].mxu1 }
0x1989   :  { %v6630_v0 = vmul.f32 %v6629_v13, %v12934_v42 }
0x198b   :  { %v6631_v47 = vsel %vm1229_vm10, %v6630_v0, 0.0 }
0x198c   :  { %v6632_v17 = vrot.slane %v6631_v47, 4 }
0x198e   :  { %v6633_v63 = vadd.f32 %v6632_v17, %v6631_v47 }
0x1990   :  { %v6634_v10 = vrot.slane %v6633_v63, 2 }
0x1991   :  { %v10048_v34 = vpop.f32.mrb[252].mxu1 }
0x1992   :  { %v6635_v3 = vadd.f32 %v6634_v10, %v6633_v63  ;;  %v8644_v9 = vmul.f32 -1.442695, %v10048_v34  ;;  %v6681_v15 = vpop.f32.mrb[253].mxu1 }
0x1993   :  { %v8642_v7 = vmul.f32 -1.442695, %v6681_v15  ;;  %v10049_v36 = vpop.f32.mrb[254].mxu1 }
0x1994   :  { %v6636_v56 = vrot.slane %v6635_v3, 1  ;;  %12039 = vpow2.f32 %v8644_v9  ;;  %v8645_v48 = vmul.f32 -1.442695, %v10049_v36  ;;  %v6684_v52 = vpop.f32.mrb[255].mxu1 }
0x1995   :  { %12041 = vpow2.f32 %v8642_v7  ;;  %v8643_v19 = vmul.f32 -1.442695, %v6684_v52 }
0x1996   :  { %v6637_v51 = vadd.f32 %v6636_v56, %v6635_v3  ;;  %12043 = vpow2.f32 %v8645_v48 }
0x1997   :  { %12045 = vpow2.f32 %v8643_v19 }
0x1998   :  { %6638 = vst.msk [vmem:[#allocation2 + $0xc] sm:$0x1] %vm1237_vm11, %v6637_v51 }
0x1999   :  { %v10052_v18 = vpop.f32.mrb[0].mxu1 }
0x199a   :  { %v8648_v8 = vmul.f32 -1.442695, %v10052_v18  ;;  %v6697_v32 = vpop.f32.mrb[1].mxu1 }
0x199b   :  { %v8646_v26 = vmul.f32 -1.442695, %v6697_v32  ;;  %v10053_v39 = vpop.f32.mrb[2].mxu1 }
0x199c   :  { %12047 = vpow2.f32 %v8648_v8  ;;  %v8649_v14 = vmul.f32 -1.442695, %v10053_v39  ;;  %v6700_v62 = vpop.f32.mrb[3].mxu1 }
0x199d   :  { %12049 = vpow2.f32 %v8646_v26  ;;  %v8647_v1 = vmul.f32 -1.442695, %v6700_v62 }
0x199e   :  { %v12040_v33 = vpop.eup %12039  ;;  %12051 = vpow2.f32 %v8649_v14 }
0x199f   :  { %v12042_v25 = vpop.eup %12041  ;;  %v6758_v6 = vadd.f32 1.0, %v12040_v33  ;;  %12053 = vpow2.f32 %v8647_v1 }
0x19a0   :  { %v12044_v49 = vpop.eup %12043  ;;  %v6756_v44 = vadd.f32 1.0, %v12042_v25 }
0x19a1   :  { %v12046_v5 = vpop.eup %12045  ;;  %12055 = vrcp.f32 %v6758_v6  ;;  %v6759_v23 = vadd.f32 1.0, %v12044_v49  ;;  %v10056_v53 = vpop.f32.mrb[4].mxu1 }
0x19a2   :  { %12057 = vrcp.f32 %v6756_v44  ;;  %v6757_v50 = vadd.f32 1.0, %v12046_v5  ;;  %v6713_v59 = vpop.f32.mrb[5].mxu1 }
0x19a3   :  { %12059 = vrcp.f32 %v6759_v23  ;;  %v10057_v29 = vpop.f32.mrb[6].mxu1 }
0x19a4   :  { %12061 = vrcp.f32 %v6757_v50  ;;  %v6716_v35 = vpop.f32.mrb[7].mxu1 }
0x19a5   :  { %12063 = vtanh.f32 %v10056_v53 }
0x19a6   :  { %v12048_v43 = vpop.eup %12047  ;;  %12065 = vtanh.f32 %v6713_v59 }
0x19a7   :  { %v12050_v40 = vpop.eup %12049  ;;  %v6782_v31 = vadd.f32 1.0, %v12048_v43  ;;  %12067 = vtanh.f32 %v10057_v29 }
0x19a8   :  { %v12052_v13 = vpop.eup %12051  ;;  %v6780_v60 = vadd.f32 1.0, %v12050_v40  ;;  %12069 = vtanh.f32 %v6716_v35 }
0x19a9   :  { %v12054_v0 = vpop.eup %12053  ;;  %12071 = vrcp.f32 %v6782_v31  ;;  %v6783_v47 = vadd.f32 1.0, %v12052_v13  ;;  %v10060_v17 = vpop.f32.mrb[8].mxu1 }
0x19aa   :  { %12073 = vrcp.f32 %v6780_v60  ;;  %v6781_v63 = vadd.f32 1.0, %v12054_v0  ;;  %v8652_v10 = vmul.f32 -1.442695, %v10060_v17  ;;  %v6729_v34 = vpop.f32.mrb[9].mxu1 }
0x19ab   :  { %v12056_v3 = vpop.eup %12055  ;;  %12075 = vrcp.f32 %v6783_v47  ;;  %v8650_v9 = vmul.f32 -1.442695, %v6729_v34  ;;  %v10061_v15 = vpop.f32.mrb[10].mxu1 }
0x19ac   :  { %v12058_v7 = vpop.eup %12057  ;;  %12077 = vrcp.f32 %v6781_v63  ;;  %v8653_v36 = vmul.f32 -1.442695, %v10061_v15  ;;  %v6732_v56 = vpop.f32.mrb[11].mxu1 }
0x19ad   :  { %v12060_v48 = vpop.eup %12059  ;;  %12079 = vpow2.f32 %v8652_v10  ;;  %v8651_v52 = vmul.f32 -1.442695, %v6732_v56 }
0x19ae   :  { %v12062_v19 = vpop.eup %12061  ;;  %12081 = vpow2.f32 %v8650_v9 }
0x19af   :  { %v12064_v51 = vpop.eup %12063  ;;  %12083 = vpow2.f32 %v8653_v36 }
0x19b0   :  { %v12066_v18 = vpop.eup %12065  ;;  %v6826_v8 = vmul.f32 %v12064_v51, %v12056_v3  ;;  %12085 = vpow2.f32 %v8651_v52 }
0x19b1   :  { %v12068_v32 = vpop.eup %12067  ;;  %v6824_v26 = vmul.f32 %v12066_v18, %v12058_v7 }
0x19b2   :  { %v12070_v39 = vpop.eup %12069  ;;  %v6827_v14 = vmul.f32 %v12068_v32, %v12060_v48  ;;  %v8675_v48 = vld [vmem:[%s14842_s2 + $0x70] sm:$0x7f] }
0x19b3   :  { %v12072_v62 = vpop.eup %12071  ;;  %v6825_v1 = vmul.f32 %v12070_v39, %v12062_v19  ;;  %v7091_v52 = vmul.f32 %v8675_v48, %v12671_v24 }
0x19b4   :  { %v12074_v33 = vpop.eup %12073  ;;  %v6822_v25 = vmul.f32 %v12072_v62, %v14391_v58 }
0x19b5   :  { %v12076_v6 = vpop.eup %12075  ;;  %v6820_v49 = vmul.f32 %v12074_v33, %v14401_v37  ;;  %v7092_v19 = vsel %vm648_vm3, %v7091_v52, 1.0 }
0x19b6   :  { %v12078_v44 = vpop.eup %12077  ;;  %v6823_v5 = vmul.f32 %v12076_v6, %v14403_v57  ;;  %v14537_v23 = vadd.f32 %v6826_v8, %v6822_v25  ;;  %v7093_v51 = vpack.c.bf16 %v7092_v19, %v7092_v19  ;;  %v14626_v8 = vld [vmem:[%s14846_s6 + $0x38] sm:$0xff]  }
0x19b7   :  { %v12080_v53 = vpop.eup %12079  ;;  %v6821_v50 = vmul.f32 %v12078_v44, %v14406_v27  ;;  %v14540_v59 = vadd.f32 %v6824_v26, %v6820_v49 }
0x19b8   :  { %v12082_v29 = vpop.eup %12081  ;;  %12087 = vtanh.f32 %v14537_v23  ;;  %v14543_v35 = vadd.f32 %v6827_v14, %v6823_v5  ;;  %v6810_v43 = vadd.f32 1.0, %v12080_v53  ;;  %v7095_v18 = vsel %vm717_vm4, %v7093_v51, 0 }
0x19b9   :  { %v12084_v58 = vpop.eup %12083  ;;  %12089 = vtanh.f32 %v14540_v59  ;;  %v14546_v37 = vadd.f32 %v6825_v1, %v6821_v50  ;;  %v6808_v40 = vadd.f32 1.0, %v12082_v29 }
0x19ba   :  { %v12086_v57 = vpop.eup %12085  ;;  %12091 = vtanh.f32 %v14543_v35  ;;  %v6811_v31 = vadd.f32 1.0, %v12084_v58 }
0x19bb   :  { %12093 = vtanh.f32 %v14546_v37  ;;  %v6809_v27 = vadd.f32 1.0, %v12086_v57 }
0x19bc   :  { %12095 = vrcp.f32 %v6810_v43 }
0x19bd   :  { %12097 = vrcp.f32 %v6808_v40 }
0x19be   :  { %12099 = vrcp.f32 %v6811_v31 }
0x19bf   :  { %12101 = vrcp.f32 %v6809_v27 }
0x19c2   :  { %v12088_v13 = vpop.eup %12087 }
0x19c3   :  { %v12090_v60 = vpop.eup %12089 }
0x19c4   :  { %v12092_v0 = vpop.eup %12091 }
0x19c5   :  { %v12094_v47 = vpop.eup %12093 }
0x19c6   :  { %v12096_v17 = vpop.eup %12095 }
0x19c7   :  { %v12098_v63 = vpop.eup %12097  ;;  %v6838_v3 = vmul.f32 %v12096_v17, %v12088_v13 }
0x19c8   :  { %v12100_v10 = vpop.eup %12099  ;;  %v6836_v15 = vmul.f32 %v12098_v63, %v12090_v60 }
0x19c9   :  { %v12102_v34 = vpop.eup %12101  ;;  %v6839_v9 = vmul.f32 %v12100_v10, %v12092_v0 }
0x19ca   :  { %v6837_v7 = vmul.f32 %v12102_v34, %v12094_v47 }
0x19cb   :  { %v6841_v36 = vpack.c.bf16 %v6839_v9, %v6838_v3 }
0x19cc   :  { %v6840_v56 = vpack.c.bf16 %v6837_v7, %v6836_v15 }
0x19ce   :  { %10066 = vmatprep.subr.bf16.mxu0 %v6840_v56 }
0x19cf   :  { %10067 = vmatpush3.bf16.msra.mxu0 %v6840_v56 }
0x19d0   :  { %10068 = vmatprep.subr.bf16.mxu0 %v6841_v36 }
0x19d3   :  { %10069 = vmatpush3.bf16.msra.mxu0 %v6841_v36 }
0x19d4   :  { %10070 = vmatprep.subr.bf16.mxu0 %v12629_v4 }
0x19d7   :  { %10071 = vmatpush3.bf16.msra.mxu0 %v12629_v4 }
0x19d8   :  { %10098 = vmatprep.subr.bf16.mxu0 %v6840_v56 }
0x19da   :  { %10073 = vmatmul.mubr.msk.bf16.vlgmr.msra.gmra.mrb[252].mxu0 %vm956_vm7, %v14423_v45  ;;  %v14577_v45 = vld [vmem:[%s14846_s6] sm:$0xff]  }
0x19db   :  { %10099 = vmatpush3.bf16.msra.mxu0 %v6840_v56  ;;  %10076 = vmatprep.mubr.msk.bf16.mxu0 %vm956_vm7, %v14430_v41  ;;  %v14584_v41 = vld [vmem:[%s14846_s6 + $0x8] sm:$0xff]  }
0x19dc   :  { %10100 = vmatprep.subr.bf16.mxu0 %v6841_v36 }
0x19df   :  { %10101 = vmatpush3.bf16.msra.mxu0 %v6841_v36 }
0x19e0   :  { %10228 = vmatprep.subr.msk.bf16.mxu0 %vm717_vm4, %v7093_v51 }
0x19e2   :  { %10077 = vmatmul.mubr.msk.bf16.gmra.mrb[0].mxu0 %vm956_vm7, %v14437_v54  ;;  %v14591_v54 = vld [vmem:[%s14846_s6 + $0x10] sm:$0xff]  }
0x19e3   :  { %10103 = vmatpush3.bf16.msra.mxu0 %v7095_v18  ;;  %10080 = vmatprep.mubr.msk.bf16.mxu0 %vm956_vm7, %v14444_v21  ;;  %v14598_v21 = vld [vmem:[%s14846_s6 + $0x18] sm:$0xff]  }
0x19e4   :  { %10146 = vmatprep.subr.bf16.mxu0 %v12565_v46 }
0x19ea   :  { %10081 = vmatmul.mubr.msk.bf16.gmra.mrb[4].mxu0 %vm956_vm7, %v14451_v2  ;;  %v14605_v2 = vld [vmem:[%s14846_s6 + $0x20] sm:$0xff]  }
0x19eb   :  { %10084 = vmatprep.mubr.msk.bf16.mxu0 %vm956_vm7, %v14458_v11  ;;  %v14612_v11 = vld [vmem:[%s14846_s6 + $0x28] sm:$0xff]  }
0x19f2   :  { %10085 = vmatmul.mubr.msk.bf16.gmra.mrb[8].mxu0 %vm956_vm7, %v14465_v28  ;;  %v14619_v28 = vld [vmem:[%s14846_s6 + $0x30] sm:$0xff]  }
0x19f3   :  { %10104 = vmatprep.mubr.msk.bf16.mxu0 %vm692_vm5, %v14577_v45 }
0x19fa   :  { %10105 = vmatmul.mubr.msk.bf16.vlgmr.msra.gmra.mrb[12].mxu0 %vm692_vm5, %v14584_v41 }
0x19fb   :  { %10108 = vmatprep.mubr.msk.bf16.mxu0 %vm692_vm5, %v14591_v54 }
0x1a02   :  { %10109 = vmatmul.mubr.msk.bf16.gmra.mrb[16].mxu0 %vm692_vm5, %v14598_v21 }
0x1a03   :  { %10112 = vmatprep.mubr.msk.bf16.mxu0 %vm692_vm5, %v14605_v2 }
0x1a0a   :  { %10113 = vmatmul.mubr.msk.bf16.gmra.mrb[20].mxu0 %vm692_vm5, %v14612_v11 }
0x1a0b   :  { %10116 = vmatprep.mubr.msk.bf16.mxu0 %vm692_vm5, %v14619_v28 }
0x1a12   :  { %10117 = vmatmul.mubr.msk.bf16.gmra.mrb[24].mxu0 %vm692_vm5, %v14626_v8 }
0x1a13   :  { %10152 = vmatprep.mubr.msk.bf16.mxu0 %vm12566_vm6, %v12565_v46 }
0x1aad   :  { %v10074_v32 = vpop.f32.mrb[252].mxu0 }
0x1aae   :  { %v8664_v26 = vmul.f32 -1.442695, %v10074_v32  ;;  %v6876_v39 = vpop.f32.mrb[253].mxu0 }
0x1aaf   :  { %v8662_v14 = vmul.f32 -1.442695, %v6876_v39  ;;  %v10075_v62 = vpop.f32.mrb[254].mxu0 }
0x1ab0   :  { %12103 = vpow2.f32 %v8664_v26  ;;  %v8665_v1 = vmul.f32 -1.442695, %v10075_v62  ;;  %v6879_v33 = vpop.f32.mrb[255].mxu0 }
0x1ab1   :  { %12105 = vpow2.f32 %v8662_v14  ;;  %v8663_v25 = vmul.f32 -1.442695, %v6879_v33 }
0x1ab2   :  { %12107 = vpow2.f32 %v8665_v1 }
0x1ab3   :  { %12109 = vpow2.f32 %v8663_v25 }
0x1ab5   :  { %v10078_v6 = vpop.f32.mrb[0].mxu0 }
0x1ab6   :  { %v8668_v49 = vmul.f32 -1.442695, %v10078_v6  ;;  %v6892_v44 = vpop.f32.mrb[1].mxu0 }
0x1ab7   :  { %v8666_v5 = vmul.f32 -1.442695, %v6892_v44  ;;  %v10079_v53 = vpop.f32.mrb[2].mxu0 }
0x1ab8   :  { %12111 = vpow2.f32 %v8668_v49  ;;  %v8669_v50 = vmul.f32 -1.442695, %v10079_v53  ;;  %v6895_v29 = vpop.f32.mrb[3].mxu0 }
0x1ab9   :  { %12113 = vpow2.f32 %v8666_v5  ;;  %v8667_v43 = vmul.f32 -1.442695, %v6895_v29 }
0x1aba   :  { %v12104_v58 = vpop.eup %12103  ;;  %12115 = vpow2.f32 %v8669_v50 }
0x1abb   :  { %v12106_v40 = vpop.eup %12105  ;;  %v6953_v57 = vadd.f32 1.0, %v12104_v58  ;;  %12117 = vpow2.f32 %v8667_v43 }
0x1abc   :  { %v12108_v31 = vpop.eup %12107  ;;  %v6951_v27 = vadd.f32 1.0, %v12106_v40 }
0x1abd   :  { %v12110_v13 = vpop.eup %12109  ;;  %12119 = vrcp.f32 %v6953_v57  ;;  %v6954_v60 = vadd.f32 1.0, %v12108_v31  ;;  %v10082_v0 = vpop.f32.mrb[4].mxu0 }
0x1abe   :  { %12121 = vrcp.f32 %v6951_v27  ;;  %v6952_v47 = vadd.f32 1.0, %v12110_v13  ;;  %v6908_v17 = vpop.f32.mrb[5].mxu0 }
0x1abf   :  { %12123 = vrcp.f32 %v6954_v60  ;;  %v10083_v63 = vpop.f32.mrb[6].mxu0 }
0x1ac0   :  { %12125 = vrcp.f32 %v6952_v47  ;;  %v6911_v10 = vpop.f32.mrb[7].mxu0 }
0x1ac1   :  { %12127 = vtanh.f32 %v10082_v0 }
0x1ac2   :  { %v12112_v34 = vpop.eup %12111  ;;  %12129 = vtanh.f32 %v6908_v17 }
0x1ac3   :  { %v12114_v3 = vpop.eup %12113  ;;  %v6977_v9 = vadd.f32 1.0, %v12112_v34  ;;  %12131 = vtanh.f32 %v10083_v63 }
0x1ac4   :  { %v12116_v15 = vpop.eup %12115  ;;  %v6975_v7 = vadd.f32 1.0, %v12114_v3  ;;  %12133 = vtanh.f32 %v6911_v10 }
0x1ac5   :  { %v12118_v36 = vpop.eup %12117  ;;  %12135 = vrcp.f32 %v6977_v9  ;;  %v6978_v56 = vadd.f32 1.0, %v12116_v15  ;;  %v10086_v48 = vpop.f32.mrb[8].mxu0 }
0x1ac6   :  { %12137 = vrcp.f32 %v6975_v7  ;;  %v6976_v52 = vadd.f32 1.0, %v12118_v36  ;;  %v8672_v19 = vmul.f32 -1.442695, %v10086_v48  ;;  %v6924_v51 = vpop.f32.mrb[9].mxu0 }
0x1ac7   :  { %v12120_v18 = vpop.eup %12119  ;;  %12139 = vrcp.f32 %v6978_v56  ;;  %v8670_v32 = vmul.f32 -1.442695, %v6924_v51  ;;  %v10087_v26 = vpop.f32.mrb[10].mxu0 }
0x1ac8   :  { %v12122_v39 = vpop.eup %12121  ;;  %12141 = vrcp.f32 %v6976_v52  ;;  %v8673_v14 = vmul.f32 -1.442695, %v10087_v26  ;;  %v6927_v62 = vpop.f32.mrb[11].mxu0 }
0x1ac9   :  { %v12124_v1 = vpop.eup %12123  ;;  %12143 = vpow2.f32 %v8672_v19  ;;  %v8671_v33 = vmul.f32 -1.442695, %v6927_v62 }
0x1aca   :  { %v12126_v25 = vpop.eup %12125  ;;  %12145 = vpow2.f32 %v8670_v32 }
0x1acb   :  { %v12128_v6 = vpop.eup %12127  ;;  %12147 = vpow2.f32 %v8673_v14 }
0x1acc   :  { %v12130_v49 = vpop.eup %12129  ;;  %v7021_v44 = vmul.f32 %v12128_v6, %v12120_v18  ;;  %12149 = vpow2.f32 %v8671_v33 }
0x1acd   :  { %v12132_v5 = vpop.eup %12131  ;;  %v7019_v53 = vmul.f32 %v12130_v49, %v12122_v39  ;;  %v10106_v50 = vpop.f32.mrb[12].mxu0 }
0x1ace   :  { %v12134_v29 = vpop.eup %12133  ;;  %v7022_v43 = vmul.f32 %v12132_v5, %v12124_v1  ;;  %v8686_v58 = vmul.f32 -1.442695, %v10106_v50  ;;  %v7131_v40 = vpop.f32.mrb[13].mxu0 }
0x1acf   :  { %v12136_v57 = vpop.eup %12135  ;;  %v7020_v31 = vmul.f32 %v12134_v29, %v12126_v25  ;;  %v8684_v27 = vmul.f32 -1.442695, %v7131_v40  ;;  %v10107_v13 = vpop.f32.mrb[14].mxu0 }
0x1ad0   :  { %v12138_v60 = vpop.eup %12137  ;;  %v7017_v0 = vmul.f32 %v12136_v57, %v14477_v22  ;;  %12151 = vpow2.f32 %v8686_v58  ;;  %v8687_v47 = vmul.f32 -1.442695, %v10107_v13  ;;  %v7134_v17 = vpop.f32.mrb[15].mxu0 }
0x1ad1   :  { %v12140_v63 = vpop.eup %12139  ;;  %v7015_v10 = vmul.f32 %v12138_v60, %v14480_v12  ;;  %12153 = vpow2.f32 %v8684_v27  ;;  %v8685_v34 = vmul.f32 -1.442695, %v7134_v17 }
0x1ad2   :  { %v12142_v3 = vpop.eup %12141  ;;  %v7018_v9 = vmul.f32 %v12140_v63, %v14483_v55  ;;  %v14635_v15 = vadd.f32 %v7021_v44, %v7017_v0  ;;  %12155 = vpow2.f32 %v8687_v47 }
0x1ad3   :  { %v12144_v7 = vpop.eup %12143  ;;  %v7016_v36 = vmul.f32 %v12142_v3, %v14486_v30  ;;  %v14638_v56 = vadd.f32 %v7019_v53, %v7015_v10  ;;  %12157 = vpow2.f32 %v8685_v34 }
0x1ad4   :  { %v12146_v22 = vpop.eup %12145  ;;  %12159 = vtanh.f32 %v14635_v15  ;;  %v14641_v48 = vadd.f32 %v7022_v43, %v7018_v9  ;;  %v7005_v12 = vadd.f32 1.0, %v12144_v7 }
0x1ad5   :  { %v12148_v52 = vpop.eup %12147  ;;  %12161 = vtanh.f32 %v14638_v56  ;;  %v14644_v19 = vadd.f32 %v7020_v31, %v7016_v36  ;;  %v7003_v55 = vadd.f32 1.0, %v12146_v22  ;;  %v10110_v51 = vpop.f32.mrb[16].mxu0 }
0x1ad6   :  { %v12150_v18 = vpop.eup %12149  ;;  %12163 = vtanh.f32 %v14641_v48  ;;  %v7006_v30 = vadd.f32 1.0, %v12148_v52  ;;  %v7147_v32 = vpop.f32.mrb[17].mxu0  ;;  %v8690_v14 = vmul.f32 -1.442695, %v10110_v51 }
0x1ad7   :  { %12165 = vtanh.f32 %v14644_v19  ;;  %v7004_v26 = vadd.f32 1.0, %v12150_v18  ;;  %v10111_v39 = vpop.f32.mrb[18].mxu0  ;;  %v8688_v53 = vmul.f32 -1.442695, %v7147_v32 }
0x1ad8   :  { %12167 = vrcp.f32 %v7005_v12  ;;  %v7150_v62 = vpop.f32.mrb[19].mxu0  ;;  %v8691_v58 = vmul.f32 -1.442695, %v10111_v39 }
0x1ad9   :  { %12169 = vrcp.f32 %v7003_v55  ;;  %v8689_v31 = vmul.f32 -1.442695, %v7150_v62 }
0x1ada   :  { %v12152_v1 = vpop.eup %12151  ;;  %12171 = vrcp.f32 %v7006_v30 }
0x1adb   :  { %v12154_v33 = vpop.eup %12153  ;;  %12173 = vrcp.f32 %v7004_v26  ;;  %v7208_v25 = vadd.f32 1.0, %v12152_v1 }
0x1adc   :  { %v12156_v6 = vpop.eup %12155  ;;  %v7206_v49 = vadd.f32 1.0, %v12154_v33  ;;  %12175 = vpow2.f32 %v8690_v14 }
0x1add   :  { %v12158_v44 = vpop.eup %12157  ;;  %12177 = vrcp.f32 %v7208_v25  ;;  %v7209_v5 = vadd.f32 1.0, %v12156_v6  ;;  %v10114_v50 = vpop.f32.mrb[20].mxu0 }
0x1ade   :  { %v12160_v29 = vpop.eup %12159  ;;  %12179 = vrcp.f32 %v7206_v49  ;;  %v7207_v43 = vadd.f32 1.0, %v12158_v44  ;;  %v7163_v40 = vpop.f32.mrb[21].mxu0 }
0x1adf   :  { %v12162_v57 = vpop.eup %12161  ;;  %12181 = vrcp.f32 %v7209_v5  ;;  %v10115_v27 = vpop.f32.mrb[22].mxu0 }
0x1ae0   :  { %v12164_v13 = vpop.eup %12163  ;;  %12183 = vrcp.f32 %v7207_v43  ;;  %v7166_v60 = vpop.f32.mrb[23].mxu0 }
0x1ae1   :  { %v12166_v0 = vpop.eup %12165  ;;  %12185 = vpow2.f32 %v8688_v53 }
0x1ae2   :  { %v12168_v47 = vpop.eup %12167  ;;  %12187 = vpow2.f32 %v8691_v58 }
0x1ae3   :  { %v12170_v17 = vpop.eup %12169  ;;  %12189 = vpow2.f32 %v8689_v31  ;;  %v7033_v3 = vmul.f32 %v12168_v47, %v12160_v29 }
0x1ae4   :  { %v12172_v63 = vpop.eup %12171  ;;  %12191 = vtanh.f32 %v10114_v50  ;;  %v7031_v12 = vmul.f32 %v12170_v17, %v12162_v57 }
0x1ae5   :  { %v12174_v10 = vpop.eup %12173  ;;  %12193 = vtanh.f32 %v7163_v40  ;;  %v10118_v34 = vpop.f32.mrb[24].mxu0  ;;  %v7034_v9 = vmul.f32 %v12172_v63, %v12164_v13 }
0x1ae6   :  { %v12176_v7 = vpop.eup %12175  ;;  %12195 = vtanh.f32 %v10115_v27  ;;  %v8694_v36 = vmul.f32 -1.442695, %v10118_v34  ;;  %v7179_v22 = vpop.f32.mrb[25].mxu0  ;;  %v7032_v52 = vmul.f32 %v12174_v10, %v12166_v0 }
0x1ae7   :  { %v12178_v55 = vpop.eup %12177  ;;  %v7232_v51 = vadd.f32 1.0, %v12176_v7  ;;  %12197 = vtanh.f32 %v7166_v60  ;;  %v8692_v18 = vmul.f32 -1.442695, %v7179_v22  ;;  %v10119_v30 = vpop.f32.mrb[26].mxu0  ;;  %v7036_v32 = vpack.c.bf16 %v7034_v9, %v7033_v3  ;;  %v12538_v7 = vld [vmem:[%s14847_s7] sm:$0xff]  }
0x1ae8   :  { %v12180_v26 = vpop.eup %12179  ;;  %12199 = vpow2.f32 %v8694_v36  ;;  %v7035_v39 = vpack.c.bf16 %v7032_v52, %v7031_v12  ;;  %v8695_v14 = vmul.f32 -1.442695, %v10119_v30  ;;  %v7182_v62 = vpop.f32.mrb[27].mxu0 }
0x1ae9   :  { %v12182_v1 = vpop.eup %12181  ;;  %12201 = vrcp.f32 %v7232_v51  ;;  %v8693_v33 = vmul.f32 -1.442695, %v7182_v62 }
0x1aea   :  { %v12184_v25 = vpop.eup %12183  ;;  %12203 = vpow2.f32 %v8692_v18  ;;  %10089 = vmatpush3.bf16.msra.mxu1 %v7035_v39 }
0x1aeb   :  { %v12186_v6 = vpop.eup %12185  ;;  %12205 = vpow2.f32 %v8695_v14  ;;  %10090 = vmatprep.subr.bf16.mxu1 %v12565_v46 }
0x1aec   :  { %v12188_v49 = vpop.eup %12187  ;;  %v7230_v44 = vadd.f32 1.0, %v12186_v6  ;;  %12207 = vpow2.f32 %v8693_v33 }
0x1aed   :  { %v12190_v5 = vpop.eup %12189  ;;  %v7233_v53 = vadd.f32 1.0, %v12188_v49 }
0x1aee   :  { %v12192_v50 = vpop.eup %12191  ;;  %12209 = vrcp.f32 %v7230_v44  ;;  %v7231_v29 = vadd.f32 1.0, %v12190_v5  ;;  %10091 = vmatpush3.bf16.msra.mxu1 %v7036_v32 }
0x1aef   :  { %v12194_v43 = vpop.eup %12193  ;;  %12211 = vrcp.f32 %v7233_v53  ;;  %v7276_v58 = vmul.f32 %v12192_v50, %v12178_v55  ;;  %10092 = vmatprep.subr.bf16.mxu1 %v12565_v46  ;;  %v14686_v53 = vld [vmem:[%s14847_s7 + $0x8] sm:$0xff]   ;;  %v14693_v50 = vld [vmem:[%s14847_s7 + $0x10] sm:$0xff]  }
0x1af0   :  { %v12196_v40 = vpop.eup %12195  ;;  %12213 = vrcp.f32 %v7231_v29  ;;  %v7274_v57 = vmul.f32 %v12194_v43, %v12180_v26  ;;  %v14700_v29 = vld [vmem:[%s14847_s7 + $0x18] sm:$0xff]   ;;  %v14707_v43 = vld [vmem:[%s14847_s7 + $0x20] sm:$0xff]  }
0x1af1   :  { %v12198_v31 = vpop.eup %12197  ;;  %v7277_v27 = vmul.f32 %v12196_v40, %v12182_v1  ;;  %v14721_v40 = vld [vmem:[%s14847_s7 + $0x30] sm:$0xff]  }
0x1af2   :  { %v12200_v13 = vpop.eup %12199  ;;  %v7275_v60 = vmul.f32 %v12198_v31, %v12184_v25  ;;  %10093 = vmatpush3.bf16.msra.mxu1 %v12629_v4 }
0x1af3   :  { %v12202_v0 = vpop.eup %12201  ;;  %10120 = vmatprep.subr.bf16.mxu1 %v7035_v39  ;;  %v7260_v63 = vadd.f32 1.0, %v12200_v13 }
0x1af4   :  { %v12204_v47 = vpop.eup %12203  ;;  %v7272_v17 = vmul.f32 %v12202_v0, %v14537_v23 }
0x1af5   :  { %v12206_v10 = vpop.eup %12205  ;;  %v7258_v34 = vadd.f32 1.0, %v12204_v47  ;;  %10095 = vmatmul.mubr.msk.bf16.vlgmr.msra.gmra.mrb[12].mxu1 %vm365_vm2, %v14501_v20  ;;  %12215 = vrcp.f32 %v7260_v63 }
0x1af6   :  { %v12208_v3 = vpop.eup %12207  ;;  %v14654_v9 = vadd.f32 %v7276_v58, %v7272_v17  ;;  %10121 = vmatpush3.bf16.msra.mxu1 %v7035_v39  ;;  %10130 = vmatprep.mubr.msk.bf16.mxu1 %vm956_vm7, %v12538_v7  ;;  %v7261_v36 = vadd.f32 1.0, %v12206_v10  ;;  %v14714_v58 = vld [vmem:[%s14847_s7 + $0x28] sm:$0xff]  }
0x1af7   :  { %10122 = vmatprep.subr.bf16.mxu1 %v7036_v32  ;;  %v7259_v23 = vadd.f32 1.0, %v12208_v3  ;;  %12217 = vrcp.f32 %v7258_v34 }
0x1af8   :  { %v12210_v22 = vpop.eup %12209  ;;  %12219 = vtanh.f32 %v14654_v9 }
0x1af9   :  { %v12212_v12 = vpop.eup %12211  ;;  %v7270_v52 = vmul.f32 %v12210_v22, %v14540_v59  ;;  %12221 = vrcp.f32 %v7261_v36 }
0x1afa   :  { %v12214_v20 = vpop.eup %12213  ;;  %v7273_v55 = vmul.f32 %v12212_v12, %v14543_v35  ;;  %10123 = vmatpush3.bf16.msra.mxu1 %v7036_v32  ;;  %12223 = vrcp.f32 %v7259_v23 }
0x1afb   :  { %v7271_v51 = vmul.f32 %v12214_v20, %v14546_v37  ;;  %v14664_v18 = vadd.f32 %v7274_v57, %v7270_v52  ;;  %v14728_v57 = vld [vmem:[%s14847_s7 + $0x38] sm:$0xff]  }
0x1afc   :  { %v14666_v30 = vadd.f32 %v7277_v27, %v7273_v55 }
0x1afd   :  { %12225 = vtanh.f32 %v14664_v18  ;;  %v14669_v26 = vadd.f32 %v7275_v60, %v7271_v51 }
0x1afe   :  { %12227 = vtanh.f32 %v14666_v30 }
0x1aff   :  { %12229 = vtanh.f32 %v14669_v26  ;;  %v12216_v59 = vpop.eup %12215 }
0x1b01   :  { %v12218_v35 = vpop.eup %12217 }
0x1b02   :  { %v12220_v39 = vpop.eup %12219 }
0x1b03   :  { %v12222_v32 = vpop.eup %12221  ;;  %v7288_v33 = vmul.f32 %v12220_v39, %v12216_v59 }
0x1b04   :  { %v12224_v14 = vpop.eup %12223 }
0x1b07   :  { %v12226_v37 = vpop.eup %12225 }
0x1b08   :  { %v12228_v62 = vpop.eup %12227  ;;  %v7286_v6 = vmul.f32 %v12226_v37, %v12218_v35 }
0x1b09   :  { %v12230_v1 = vpop.eup %12229  ;;  %v7289_v25 = vmul.f32 %v12228_v62, %v12222_v32 }
0x1b0a   :  { %v7287_v49 = vmul.f32 %v12230_v1, %v12224_v14 }
0x1b0b   :  { %v14673_v44 = vpack.c.bf16 %v7289_v25, %v7288_v33 }
0x1b0c   :  { %v14675_v5 = vpack.c.bf16 %v7287_v49, %v7286_v6 }
0x1b0e   :  { %10124 = vmatprep.subr.bf16.mxu1 %v14675_v5 }
0x1b0f   :  { %10125 = vmatpush3.bf16.msra.mxu1 %v14675_v5 }
0x1b10   :  { %10126 = vmatprep.subr.bf16.mxu1 %v14673_v44 }
0x1b13   :  { %10127 = vmatpush3.bf16.msra.mxu1 %v14673_v44 }
0x1b14   :  { %10128 = vmatprep.subr.bf16.mxu1 %v12629_v4 }
0x1b17   :  { %10129 = vmatpush3.bf16.msra.mxu1 %v12629_v4 }
0x1b1a   :  { %10131 = vmatmul.mubr.msk.bf16.vlgmr.msra.gmra.mrb[16].mxu1 %vm956_vm7, %v14686_v53 }
0x1b1b   :  { %10134 = vmatprep.mubr.msk.bf16.mxu1 %vm956_vm7, %v14693_v50 }
0x1b22   :  { %10135 = vmatmul.mubr.msk.bf16.gmra.mrb[20].mxu1 %vm956_vm7, %v14700_v29 }
0x1b23   :  { %10138 = vmatprep.mubr.msk.bf16.mxu1 %vm956_vm7, %v14707_v43 }
0x1b2a   :  { %10139 = vmatmul.mubr.msk.bf16.gmra.mrb[24].mxu1 %vm956_vm7, %v14714_v58 }
0x1b2b   :  { %10142 = vmatprep.mubr.msk.bf16.mxu1 %vm956_vm7, %v14721_v40 }
0x1b32   :  { %10143 = vmatmul.mubr.msk.bf16.gmra.mrb[28].mxu1 %vm956_vm7, %v14728_v57 }
0x1b33   :  { %10188 = vmatprep.mubr.msk.bf16.mxu1 %vm956_vm7, %v12538_v7 }
0x1bc8   :  { %v7071_v31 = vpop.f32.mrb[12].mxu1 }
0x1bc9   :  { %vm7077_vm8 = vcmp.ge.f32.partialorder %v7071_v31, 0.0  ;;  %v7078_v27 = vmul.f32 %v7071_v31, %v12931_v38  ;;  %v10096_v13 = vpop.f32.mrb[13].mxu1 }
0x1bca   :  { %v7074_v60 = vpop.f32.mrb[14].mxu1 }
0x1bcb   :  { %v7079_v0 = vsel %vm7077_vm8, %v7071_v31, %v7078_v27  ;;  %v10097_v47 = vpop.f32.mrb[15].mxu1 }
0x1bcc   :  { %v7080_v17 = vmul.f32 %v7079_v0, %v12934_v42 }
0x1bce   :  { %v7081_v63 = vsel %vm1229_vm10, %v7080_v17, 0.0 }
0x1bcf   :  { %v7082_v10 = vrot.slane %v7081_v63, 4 }
0x1bd1   :  { %v7083_v34 = vadd.f32 %v7082_v10, %v7081_v63 }
0x1bd3   :  { %v7084_v3 = vrot.slane %v7083_v34, 2 }
0x1bd5   :  { %v7085_v36 = vadd.f32 %v7084_v3, %v7083_v34 }
0x1bd7   :  { %v7086_v22 = vrot.slane %v7085_v36, 1 }
0x1bd9   :  { %v7087_v23 = vadd.f32 %v7086_v22, %v7085_v36 }
0x1bdb   :  { %7088 = vst.msk [vmem:[#allocation2 + $0xd] sm:$0x1] %vm1237_vm11, %v7087_v23 }
0x1bed   :  { %v10132_v7 = vpop.f32.mrb[16].mxu1 }
0x1bee   :  { %v8706_v12 = vmul.f32 -1.442695, %v10132_v7  ;;  %v7326_v52 = vpop.f32.mrb[17].mxu1 }
0x1bef   :  { %v8704_v20 = vmul.f32 -1.442695, %v7326_v52  ;;  %v10133_v55 = vpop.f32.mrb[18].mxu1 }
0x1bf0   :  { %12231 = vpow2.f32 %v8706_v12  ;;  %v8707_v51 = vmul.f32 -1.442695, %v10133_v55  ;;  %v7329_v59 = vpop.f32.mrb[19].mxu1 }
0x1bf1   :  { %12233 = vpow2.f32 %v8704_v20  ;;  %v8705_v35 = vmul.f32 -1.442695, %v7329_v59 }
0x1bf2   :  { %12235 = vpow2.f32 %v8707_v51 }
0x1bf3   :  { %12237 = vpow2.f32 %v8705_v35 }
0x1bf5   :  { %v10136_v39 = vpop.f32.mrb[20].mxu1 }
0x1bf6   :  { %v8710_v32 = vmul.f32 -1.442695, %v10136_v39  ;;  %v7342_v14 = vpop.f32.mrb[21].mxu1 }
0x1bf7   :  { %v8708_v37 = vmul.f32 -1.442695, %v7342_v14  ;;  %v10137_v62 = vpop.f32.mrb[22].mxu1 }
0x1bf8   :  { %12239 = vpow2.f32 %v8710_v32  ;;  %v8711_v1 = vmul.f32 -1.442695, %v10137_v62  ;;  %v7345_v33 = vpop.f32.mrb[23].mxu1 }
0x1bf9   :  { %12241 = vpow2.f32 %v8708_v37  ;;  %v8709_v25 = vmul.f32 -1.442695, %v7345_v33 }
0x1bfa   :  { %v12232_v6 = vpop.eup %12231  ;;  %12243 = vpow2.f32 %v8711_v1 }
0x1bfb   :  { %v12234_v49 = vpop.eup %12233  ;;  %v7403_v31 = vadd.f32 1.0, %v12232_v6  ;;  %12245 = vpow2.f32 %v8709_v25 }
0x1bfc   :  { %v12236_v27 = vpop.eup %12235  ;;  %v7401_v13 = vadd.f32 1.0, %v12234_v49 }
0x1bfd   :  { %v12238_v60 = vpop.eup %12237  ;;  %12247 = vrcp.f32 %v7403_v31  ;;  %v7404_v0 = vadd.f32 1.0, %v12236_v27  ;;  %v10140_v47 = vpop.f32.mrb[24].mxu1 }
0x1bfe   :  { %12249 = vrcp.f32 %v7401_v13  ;;  %v7402_v17 = vadd.f32 1.0, %v12238_v60  ;;  %v7358_v63 = vpop.f32.mrb[25].mxu1 }
0x1bff   :  { %12251 = vrcp.f32 %v7404_v0  ;;  %v10141_v10 = vpop.f32.mrb[26].mxu1 }
0x1c00   :  { %12253 = vrcp.f32 %v7402_v17  ;;  %v7361_v34 = vpop.f32.mrb[27].mxu1 }
0x1c01   :  { %12255 = vtanh.f32 %v10140_v47 }
0x1c02   :  { %v12240_v3 = vpop.eup %12239  ;;  %12257 = vtanh.f32 %v7358_v63 }
0x1c03   :  { %v12242_v36 = vpop.eup %12241  ;;  %v7427_v22 = vadd.f32 1.0, %v12240_v3  ;;  %12259 = vtanh.f32 %v10141_v10 }
0x1c04   :  { %v12244_v23 = vpop.eup %12243  ;;  %v7425_v7 = vadd.f32 1.0, %v12242_v36  ;;  %12261 = vtanh.f32 %v7361_v34 }
0x1c05   :  { %v12246_v12 = vpop.eup %12245  ;;  %12263 = vrcp.f32 %v7427_v22  ;;  %v7428_v52 = vadd.f32 1.0, %v12244_v23  ;;  %v10144_v20 = vpop.f32.mrb[28].mxu1 }
0x1c06   :  { %12265 = vrcp.f32 %v7425_v7  ;;  %v7426_v55 = vadd.f32 1.0, %v12246_v12  ;;  %v8714_v51 = vmul.f32 -1.442695, %v10144_v20  ;;  %v7374_v59 = vpop.f32.mrb[29].mxu1 }
0x1c07   :  { %v12248_v35 = vpop.eup %12247  ;;  %12267 = vrcp.f32 %v7428_v52  ;;  %v8712_v39 = vmul.f32 -1.442695, %v7374_v59  ;;  %v10145_v32 = vpop.f32.mrb[30].mxu1 }
0x1c08   :  { %v12250_v14 = vpop.eup %12249  ;;  %12269 = vrcp.f32 %v7426_v55  ;;  %v8715_v37 = vmul.f32 -1.442695, %v10145_v32  ;;  %v7377_v62 = vpop.f32.mrb[31].mxu1 }
0x1c09   :  { %v12252_v1 = vpop.eup %12251  ;;  %12271 = vpow2.f32 %v8714_v51  ;;  %v8713_v33 = vmul.f32 -1.442695, %v7377_v62 }
0x1c0a   :  { %v12254_v25 = vpop.eup %12253  ;;  %12273 = vpow2.f32 %v8712_v39 }
0x1c0b   :  { %v12256_v6 = vpop.eup %12255  ;;  %12275 = vpow2.f32 %v8715_v37 }
0x1c0c   :  { %v12258_v49 = vpop.eup %12257  ;;  %v7471_v31 = vmul.f32 %v12256_v6, %v12248_v35  ;;  %12277 = vpow2.f32 %v8713_v33 }
0x1c0d   :  { %v12260_v27 = vpop.eup %12259  ;;  %v7469_v13 = vmul.f32 %v12258_v49, %v12250_v14 }
0x1c0e   :  { %v12262_v60 = vpop.eup %12261  ;;  %v7472_v0 = vmul.f32 %v12260_v27, %v12252_v1 }
0x1c0f   :  { %v12264_v47 = vpop.eup %12263  ;;  %v7470_v17 = vmul.f32 %v12262_v60, %v12254_v25 }
0x1c10   :  { %v12266_v63 = vpop.eup %12265  ;;  %v7467_v10 = vmul.f32 %v12264_v47, %v14635_v15 }
0x1c11   :  { %v12268_v34 = vpop.eup %12267  ;;  %v7465_v3 = vmul.f32 %v12266_v63, %v14638_v56 }
0x1c12   :  { %v12270_v36 = vpop.eup %12269  ;;  %v7468_v22 = vmul.f32 %v12268_v34, %v14641_v48  ;;  %v14740_v23 = vadd.f32 %v7471_v31, %v7467_v10 }
0x1c13   :  { %v12272_v7 = vpop.eup %12271  ;;  %v7466_v12 = vmul.f32 %v12270_v36, %v14644_v19  ;;  %v14743_v52 = vadd.f32 %v7469_v13, %v7465_v3 }
0x1c14   :  { %v12274_v20 = vpop.eup %12273  ;;  %12279 = vtanh.f32 %v14740_v23  ;;  %v14746_v55 = vadd.f32 %v7472_v0, %v7468_v22  ;;  %v7455_v51 = vadd.f32 1.0, %v12272_v7  ;;  %v8717_v0 = vld [vmem:[%s14842_s2 + $0x78] sm:$0x7f] }
0x1c15   :  { %v12276_v15 = vpop.eup %12275  ;;  %12281 = vtanh.f32 %v14743_v52  ;;  %v14749_v56 = vadd.f32 %v7470_v17, %v7466_v12  ;;  %v7453_v59 = vadd.f32 1.0, %v12274_v20  ;;  %v7541_v47 = vmul.f32 %v8717_v0, %v12671_v24  ;;  %v14764_v17 = vld [vmem:[%s14848_s8] sm:$0xf] }
0x1c16   :  { %v12278_v48 = vpop.eup %12277  ;;  %12283 = vtanh.f32 %v14746_v55  ;;  %v7456_v35 = vadd.f32 1.0, %v12276_v15 }
0x1c17   :  { %12285 = vtanh.f32 %v14749_v56  ;;  %v7454_v19 = vadd.f32 1.0, %v12278_v48  ;;  %v7542_v63 = vsel %vm648_vm3, %v7541_v47, 1.0 }
0x1c18   :  { %12287 = vrcp.f32 %v7455_v51  ;;  %v7543_v24 = vpack.c.bf16 %v7542_v63, %v7542_v63 }
0x1c19   :  { %12289 = vrcp.f32 %v7453_v59 }
0x1c1a   :  { %12291 = vrcp.f32 %v7456_v35  ;;  %v7545_v10 = vsel %vm717_vm4, %v7543_v24, 0 }
0x1c1b   :  { %12293 = vrcp.f32 %v7454_v19 }
0x1c1e   :  { %v12280_v39 = vpop.eup %12279 }
0x1c1f   :  { %v12282_v32 = vpop.eup %12281 }
0x1c20   :  { %v12284_v14 = vpop.eup %12283 }
0x1c21   :  { %v12286_v37 = vpop.eup %12285 }
0x1c22   :  { %v12288_v62 = vpop.eup %12287 }
0x1c23   :  { %v12290_v1 = vpop.eup %12289  ;;  %v7483_v6 = vmul.f32 %v12288_v62, %v12280_v39 }
0x1c24   :  { %v12292_v33 = vpop.eup %12291  ;;  %v7481_v31 = vmul.f32 %v12290_v1, %v12282_v32 }
0x1c25   :  { %v12294_v25 = vpop.eup %12293  ;;  %v7484_v49 = vmul.f32 %v12292_v33, %v12284_v14 }
0x1c26   :  { %v7482_v27 = vmul.f32 %v12294_v25, %v12286_v37 }
0x1c27   :  { %v7486_v13 = vpack.c.bf16 %v7484_v49, %v7483_v6 }
0x1c28   :  { %v7485_v60 = vpack.c.bf16 %v7482_v27, %v7481_v31 }
0x1c2a   :  { %10147 = vmatpush3.bf16.msra.mxu0 %v7485_v60  ;;  %10178 = vmatprep.subr.bf16.mxu1 %v7485_v60 }
0x1c2b   :  { %10179 = vmatpush3.bf16.msra.mxu1 %v7485_v60  ;;  %10148 = vmatprep.subr.bf16.mxu0 %v12565_v46 }
0x1c2c   :  { %10180 = vmatprep.subr.bf16.mxu1 %v7486_v13 }
0x1c2e   :  { %10149 = vmatpush3.bf16.msra.mxu0 %v7486_v13 }
0x1c2f   :  { %10181 = vmatpush3.bf16.msra.mxu1 %v7486_v13  ;;  %10150 = vmatprep.subr.bf16.mxu0 %v12565_v46 }
0x1c32   :  { %10151 = vmatpush3.bf16.msra.mxu0 %v12629_v4 }
0x1c33   :  { %10156 = vmatprep.subr.bf16.mxu0 %v14675_v5 }
0x1c35   :  { %10153 = vmatmul.mubr.msk.bf16.vlgmr.msra.gmra.mrb[28].mxu0 %vm365_vm2, %v14764_v17 }
0x1c36   :  { %10157 = vmatpush3.bf16.msra.mxu0 %v14675_v5  ;;  %10162 = vmatprep.mubr.msk.bf16.mxu0 %vm692_vm5, %v14577_v45 }
0x1c37   :  { %10158 = vmatprep.subr.bf16.mxu0 %v14673_v44 }
0x1c3a   :  { %10159 = vmatpush3.bf16.msra.mxu0 %v14673_v44 }
0x1c3b   :  { %10229 = vmatprep.subr.msk.bf16.mxu0 %vm717_vm4, %v7543_v24 }
0x1c3e   :  { %10161 = vmatpush3.bf16.msra.mxu0 %v7545_v10 }
0x1c3f   :  { %10204 = vmatprep.subr.bf16.mxu0 %v12565_v46 }
0x1c41   :  { %10163 = vmatmul.mubr.msk.bf16.vlgmr.msra.gmra.mrb[32].mxu0 %vm692_vm5, %v14584_v41 }
0x1c42   :  { %10166 = vmatprep.mubr.msk.bf16.mxu0 %vm692_vm5, %v14591_v54 }
0x1c49   :  { %10167 = vmatmul.mubr.msk.bf16.gmra.mrb[36].mxu0 %vm692_vm5, %v14598_v21 }
0x1c4a   :  { %10170 = vmatprep.mubr.msk.bf16.mxu0 %vm692_vm5, %v14605_v2 }
0x1c51   :  { %10171 = vmatmul.mubr.msk.bf16.gmra.mrb[40].mxu0 %vm692_vm5, %v14612_v11 }
0x1c52   :  { %10174 = vmatprep.mubr.msk.bf16.mxu0 %vm692_vm5, %v14619_v28 }
0x1c59   :  { %10175 = vmatmul.mubr.msk.bf16.gmra.mrb[44].mxu0 %vm692_vm5, %v14626_v8 }
0x1c5a   :  { %10210 = vmatprep.mubr.msk.bf16.mxu0 %vm12566_vm6, %v12565_v46 }
0x1d08   :  { %v7521_v45 = vpop.f32.mrb[28].mxu0 }
0x1d09   :  { %vm7527_vm3 = vcmp.ge.f32.partialorder %v7521_v45, 0.0  ;;  %v7528_v41 = vmul.f32 %v7521_v45, %v12931_v38  ;;  %v10154_v54 = vpop.f32.mrb[29].mxu0 }
0x1d0a   :  { %v7524_v21 = vpop.f32.mrb[30].mxu0 }
0x1d0b   :  { %v7529_v44 = vsel %vm7527_vm3, %v7521_v45, %v7528_v41  ;;  %v10155_v2 = vpop.f32.mrb[31].mxu0 }
0x1d0c   :  { %v7530_v5 = vmul.f32 %v7529_v44, %v12934_v42 }
0x1d0e   :  { %v7531_v11 = vsel %vm1229_vm10, %v7530_v5, 0.0 }
0x1d0f   :  { %v7532_v34 = vrot.slane %v7531_v11, 4 }
0x1d11   :  { %v7533_v28 = vadd.f32 %v7532_v34, %v7531_v11 }
0x1d13   :  { %v7534_v3 = vrot.slane %v7533_v28, 2 }
0x1d14   :  { %v10164_v36 = vpop.f32.mrb[32].mxu0 }
0x1d15   :  { %v7535_v8 = vadd.f32 %v7534_v3, %v7533_v28  ;;  %v8728_v22 = vmul.f32 -1.442695, %v10164_v36  ;;  %v7581_v7 = vpop.f32.mrb[33].mxu0 }
0x1d16   :  { %v8726_v12 = vmul.f32 -1.442695, %v7581_v7  ;;  %v10165_v20 = vpop.f32.mrb[34].mxu0 }
0x1d17   :  { %v7536_v51 = vrot.slane %v7535_v8, 1  ;;  %12295 = vpow2.f32 %v8728_v22  ;;  %v8729_v15 = vmul.f32 -1.442695, %v10165_v20  ;;  %v7584_v59 = vpop.f32.mrb[35].mxu0 }
0x1d18   :  { %12297 = vpow2.f32 %v8726_v12  ;;  %v8727_v48 = vmul.f32 -1.442695, %v7584_v59 }
0x1d19   :  { %v7537_v35 = vadd.f32 %v7536_v51, %v7535_v8  ;;  %12299 = vpow2.f32 %v8729_v15 }
0x1d1a   :  { %12301 = vpow2.f32 %v8727_v48 }
0x1d1b   :  { %7538 = vst.msk [vmem:[#allocation2 + $0xe] sm:$0x1] %vm1237_vm11, %v7537_v35 }
0x1d1c   :  { %v10168_v19 = vpop.f32.mrb[36].mxu0 }
0x1d1d   :  { %v8732_v39 = vmul.f32 -1.442695, %v10168_v19  ;;  %v7597_v32 = vpop.f32.mrb[37].mxu0 }
0x1d1e   :  { %v8730_v14 = vmul.f32 -1.442695, %v7597_v32  ;;  %v10169_v37 = vpop.f32.mrb[38].mxu0 }
0x1d1f   :  { %12303 = vpow2.f32 %v8732_v39  ;;  %v8733_v62 = vmul.f32 -1.442695, %v10169_v37  ;;  %v7600_v1 = vpop.f32.mrb[39].mxu0 }
0x1d20   :  { %12305 = vpow2.f32 %v8730_v14  ;;  %v8731_v33 = vmul.f32 -1.442695, %v7600_v1 }
0x1d21   :  { %v12296_v25 = vpop.eup %12295  ;;  %12307 = vpow2.f32 %v8733_v62 }
0x1d22   :  { %v12298_v6 = vpop.eup %12297  ;;  %v7658_v49 = vadd.f32 1.0, %v12296_v25  ;;  %12309 = vpow2.f32 %v8731_v33 }
0x1d23   :  { %v12300_v31 = vpop.eup %12299  ;;  %v7656_v27 = vadd.f32 1.0, %v12298_v6 }
0x1d24   :  { %v12302_v13 = vpop.eup %12301  ;;  %12311 = vrcp.f32 %v7658_v49  ;;  %v7659_v60 = vadd.f32 1.0, %v12300_v31  ;;  %v10172_v0 = vpop.f32.mrb[40].mxu0 }
0x1d25   :  { %12313 = vrcp.f32 %v7656_v27  ;;  %v7657_v47 = vadd.f32 1.0, %v12302_v13  ;;  %v7613_v63 = vpop.f32.mrb[41].mxu0 }
0x1d26   :  { %12315 = vrcp.f32 %v7659_v60  ;;  %v10173_v24 = vpop.f32.mrb[42].mxu0 }
0x1d27   :  { %12317 = vrcp.f32 %v7657_v47  ;;  %v7616_v10 = vpop.f32.mrb[43].mxu0 }
0x1d28   :  { %12319 = vtanh.f32 %v10172_v0 }
0x1d29   :  { %v12304_v45 = vpop.eup %12303  ;;  %12321 = vtanh.f32 %v7613_v63 }
0x1d2a   :  { %v12306_v41 = vpop.eup %12305  ;;  %v7682_v54 = vadd.f32 1.0, %v12304_v45  ;;  %12323 = vtanh.f32 %v10173_v24 }
0x1d2b   :  { %v12308_v21 = vpop.eup %12307  ;;  %v7680_v44 = vadd.f32 1.0, %v12306_v41  ;;  %12325 = vtanh.f32 %v7616_v10 }
0x1d2c   :  { %v12310_v2 = vpop.eup %12309  ;;  %12327 = vrcp.f32 %v7682_v54  ;;  %v7683_v5 = vadd.f32 1.0, %v12308_v21  ;;  %v10176_v11 = vpop.f32.mrb[44].mxu0 }
0x1d2d   :  { %12329 = vrcp.f32 %v7680_v44  ;;  %v7681_v34 = vadd.f32 1.0, %v12310_v2  ;;  %v8736_v28 = vmul.f32 -1.442695, %v10176_v11  ;;  %v7629_v3 = vpop.f32.mrb[45].mxu0 }
0x1d2e   :  { %v12312_v36 = vpop.eup %12311  ;;  %12331 = vrcp.f32 %v7683_v5  ;;  %v8734_v8 = vmul.f32 -1.442695, %v7629_v3  ;;  %v10177_v22 = vpop.f32.mrb[46].mxu0 }
0x1d2f   :  { %v12314_v7 = vpop.eup %12313  ;;  %12333 = vrcp.f32 %v7681_v34  ;;  %v8737_v12 = vmul.f32 -1.442695, %v10177_v22  ;;  %v7632_v20 = vpop.f32.mrb[47].mxu0 }
0x1d30   :  { %v12316_v51 = vpop.eup %12315  ;;  %12335 = vpow2.f32 %v8736_v28  ;;  %v8735_v15 = vmul.f32 -1.442695, %v7632_v20 }
0x1d31   :  { %v12318_v59 = vpop.eup %12317  ;;  %12337 = vpow2.f32 %v8734_v8 }
0x1d32   :  { %v12320_v48 = vpop.eup %12319  ;;  %12339 = vpow2.f32 %v8737_v12 }
0x1d33   :  { %v12322_v35 = vpop.eup %12321  ;;  %v7726_v19 = vmul.f32 %v12320_v48, %v12312_v36  ;;  %12341 = vpow2.f32 %v8735_v15 }
0x1d34   :  { %v12324_v39 = vpop.eup %12323  ;;  %v7724_v32 = vmul.f32 %v12322_v35, %v12314_v7 }
0x1d35   :  { %v12326_v14 = vpop.eup %12325  ;;  %v7727_v37 = vmul.f32 %v12324_v39, %v12316_v51 }
0x1d36   :  { %v12328_v62 = vpop.eup %12327  ;;  %v7725_v1 = vmul.f32 %v12326_v14, %v12318_v59 }
0x1d37   :  { %v12330_v33 = vpop.eup %12329  ;;  %v7722_v25 = vmul.f32 %v12328_v62, %v14654_v9 }
0x1d38   :  { %v12332_v6 = vpop.eup %12331  ;;  %v7720_v49 = vmul.f32 %v12330_v33, %v14664_v18 }
0x1d39   :  { %v12334_v31 = vpop.eup %12333  ;;  %v7723_v27 = vmul.f32 %v12332_v6, %v14666_v30  ;;  %v7730_v13 = vadd.f32 %v7726_v19, %v7722_v25 }
0x1d3a   :  { %v12336_v60 = vpop.eup %12335  ;;  %v7721_v0 = vmul.f32 %v12334_v31, %v14669_v26  ;;  %v7728_v47 = vadd.f32 %v7724_v32, %v7720_v49 }
0x1d3b   :  { %v12338_v63 = vpop.eup %12337  ;;  %12343 = vtanh.f32 %v7730_v13  ;;  %v7731_v24 = vadd.f32 %v7727_v37, %v7723_v27  ;;  %v7710_v10 = vadd.f32 1.0, %v12336_v60 }
0x1d3c   :  { %v12340_v45 = vpop.eup %12339  ;;  %12345 = vtanh.f32 %v7728_v47  ;;  %v7729_v41 = vadd.f32 %v7725_v1, %v7721_v0  ;;  %v7708_v54 = vadd.f32 1.0, %v12338_v63 }
0x1d3d   :  { %v12342_v9 = vpop.eup %12341  ;;  %12347 = vtanh.f32 %v7731_v24  ;;  %v7711_v21 = vadd.f32 1.0, %v12340_v45 }
0x1d3e   :  { %12349 = vtanh.f32 %v7729_v41  ;;  %v7709_v18 = vadd.f32 1.0, %v12342_v9 }
0x1d3f   :  { %12351 = vrcp.f32 %v7710_v10 }
0x1d40   :  { %12353 = vrcp.f32 %v7708_v54 }
0x1d41   :  { %12355 = vrcp.f32 %v7711_v21 }
0x1d42   :  { %12357 = vrcp.f32 %v7709_v18 }
0x1d45   :  { %v12344_v30 = vpop.eup %12343 }
0x1d46   :  { %v12346_v26 = vpop.eup %12345 }
0x1d47   :  { %v12348_v44 = vpop.eup %12347 }
0x1d48   :  { %v12350_v2 = vpop.eup %12349 }
0x1d49   :  { %v12352_v5 = vpop.eup %12351 }
0x1d4a   :  { %v12354_v11 = vpop.eup %12353  ;;  %v7738_v34 = vmul.f32 %v12352_v5, %v12344_v30 }
0x1d4b   :  { %v12356_v28 = vpop.eup %12355  ;;  %v7736_v3 = vmul.f32 %v12354_v11, %v12346_v26 }
0x1d4c   :  { %v12358_v36 = vpop.eup %12357  ;;  %v7739_v8 = vmul.f32 %v12356_v28, %v12348_v44 }
0x1d4d   :  { %v7737_v22 = vmul.f32 %v12358_v36, %v12350_v2 }
0x1d4e   :  { %v7741_v7 = vpack.c.bf16 %v7739_v8, %v7738_v34 }
0x1d4f   :  { %v7740_v12 = vpack.c.bf16 %v7737_v22, %v7736_v3 }
0x1d51   :  { %10182 = vmatprep.subr.bf16.mxu1 %v7740_v12 }
0x1d52   :  { %10183 = vmatpush3.bf16.msra.mxu1 %v7740_v12 }
0x1d53   :  { %10184 = vmatprep.subr.bf16.mxu1 %v7741_v7 }
0x1d56   :  { %10185 = vmatpush3.bf16.msra.mxu1 %v7741_v7 }
0x1d57   :  { %10186 = vmatprep.subr.bf16.mxu1 %v12629_v4 }
0x1d5a   :  { %10187 = vmatpush3.bf16.msra.mxu1 %v12629_v4 }
0x1d5d   :  { %10189 = vmatmul.mubr.msk.bf16.vlgmr.msra.gmra.mrb[32].mxu1 %vm956_vm7, %v14686_v53 }
0x1d5e   :  { %10192 = vmatprep.mubr.msk.bf16.mxu1 %vm956_vm7, %v14693_v50 }
0x1d65   :  { %10193 = vmatmul.mubr.msk.bf16.gmra.mrb[36].mxu1 %vm956_vm7, %v14700_v29 }
0x1d66   :  { %10196 = vmatprep.mubr.msk.bf16.mxu1 %vm956_vm7, %v14707_v43 }
0x1d6d   :  { %10197 = vmatmul.mubr.msk.bf16.gmra.mrb[40].mxu1 %vm956_vm7, %v14714_v58 }
0x1d6e   :  { %10200 = vmatprep.mubr.msk.bf16.mxu1 %vm956_vm7, %v14721_v40 }
0x1d75   :  { %10201 = vmatmul.mubr.msk.bf16.gmra.mrb[44].mxu1 %vm956_vm7, %v14728_v57 }
0x1e30   :  { %v10190_v20 = vpop.f32.mrb[32].mxu1 }
0x1e31   :  { %v8748_v53 = vmul.f32 -1.442695, %v10190_v20  ;;  %v7776_v51 = vpop.f32.mrb[33].mxu1 }
0x1e32   :  { %v8746_v15 = vmul.f32 -1.442695, %v7776_v51  ;;  %v10191_v50 = vpop.f32.mrb[34].mxu1 }
0x1e33   :  { %12359 = vpow2.f32 %v8748_v53  ;;  %v8749_v59 = vmul.f32 -1.442695, %v10191_v50  ;;  %v7779_v29 = vpop.f32.mrb[35].mxu1 }
0x1e34   :  { %12361 = vpow2.f32 %v8746_v15  ;;  %v8747_v48 = vmul.f32 -1.442695, %v7779_v29 }
0x1e35   :  { %12363 = vpow2.f32 %v8749_v59 }
0x1e36   :  { %12365 = vpow2.f32 %v8747_v48 }
0x1e38   :  { %v10194_v43 = vpop.f32.mrb[36].mxu1 }
0x1e39   :  { %v8752_v58 = vmul.f32 -1.442695, %v10194_v43  ;;  %v7792_v35 = vpop.f32.mrb[37].mxu1 }
0x1e3a   :  { %v8750_v19 = vmul.f32 -1.442695, %v7792_v35  ;;  %v10195_v40 = vpop.f32.mrb[38].mxu1 }
0x1e3b   :  { %12367 = vpow2.f32 %v8752_v58  ;;  %v8753_v39 = vmul.f32 -1.442695, %v10195_v40  ;;  %v7795_v57 = vpop.f32.mrb[39].mxu1 }
0x1e3c   :  { %12369 = vpow2.f32 %v8750_v19  ;;  %v8751_v32 = vmul.f32 -1.442695, %v7795_v57 }
0x1e3d   :  { %v12360_v14 = vpop.eup %12359  ;;  %12371 = vpow2.f32 %v8753_v39 }
0x1e3e   :  { %v12362_v37 = vpop.eup %12361  ;;  %v7853_v62 = vadd.f32 1.0, %v12360_v14  ;;  %12373 = vpow2.f32 %v8751_v32 }
0x1e3f   :  { %v12364_v1 = vpop.eup %12363  ;;  %v7851_v33 = vadd.f32 1.0, %v12362_v37 }
0x1e40   :  { %v12366_v25 = vpop.eup %12365  ;;  %12375 = vrcp.f32 %v7853_v62  ;;  %v7854_v6 = vadd.f32 1.0, %v12364_v1  ;;  %v10198_v49 = vpop.f32.mrb[40].mxu1 }
0x1e41   :  { %12377 = vrcp.f32 %v7851_v33  ;;  %v7852_v31 = vadd.f32 1.0, %v12366_v25  ;;  %v7808_v27 = vpop.f32.mrb[41].mxu1 }
0x1e42   :  { %12379 = vrcp.f32 %v7854_v6  ;;  %v10199_v13 = vpop.f32.mrb[42].mxu1 }
0x1e43   :  { %12381 = vrcp.f32 %v7852_v31  ;;  %v7811_v60 = vpop.f32.mrb[43].mxu1 }
0x1e44   :  { %12383 = vtanh.f32 %v10198_v49 }
0x1e45   :  { %v12368_v0 = vpop.eup %12367  ;;  %12385 = vtanh.f32 %v7808_v27 }
0x1e46   :  { %v12370_v47 = vpop.eup %12369  ;;  %v7877_v63 = vadd.f32 1.0, %v12368_v0  ;;  %12387 = vtanh.f32 %v10199_v13 }
0x1e47   :  { %v12372_v24 = vpop.eup %12371  ;;  %v7875_v10 = vadd.f32 1.0, %v12370_v47  ;;  %12389 = vtanh.f32 %v7811_v60 }
0x1e48   :  { %v12374_v45 = vpop.eup %12373  ;;  %12391 = vrcp.f32 %v7877_v63  ;;  %v7878_v41 = vadd.f32 1.0, %v12372_v24  ;;  %v10202_v54 = vpop.f32.mrb[44].mxu1 }
0x1e49   :  { %12393 = vrcp.f32 %v7875_v10  ;;  %v7876_v9 = vadd.f32 1.0, %v12374_v45  ;;  %v8756_v21 = vmul.f32 -1.442695, %v10202_v54  ;;  %v7824_v18 = vpop.f32.mrb[45].mxu1 }
0x1e4a   :  { %v12376_v30 = vpop.eup %12375  ;;  %12395 = vrcp.f32 %v7878_v41  ;;  %v8754_v26 = vmul.f32 -1.442695, %v7824_v18  ;;  %v10203_v44 = vpop.f32.mrb[46].mxu1 }
0x1e4b   :  { %v12378_v2 = vpop.eup %12377  ;;  %12397 = vrcp.f32 %v7876_v9  ;;  %v8757_v5 = vmul.f32 -1.442695, %v10203_v44  ;;  %v7827_v11 = vpop.f32.mrb[47].mxu1 }
0x1e4c   :  { %v12380_v34 = vpop.eup %12379  ;;  %12399 = vpow2.f32 %v8756_v21  ;;  %v8755_v28 = vmul.f32 -1.442695, %v7827_v11 }
0x1e4d   :  { %v12382_v3 = vpop.eup %12381  ;;  %12401 = vpow2.f32 %v8754_v26 }
0x1e4e   :  { %v12384_v36 = vpop.eup %12383  ;;  %12403 = vpow2.f32 %v8757_v5 }
0x1e4f   :  { %v12386_v8 = vpop.eup %12385  ;;  %v7921_v22 = vmul.f32 %v12384_v36, %v12376_v30  ;;  %12405 = vpow2.f32 %v8755_v28 }
0x1e50   :  { %v12388_v7 = vpop.eup %12387  ;;  %v7919_v12 = vmul.f32 %v12386_v8, %v12378_v2  ;;  %v12547_v8 = vld [vmem:[%s14841_s1 + $0x8] sm:$0xff] }
0x1e51   :  { %v12390_v20 = vpop.eup %12389  ;;  %v7922_v53 = vmul.f32 %v12388_v7, %v12380_v34 }
0x1e52   :  { %v12392_v51 = vpop.eup %12391  ;;  %v7920_v15 = vmul.f32 %v12390_v20, %v12382_v3 }
0x1e53   :  { %v12394_v50 = vpop.eup %12393  ;;  %v7917_v59 = vmul.f32 %v12392_v51, %v14740_v23 }
0x1e54   :  { %v12396_v29 = vpop.eup %12395  ;;  %v7915_v48 = vmul.f32 %v12394_v50, %v14743_v52 }
0x1e55   :  { %v12398_v43 = vpop.eup %12397  ;;  %v7918_v58 = vmul.f32 %v12396_v29, %v14746_v55  ;;  %v7925_v35 = vadd.f32 %v7921_v22, %v7917_v59 }
0x1e56   :  { %v12400_v19 = vpop.eup %12399  ;;  %v7916_v40 = vmul.f32 %v12398_v43, %v14749_v56  ;;  %v7923_v39 = vadd.f32 %v7919_v12, %v7915_v48 }
0x1e57   :  { %v12402_v57 = vpop.eup %12401  ;;  %12407 = vtanh.f32 %v7925_v35  ;;  %v7926_v32 = vadd.f32 %v7922_v53, %v7918_v58  ;;  %v7905_v14 = vadd.f32 1.0, %v12400_v19 }
0x1e58   :  { %v12404_v37 = vpop.eup %12403  ;;  %12409 = vtanh.f32 %v7923_v39  ;;  %v7924_v62 = vadd.f32 %v7920_v15, %v7916_v40  ;;  %v7903_v1 = vadd.f32 1.0, %v12402_v57 }
0x1e59   :  { %v12406_v23 = vpop.eup %12405  ;;  %12411 = vtanh.f32 %v7926_v32  ;;  %v7906_v33 = vadd.f32 1.0, %v12404_v37 }
0x1e5a   :  { %12413 = vtanh.f32 %v7924_v62  ;;  %v7904_v52 = vadd.f32 1.0, %v12406_v23 }
0x1e5b   :  { %12415 = vrcp.f32 %v7905_v14 }
0x1e5c   :  { %12417 = vrcp.f32 %v7903_v1 }
0x1e5d   :  { %12419 = vrcp.f32 %v7906_v33 }
0x1e5e   :  { %12421 = vrcp.f32 %v7904_v52 }
0x1e61   :  { %v12408_v55 = vpop.eup %12407 }
0x1e62   :  { %v12410_v56 = vpop.eup %12409 }
0x1e63   :  { %v12412_v25 = vpop.eup %12411 }
0x1e64   :  { %v12414_v6 = vpop.eup %12413 }
0x1e65   :  { %v12416_v49 = vpop.eup %12415 }
0x1e66   :  { %v12418_v31 = vpop.eup %12417  ;;  %v7933_v27 = vmul.f32 %v12416_v49, %v12408_v55 }
0x1e67   :  { %v12420_v13 = vpop.eup %12419  ;;  %v7931_v60 = vmul.f32 %v12418_v31, %v12410_v56 }
0x1e68   :  { %v12422_v0 = vpop.eup %12421  ;;  %v7934_v47 = vmul.f32 %v12420_v13, %v12412_v25 }
0x1e69   :  { %v7932_v63 = vmul.f32 %v12422_v0, %v12414_v6 }
0x1e6a   :  { %v7936_v24 = vpack.c.bf16 %v7934_v47, %v7933_v27 }
0x1e6b   :  { %v7935_v10 = vpack.c.bf16 %v7932_v63, %v7931_v60 }
0x1e6d   :  { %10205 = vmatpush3.bf16.msra.mxu0 %v7935_v10 }
0x1e6e   :  { %10206 = vmatprep.subr.bf16.mxu0 %v12565_v46 }
0x1e71   :  { %10207 = vmatpush3.bf16.msra.mxu0 %v7936_v24 }
0x1e72   :  { %10208 = vmatprep.subr.bf16.mxu0 %v12565_v46 }
0x1e75   :  { %10209 = vmatpush3.bf16.msra.mxu0 %v12629_v4 }
0x1e78   :  { %10211 = vmatmul.mubr.msk.bf16.vlgmr.msra.gmra.mrb[48].mxu0 %vm365_vm2, %v14764_v17 }
0x1f4b   :  { %v7971_v45 = vpop.f32.mrb[48].mxu0 }
0x1f4c   :  { %vm7977_vm4 = vcmp.ge.f32.partialorder %v7971_v45, 0.0  ;;  %v7978_v41 = vmul.f32 %v7971_v45, %v12931_v38  ;;  %v10212_v54 = vpop.f32.mrb[49].mxu0 }
0x1f4d   :  { %v7974_v9 = vpop.f32.mrb[50].mxu0 }
0x1f4e   :  { %v7979_v21 = vsel %vm7977_vm4, %v7971_v45, %v7978_v41  ;;  %v10213_v18 = vpop.f32.mrb[51].mxu0 }
0x1f4f   :  { %v7980_v30 = vmul.f32 %v7979_v21, %v12934_v42 }
0x1f51   :  { %v7981_v26 = vsel %vm1229_vm10, %v7980_v30, 0.0 }
0x1f52   :  { %v7982_v44 = vrot.slane %v7981_v26, 4 }
0x1f54   :  { %v7983_v46 = vadd.f32 %v7982_v44, %v7981_v26 }
0x1f56   :  { %v7984_v2 = vrot.slane %v7983_v46, 2 }
0x1f58   :  { %v7985_v4 = vadd.f32 %v7984_v2, %v7983_v46 }
0x1f5a   :  { %v7986_v5 = vrot.slane %v7985_v4, 1 }
0x1f5c   :  { %v7987_v11 = vadd.f32 %v7986_v5, %v7985_v4 }
0x1f5e   :  { %7988 = vst.msk [vmem:[#allocation2 + $0xf] sm:$0x1] %vm1237_vm11, %v7987_v11 }
0x1f65   :  { %v7990_v17 = vld [vmem:[#allocation2 + $0x8] sm:$0xff] }
0x1f66   :  { %v7992_v38 = vmul.f32 %v7990_v17, %v12874_v61 }
0x1f68   :  { %v7995_v34 = vadd.f32 %v7993_v16, %v7992_v38 }
0x1f6a   :  { %v8760_v28 = vmul.f32 -1.442695, %v7995_v34 }
0x1f6c   :  { %12423 = vpow2.f32 %v8760_v28 }
0x1f76   :  { %v12424_v3 = vpop.eup %12423 }
0x1f77   :  { %v8003_v36 = vadd.f32 1.0, %v12424_v3 }
0x1f79   :  { %12425 = vrcp.f32 %v8003_v36 }
0x1f83   :  { %v12426_v42 = vpop.eup %12425 }
0x1f84   :  { %v8009_v22 = vmul.f32 %v12547_v8, %v12426_v42 }
0x1f86   :  { %8012 = vst.msk [vmem:[%s14850_s10 + $0x8] sm:$0xff] %vm8010_vm12, %v8009_v22 }
0x1f87   :  { %8017 = vsyncpa [#allocation4], 1 }

</bundles_post_ra>
